<compile_context>
chip_gen: v6e
topology: v6e:2x2x1
jax: 0.10.0
libtpu: 0.0.40
codegen_flags: <defaults>
</compile_context>

<pallas_src>
import numpy as np
import jax
import jax.numpy as jnp
from jax.experimental import pallas as pl
from jax.experimental.pallas import tpu as pltpu

EPS = 1e-5  # PyTorch BatchNorm2d default eps


# ------------------------------ small helpers -------------------------------

def _round_up(x, m):
    return ((x + m - 1) // m) * m


def _pad2d(a, rows, cols):
    r, c = a.shape
    return jnp.pad(a, ((0, rows - r), (0, cols - c)))


# ----------------------------- Pallas kernels ------------------------------

def make_conv_stats_kernel(tm, m_real):
    """Pass 1: tiled matmul+bias; accumulate per-channel sum / sumsq.

    x tile: (tm, Kp) bf16, w: (Kp, Np) bf16, bias: (1, Np) f32.
    Outputs: y tile (tm, Np) f32 and a VMEM-resident (2, Np) stats accumulator
    (row 0 = sum, row 1 = sum of squares) over the real (un-padded) rows.
    """

    def kernel(x_ref, w_ref, b_ref, y_ref, stats_ref):
        i = pl.program_id(0)
        y = jnp.dot(x_ref[...], w_ref[...], preferred_element_type=jnp.float32)
        y = y + b_ref[...]
        y_ref[...] = y

        # Mask rows that are M-padding so they don't pollute the batch stats.
        row = jax.lax.broadcasted_iota(jnp.int32, y.shape, 0) + i * tm
        valid = jnp.where(row < m_real, 1.0, 0.0).astype(jnp.float32)
        yv = y * valid
        s = jnp.sum(yv, axis=0, keepdims=True)
        ss = jnp.sum(yv * y, axis=0, keepdims=True)
        upd = jnp.concatenate([s, ss], axis=0)  # (2, Np)

        @pl.when(i == 0)
        def _():
            stats_ref[...] = jnp.zeros_like(stats_ref)

        stats_ref[...] = stats_ref[...] + upd

    return kernel


def make_bn_relu_kernel(inv_m):
    """Pass 2: normalize with global batch stats, affine, ReLU (all f32)."""

    def kernel(y_ref, stats_ref, gamma_ref, beta_ref, o_ref):
        st = stats_ref[...]                       # (2, Np)
        mean = st[0:1, :] * inv_m
        var = jnp.maximum(st[1:2, :] * inv_m - mean * mean, 0.0)
        scale = gamma_ref[...] * jax.lax.rsqrt(var + EPS)
        o_ref[...] = jnp.maximum((y_ref[...] - mean) * scale + beta_ref[...], 0.0)

    return kernel


def matmul_bias_kernel(x_ref, w_ref, b_ref, o_ref):
    """Tiled bf16 matmul + bias (ConvTranspose2d and final 1x1 conv)."""
    o_ref[...] = (
        jnp.dot(x_ref[...], w_ref[...], preferred_element_type=jnp.float32)
        + b_ref[...]
    )


# ----------------------------- Pallas wrappers ------------------------------

def _tiling(m):
    tm = min(256, _round_up(m, 8))
    mp = _round_up(m, tm)
    return tm, mp, mp // tm


def pallas_conv_bn_relu(patches, wmat, bias, gamma, beta):
    """Fused ConvBlock on im2col patches: (M, K) x (K, Cout) + BN + ReLU."""
    M, K = patches.shape
    Cout = wmat.shape[1]
    Kp = _round_up(K, 128)
    Np = _round_up(Cout, 128)
    TM, Mp, grid_m = _tiling(M)

    xp = _pad2d(patches, Mp, Kp).astype(jnp.bfloat16)
    wp = _pad2d(wmat, Kp, Np).astype(jnp.bfloat16)
    bp = jnp.pad(bias, (0, Np - Cout)).reshape(1, Np).astype(jnp.float32)
    gp = jnp.pad(gamma, (0, Np - Cout)).reshape(1, Np).astype(jnp.float32)
    bep = jnp.pad(beta, (0, Np - Cout)).reshape(1, Np).astype(jnp.float32)

    mm_cost = pl.CostEstimate(
        flops=2 * Mp * Kp * Np,
        transcendentals=0,
        bytes_accessed=xp.size * 2 + wp.size * 2 + Mp * Np * 4,
    )

    # Pass 1: matmul + bias, accumulate per-channel sum / sumsq.
    y, stats = pl.pallas_call(
        make_conv_stats_kernel(TM, M),
        grid=(grid_m,),
        in_specs=[
            pl.BlockSpec((TM, Kp), lambda i: (i, 0)),
            pl.BlockSpec((Kp, Np), lambda i: (0, 0)),
            pl.BlockSpec((1, Np), lambda i: (0, 0)),
        ],
        out_specs=(
            pl.BlockSpec((TM, Np), lambda i: (i, 0)),
            pl.BlockSpec((2, Np), lambda i: (0, 0)),   # resident accumulator
        ),
        out_shape=(
            jax.ShapeDtypeStruct((Mp, Np), jnp.float32),
            jax.ShapeDtypeStruct((2, Np), jnp.float32),
        ),
        compiler_params=pltpu.CompilerParams(
            dimension_semantics=("arbitrary",)),
        cost_estimate=mm_cost,
    )(xp, wp, bp)

    # Pass 2: normalize with global batch stats + affine + ReLU.
    out = pl.pallas_call(
        make_bn_relu_kernel(1.0 / float(M)),
        grid=(grid_m,),
        in_specs=[
            pl.BlockSpec((TM, Np), lambda i: (i, 0)),
            pl.BlockSpec((2, Np), lambda i: (0, 0)),
            pl.BlockSpec((1, Np), lambda i: (0, 0)),
            pl.BlockSpec((1, Np), lambda i: (0, 0)),
        ],
        out_specs=pl.BlockSpec((TM, Np), lambda i: (i, 0)),
        out_shape=jax.ShapeDtypeStruct((Mp, Np), jnp.float32),
        compiler_params=pltpu.CompilerParams(
            dimension_semantics=("parallel",)),
        cost_estimate=pl.CostEstimate(
            flops=5 * Mp * Np, transcendentals=Np,
            bytes_accessed=Mp * Np * 8),
    )(y, stats, gp, bep)

    return out[:M, :Cout]


def pallas_matmul_bias(x2d, w2d, bias):
    """Gridded bf16 matmul + bias with lane-dense padded output, sliced back."""
    M, K = x2d.shape
    N = w2d.shape[1]
    Kp = _round_up(K, 128)
    Np = _round_up(N, 128)
    TM, Mp, grid_m = _tiling(M)

    xp = _pad2d(x2d, Mp, Kp).astype(jnp.bfloat16)
    wp = _pad2d(w2d, Kp, Np).astype(jnp.bfloat16)
    bp = jnp.pad(bias, (0, Np - N)).reshape(1, Np).astype(jnp.float32)

    y = pl.pallas_call(
        matmul_bias_kernel,
        grid=(grid_m,),
        in_specs=[
            pl.BlockSpec((TM, Kp), lambda i: (i, 0)),
            pl.BlockSpec((Kp, Np), lambda i: (0, 0)),
            pl.BlockSpec((1, Np), lambda i: (0, 0)),
        ],
        out_specs=pl.BlockSpec((TM, Np), lambda i: (i, 0)),
        out_shape=jax.ShapeDtypeStruct((Mp, Np), jnp.float32),
        compiler_params=pltpu.CompilerParams(
            dimension_semantics=("parallel",)),
        cost_estimate=pl.CostEstimate(
            flops=2 * Mp * Kp * Np, transcendentals=0,
            bytes_accessed=xp.size * 2 + wp.size * 2 + Mp * Np * 4),
    )(xp, wp, bp)

    return y[:M, :N]


# ------------------------------- JAX glue -----------------------------------

def im2col_3x3(x):
    """(B,H,W,C) -> (B*H*W, 9*C) patches for a 3x3 / pad 1 / stride 1 conv."""
    # TODO(synk): replace with in-kernel halo DMA + 9 shifted accumulating
    # sub-matmuls to avoid the 9x HBM expansion of activations.
    B, H, W, C = x.shape
    xp = jnp.pad(x, ((0, 0), (1, 1), (1, 1), (0, 0)))
    cols = [xp[:, dh:dh + H, dw:dw + W, :] for dh in range(3) for dw in range(3)]
    patches = jnp.concatenate(cols, axis=-1)
    return patches.reshape(B * H * W, 9 * C)


def conv_block(x, params):
    """ConvBlock: 3x3 conv + BatchNorm(train-mode batch stats) + ReLU."""
    w, b, gamma, beta = params            # w is PyTorch layout (Cout, Cin, 3, 3)
    B, H, W, C = x.shape
    Cout = w.shape[0]
    wmat = jnp.transpose(w, (2, 3, 1, 0)).reshape(9 * C, Cout)  # (kh,kw,cin,cout)
    patches = im2col_3x3(x)
    y = pallas_conv_bn_relu(patches, wmat, b, gamma, beta)
    return y.reshape(B, H, W, Cout)


def max_pool(x, ph, pw):
    """MaxPool2d((ph, pw)), stride == kernel, floor mode, no padding. NHWC."""
    B, H, W, C = x.shape
    Ho, Wo = H // ph, W // pw
    x = x[:, :Ho * ph, :Wo * pw, :]
    x = x.reshape(B, Ho, ph, Wo, pw, C)
    return jnp.max(x, axis=(2, 4))


def conv_transpose_2x2(x, w, b):
    """ConvTranspose2d(kernel=2, stride=2). w is PyTorch layout (Cin, Cout, 2, 2)."""
    B, H, W, Cin = x.shape
    Cout = w.shape[1]
    wmat = jnp.transpose(w, (0, 2, 3, 1)).reshape(Cin, 4 * Cout)  # (cin,(kh,kw,cout))
    bias4 = jnp.tile(b, (4,))
    y = pallas_matmul_bias(x.reshape(B * H * W, Cin), wmat, bias4)
    y = y.reshape(B, H, W, 2, 2, Cout)
    y = jnp.transpose(y, (0, 1, 3, 2, 4, 5)).reshape(B, 2 * H, 2 * W, Cout)
    return y


def final_conv_1x1(x, w, b):
    """Conv2d(kernel=1). w is PyTorch layout (Cout, Cin, 1, 1)."""
    B, H, W, C = x.shape
    Cout = w.shape[0]
    wmat = jnp.transpose(w.reshape(Cout, C), (1, 0))
    y = pallas_matmul_bias(x.reshape(B * H * W, C), wmat, b)
    return y.reshape(B, H, W, Cout)


def center_crop(x, th, tw):
    """Center crop spatial dims (NHWC) to (th, tw), matching the PyTorch slicing."""
    _, H, W, _ = x.shape
    dh, dw = H - th, W - tw
    return x[:, dh // 2:H - (dh - dh // 2), dw // 2:W - (dw - dw // 2), :]


def bilinear_resize(x, out_h, out_w):
    """F.interpolate(mode='bilinear', align_corners=False) on NHWC tensors."""
    B, H, W, C = x.shape

    def idx_weights(in_size, out_size):
        if in_size == out_size:
            i = np.arange(out_size)
            return i, i, np.ones(out_size, np.float32), np.zeros(out_size, np.float32)
        scale = in_size / out_size
        src = (np.arange(out_size) + 0.5) * scale - 0.5
        src = np.maximum(src, 0.0)
        i0 = np.minimum(np.floor(src).astype(np.int64), in_size - 1)
        i1 = np.minimum(i0 + 1, in_size - 1)
        l1 = (src - i0).astype(np.float32)
        return i0, i1, (1.0 - l1).astype(np.float32), l1

    h0, h1, hl0, hl1 = idx_weights(H, out_h)
    w0, w1, wl0, wl1 = idx_weights(W, out_w)
    xh = (x[:, h0] * hl0[None, :, None, None]
          + x[:, h1] * hl1[None, :, None, None])
    out = (xh[:, :, w0] * wl0[None, None, :, None]
           + xh[:, :, w1] * wl1[None, None, :, None])
    return out


# ------------------------------ parameters ----------------------------------

def init_params(key, in_channels, out_channels):
    ks = jax.random.split(key, 16)

    def convblock_p(k, cin, cout):
        kw_, kb_ = jax.random.split(k)
        w = jax.random.normal(kw_, (cout, cin, 3, 3), jnp.float32) * 0.05
        b = jax.random.normal(kb_, (cout,), jnp.float32) * 0.01
        gamma = jnp.ones((cout,), jnp.float32)   # PyTorch BN defaults
        beta = jnp.zeros((cout,), jnp.float32)
        return (w, b, gamma, beta)

    def convT_p(k, cin, cout):
        kw_, kb_ = jax.random.split(k)
        w = jax.random.normal(kw_, (cin, cout, 2, 2), jnp.float32) * 0.05
        b = jax.random.normal(kb_, (cout,), jnp.float32) * 0.01
        return (w, b)

    def conv1_p(k, cin, cout):
        kw_, kb_ = jax.random.split(k)
        w = jax.random.normal(kw_, (cout, cin, 1, 1), jnp.float32) * 0.05
        b = jax.random.normal(kb_, (cout,), jnp.float32) * 0.01
        return (w, b)

    return {
        "enc1": convblock_p(ks[0], in_channels, 64),
        "enc2": convblock_p(ks[1], 64, 128),
        "enc3": convblock_p(ks[2], 128, 256),
        "upconv2": convT_p(ks[3], 256, 128),
        "dec2": convblock_p(ks[4], 256, 128),
        "upconv1": convT_p(ks[5], 128, 64),
        "dec1": convblock_p(ks[6], 128, 64),
        "final": conv1_p(ks[7], 64, out_channels),
    }


# ------------------------------- forward ------------------------------------

def unet_forward(x_nchw, params):
    x = jnp.transpose(x_nchw, (0, 2, 3, 1)).astype(jnp.float32)  # NCHW -> NHWC

    enc1 = conv_block(x, params["enc1"])
    pol1 = max_pool(enc1, 3, 2)
    enc2 = conv_block(pol1, params["enc2"])
    enc3 = conv_block(max_pool(enc2, 2, 2), params["enc3"])

    dec2 = conv_transpose_2x2(enc3, *params["upconv2"])
    enc2c = center_crop(enc2, dec2.shape[1], dec2.shape[2])
    dec2 = jnp.concatenate([dec2, enc2c], axis=-1)
    dec2 = conv_block(dec2, params["dec2"])

    dec1 = conv_transpose_2x2(dec2, *params["upconv1"])
    dec1 = bilinear_resize(dec1, enc1.shape[1], enc1.shape[2])
    dec1 = jnp.concatenate([dec1, enc1], axis=-1)
    dec1 = conv_block(dec1, params["dec1"])

    out = final_conv_1x1(dec1, *params["final"])
    return jnp.transpose(out, (0, 3, 1, 2))  # back to NCHW


# --------------------------------- main --------------------------------------

if __name__ == "__main__":
    B, IN_CH, OUT_CH, H, W = 2, 4, 3, 12, 16  # H divisible by 3*2, W by 2*2
    key = jax.random.PRNGKey(0)
    kx, kp = jax.random.split(key)
    x = jax.random.normal(kx, (B, IN_CH, H, W), jnp.float32)
    params = init_params(kp, IN_CH, OUT_CH)

    fwd = jax.jit(lambda inp: unet_forward(inp, params))
    out = fwd(x)
    out = jax.block_until_ready(out)

    assert out.shape == (B, OUT_CH, H, W), out.shape
    assert bool(jnp.all(jnp.isfinite(out)))
    print("KERNEL_OK")
</pallas_src>

<mosaic_0001>
module attributes {stable_mosaic.version = 11 : i64} {
  func.func @kernel(%arg0: i32, %arg1: memref<256x128xf32, #tpu.memory_space<vmem>>, %arg2: memref<2x128xf32, #tpu.memory_space<vmem>>, %arg3: memref<1x128xf32, #tpu.memory_space<vmem>>, %arg4: memref<1x128xf32, #tpu.memory_space<vmem>>, %arg5: memref<256x128xf32, #tpu.memory_space<vmem>>) attributes {dimension_semantics = [#tpu.dimension_semantics<parallel>], iteration_bounds = array<i64: 2>, scalar_prefetch = 0 : i64, scratch_operands = 0 : i64, tpu.core_type = #tpu.core_type<tc>, window_params = [{transform_indices = @transform_0, window_bounds = array<i64: 256, 128>}, {pipeline_mode = #tpu.pipeline_mode<synchronous>, transform_indices = @transform_1, window_bounds = array<i64: 2, 128>}, {pipeline_mode = #tpu.pipeline_mode<synchronous>, transform_indices = @transform_2, window_bounds = array<i64: 1, 128>}, {pipeline_mode = #tpu.pipeline_mode<synchronous>, transform_indices = @transform_3, window_bounds = array<i64: 1, 128>}, {transform_indices = @transform_4, window_bounds = array<i64: 256, 128>}]} {
    %c0 = arith.constant 0 : index
    %c0_0 = arith.constant 0 : index
    %0 = vector.load %arg2[%c0, %c0_0] : memref<2x128xf32, #tpu.memory_space<vmem>>, vector<2x128xf32>
    %1 = vector.extract_strided_slice %0 {offsets = [0, 0], sizes = [1, 128], strides = [1, 1]} : vector<2x128xf32> to vector<1x128xf32>
    %cst = arith.constant 0.00260416674 : f32
    %2 = vector.broadcast %cst : f32 to vector<1x128xf32>
    %3 = arith.mulf %1, %2 : vector<1x128xf32>
    %4 = vector.extract_strided_slice %0 {offsets = [1, 0], sizes = [1, 128], strides = [1, 1]} : vector<2x128xf32> to vector<1x128xf32>
    %cst_1 = arith.constant 0.00260416674 : f32
    %5 = vector.broadcast %cst_1 : f32 to vector<1x128xf32>
    %6 = arith.mulf %4, %5 : vector<1x128xf32>
    %7 = arith.mulf %3, %3 : vector<1x128xf32>
    %8 = arith.subf %6, %7 : vector<1x128xf32>
    %cst_2 = arith.constant 0.000000e+00 : f32
    %9 = vector.broadcast %cst_2 : f32 to vector<1x128xf32>
    %10 = arith.maximumf %8, %9 : vector<1x128xf32>
    %c0_3 = arith.constant 0 : index
    %c0_4 = arith.constant 0 : index
    %11 = vector.load %arg3[%c0_3, %c0_4] : memref<1x128xf32, #tpu.memory_space<vmem>>, vector<1x128xf32>
    %cst_5 = arith.constant 9.99999974E-6 : f32
    %12 = vector.broadcast %cst_5 : f32 to vector<1x128xf32>
    %13 = arith.addf %10, %12 : vector<1x128xf32>
    %14 = math.rsqrt %13 : vector<1x128xf32>
    %15 = arith.mulf %11, %14 : vector<1x128xf32>
    %c0_6 = arith.constant 0 : index
    %c0_7 = arith.constant 0 : index
    %16 = vector.load %arg1[%c0_6, %c0_7] : memref<256x128xf32, #tpu.memory_space<vmem>>, vector<256x128xf32>
    %17 = vector.broadcast %3 : vector<1x128xf32> to vector<256x128xf32>
    %18 = arith.subf %16, %17 : vector<256x128xf32>
    %19 = vector.broadcast %15 : vector<1x128xf32> to vector<256x128xf32>
    %20 = arith.mulf %18, %19 : vector<256x128xf32>
    %c0_8 = arith.constant 0 : index
    %c0_9 = arith.constant 0 : index
    %21 = vector.load %arg4[%c0_8, %c0_9] : memref<1x128xf32, #tpu.memory_space<vmem>>, vector<1x128xf32>
    %22 = vector.broadcast %21 : vector<1x128xf32> to vector<256x128xf32>
    %23 = arith.addf %20, %22 : vector<256x128xf32>
    %cst_10 = arith.constant 0.000000e+00 : f32
    %24 = vector.broadcast %cst_10 : f32 to vector<256x128xf32>
    %25 = arith.maximumf %23, %24 : vector<256x128xf32>
    %c0_11 = arith.constant 0 : index
    %c0_12 = arith.constant 0 : index
    %26 = vector.load %arg5[%c0_11, %c0_12] : memref<256x128xf32, #tpu.memory_space<vmem>>, vector<256x128xf32>
    tpu.vector_store %arg5[%c0_11, %c0_12], %25 {strides = array<i32>} : memref<256x128xf32, #tpu.memory_space<vmem>>, vector<256x128xf32>,
    return
  }
  func.func @transform_0(%arg0: i32) -> (i32, i32) {
    %c0_i32 = arith.constant 0 : i32
    %c0_i32_0 = arith.constant 0 : i32
    return %arg0, %c0_i32 : i32, i32
  }
  func.func @transform_1(%arg0: i32) -> (i32, i32) {
    %c0_i32 = arith.constant 0 : i32
    %c0_i32_0 = arith.constant 0 : i32
    %c0_i32_1 = arith.constant 0 : i32
    return %c0_i32, %c0_i32_0 : i32, i32
  }
  func.func @transform_2(%arg0: i32) -> (i32, i32) {
    %c0_i32 = arith.constant 0 : i32
    %c0_i32_0 = arith.constant 0 : i32
    %c0_i32_1 = arith.constant 0 : i32
    return %c0_i32, %c0_i32_0 : i32, i32
  }
  func.func @transform_3(%arg0: i32) -> (i32, i32) {
    %c0_i32 = arith.constant 0 : i32
    %c0_i32_0 = arith.constant 0 : i32
    %c0_i32_1 = arith.constant 0 : i32
    return %c0_i32, %c0_i32_0 : i32, i32
  }
  func.func @transform_4(%arg0: i32) -> (i32, i32) {
    %c0_i32 = arith.constant 0 : i32
    %c0_i32_0 = arith.constant 0 : i32
    return %arg0, %c0_i32 : i32, i32
  }
}

module attributes {stable_mosaic.version = 11 : i64} {
  func.func @kernel(%arg0: i32, %arg1: memref<256x128xbf16, #tpu.memory_space<vmem>>, %arg2: memref<128x128xbf16, #tpu.memory_space<vmem>>, %arg3: memref<1x128xf32, #tpu.memory_space<vmem>>, %arg4: memref<256x128xf32, #tpu.memory_space<vmem>>, %arg5: memref<2x128xf32, #tpu.memory_space<vmem>>) attributes {dimension_semantics = [#tpu.dimension_semantics<arbitrary>], iteration_bounds = array<i64: 2>, scalar_prefetch = 0 : i64, scratch_operands = 0 : i64, tpu.core_type = #tpu.core_type<tc>, window_params = [{transform_indices = @transform_0, window_bounds = array<i64: 256, 128>}, {pipeline_mode = #tpu.pipeline_mode<synchronous>, transform_indices = @transform_1, window_bounds = array<i64: 128, 128>}, {pipeline_mode = #tpu.pipeline_mode<synchronous>, transform_indices = @transform_2, window_bounds = array<i64: 1, 128>}, {transform_indices = @transform_3, window_bounds = array<i64: 256, 128>}, {pipeline_mode = #tpu.pipeline_mode<synchronous>, transform_indices = @transform_4, window_bounds = array<i64: 2, 128>}]} {
    %c0 = arith.constant 0 : index
    %c0_0 = arith.constant 0 : index
    %0 = vector.load %arg1[%c0, %c0_0] : memref<256x128xbf16, #tpu.memory_space<vmem>>, vector<256x128xbf16>
    %c0_1 = arith.constant 0 : index
    %c0_2 = arith.constant 0 : index
    %1 = vector.load %arg2[%c0_1, %c0_2] : memref<128x128xbf16, #tpu.memory_space<vmem>>, vector<128x128xbf16>
    %cst = arith.constant dense<0.000000e+00> : vector<256x128xf32>
    %2 = tpu.matmul %0, %1, %cst {dimension_numbers = #tpu.dot_dimension_numbers<[1], [0], [0], [1], [0, 0, 1, 1], [], []>} : vector<256x128xbf16>, vector<128x128xbf16>, vector<256x128xf32> -> vector<256x128xf32>
    %c0_3 = arith.constant 0 : index
    %c0_4 = arith.constant 0 : index
    %3 = vector.load %arg3[%c0_3, %c0_4] : memref<1x128xf32, #tpu.memory_space<vmem>>, vector<1x128xf32>
    %4 = vector.broadcast %3 : vector<1x128xf32> to vector<256x128xf32>
    %5 = arith.addf %2, %4 : vector<256x128xf32>
    %c0_5 = arith.constant 0 : index
    %c0_6 = arith.constant 0 : index
    %6 = vector.load %arg4[%c0_5, %c0_6] : memref<256x128xf32, #tpu.memory_space<vmem>>, vector<256x128xf32>
    tpu.vector_store %arg4[%c0_5, %c0_6], %5 {strides = array<i32>} : memref<256x128xf32, #tpu.memory_space<vmem>>, vector<256x128xf32>,
    %7 = tpu.iota {dimensions = array<i32: 0>} : vector<256x128xi32>
    %c256_i32 = arith.constant 256 : i32
    %8 = arith.muli %arg0, %c256_i32 : i32
    %9 = vector.broadcast %8 : i32 to vector<256x128xi32>
    %10 = arith.addi %7, %9 : vector<256x128xi32>
    %c384_i32 = arith.constant 384 : i32
    %11 = vector.broadcast %c384_i32 : i32 to vector<256x128xi32>
    %12 = arith.cmpi slt, %10, %11 : vector<256x128xi32>
    %cst_7 = arith.constant 1.000000e+00 : f32
    %cst_8 = arith.constant 0.000000e+00 : f32
    %13 = vector.broadcast %cst_7 : f32 to vector<256x128xf32>
    %14 = vector.broadcast %cst_8 : f32 to vector<256x128xf32>
    %15 = arith.select %12, %13, %14 : vector<256x128xi1>, vector<256x128xf32>
    %16 = arith.mulf %5, %15 : vector<256x128xf32>
    %cst_9 = arith.constant dense<0.000000e+00> : vector<128xf32>
    %17 = vector.multi_reduction <add>, %16, %cst_9 [0] : vector<256x128xf32> to vector<128xf32>
    %18 = vector.shape_cast %17 : vector<128xf32> to vector<1x128xf32>
    %19 = arith.mulf %16, %5 : vector<256x128xf32>
    %cst_10 = arith.constant dense<0.000000e+00> : vector<128xf32>
    %20 = vector.multi_reduction <add>, %19, %cst_10 [0] : vector<256x128xf32> to vector<128xf32>
    %21 = vector.shape_cast %20 : vector<128xf32> to vector<1x128xf32>
    %22 = tpu.concatenate %18, %21 in 0 : vector<1x128xf32>, vector<1x128xf32> -> vector<2x128xf32>
    %c0_i32 = arith.constant 0 : i32
    %23 = arith.cmpi eq, %arg0, %c0_i32 : i32
    %24 = arith.extui %23 : i1 to i32
    %c0_i32_11 = arith.constant 0 : i32
    %25 = arith.cmpi ne, %24, %c0_i32_11 : i32
    scf.if %25 {
      %cst_16 = arith.constant 0.000000e+00 : f32
      %29 = vector.broadcast %cst_16 : f32 to vector<2x128xf32>
      %c0_17 = arith.constant 0 : index
      %c0_18 = arith.constant 0 : index
      %30 = vector.load %arg5[%c0_17, %c0_18] : memref<2x128xf32, #tpu.memory_space<vmem>>, vector<2x128xf32>
      tpu.vector_store %arg5[%c0_17, %c0_18], %29 {strides = array<i32>} : memref<2x128xf32, #tpu.memory_space<vmem>>, vector<2x128xf32>,
    } else {
    }
    %c0_12 = arith.constant 0 : index
    %c0_13 = arith.constant 0 : index
    %26 = vector.load %arg5[%c0_12, %c0_13] : memref<2x128xf32, #tpu.memory_space<vmem>>, vector<2x128xf32>
    %27 = arith.addf %26, %22 : vector<2x128xf32>
    %c0_14 = arith.constant 0 : index
    %c0_15 = arith.constant 0 : index
    %28 = vector.load %arg5[%c0_14, %c0_15] : memref<2x128xf32, #tpu.memory_space<vmem>>, vector<2x128xf32>
    tpu.vector_store %arg5[%c0_14, %c0_15], %27 {strides = array<i32>} : memref<2x128xf32, #tpu.memory_space<vmem>>, vector<2x128xf32>,
    return
  }
  func.func @transform_0(%arg0: i32) -> (i32, i32) {
    %c0_i32 = arith.constant 0 : i32
    %c0_i32_0 = arith.constant 0 : i32
    return %arg0, %c0_i32 : i32, i32
  }
  func.func @transform_1(%arg0: i32) -> (i32, i32) {
    %c0_i32 = arith.constant 0 : i32
    %c0_i32_0 = arith.constant 0 : i32
    %c0_i32_1 = arith.constant 0 : i32
    return %c0_i32, %c0_i32_0 : i32, i32
  }
  func.func @transform_2(%arg0: i32) -> (i32, i32) {
    %c0_i32 = arith.constant 0 : i32
    %c0_i32_0 = arith.constant 0 : i32
    %c0_i32_1 = arith.constant 0 : i32
    return %c0_i32, %c0_i32_0 : i32, i32
  }
  func.func @transform_3(%arg0: i32) -> (i32, i32) {
    %c0_i32 = arith.constant 0 : i32
    %c0_i32_0 = arith.constant 0 : i32
    return %arg0, %c0_i32 : i32, i32
  }
  func.func @transform_4(%arg0: i32) -> (i32, i32) {
    %c0_i32 = arith.constant 0 : i32
    %c0_i32_0 = arith.constant 0 : i32
    %c0_i32_1 = arith.constant 0 : i32
    return %c0_i32, %c0_i32_0 : i32, i32
  }
}

module attributes {stable_mosaic.version = 11 : i64} {
  func.func @kernel(%arg0: i32, %arg1: memref<64x640xbf16, #tpu.memory_space<vmem>>, %arg2: memref<640x128xbf16, #tpu.memory_space<vmem>>, %arg3: memref<1x128xf32, #tpu.memory_space<vmem>>, %arg4: memref<64x128xf32, #tpu.memory_space<vmem>>, %arg5: memref<2x128xf32, #tpu.memory_space<vmem>>) attributes {dimension_semantics = [#tpu.dimension_semantics<arbitrary>], iteration_bounds = array<i64: 1>, scalar_prefetch = 0 : i64, scratch_operands = 0 : i64, tpu.core_type = #tpu.core_type<tc>, window_params = [{transform_indices = @transform_0, window_bounds = array<i64: 64, 640>}, {pipeline_mode = #tpu.pipeline_mode<synchronous>, transform_indices = @transform_1, window_bounds = array<i64: 640, 128>}, {pipeline_mode = #tpu.pipeline_mode<synchronous>, transform_indices = @transform_2, window_bounds = array<i64: 1, 128>}, {transform_indices = @transform_3, window_bounds = array<i64: 64, 128>}, {pipeline_mode = #tpu.pipeline_mode<synchronous>, transform_indices = @transform_4, window_bounds = array<i64: 2, 128>}]} {
    %c0 = arith.constant 0 : index
    %c0_0 = arith.constant 0 : index
    %0 = vector.load %arg1[%c0, %c0_0] : memref<64x640xbf16, #tpu.memory_space<vmem>>, vector<64x640xbf16>
    %c0_1 = arith.constant 0 : index
    %c0_2 = arith.constant 0 : index
    %1 = vector.load %arg2[%c0_1, %c0_2] : memref<640x128xbf16, #tpu.memory_space<vmem>>, vector<640x128xbf16>
    %cst = arith.constant dense<0.000000e+00> : vector<64x128xf32>
    %2 = tpu.matmul %0, %1, %cst {dimension_numbers = #tpu.dot_dimension_numbers<[1], [0], [0], [1], [0, 0, 1, 1], [], []>} : vector<64x640xbf16>, vector<640x128xbf16>, vector<64x128xf32> -> vector<64x128xf32>
    %c0_3 = arith.constant 0 : index
    %c0_4 = arith.constant 0 : index
    %3 = vector.load %arg3[%c0_3, %c0_4] : memref<1x128xf32, #tpu.memory_space<vmem>>, vector<1x128xf32>
    %4 = vector.broadcast %3 : vector<1x128xf32> to vector<64x128xf32>
    %5 = arith.addf %2, %4 : vector<64x128xf32>
    %c0_5 = arith.constant 0 : index
    %c0_6 = arith.constant 0 : index
    %6 = vector.load %arg4[%c0_5, %c0_6] : memref<64x128xf32, #tpu.memory_space<vmem>>, vector<64x128xf32>
    tpu.vector_store %arg4[%c0_5, %c0_6], %5 {strides = array<i32>} : memref<64x128xf32, #tpu.memory_space<vmem>>, vector<64x128xf32>,
    %7 = tpu.iota {dimensions = array<i32: 0>} : vector<64x128xi32>
    %c64_i32 = arith.constant 64 : i32
    %8 = arith.muli %arg0, %c64_i32 : i32
    %9 = vector.broadcast %8 : i32 to vector<64x128xi32>
    %10 = arith.addi %7, %9 : vector<64x128xi32>
    %c64_i32_7 = arith.constant 64 : i32
    %11 = vector.broadcast %c64_i32_7 : i32 to vector<64x128xi32>
    %12 = arith.cmpi slt, %10, %11 : vector<64x128xi32>
    %cst_8 = arith.constant 1.000000e+00 : f32
    %cst_9 = arith.constant 0.000000e+00 : f32
    %13 = vector.broadcast %cst_8 : f32 to vector<64x128xf32>
    %14 = vector.broadcast %cst_9 : f32 to vector<64x128xf32>
    %15 = arith.select %12, %13, %14 : vector<64x128xi1>, vector<64x128xf32>
    %16 = arith.mulf %5, %15 : vector<64x128xf32>
    %cst_10 = arith.constant dense<0.000000e+00> : vector<128xf32>
    %17 = vector.multi_reduction <add>, %16, %cst_10 [0] : vector<64x128xf32> to vector<128xf32>
    %18 = vector.shape_cast %17 : vector<128xf32> to vector<1x128xf32>
    %19 = arith.mulf %16, %5 : vector<64x128xf32>
    %cst_11 = arith.constant dense<0.000000e+00> : vector<128xf32>
    %20 = vector.multi_reduction <add>, %19, %cst_11 [0] : vector<64x128xf32> to vector<128xf32>
    %21 = vector.shape_cast %20 : vector<128xf32> to vector<1x128xf32>
    %22 = tpu.concatenate %18, %21 in 0 : vector<1x128xf32>, vector<1x128xf32> -> vector<2x128xf32>
    %c0_i32 = arith.constant 0 : i32
    %23 = arith.cmpi eq, %arg0, %c0_i32 : i32
    %24 = arith.extui %23 : i1 to i32
    %c0_i32_12 = arith.constant 0 : i32
    %25 = arith.cmpi ne, %24, %c0_i32_12 : i32
    scf.if %25 {
      %cst_17 = arith.constant 0.000000e+00 : f32
      %29 = vector.broadcast %cst_17 : f32 to vector<2x128xf32>
      %c0_18 = arith.constant 0 : index
      %c0_19 = arith.constant 0 : index
      %30 = vector.load %arg5[%c0_18, %c0_19] : memref<2x128xf32, #tpu.memory_space<vmem>>, vector<2x128xf32>
      tpu.vector_store %arg5[%c0_18, %c0_19], %29 {strides = array<i32>} : memref<2x128xf32, #tpu.memory_space<vmem>>, vector<2x128xf32>,
    } else {
    }
    %c0_13 = arith.constant 0 : index
    %c0_14 = arith.constant 0 : index
    %26 = vector.load %arg5[%c0_13, %c0_14] : memref<2x128xf32, #tpu.memory_space<vmem>>, vector<2x128xf32>
    %27 = arith.addf %26, %22 : vector<2x128xf32>
    %c0_15 = arith.constant 0 : index
    %c0_16 = arith.constant 0 : index
    %28 = vector.load %arg5[%c0_15, %c0_16] : memref<2x128xf32, #tpu.memory_space<vmem>>, vector<2x128xf32>
    tpu.vector_store %arg5[%c0_15, %c0_16], %27 {strides = array<i32>} : memref<2x128xf32, #tpu.memory_space<vmem>>, vector<2x128xf32>,
    return
  }
  func.func @transform_0(%arg0: i32) -> (i32, i32) {
    %c0_i32 = arith.constant 0 : i32
    %c0_i32_0 = arith.constant 0 : i32
    return %arg0, %c0_i32 : i32, i32
  }
  func.func @transform_1(%arg0: i32) -> (i32, i32) {
    %c0_i32 = arith.constant 0 : i32
    %c0_i32_0 = arith.constant 0 : i32
    %c0_i32_1 = arith.constant 0 : i32
    return %c0_i32, %c0_i32_0 : i32, i32
  }
  func.func @transform_2(%arg0: i32) -> (i32, i32) {
    %c0_i32 = arith.constant 0 : i32
    %c0_i32_0 = arith.constant 0 : i32
    %c0_i32_1 = arith.constant 0 : i32
    return %c0_i32, %c0_i32_0 : i32, i32
  }
  func.func @transform_3(%arg0: i32) -> (i32, i32) {
    %c0_i32 = arith.constant 0 : i32
    %c0_i32_0 = arith.constant 0 : i32
    return %arg0, %c0_i32 : i32, i32
  }
  func.func @transform_4(%arg0: i32) -> (i32, i32) {
    %c0_i32 = arith.constant 0 : i32
    %c0_i32_0 = arith.constant 0 : i32
    %c0_i32_1 = arith.constant 0 : i32
    return %c0_i32, %c0_i32_0 : i32, i32
  }
}

module attributes {stable_mosaic.version = 11 : i64} {
  func.func @kernel(%arg0: i32, %arg1: memref<64x128xf32, #tpu.memory_space<vmem>>, %arg2: memref<2x128xf32, #tpu.memory_space<vmem>>, %arg3: memref<1x128xf32, #tpu.memory_space<vmem>>, %arg4: memref<1x128xf32, #tpu.memory_space<vmem>>, %arg5: memref<64x128xf32, #tpu.memory_space<vmem>>) attributes {dimension_semantics = [#tpu.dimension_semantics<parallel>], iteration_bounds = array<i64: 1>, scalar_prefetch = 0 : i64, scratch_operands = 0 : i64, tpu.core_type = #tpu.core_type<tc>, window_params = [{transform_indices = @transform_0, window_bounds = array<i64: 64, 128>}, {pipeline_mode = #tpu.pipeline_mode<synchronous>, transform_indices = @transform_1, window_bounds = array<i64: 2, 128>}, {pipeline_mode = #tpu.pipeline_mode<synchronous>, transform_indices = @transform_2, window_bounds = array<i64: 1, 128>}, {pipeline_mode = #tpu.pipeline_mode<synchronous>, transform_indices = @transform_3, window_bounds = array<i64: 1, 128>}, {transform_indices = @transform_4, window_bounds = array<i64: 64, 128>}]} {
    %c0 = arith.constant 0 : index
    %c0_0 = arith.constant 0 : index
    %0 = vector.load %arg2[%c0, %c0_0] : memref<2x128xf32, #tpu.memory_space<vmem>>, vector<2x128xf32>
    %1 = vector.extract_strided_slice %0 {offsets = [0, 0], sizes = [1, 128], strides = [1, 1]} : vector<2x128xf32> to vector<1x128xf32>
    %cst = arith.constant 1.562500e-02 : f32
    %2 = vector.broadcast %cst : f32 to vector<1x128xf32>
    %3 = arith.mulf %1, %2 : vector<1x128xf32>
    %4 = vector.extract_strided_slice %0 {offsets = [1, 0], sizes = [1, 128], strides = [1, 1]} : vector<2x128xf32> to vector<1x128xf32>
    %cst_1 = arith.constant 1.562500e-02 : f32
    %5 = vector.broadcast %cst_1 : f32 to vector<1x128xf32>
    %6 = arith.mulf %4, %5 : vector<1x128xf32>
    %7 = arith.mulf %3, %3 : vector<1x128xf32>
    %8 = arith.subf %6, %7 : vector<1x128xf32>
    %cst_2 = arith.constant 0.000000e+00 : f32
    %9 = vector.broadcast %cst_2 : f32 to vector<1x128xf32>
    %10 = arith.maximumf %8, %9 : vector<1x128xf32>
    %c0_3 = arith.constant 0 : index
    %c0_4 = arith.constant 0 : index
    %11 = vector.load %arg3[%c0_3, %c0_4] : memref<1x128xf32, #tpu.memory_space<vmem>>, vector<1x128xf32>
    %cst_5 = arith.constant 9.99999974E-6 : f32
    %12 = vector.broadcast %cst_5 : f32 to vector<1x128xf32>
    %13 = arith.addf %10, %12 : vector<1x128xf32>
    %14 = math.rsqrt %13 : vector<1x128xf32>
    %15 = arith.mulf %11, %14 : vector<1x128xf32>
    %c0_6 = arith.constant 0 : index
    %c0_7 = arith.constant 0 : index
    %16 = vector.load %arg1[%c0_6, %c0_7] : memref<64x128xf32, #tpu.memory_space<vmem>>, vector<64x128xf32>
    %17 = vector.broadcast %3 : vector<1x128xf32> to vector<64x128xf32>
    %18 = arith.subf %16, %17 : vector<64x128xf32>
    %19 = vector.broadcast %15 : vector<1x128xf32> to vector<64x128xf32>
    %20 = arith.mulf %18, %19 : vector<64x128xf32>
    %c0_8 = arith.constant 0 : index
    %c0_9 = arith.constant 0 : index
    %21 = vector.load %arg4[%c0_8, %c0_9] : memref<1x128xf32, #tpu.memory_space<vmem>>, vector<1x128xf32>
    %22 = vector.broadcast %21 : vector<1x128xf32> to vector<64x128xf32>
    %23 = arith.addf %20, %22 : vector<64x128xf32>
    %cst_10 = arith.constant 0.000000e+00 : f32
    %24 = vector.broadcast %cst_10 : f32 to vector<64x128xf32>
    %25 = arith.maximumf %23, %24 : vector<64x128xf32>
    %c0_11 = arith.constant 0 : index
    %c0_12 = arith.constant 0 : index
    %26 = vector.load %arg5[%c0_11, %c0_12] : memref<64x128xf32, #tpu.memory_space<vmem>>, vector<64x128xf32>
    tpu.vector_store %arg5[%c0_11, %c0_12], %25 {strides = array<i32>} : memref<64x128xf32, #tpu.memory_space<vmem>>, vector<64x128xf32>,
    return
  }
  func.func @transform_0(%arg0: i32) -> (i32, i32) {
    %c0_i32 = arith.constant 0 : i32
    %c0_i32_0 = arith.constant 0 : i32
    return %arg0, %c0_i32 : i32, i32
  }
  func.func @transform_1(%arg0: i32) -> (i32, i32) {
    %c0_i32 = arith.constant 0 : i32
    %c0_i32_0 = arith.constant 0 : i32
    %c0_i32_1 = arith.constant 0 : i32
    return %c0_i32, %c0_i32_0 : i32, i32
  }
  func.func @transform_2(%arg0: i32) -> (i32, i32) {
    %c0_i32 = arith.constant 0 : i32
    %c0_i32_0 = arith.constant 0 : i32
    %c0_i32_1 = arith.constant 0 : i32
    return %c0_i32, %c0_i32_0 : i32, i32
  }
  func.func @transform_3(%arg0: i32) -> (i32, i32) {
    %c0_i32 = arith.constant 0 : i32
    %c0_i32_0 = arith.constant 0 : i32
    %c0_i32_1 = arith.constant 0 : i32
    return %c0_i32, %c0_i32_0 : i32, i32
  }
  func.func @transform_4(%arg0: i32) -> (i32, i32) {
    %c0_i32 = arith.constant 0 : i32
    %c0_i32_0 = arith.constant 0 : i32
    return %arg0, %c0_i32 : i32, i32
  }
}

module attributes {stable_mosaic.version = 11 : i64} {
  func.func @kernel(%arg0: i32, %arg1: memref<16x1152xbf16, #tpu.memory_space<vmem>>, %arg2: memref<1152x256xbf16, #tpu.memory_space<vmem>>, %arg3: memref<1x256xf32, #tpu.memory_space<vmem>>, %arg4: memref<16x256xf32, #tpu.memory_space<vmem>>, %arg5: memref<2x256xf32, #tpu.memory_space<vmem>>) attributes {dimension_semantics = [#tpu.dimension_semantics<arbitrary>], iteration_bounds = array<i64: 1>, scalar_prefetch = 0 : i64, scratch_operands = 0 : i64, tpu.core_type = #tpu.core_type<tc>, window_params = [{transform_indices = @transform_0, window_bounds = array<i64: 16, 1152>}, {pipeline_mode = #tpu.pipeline_mode<synchronous>, transform_indices = @transform_1, window_bounds = array<i64: 1152, 256>}, {pipeline_mode = #tpu.pipeline_mode<synchronous>, transform_indices = @transform_2, window_bounds = array<i64: 1, 256>}, {transform_indices = @transform_3, window_bounds = array<i64: 16, 256>}, {pipeline_mode = #tpu.pipeline_mode<synchronous>, transform_indices = @transform_4, window_bounds = array<i64: 2, 256>}]} {
    %c0 = arith.constant 0 : index
    %c0_0 = arith.constant 0 : index
    %0 = vector.load %arg1[%c0, %c0_0] : memref<16x1152xbf16, #tpu.memory_space<vmem>>, vector<16x1152xbf16>
    %c0_1 = arith.constant 0 : index
    %c0_2 = arith.constant 0 : index
    %1 = vector.load %arg2[%c0_1, %c0_2] : memref<1152x256xbf16, #tpu.memory_space<vmem>>, vector<1152x256xbf16>
    %cst = arith.constant dense<0.000000e+00> : vector<16x256xf32>
    %2 = tpu.matmul %0, %1, %cst {dimension_numbers = #tpu.dot_dimension_numbers<[1], [0], [0], [1], [0, 0, 1, 1], [], []>} : vector<16x1152xbf16>, vector<1152x256xbf16>, vector<16x256xf32> -> vector<16x256xf32>
    %c0_3 = arith.constant 0 : index
    %c0_4 = arith.constant 0 : index
    %3 = vector.load %arg3[%c0_3, %c0_4] : memref<1x256xf32, #tpu.memory_space<vmem>>, vector<1x256xf32>
    %4 = vector.broadcast %3 : vector<1x256xf32> to vector<16x256xf32>
    %5 = arith.addf %2, %4 : vector<16x256xf32>
    %c0_5 = arith.constant 0 : index
    %c0_6 = arith.constant 0 : index
    %6 = vector.load %arg4[%c0_5, %c0_6] : memref<16x256xf32, #tpu.memory_space<vmem>>, vector<16x256xf32>
    tpu.vector_store %arg4[%c0_5, %c0_6], %5 {strides = array<i32>} : memref<16x256xf32, #tpu.memory_space<vmem>>, vector<16x256xf32>,
    %7 = tpu.iota {dimensions = array<i32: 0>} : vector<16x256xi32>
    %c16_i32 = arith.constant 16 : i32
    %8 = arith.muli %arg0, %c16_i32 : i32
    %9 = vector.broadcast %8 : i32 to vector<16x256xi32>
    %10 = arith.addi %7, %9 : vector<16x256xi32>
    %c16_i32_7 = arith.constant 16 : i32
    %11 = vector.broadcast %c16_i32_7 : i32 to vector<16x256xi32>
    %12 = arith.cmpi slt, %10, %11 : vector<16x256xi32>
    %cst_8 = arith.constant 1.000000e+00 : f32
    %cst_9 = arith.constant 0.000000e+00 : f32
    %13 = vector.broadcast %cst_8 : f32 to vector<16x256xf32>
    %14 = vector.broadcast %cst_9 : f32 to vector<16x256xf32>
    %15 = arith.select %12, %13, %14 : vector<16x256xi1>, vector<16x256xf32>
    %16 = arith.mulf %5, %15 : vector<16x256xf32>
    %cst_10 = arith.constant dense<0.000000e+00> : vector<256xf32>
    %17 = vector.multi_reduction <add>, %16, %cst_10 [0] : vector<16x256xf32> to vector<256xf32>
    %18 = vector.shape_cast %17 : vector<256xf32> to vector<1x256xf32>
    %19 = arith.mulf %16, %5 : vector<16x256xf32>
    %cst_11 = arith.constant dense<0.000000e+00> : vector<256xf32>
    %20 = vector.multi_reduction <add>, %19, %cst_11 [0] : vector<16x256xf32> to vector<256xf32>
    %21 = vector.shape_cast %20 : vector<256xf32> to vector<1x256xf32>
    %22 = tpu.concatenate %18, %21 in 0 : vector<1x256xf32>, vector<1x256xf32> -> vector<2x256xf32>
    %c0_i32 = arith.constant 0 : i32
    %23 = arith.cmpi eq, %arg0, %c0_i32 : i32
    %24 = arith.extui %23 : i1 to i32
    %c0_i32_12 = arith.constant 0 : i32
    %25 = arith.cmpi ne, %24, %c0_i32_12 : i32
    scf.if %25 {
      %cst_17 = arith.constant 0.000000e+00 : f32
      %29 = vector.broadcast %cst_17 : f32 to vector<2x256xf32>
      %c0_18 = arith.constant 0 : index
      %c0_19 = arith.constant 0 : index
      %30 = vector.load %arg5[%c0_18, %c0_19] : memref<2x256xf32, #tpu.memory_space<vmem>>, vector<2x256xf32>
      tpu.vector_store %arg5[%c0_18, %c0_19], %29 {strides = array<i32>} : memref<2x256xf32, #tpu.memory_space<vmem>>, vector<2x256xf32>,
    } else {
    }
    %c0_13 = arith.constant 0 : index
    %c0_14 = arith.constant 0 : index
    %26 = vector.load %arg5[%c0_13, %c0_14] : memref<2x256xf32, #tpu.memory_space<vmem>>, vector<2x256xf32>
    %27 = arith.addf %26, %22 : vector<2x256xf32>
    %c0_15 = arith.constant 0 : index
    %c0_16 = arith.constant 0 : index
    %28 = vector.load %arg5[%c0_15, %c0_16] : memref<2x256xf32, #tpu.memory_space<vmem>>, vector<2x256xf32>
    tpu.vector_store %arg5[%c0_15, %c0_16], %27 {strides = array<i32>} : memref<2x256xf32, #tpu.memory_space<vmem>>, vector<2x256xf32>,
    return
  }
  func.func @transform_0(%arg0: i32) -> (i32, i32) {
    %c0_i32 = arith.constant 0 : i32
    %c0_i32_0 = arith.constant 0 : i32
    return %arg0, %c0_i32 : i32, i32
  }
  func.func @transform_1(%arg0: i32) -> (i32, i32) {
    %c0_i32 = arith.constant 0 : i32
    %c0_i32_0 = arith.constant 0 : i32
    %c0_i32_1 = arith.constant 0 : i32
    return %c0_i32, %c0_i32_0 : i32, i32
  }
  func.func @transform_2(%arg0: i32) -> (i32, i32) {
    %c0_i32 = arith.constant 0 : i32
    %c0_i32_0 = arith.constant 0 : i32
    %c0_i32_1 = arith.constant 0 : i32
    return %c0_i32, %c0_i32_0 : i32, i32
  }
  func.func @transform_3(%arg0: i32) -> (i32, i32) {
    %c0_i32 = arith.constant 0 : i32
    %c0_i32_0 = arith.constant 0 : i32
    return %arg0, %c0_i32 : i32, i32
  }
  func.func @transform_4(%arg0: i32) -> (i32, i32) {
    %c0_i32 = arith.constant 0 : i32
    %c0_i32_0 = arith.constant 0 : i32
    %c0_i32_1 = arith.constant 0 : i32
    return %c0_i32, %c0_i32_0 : i32, i32
  }
}

module attributes {stable_mosaic.version = 11 : i64} {
  func.func @kernel(%arg0: i32, %arg1: memref<16x256xf32, #tpu.memory_space<vmem>>, %arg2: memref<2x256xf32, #tpu.memory_space<vmem>>, %arg3: memref<1x256xf32, #tpu.memory_space<vmem>>, %arg4: memref<1x256xf32, #tpu.memory_space<vmem>>, %arg5: memref<16x256xf32, #tpu.memory_space<vmem>>) attributes {dimension_semantics = [#tpu.dimension_semantics<parallel>], iteration_bounds = array<i64: 1>, scalar_prefetch = 0 : i64, scratch_operands = 0 : i64, tpu.core_type = #tpu.core_type<tc>, window_params = [{transform_indices = @transform_0, window_bounds = array<i64: 16, 256>}, {pipeline_mode = #tpu.pipeline_mode<synchronous>, transform_indices = @transform_1, window_bounds = array<i64: 2, 256>}, {pipeline_mode = #tpu.pipeline_mode<synchronous>, transform_indices = @transform_2, window_bounds = array<i64: 1, 256>}, {pipeline_mode = #tpu.pipeline_mode<synchronous>, transform_indices = @transform_3, window_bounds = array<i64: 1, 256>}, {transform_indices = @transform_4, window_bounds = array<i64: 16, 256>}]} {
    %c0 = arith.constant 0 : index
    %c0_0 = arith.constant 0 : index
    %0 = vector.load %arg2[%c0, %c0_0] : memref<2x256xf32, #tpu.memory_space<vmem>>, vector<2x256xf32>
    %1 = vector.extract_strided_slice %0 {offsets = [0, 0], sizes = [1, 256], strides = [1, 1]} : vector<2x256xf32> to vector<1x256xf32>
    %cst = arith.constant 6.250000e-02 : f32
    %2 = vector.broadcast %cst : f32 to vector<1x256xf32>
    %3 = arith.mulf %1, %2 : vector<1x256xf32>
    %4 = vector.extract_strided_slice %0 {offsets = [1, 0], sizes = [1, 256], strides = [1, 1]} : vector<2x256xf32> to vector<1x256xf32>
    %cst_1 = arith.constant 6.250000e-02 : f32
    %5 = vector.broadcast %cst_1 : f32 to vector<1x256xf32>
    %6 = arith.mulf %4, %5 : vector<1x256xf32>
    %7 = arith.mulf %3, %3 : vector<1x256xf32>
    %8 = arith.subf %6, %7 : vector<1x256xf32>
    %cst_2 = arith.constant 0.000000e+00 : f32
    %9 = vector.broadcast %cst_2 : f32 to vector<1x256xf32>
    %10 = arith.maximumf %8, %9 : vector<1x256xf32>
    %c0_3 = arith.constant 0 : index
    %c0_4 = arith.constant 0 : index
    %11 = vector.load %arg3[%c0_3, %c0_4] : memref<1x256xf32, #tpu.memory_space<vmem>>, vector<1x256xf32>
    %cst_5 = arith.constant 9.99999974E-6 : f32
    %12 = vector.broadcast %cst_5 : f32 to vector<1x256xf32>
    %13 = arith.addf %10, %12 : vector<1x256xf32>
    %14 = math.rsqrt %13 : vector<1x256xf32>
    %15 = arith.mulf %11, %14 : vector<1x256xf32>
    %c0_6 = arith.constant 0 : index
    %c0_7 = arith.constant 0 : index
    %16 = vector.load %arg1[%c0_6, %c0_7] : memref<16x256xf32, #tpu.memory_space<vmem>>, vector<16x256xf32>
    %17 = vector.broadcast %3 : vector<1x256xf32> to vector<16x256xf32>
    %18 = arith.subf %16, %17 : vector<16x256xf32>
    %19 = vector.broadcast %15 : vector<1x256xf32> to vector<16x256xf32>
    %20 = arith.mulf %18, %19 : vector<16x256xf32>
    %c0_8 = arith.constant 0 : index
    %c0_9 = arith.constant 0 : index
    %21 = vector.load %arg4[%c0_8, %c0_9] : memref<1x256xf32, #tpu.memory_space<vmem>>, vector<1x256xf32>
    %22 = vector.broadcast %21 : vector<1x256xf32> to vector<16x256xf32>
    %23 = arith.addf %20, %22 : vector<16x256xf32>
    %cst_10 = arith.constant 0.000000e+00 : f32
    %24 = vector.broadcast %cst_10 : f32 to vector<16x256xf32>
    %25 = arith.maximumf %23, %24 : vector<16x256xf32>
    %c0_11 = arith.constant 0 : index
    %c0_12 = arith.constant 0 : index
    %26 = vector.load %arg5[%c0_11, %c0_12] : memref<16x256xf32, #tpu.memory_space<vmem>>, vector<16x256xf32>
    tpu.vector_store %arg5[%c0_11, %c0_12], %25 {strides = array<i32>} : memref<16x256xf32, #tpu.memory_space<vmem>>, vector<16x256xf32>,
    return
  }
  func.func @transform_0(%arg0: i32) -> (i32, i32) {
    %c0_i32 = arith.constant 0 : i32
    %c0_i32_0 = arith.constant 0 : i32
    return %arg0, %c0_i32 : i32, i32
  }
  func.func @transform_1(%arg0: i32) -> (i32, i32) {
    %c0_i32 = arith.constant 0 : i32
    %c0_i32_0 = arith.constant 0 : i32
    %c0_i32_1 = arith.constant 0 : i32
    return %c0_i32, %c0_i32_0 : i32, i32
  }
  func.func @transform_2(%arg0: i32) -> (i32, i32) {
    %c0_i32 = arith.constant 0 : i32
    %c0_i32_0 = arith.constant 0 : i32
    %c0_i32_1 = arith.constant 0 : i32
    return %c0_i32, %c0_i32_0 : i32, i32
  }
  func.func @transform_3(%arg0: i32) -> (i32, i32) {
    %c0_i32 = arith.constant 0 : i32
    %c0_i32_0 = arith.constant 0 : i32
    %c0_i32_1 = arith.constant 0 : i32
    return %c0_i32, %c0_i32_0 : i32, i32
  }
  func.func @transform_4(%arg0: i32) -> (i32, i32) {
    %c0_i32 = arith.constant 0 : i32
    %c0_i32_0 = arith.constant 0 : i32
    return %arg0, %c0_i32 : i32, i32
  }
}

module attributes {stable_mosaic.version = 11 : i64} {
  func.func @matmul_bias_kernel(%arg0: i32, %arg1: memref<16x256xbf16, #tpu.memory_space<vmem>>, %arg2: memref<256x512xbf16, #tpu.memory_space<vmem>>, %arg3: memref<1x512xf32, #tpu.memory_space<vmem>>, %arg4: memref<16x512xf32, #tpu.memory_space<vmem>>) attributes {dimension_semantics = [#tpu.dimension_semantics<parallel>], iteration_bounds = array<i64: 1>, scalar_prefetch = 0 : i64, scratch_operands = 0 : i64, tpu.core_type = #tpu.core_type<tc>, window_params = [{transform_indices = @transform_0, window_bounds = array<i64: 16, 256>}, {pipeline_mode = #tpu.pipeline_mode<synchronous>, transform_indices = @transform_1, window_bounds = array<i64: 256, 512>}, {pipeline_mode = #tpu.pipeline_mode<synchronous>, transform_indices = @transform_2, window_bounds = array<i64: 1, 512>}, {transform_indices = @transform_3, window_bounds = array<i64: 16, 512>}]} {
    %c0 = arith.constant 0 : index
    %c0_0 = arith.constant 0 : index
    %0 = vector.load %arg1[%c0, %c0_0] : memref<16x256xbf16, #tpu.memory_space<vmem>>, vector<16x256xbf16>
    %c0_1 = arith.constant 0 : index
    %c0_2 = arith.constant 0 : index
    %1 = vector.load %arg2[%c0_1, %c0_2] : memref<256x512xbf16, #tpu.memory_space<vmem>>, vector<256x512xbf16>
    %cst = arith.constant dense<0.000000e+00> : vector<16x512xf32>
    %2 = tpu.matmul %0, %1, %cst {dimension_numbers = #tpu.dot_dimension_numbers<[1], [0], [0], [1], [0, 0, 1, 1], [], []>} : vector<16x256xbf16>, vector<256x512xbf16>, vector<16x512xf32> -> vector<16x512xf32>
    %c0_3 = arith.constant 0 : index
    %c0_4 = arith.constant 0 : index
    %3 = vector.load %arg3[%c0_3, %c0_4] : memref<1x512xf32, #tpu.memory_space<vmem>>, vector<1x512xf32>
    %4 = vector.broadcast %3 : vector<1x512xf32> to vector<16x512xf32>
    %5 = arith.addf %2, %4 : vector<16x512xf32>
    %c0_5 = arith.constant 0 : index
    %c0_6 = arith.constant 0 : index
    %6 = vector.load %arg4[%c0_5, %c0_6] : memref<16x512xf32, #tpu.memory_space<vmem>>, vector<16x512xf32>
    tpu.vector_store %arg4[%c0_5, %c0_6], %5 {strides = array<i32>} : memref<16x512xf32, #tpu.memory_space<vmem>>, vector<16x512xf32>,
    return
  }
  func.func @transform_0(%arg0: i32) -> (i32, i32) {
    %c0_i32 = arith.constant 0 : i32
    %c0_i32_0 = arith.constant 0 : i32
    return %arg0, %c0_i32 : i32, i32
  }
  func.func @transform_1(%arg0: i32) -> (i32, i32) {
    %c0_i32 = arith.constant 0 : i32
    %c0_i32_0 = arith.constant 0 : i32
    %c0_i32_1 = arith.constant 0 : i32
    return %c0_i32, %c0_i32_0 : i32, i32
  }
  func.func @transform_2(%arg0: i32) -> (i32, i32) {
    %c0_i32 = arith.constant 0 : i32
    %c0_i32_0 = arith.constant 0 : i32
    %c0_i32_1 = arith.constant 0 : i32
    return %c0_i32, %c0_i32_0 : i32, i32
  }
  func.func @transform_3(%arg0: i32) -> (i32, i32) {
    %c0_i32 = arith.constant 0 : i32
    %c0_i32_0 = arith.constant 0 : i32
    return %arg0, %c0_i32 : i32, i32
  }
}

module attributes {stable_mosaic.version = 11 : i64} {
  func.func @kernel(%arg0: i32, %arg1: memref<64x2304xbf16, #tpu.memory_space<vmem>>, %arg2: memref<2304x128xbf16, #tpu.memory_space<vmem>>, %arg3: memref<1x128xf32, #tpu.memory_space<vmem>>, %arg4: memref<64x128xf32, #tpu.memory_space<vmem>>, %arg5: memref<2x128xf32, #tpu.memory_space<vmem>>) attributes {dimension_semantics = [#tpu.dimension_semantics<arbitrary>], iteration_bounds = array<i64: 1>, scalar_prefetch = 0 : i64, scratch_operands = 0 : i64, tpu.core_type = #tpu.core_type<tc>, window_params = [{transform_indices = @transform_0, window_bounds = array<i64: 64, 2304>}, {pipeline_mode = #tpu.pipeline_mode<synchronous>, transform_indices = @transform_1, window_bounds = array<i64: 2304, 128>}, {pipeline_mode = #tpu.pipeline_mode<synchronous>, transform_indices = @transform_2, window_bounds = array<i64: 1, 128>}, {transform_indices = @transform_3, window_bounds = array<i64: 64, 128>}, {pipeline_mode = #tpu.pipeline_mode<synchronous>, transform_indices = @transform_4, window_bounds = array<i64: 2, 128>}]} {
    %c0 = arith.constant 0 : index
    %c0_0 = arith.constant 0 : index
    %0 = vector.load %arg1[%c0, %c0_0] : memref<64x2304xbf16, #tpu.memory_space<vmem>>, vector<64x2304xbf16>
    %c0_1 = arith.constant 0 : index
    %c0_2 = arith.constant 0 : index
    %1 = vector.load %arg2[%c0_1, %c0_2] : memref<2304x128xbf16, #tpu.memory_space<vmem>>, vector<2304x128xbf16>
    %cst = arith.constant dense<0.000000e+00> : vector<64x128xf32>
    %2 = tpu.matmul %0, %1, %cst {dimension_numbers = #tpu.dot_dimension_numbers<[1], [0], [0], [1], [0, 0, 1, 1], [], []>} : vector<64x2304xbf16>, vector<2304x128xbf16>, vector<64x128xf32> -> vector<64x128xf32>
    %c0_3 = arith.constant 0 : index
    %c0_4 = arith.constant 0 : index
    %3 = vector.load %arg3[%c0_3, %c0_4] : memref<1x128xf32, #tpu.memory_space<vmem>>, vector<1x128xf32>
    %4 = vector.broadcast %3 : vector<1x128xf32> to vector<64x128xf32>
    %5 = arith.addf %2, %4 : vector<64x128xf32>
    %c0_5 = arith.constant 0 : index
    %c0_6 = arith.constant 0 : index
    %6 = vector.load %arg4[%c0_5, %c0_6] : memref<64x128xf32, #tpu.memory_space<vmem>>, vector<64x128xf32>
    tpu.vector_store %arg4[%c0_5, %c0_6], %5 {strides = array<i32>} : memref<64x128xf32, #tpu.memory_space<vmem>>, vector<64x128xf32>,
    %7 = tpu.iota {dimensions = array<i32: 0>} : vector<64x128xi32>
    %c64_i32 = arith.constant 64 : i32
    %8 = arith.muli %arg0, %c64_i32 : i32
    %9 = vector.broadcast %8 : i32 to vector<64x128xi32>
    %10 = arith.addi %7, %9 : vector<64x128xi32>
    %c64_i32_7 = arith.constant 64 : i32
    %11 = vector.broadcast %c64_i32_7 : i32 to vector<64x128xi32>
    %12 = arith.cmpi slt, %10, %11 : vector<64x128xi32>
    %cst_8 = arith.constant 1.000000e+00 : f32
    %cst_9 = arith.constant 0.000000e+00 : f32
    %13 = vector.broadcast %cst_8 : f32 to vector<64x128xf32>
    %14 = vector.broadcast %cst_9 : f32 to vector<64x128xf32>
    %15 = arith.select %12, %13, %14 : vector<64x128xi1>, vector<64x128xf32>
    %16 = arith.mulf %5, %15 : vector<64x128xf32>
    %cst_10 = arith.constant dense<0.000000e+00> : vector<128xf32>
    %17 = vector.multi_reduction <add>, %16, %cst_10 [0] : vector<64x128xf32> to vector<128xf32>
    %18 = vector.shape_cast %17 : vector<128xf32> to vector<1x128xf32>
    %19 = arith.mulf %16, %5 : vector<64x128xf32>
    %cst_11 = arith.constant dense<0.000000e+00> : vector<128xf32>
    %20 = vector.multi_reduction <add>, %19, %cst_11 [0] : vector<64x128xf32> to vector<128xf32>
    %21 = vector.shape_cast %20 : vector<128xf32> to vector<1x128xf32>
    %22 = tpu.concatenate %18, %21 in 0 : vector<1x128xf32>, vector<1x128xf32> -> vector<2x128xf32>
    %c0_i32 = arith.constant 0 : i32
    %23 = arith.cmpi eq, %arg0, %c0_i32 : i32
    %24 = arith.extui %23 : i1 to i32
    %c0_i32_12 = arith.constant 0 : i32
    %25 = arith.cmpi ne, %24, %c0_i32_12 : i32
    scf.if %25 {
      %cst_17 = arith.constant 0.000000e+00 : f32
      %29 = vector.broadcast %cst_17 : f32 to vector<2x128xf32>
      %c0_18 = arith.constant 0 : index
      %c0_19 = arith.constant 0 : index
      %30 = vector.load %arg5[%c0_18, %c0_19] : memref<2x128xf32, #tpu.memory_space<vmem>>, vector<2x128xf32>
      tpu.vector_store %arg5[%c0_18, %c0_19], %29 {strides = array<i32>} : memref<2x128xf32, #tpu.memory_space<vmem>>, vector<2x128xf32>,
    } else {
    }
    %c0_13 = arith.constant 0 : index
    %c0_14 = arith.constant 0 : index
    %26 = vector.load %arg5[%c0_13, %c0_14] : memref<2x128xf32, #tpu.memory_space<vmem>>, vector<2x128xf32>
    %27 = arith.addf %26, %22 : vector<2x128xf32>
    %c0_15 = arith.constant 0 : index
    %c0_16 = arith.constant 0 : index
    %28 = vector.load %arg5[%c0_15, %c0_16] : memref<2x128xf32, #tpu.memory_space<vmem>>, vector<2x128xf32>
    tpu.vector_store %arg5[%c0_15, %c0_16], %27 {strides = array<i32>} : memref<2x128xf32, #tpu.memory_space<vmem>>, vector<2x128xf32>,
    return
  }
  func.func @transform_0(%arg0: i32) -> (i32, i32) {
    %c0_i32 = arith.constant 0 : i32
    %c0_i32_0 = arith.constant 0 : i32
    return %arg0, %c0_i32 : i32, i32
  }
  func.func @transform_1(%arg0: i32) -> (i32, i32) {
    %c0_i32 = arith.constant 0 : i32
    %c0_i32_0 = arith.constant 0 : i32
    %c0_i32_1 = arith.constant 0 : i32
    return %c0_i32, %c0_i32_0 : i32, i32
  }
  func.func @transform_2(%arg0: i32) -> (i32, i32) {
    %c0_i32 = arith.constant 0 : i32
    %c0_i32_0 = arith.constant 0 : i32
    %c0_i32_1 = arith.constant 0 : i32
    return %c0_i32, %c0_i32_0 : i32, i32
  }
  func.func @transform_3(%arg0: i32) -> (i32, i32) {
    %c0_i32 = arith.constant 0 : i32
    %c0_i32_0 = arith.constant 0 : i32
    return %arg0, %c0_i32 : i32, i32
  }
  func.func @transform_4(%arg0: i32) -> (i32, i32) {
    %c0_i32 = arith.constant 0 : i32
    %c0_i32_0 = arith.constant 0 : i32
    %c0_i32_1 = arith.constant 0 : i32
    return %c0_i32, %c0_i32_0 : i32, i32
  }
}

module attributes {stable_mosaic.version = 11 : i64} {
  func.func @matmul_bias_kernel(%arg0: i32, %arg1: memref<64x128xbf16, #tpu.memory_space<vmem>>, %arg2: memref<128x256xbf16, #tpu.memory_space<vmem>>, %arg3: memref<1x256xf32, #tpu.memory_space<vmem>>, %arg4: memref<64x256xf32, #tpu.memory_space<vmem>>) attributes {dimension_semantics = [#tpu.dimension_semantics<parallel>], iteration_bounds = array<i64: 1>, scalar_prefetch = 0 : i64, scratch_operands = 0 : i64, tpu.core_type = #tpu.core_type<tc>, window_params = [{transform_indices = @transform_0, window_bounds = array<i64: 64, 128>}, {pipeline_mode = #tpu.pipeline_mode<synchronous>, transform_indices = @transform_1, window_bounds = array<i64: 128, 256>}, {pipeline_mode = #tpu.pipeline_mode<synchronous>, transform_indices = @transform_2, window_bounds = array<i64: 1, 256>}, {transform_indices = @transform_3, window_bounds = array<i64: 64, 256>}]} {
    %c0 = arith.constant 0 : index
    %c0_0 = arith.constant 0 : index
    %0 = vector.load %arg1[%c0, %c0_0] : memref<64x128xbf16, #tpu.memory_space<vmem>>, vector<64x128xbf16>
    %c0_1 = arith.constant 0 : index
    %c0_2 = arith.constant 0 : index
    %1 = vector.load %arg2[%c0_1, %c0_2] : memref<128x256xbf16, #tpu.memory_space<vmem>>, vector<128x256xbf16>
    %cst = arith.constant dense<0.000000e+00> : vector<64x256xf32>
    %2 = tpu.matmul %0, %1, %cst {dimension_numbers = #tpu.dot_dimension_numbers<[1], [0], [0], [1], [0, 0, 1, 1], [], []>} : vector<64x128xbf16>, vector<128x256xbf16>, vector<64x256xf32> -> vector<64x256xf32>
    %c0_3 = arith.constant 0 : index
    %c0_4 = arith.constant 0 : index
    %3 = vector.load %arg3[%c0_3, %c0_4] : memref<1x256xf32, #tpu.memory_space<vmem>>, vector<1x256xf32>
    %4 = vector.broadcast %3 : vector<1x256xf32> to vector<64x256xf32>
    %5 = arith.addf %2, %4 : vector<64x256xf32>
    %c0_5 = arith.constant 0 : index
    %c0_6 = arith.constant 0 : index
    %6 = vector.load %arg4[%c0_5, %c0_6] : memref<64x256xf32, #tpu.memory_space<vmem>>, vector<64x256xf32>
    tpu.vector_store %arg4[%c0_5, %c0_6], %5 {strides = array<i32>} : memref<64x256xf32, #tpu.memory_space<vmem>>, vector<64x256xf32>,
    return
  }
  func.func @transform_0(%arg0: i32) -> (i32, i32) {
    %c0_i32 = arith.constant 0 : i32
    %c0_i32_0 = arith.constant 0 : i32
    return %arg0, %c0_i32 : i32, i32
  }
  func.func @transform_1(%arg0: i32) -> (i32, i32) {
    %c0_i32 = arith.constant 0 : i32
    %c0_i32_0 = arith.constant 0 : i32
    %c0_i32_1 = arith.constant 0 : i32
    return %c0_i32, %c0_i32_0 : i32, i32
  }
  func.func @transform_2(%arg0: i32) -> (i32, i32) {
    %c0_i32 = arith.constant 0 : i32
    %c0_i32_0 = arith.constant 0 : i32
    %c0_i32_1 = arith.constant 0 : i32
    return %c0_i32, %c0_i32_0 : i32, i32
  }
  func.func @transform_3(%arg0: i32) -> (i32, i32) {
    %c0_i32 = arith.constant 0 : i32
    %c0_i32_0 = arith.constant 0 : i32
    return %arg0, %c0_i32 : i32, i32
  }
}

module attributes {stable_mosaic.version = 11 : i64} {
  func.func @kernel(%arg0: i32, %arg1: memref<256x1152xbf16, #tpu.memory_space<vmem>>, %arg2: memref<1152x128xbf16, #tpu.memory_space<vmem>>, %arg3: memref<1x128xf32, #tpu.memory_space<vmem>>, %arg4: memref<256x128xf32, #tpu.memory_space<vmem>>, %arg5: memref<2x128xf32, #tpu.memory_space<vmem>>) attributes {dimension_semantics = [#tpu.dimension_semantics<arbitrary>], iteration_bounds = array<i64: 2>, scalar_prefetch = 0 : i64, scratch_operands = 0 : i64, tpu.core_type = #tpu.core_type<tc>, window_params = [{transform_indices = @transform_0, window_bounds = array<i64: 256, 1152>}, {pipeline_mode = #tpu.pipeline_mode<synchronous>, transform_indices = @transform_1, window_bounds = array<i64: 1152, 128>}, {pipeline_mode = #tpu.pipeline_mode<synchronous>, transform_indices = @transform_2, window_bounds = array<i64: 1, 128>}, {transform_indices = @transform_3, window_bounds = array<i64: 256, 128>}, {pipeline_mode = #tpu.pipeline_mode<synchronous>, transform_indices = @transform_4, window_bounds = array<i64: 2, 128>}]} {
    %c0 = arith.constant 0 : index
    %c0_0 = arith.constant 0 : index
    %0 = vector.load %arg1[%c0, %c0_0] : memref<256x1152xbf16, #tpu.memory_space<vmem>>, vector<256x1152xbf16>
    %c0_1 = arith.constant 0 : index
    %c0_2 = arith.constant 0 : index
    %1 = vector.load %arg2[%c0_1, %c0_2] : memref<1152x128xbf16, #tpu.memory_space<vmem>>, vector<1152x128xbf16>
    %cst = arith.constant dense<0.000000e+00> : vector<256x128xf32>
    %2 = tpu.matmul %0, %1, %cst {dimension_numbers = #tpu.dot_dimension_numbers<[1], [0], [0], [1], [0, 0, 1, 1], [], []>} : vector<256x1152xbf16>, vector<1152x128xbf16>, vector<256x128xf32> -> vector<256x128xf32>
    %c0_3 = arith.constant 0 : index
    %c0_4 = arith.constant 0 : index
    %3 = vector.load %arg3[%c0_3, %c0_4] : memref<1x128xf32, #tpu.memory_space<vmem>>, vector<1x128xf32>
    %4 = vector.broadcast %3 : vector<1x128xf32> to vector<256x128xf32>
    %5 = arith.addf %2, %4 : vector<256x128xf32>
    %c0_5 = arith.constant 0 : index
    %c0_6 = arith.constant 0 : index
    %6 = vector.load %arg4[%c0_5, %c0_6] : memref<256x128xf32, #tpu.memory_space<vmem>>, vector<256x128xf32>
    tpu.vector_store %arg4[%c0_5, %c0_6], %5 {strides = array<i32>} : memref<256x128xf32, #tpu.memory_space<vmem>>, vector<256x128xf32>,
    %7 = tpu.iota {dimensions = array<i32: 0>} : vector<256x128xi32>
    %c256_i32 = arith.constant 256 : i32
    %8 = arith.muli %arg0, %c256_i32 : i32
    %9 = vector.broadcast %8 : i32 to vector<256x128xi32>
    %10 = arith.addi %7, %9 : vector<256x128xi32>
    %c384_i32 = arith.constant 384 : i32
    %11 = vector.broadcast %c384_i32 : i32 to vector<256x128xi32>
    %12 = arith.cmpi slt, %10, %11 : vector<256x128xi32>
    %cst_7 = arith.constant 1.000000e+00 : f32
    %cst_8 = arith.constant 0.000000e+00 : f32
    %13 = vector.broadcast %cst_7 : f32 to vector<256x128xf32>
    %14 = vector.broadcast %cst_8 : f32 to vector<256x128xf32>
    %15 = arith.select %12, %13, %14 : vector<256x128xi1>, vector<256x128xf32>
    %16 = arith.mulf %5, %15 : vector<256x128xf32>
    %cst_9 = arith.constant dense<0.000000e+00> : vector<128xf32>
    %17 = vector.multi_reduction <add>, %16, %cst_9 [0] : vector<256x128xf32> to vector<128xf32>
    %18 = vector.shape_cast %17 : vector<128xf32> to vector<1x128xf32>
    %19 = arith.mulf %16, %5 : vector<256x128xf32>
    %cst_10 = arith.constant dense<0.000000e+00> : vector<128xf32>
    %20 = vector.multi_reduction <add>, %19, %cst_10 [0] : vector<256x128xf32> to vector<128xf32>
    %21 = vector.shape_cast %20 : vector<128xf32> to vector<1x128xf32>
    %22 = tpu.concatenate %18, %21 in 0 : vector<1x128xf32>, vector<1x128xf32> -> vector<2x128xf32>
    %c0_i32 = arith.constant 0 : i32
    %23 = arith.cmpi eq, %arg0, %c0_i32 : i32
    %24 = arith.extui %23 : i1 to i32
    %c0_i32_11 = arith.constant 0 : i32
    %25 = arith.cmpi ne, %24, %c0_i32_11 : i32
    scf.if %25 {
      %cst_16 = arith.constant 0.000000e+00 : f32
      %29 = vector.broadcast %cst_16 : f32 to vector<2x128xf32>
      %c0_17 = arith.constant 0 : index
      %c0_18 = arith.constant 0 : index
      %30 = vector.load %arg5[%c0_17, %c0_18] : memref<2x128xf32, #tpu.memory_space<vmem>>, vector<2x128xf32>
      tpu.vector_store %arg5[%c0_17, %c0_18], %29 {strides = array<i32>} : memref<2x128xf32, #tpu.memory_space<vmem>>, vector<2x128xf32>,
    } else {
    }
    %c0_12 = arith.constant 0 : index
    %c0_13 = arith.constant 0 : index
    %26 = vector.load %arg5[%c0_12, %c0_13] : memref<2x128xf32, #tpu.memory_space<vmem>>, vector<2x128xf32>
    %27 = arith.addf %26, %22 : vector<2x128xf32>
    %c0_14 = arith.constant 0 : index
    %c0_15 = arith.constant 0 : index
    %28 = vector.load %arg5[%c0_14, %c0_15] : memref<2x128xf32, #tpu.memory_space<vmem>>, vector<2x128xf32>
    tpu.vector_store %arg5[%c0_14, %c0_15], %27 {strides = array<i32>} : memref<2x128xf32, #tpu.memory_space<vmem>>, vector<2x128xf32>,
    return
  }
  func.func @transform_0(%arg0: i32) -> (i32, i32) {
    %c0_i32 = arith.constant 0 : i32
    %c0_i32_0 = arith.constant 0 : i32
    return %arg0, %c0_i32 : i32, i32
  }
  func.func @transform_1(%arg0: i32) -> (i32, i32) {
    %c0_i32 = arith.constant 0 : i32
    %c0_i32_0 = arith.constant 0 : i32
    %c0_i32_1 = arith.constant 0 : i32
    return %c0_i32, %c0_i32_0 : i32, i32
  }
  func.func @transform_2(%arg0: i32) -> (i32, i32) {
    %c0_i32 = arith.constant 0 : i32
    %c0_i32_0 = arith.constant 0 : i32
    %c0_i32_1 = arith.constant 0 : i32
    return %c0_i32, %c0_i32_0 : i32, i32
  }
  func.func @transform_3(%arg0: i32) -> (i32, i32) {
    %c0_i32 = arith.constant 0 : i32
    %c0_i32_0 = arith.constant 0 : i32
    return %arg0, %c0_i32 : i32, i32
  }
  func.func @transform_4(%arg0: i32) -> (i32, i32) {
    %c0_i32 = arith.constant 0 : i32
    %c0_i32_0 = arith.constant 0 : i32
    %c0_i32_1 = arith.constant 0 : i32
    return %c0_i32, %c0_i32_0 : i32, i32
  }
}

module attributes {stable_mosaic.version = 11 : i64} {
  func.func @matmul_bias_kernel(%arg0: i32, %arg1: memref<256x128xbf16, #tpu.memory_space<vmem>>, %arg2: memref<128x128xbf16, #tpu.memory_space<vmem>>, %arg3: memref<1x128xf32, #tpu.memory_space<vmem>>, %arg4: memref<256x128xf32, #tpu.memory_space<vmem>>) attributes {dimension_semantics = [#tpu.dimension_semantics<parallel>], iteration_bounds = array<i64: 2>, scalar_prefetch = 0 : i64, scratch_operands = 0 : i64, tpu.core_type = #tpu.core_type<tc>, window_params = [{transform_indices = @transform_0, window_bounds = array<i64: 256, 128>}, {pipeline_mode = #tpu.pipeline_mode<synchronous>, transform_indices = @transform_1, window_bounds = array<i64: 128, 128>}, {pipeline_mode = #tpu.pipeline_mode<synchronous>, transform_indices = @transform_2, window_bounds = array<i64: 1, 128>}, {transform_indices = @transform_3, window_bounds = array<i64: 256, 128>}]} {
    %c0 = arith.constant 0 : index
    %c0_0 = arith.constant 0 : index
    %0 = vector.load %arg1[%c0, %c0_0] : memref<256x128xbf16, #tpu.memory_space<vmem>>, vector<256x128xbf16>
    %c0_1 = arith.constant 0 : index
    %c0_2 = arith.constant 0 : index
    %1 = vector.load %arg2[%c0_1, %c0_2] : memref<128x128xbf16, #tpu.memory_space<vmem>>, vector<128x128xbf16>
    %cst = arith.constant dense<0.000000e+00> : vector<256x128xf32>
    %2 = tpu.matmul %0, %1, %cst {dimension_numbers = #tpu.dot_dimension_numbers<[1], [0], [0], [1], [0, 0, 1, 1], [], []>} : vector<256x128xbf16>, vector<128x128xbf16>, vector<256x128xf32> -> vector<256x128xf32>
    %c0_3 = arith.constant 0 : index
    %c0_4 = arith.constant 0 : index
    %3 = vector.load %arg3[%c0_3, %c0_4] : memref<1x128xf32, #tpu.memory_space<vmem>>, vector<1x128xf32>
    %4 = vector.broadcast %3 : vector<1x128xf32> to vector<256x128xf32>
    %5 = arith.addf %2, %4 : vector<256x128xf32>
    %c0_5 = arith.constant 0 : index
    %c0_6 = arith.constant 0 : index
    %6 = vector.load %arg4[%c0_5, %c0_6] : memref<256x128xf32, #tpu.memory_space<vmem>>, vector<256x128xf32>
    tpu.vector_store %arg4[%c0_5, %c0_6], %5 {strides = array<i32>} : memref<256x128xf32, #tpu.memory_space<vmem>>, vector<256x128xf32>,
    return
  }
  func.func @transform_0(%arg0: i32) -> (i32, i32) {
    %c0_i32 = arith.constant 0 : i32
    %c0_i32_0 = arith.constant 0 : i32
    return %arg0, %c0_i32 : i32, i32
  }
  func.func @transform_1(%arg0: i32) -> (i32, i32) {
    %c0_i32 = arith.constant 0 : i32
    %c0_i32_0 = arith.constant 0 : i32
    %c0_i32_1 = arith.constant 0 : i32
    return %c0_i32, %c0_i32_0 : i32, i32
  }
  func.func @transform_2(%arg0: i32) -> (i32, i32) {
    %c0_i32 = arith.constant 0 : i32
    %c0_i32_0 = arith.constant 0 : i32
    %c0_i32_1 = arith.constant 0 : i32
    return %c0_i32, %c0_i32_0 : i32, i32
  }
  func.func @transform_3(%arg0: i32) -> (i32, i32) {
    %c0_i32 = arith.constant 0 : i32
    %c0_i32_0 = arith.constant 0 : i32
    return %arg0, %c0_i32 : i32, i32
  }
}

</mosaic_0001>

<bundles_post_ra>
// kernel: tile.10
= control target key start
LH: loop header
LB: loop body
LE: loop exit
PB: predicated region body
PF: predicated region fallthrough
CT: control target
= control target key end

     0   :  { %2 = vsyncpa [#allocation1], 0  ;;  %s42_s6 = smov [#allocation0]   ;;  %s59_s0 = inlined_call_operand.hbm [shape: f32[128], index: 0, kind: input, shape index: {}]   ;;  %s60_s1 = inlined_call_operand.vmem [shape: f32[4,128], index: 1, kind: output, shape index: {}]  }
   0x1   :  { %s9_s7 = sshll.u32 %s42_s6, 4  ;;  %s10_s7 = int_to_ptr.vmem [resolvable:$true] %s9_s7 }
   0x2   :  { %s28_s8 = scalar_lea.vmem %s10_s7, 16  ;;  %s32_s9 = scalar_lea.vmem %s10_s7, 32 }
   0x3   :  { %p29_p0 = scmp.ne.s32.totalorder %s10_s7, %s28_s8  ;;  %p33_p1 = scmp.lt.s32.totalorder %s10_s7, %s10_s7 }
   0x4   :  { %p34_p2 = scmp.lt.s32.totalorder %s32_s9, %s28_s8 }
   0x6   :  { %p35_p3 = por %p34_p2, %p33_p1 }
   0x8   :  { %p36_p4 = pnand %p35_p3, %p29_p0 }
   0xa   :  { %39 = shalt.err (!%p36_p4)
}
   0xb   :  { %12 = dma.hbm_to_vmem [thread:$0]  %s59_s0, 16, %s10_s7, [#allocation1]  }
   0xc   :  { %40 = dma.done.wait [#allocation1], 16  }
   0xd   :  { %41 = vsyncadd [#allocation1], 4294967280  ;;  %v16_v0 = vld [vmem:[#allocation0] ss:$0 sm:$0xff] }
   0xe   :  { %17 = vst [vmem:[%s60_s1] sm:$0xf] %v16_v0 }
   0xf   :  { %18 = vsyncpa [#allocation1], 1 }

// kernel: tile.14
= control target key start
LH: loop header
LB: loop body
LE: loop exit
PB: predicated region body
PF: predicated region fallthrough
CT: control target
= control target key end

     0   :  { %2 = vsyncpa [#allocation1], 0  ;;  %s42_s6 = smov [#allocation0]   ;;  %s59_s0 = inlined_call_operand.hbm [shape: f32[64], index: 0, kind: input, shape index: {}]   ;;  %s60_s1 = inlined_call_operand.vmem [shape: f32[4,64], index: 1, kind: output, shape index: {}]  }
   0x1   :  { %s9_s7 = sshll.u32 %s42_s6, 4  ;;  %s10_s7 = int_to_ptr.vmem [resolvable:$true] %s9_s7 }
   0x2   :  { %s28_s8 = scalar_lea.vmem %s10_s7, 16  ;;  %s32_s9 = scalar_lea.vmem %s10_s7, 32 }
   0x3   :  { %p29_p0 = scmp.ne.s32.totalorder %s10_s7, %s28_s8  ;;  %p33_p1 = scmp.lt.s32.totalorder %s10_s7, %s10_s7 }
   0x4   :  { %p34_p2 = scmp.lt.s32.totalorder %s32_s9, %s28_s8 }
   0x6   :  { %p35_p3 = por %p34_p2, %p33_p1 }
   0x8   :  { %p36_p4 = pnand %p35_p3, %p29_p0 }
   0xa   :  { %39 = shalt.err (!%p36_p4)
}
   0xb   :  { %12 = dma.hbm_to_vmem [thread:$0]  %s59_s0, 16, %s10_s7, [#allocation1]  }
   0xc   :  { %40 = dma.done.wait [#allocation1], 16  }
   0xd   :  { %41 = vsyncadd [#allocation1], 4294967280  ;;  %v16_v0 = vld [vmem:[#allocation0] ss:$0 sm:$0xff] }
   0xe   :  { %17 = vst [vmem:[%s60_s1] sm:$0xf] %v16_v0 }
   0xf   :  { %18 = vsyncpa [#allocation1], 1 }

// kernel: _lambda_.14
= control target key start
LH: loop header
LB: loop body
LE: loop exit
PB: predicated region body
PF: predicated region fallthrough
CT: control target
= control target key end

     0   :  { %s552_s15 = smov 0   ;;  %s931_s0 = inlined_call_operand.vmem [shape: f32[512,128], index: 0, kind: input, shape index: {}]   ;;  %s932_s1 = inlined_call_operand.vmem [shape: f32[2,128], index: 1, kind: input, shape index: {}]   ;;  %s933_s2 = inlined_call_operand.vmem [shape: f32[1,128], index: 2, kind: input, shape index: {}]   ;;  %s934_s3 = inlined_call_operand.vmem [shape: f32[1,128], index: 3, kind: input, shape index: {}]   ;;  %s935_s4 = inlined_call_operand.vmem [shape: f32[512,128], index: 4, kind: output, shape index: {}]  }
   0x1 LB: > { %s495_s16 = sadd.s32 4294967295, %s524_s15   ;;  %p499_p0 = scmp.ge.s32.totalorder %s524_s15, 1  ;;  %s524_s15 = sphi %s552_s15, %s14_s15  }
   0x2   : > { %p163_p1 = scmp.lt.s32.totalorder %s524_s15, 3 }
   0x4   : > { %p164_p2 = pnand %p499_p0, %p163_p1 }
   0x5   : > { %s500_s19 = sshll.u32 (!%p164_p2), %s495_s16, 5 }
   0x6   : > { %167 = sbr.rel (%p164_p2) target bundleno = 80 (0x50), region = 36  ;;  %p190_p3 = scmp.lt.s32.totalorder (!%p164_p2), %s500_s19, 63 }
   0xb   : > { %v201_v0 = vld [vmem:[%s932_s1] sm:$0x3]  ;;  %s944_s19 = smov (!%p190_p3, %s500_s19), 63  ;;  %v216_v7 = vlaneseq  ;;  %v526_v8 = vmov 1966171168  }
   0xc   : > { %v202_v1 = vmul.f32 0.0026041667, %v201_v0  ;;  %v214_v9 = vunpack.c.l.s4 %v526_v8  ;;  %s501_s20 = sshll.u32 %s944_s19, 3  ;;  %v209_v31 = vld [vmem:[%s933_s2] sm:$0x1] }
   0xd   : > { %v566_v10 = vshrl.u32 %v216_v7, 7  ;;  %s573_s23 = scalar_lea.vmem %s931_s0, %s501_s20  ;;  %s770_s30 = scalar_lea.vmem %s935_s4, %s501_s20 }
   0xe   : > { %v203_v2 = vmul.f32 %v202_v1, %v202_v1  ;;  %v215_v11 = vunpack.c.0.s8 %v214_v9  ;;  %v578_v14 = vld [vmem:[%s573_s23] sm:$0xff]  ;;  %v581_v15 = vld [vmem:[%s573_s23 + $0x8] sm:$0xff]  ;;  %v588_v17 = vld [vmem:[%s573_s23 + $0x10] sm:$0xff] }
   0xf   : > { %v264_v12 = vsub.s32 0, %v566_v10  ;;  %v591_v18 = vld [vmem:[%s573_s23 + $0x18] sm:$0xff]  ;;  %v594_v19 = vld [vmem:[%s573_s23 + $0x20] sm:$0xff]  ;;  %v597_v20 = vld [vmem:[%s573_s23 + $0x28] sm:$0xff] }
  0x10   : > { %v205_v3 = vrot.slane %v203_v2, 7  ;;  %v218_v13 = vsub.s32 %v215_v11, %v566_v10  ;;  %v600_v21 = vld [vmem:[%s573_s23 + $0x30] sm:$0xff]  ;;  %v603_v22 = vld [vmem:[%s573_s23 + $0x38] sm:$0xff]  ;;  %v606_v24 = vld [vmem:[%s573_s23 + $0x40] sm:$0xff] }
  0x11   : > { %v585_v16 = vrot.slane %v202_v1, %v264_v12  ;;  %v609_v25 = vld [vmem:[%s573_s23 + $0x48] sm:$0xff]  ;;  %v612_v26 = vld [vmem:[%s573_s23 + $0x50] sm:$0xff]  ;;  %v615_v28 = vld [vmem:[%s573_s23 + $0x58] sm:$0xff] }
  0x12   : > { %v207_v4 = vsub.f32 %v202_v1, %v205_v3  ;;  %v618_v29 = vld [vmem:[%s573_s23 + $0x60] sm:$0xff]  ;;  %v621_v30 = vld [vmem:[%s573_s23 + $0x68] sm:$0xff]  ;;  %v635_v36 = vld [vmem:[%s573_s23 + $0x70] sm:$0xff] }
  0x13   : > { %v266_v32 = vsub.f32 %v578_v14, %v585_v16  ;;  %v267_v33 = vsub.f32 %v581_v15, %v585_v16  ;;  %v268_v34 = vsub.f32 %v588_v17, %v585_v16  ;;  %v269_v35 = vsub.f32 %v591_v18, %v585_v16  ;;  %v638_v37 = vld [vmem:[%s573_s23 + $0x78] sm:$0xff]  ;;  %v641_v38 = vld [vmem:[%s573_s23 + $0x80] sm:$0xff]  ;;  %v650_v43 = vld [vmem:[%s573_s23 + $0x88] sm:$0xff] }
  0x14   : > { %v208_v5 = vmax.f32 %v207_v4, 0.0  ;;  %v270_v40 = vsub.f32 %v594_v19, %v585_v16  ;;  %v271_v41 = vsub.f32 %v597_v20, %v585_v16  ;;  %v272_v42 = vsub.f32 %v600_v21, %v585_v16  ;;  %v653_v44 = vld [vmem:[%s573_s23 + $0x90] sm:$0xff]  ;;  %v656_v45 = vld [vmem:[%s573_s23 + $0x98] sm:$0xff]  ;;  %v667_v50 = vld [vmem:[%s573_s23 + $0xa0] sm:$0xff] }
  0x15   : > { %v273_v46 = vsub.f32 %v603_v22, %v585_v16  ;;  %v274_v47 = vsub.f32 %v606_v24, %v585_v16  ;;  %v275_v48 = vsub.f32 %v609_v25, %v585_v16  ;;  %v276_v49 = vsub.f32 %v612_v26, %v585_v16  ;;  %v670_v51 = vld [vmem:[%s573_s23 + $0xa8] sm:$0xff]  ;;  %v673_v52 = vld [vmem:[%s573_s23 + $0xb0] sm:$0xff]  ;;  %v682_v57 = vld [vmem:[%s573_s23 + $0xb8] sm:$0xff] }
  0x16   : > { %v210_v6 = vadd.f32 1e-05, %v208_v5  ;;  %v277_v54 = vsub.f32 %v615_v28, %v585_v16  ;;  %v278_v55 = vsub.f32 %v618_v29, %v585_v16  ;;  %v279_v56 = vsub.f32 %v621_v30, %v585_v16  ;;  %v685_v58 = vld [vmem:[%s573_s23 + $0xc0] sm:$0xff]  ;;  %v688_v59 = vld [vmem:[%s573_s23 + $0xc8] sm:$0xff]  ;;  %v699_v0 = vld [vmem:[%s573_s23 + $0xd0] sm:$0xff] }
  0x17   : > { %v280_v60 = vsub.f32 %v635_v36, %v585_v16  ;;  %v281_v61 = vsub.f32 %v638_v37, %v585_v16  ;;  %v282_v62 = vsub.f32 %v641_v38, %v585_v16  ;;  %v283_v63 = vsub.f32 %v650_v43, %v585_v16  ;;  %v702_v1 = vld [vmem:[%s573_s23 + $0xd8] sm:$0xff]  ;;  %v705_v2 = vld [vmem:[%s573_s23 + $0xe0] sm:$0xff]  ;;  %v714_v7 = vld [vmem:[%s573_s23 + $0xe8] sm:$0xff] }
  0x18   : > { %516 = vrsqrt.f32 %v210_v6  ;;  %v284_v4 = vsub.f32 %v653_v44, %v585_v16  ;;  %v285_v5 = vsub.f32 %v656_v45, %v585_v16  ;;  %v286_v6 = vsub.f32 %v667_v50, %v585_v16  ;;  %v717_v8 = vld [vmem:[%s573_s23 + $0xf0] sm:$0xff]  ;;  %v720_v9 = vld [vmem:[%s573_s23 + $0xf8] sm:$0xff]  ;;  %v743_v21 = vld [vmem:[%s934_s3] ss:$0 sm:$0xff] }
  0x19   : > { %v287_v11 = vsub.f32 %v670_v51, %v585_v16  ;;  %v289_v14 = vsub.f32 %v682_v57, %v585_v16  ;;  %v290_v15 = vsub.f32 %v685_v58, %v585_v16  ;;  %v939_v58 = vsub.f32 %v705_v2, %v585_v16 }
  0x25   : > { %v517_v23 = vpop.eup %516 }
  0x26   : > { %v219_v27 = vrot.slane %v517_v23, %v218_v13 }
  0x28   : > { %v220_v39 = vcombine.high %v219_v27, %v219_v27 }
  0x2a   : > { %v227_v53 = vrot.slane %v220_v39, %v218_v13  ;;  %v288_v13 = vsub.f32 %v673_v52, %v585_v16 }
  0x2c   : > { %v229_v3 = vmul.f32 %v227_v53, %v209_v31 }
  0x2e   : > { %v732_v17 = vrot.slane %v229_v3, %v264_v12 }
  0x30   : > { %v304_v27 = vmul.f32 %v732_v17, %v266_v32  ;;  %v305_v31 = vmul.f32 %v732_v17, %v267_v33  ;;  %v306_v39 = vmul.f32 %v732_v17, %v268_v34  ;;  %v307_v53 = vmul.f32 %v732_v17, %v269_v35 }
  0x31   : > { %v308_v3 = vmul.f32 %v732_v17, %v270_v40  ;;  %v309_v22 = vmul.f32 %v732_v17, %v271_v41  ;;  %v310_v10 = vmul.f32 %v732_v17, %v272_v42  ;;  %v311_v20 = vmul.f32 %v732_v17, %v273_v46 }
  0x32   : > { %v343_v12 = vadd.f32 %v743_v21, %v304_v27  ;;  %v344_v23 = vadd.f32 %v743_v21, %v305_v31  ;;  %v345_v32 = vadd.f32 %v743_v21, %v306_v39  ;;  %v346_v33 = vadd.f32 %v743_v21, %v307_v53 }
  0x33   : > { %v347_v34 = vadd.f32 %v743_v21, %v308_v3  ;;  %v348_v35 = vadd.f32 %v743_v21, %v309_v22  ;;  %v349_v40 = vadd.f32 %v743_v21, %v310_v10  ;;  %v350_v41 = vadd.f32 %v743_v21, %v311_v20 }
  0x34   : > { %v375_v42 = vmax.f32 %v343_v12, 0.0  ;;  %v376_v46 = vmax.f32 %v344_v23, 0.0  ;;  %v377_v27 = vmax.f32 %v345_v32, 0.0  ;;  %v378_v31 = vmax.f32 %v346_v33, 0.0 }
  0x35   : > { %v379_v39 = vmax.f32 %v347_v34, 0.0  ;;  %v380_v53 = vmax.f32 %v348_v35, 0.0  ;;  %v381_v19 = vmax.f32 %v349_v40, 0.0  ;;  %v382_v18 = vmax.f32 %v350_v41, 0.0 }
  0x36   : > { %407 = vst [vmem:[%s770_s30] sm:$0xff] %v375_v42  ;;  %408 = vst [vmem:[%s770_s30 + $0x8] sm:$0xff] %v376_v46  ;;  %v312_v20 = vmul.f32 %v732_v17, %v274_v47  ;;  %v313_v22 = vmul.f32 %v732_v17, %v275_v48  ;;  %v314_v10 = vmul.f32 %v732_v17, %v276_v49 }
  0x37   : > { %409 = vst [vmem:[%s770_s30 + $0x10] sm:$0xff] %v377_v27  ;;  %410 = vst [vmem:[%s770_s30 + $0x18] sm:$0xff] %v378_v31  ;;  %v315_v12 = vmul.f32 %v732_v17, %v277_v54  ;;  %v316_v24 = vmul.f32 %v732_v17, %v278_v55  ;;  %v317_v25 = vmul.f32 %v732_v17, %v279_v56 }
  0x38   : > { %411 = vst [vmem:[%s770_s30 + $0x20] sm:$0xff] %v379_v39  ;;  %412 = vst [vmem:[%s770_s30 + $0x28] sm:$0xff] %v380_v53  ;;  %v318_v26 = vmul.f32 %v732_v17, %v280_v60  ;;  %v319_v28 = vmul.f32 %v732_v17, %v281_v61  ;;  %v351_v47 = vadd.f32 %v743_v21, %v312_v20 }
  0x39   : > { %413 = vst [vmem:[%s770_s30 + $0x30] sm:$0xff] %v381_v19  ;;  %414 = vst [vmem:[%s770_s30 + $0x38] sm:$0xff] %v382_v18  ;;  %v352_v29 = vadd.f32 %v743_v21, %v313_v22  ;;  %v353_v30 = vadd.f32 %v743_v21, %v314_v10  ;;  %v354_v48 = vadd.f32 %v743_v21, %v315_v12 }
  0x3a   : > { %v355_v36 = vadd.f32 %v743_v21, %v316_v24  ;;  %v356_v49 = vadd.f32 %v743_v21, %v317_v25  ;;  %v357_v37 = vadd.f32 %v743_v21, %v318_v26  ;;  %v358_v54 = vadd.f32 %v743_v21, %v319_v28 }
  0x3b   : > { %v383_v55 = vmax.f32 %v351_v47, 0.0  ;;  %v384_v56 = vmax.f32 %v352_v29, 0.0  ;;  %v385_v60 = vmax.f32 %v353_v30, 0.0  ;;  %v386_v61 = vmax.f32 %v354_v48, 0.0 }
  0x3c   : > { %v387_v18 = vmax.f32 %v355_v36, 0.0  ;;  %v388_v19 = vmax.f32 %v356_v49, 0.0  ;;  %v389_v23 = vmax.f32 %v357_v37, 0.0  ;;  %v390_v3 = vmax.f32 %v358_v54, 0.0 }
  0x3d   : > { %415 = vst [vmem:[%s770_s30 + $0x40] sm:$0xff] %v383_v55  ;;  %416 = vst [vmem:[%s770_s30 + $0x48] sm:$0xff] %v384_v56  ;;  %v320_v32 = vmul.f32 %v732_v17, %v282_v62  ;;  %v321_v33 = vmul.f32 %v732_v17, %v283_v63  ;;  %v322_v34 = vmul.f32 %v732_v17, %v284_v4 }
  0x3e   : > { %417 = vst [vmem:[%s770_s30 + $0x50] sm:$0xff] %v385_v60  ;;  %418 = vst [vmem:[%s770_s30 + $0x58] sm:$0xff] %v386_v61  ;;  %v323_v35 = vmul.f32 %v732_v17, %v285_v5  ;;  %v324_v38 = vmul.f32 %v732_v17, %v286_v6  ;;  %v325_v43 = vmul.f32 %v732_v17, %v287_v11 }
  0x3f   : > { %419 = vst [vmem:[%s770_s30 + $0x60] sm:$0xff] %v387_v18  ;;  %420 = vst [vmem:[%s770_s30 + $0x68] sm:$0xff] %v388_v19  ;;  %v326_v44 = vmul.f32 %v732_v17, %v288_v13  ;;  %v327_v45 = vmul.f32 %v732_v17, %v289_v14  ;;  %v359_v62 = vadd.f32 %v743_v21, %v320_v32 }
  0x40   : > { %421 = vst [vmem:[%s770_s30 + $0x70] sm:$0xff] %v389_v23  ;;  %422 = vst [vmem:[%s770_s30 + $0x78] sm:$0xff] %v390_v3  ;;  %v360_v50 = vadd.f32 %v743_v21, %v321_v33  ;;  %v361_v51 = vadd.f32 %v743_v21, %v322_v34  ;;  %v362_v63 = vadd.f32 %v743_v21, %v323_v35 }
  0x41   : > { %v363_v52 = vadd.f32 %v743_v21, %v324_v38  ;;  %v364_v4 = vadd.f32 %v743_v21, %v325_v43  ;;  %v365_v57 = vadd.f32 %v743_v21, %v326_v44  ;;  %v366_v5 = vadd.f32 %v743_v21, %v327_v45 }
  0x42   : > { %v391_v6 = vmax.f32 %v359_v62, 0.0  ;;  %v392_v11 = vmax.f32 %v360_v50, 0.0  ;;  %v393_v13 = vmax.f32 %v361_v51, 0.0  ;;  %v394_v14 = vmax.f32 %v362_v63, 0.0 }
  0x43   : > { %v395_v40 = vmax.f32 %v363_v52, 0.0  ;;  %v396_v41 = vmax.f32 %v364_v4, 0.0  ;;  %v397_v42 = vmax.f32 %v365_v57, 0.0  ;;  %v398_v46 = vmax.f32 %v366_v5, 0.0 }
  0x44   : > { %423 = vst [vmem:[%s770_s30 + $0x80] sm:$0xff] %v391_v6  ;;  %424 = vst [vmem:[%s770_s30 + $0x88] sm:$0xff] %v392_v11  ;;  %v328_v27 = vmul.f32 %v732_v17, %v290_v15  ;;  %v936_v31 = vsub.f32 %v688_v59, %v585_v16  ;;  %v937_v53 = vsub.f32 %v699_v0, %v585_v16 }
  0x45   : > { %425 = vst [vmem:[%s770_s30 + $0x90] sm:$0xff] %v393_v13  ;;  %426 = vst [vmem:[%s770_s30 + $0x98] sm:$0xff] %v394_v14  ;;  %v938_v22 = vsub.f32 %v702_v1, %v585_v16  ;;  %v332_v59 = vmul.f32 %v732_v17, %v939_v58  ;;  %v940_v15 = vsub.f32 %v714_v7, %v585_v16 }
  0x46   : > { %v329_v39 = vmul.f32 %v732_v17, %v936_v31  ;;  %v330_v20 = vmul.f32 %v732_v17, %v937_v53  ;;  %427 = vst [vmem:[%s770_s30 + $0xa0] sm:$0xff] %v395_v40  ;;  %428 = vst [vmem:[%s770_s30 + $0xa8] sm:$0xff] %v396_v41  ;;  %v941_v12 = vsub.f32 %v717_v8, %v585_v16 }
  0x47   : > { %v331_v10 = vmul.f32 %v732_v17, %v938_v22  ;;  %429 = vst [vmem:[%s770_s30 + $0xb0] sm:$0xff] %v397_v42  ;;  %430 = vst [vmem:[%s770_s30 + $0xb8] sm:$0xff] %v398_v46  ;;  %v333_v0 = vmul.f32 %v732_v17, %v940_v15  ;;  %v942_v24 = vsub.f32 %v720_v9, %v585_v16 }
  0x48   : > { %v334_v1 = vmul.f32 %v732_v17, %v941_v12  ;;  %v367_v26 = vadd.f32 %v743_v21, %v328_v27  ;;  %v368_v2 = vadd.f32 %v743_v21, %v329_v39  ;;  %v369_v7 = vadd.f32 %v743_v21, %v330_v20 }
  0x49   : > { %v335_v25 = vmul.f32 %v732_v17, %v942_v24  ;;  %v370_v28 = vadd.f32 %v743_v21, %v331_v10  ;;  %v371_v8 = vadd.f32 %v743_v21, %v332_v59  ;;  %v372_v47 = vadd.f32 %v743_v21, %v333_v0 }
  0x4a   : > { %v373_v16 = vadd.f32 %v743_v21, %v334_v1  ;;  %v399_v17 = vmax.f32 %v367_v26, 0.0  ;;  %v400_v29 = vmax.f32 %v368_v2, 0.0  ;;  %v401_v30 = vmax.f32 %v369_v7, 0.0 }
  0x4b   : > { %v374_v9 = vadd.f32 %v743_v21, %v335_v25  ;;  %v402_v48 = vmax.f32 %v370_v28, 0.0  ;;  %v403_v36 = vmax.f32 %v371_v8, 0.0  ;;  %v404_v49 = vmax.f32 %v372_v47, 0.0 }
  0x4c   : > { %v405_v37 = vmax.f32 %v373_v16, 0.0  ;;  %431 = vst [vmem:[%s770_s30 + $0xc0] sm:$0xff] %v399_v17  ;;  %432 = vst [vmem:[%s770_s30 + $0xc8] sm:$0xff] %v400_v29 }
  0x4d   : > { %v406_v54 = vmax.f32 %v374_v9, 0.0  ;;  %433 = vst [vmem:[%s770_s30 + $0xd0] sm:$0xff] %v401_v30  ;;  %434 = vst [vmem:[%s770_s30 + $0xd8] sm:$0xff] %v402_v48 }
  0x4e   : > { %435 = vst [vmem:[%s770_s30 + $0xe0] sm:$0xff] %v403_v36  ;;  %436 = vst [vmem:[%s770_s30 + $0xe8] sm:$0xff] %v404_v49 }
  0x4f   : > { %437 = vst [vmem:[%s770_s30 + $0xf0] sm:$0xff] %v405_v37  ;;  %438 = vst [vmem:[%s770_s30 + $0xf8] sm:$0xff] %v406_v54 }
  0x50 PF: > { %s14_s15 = sadd.s32 1, %s524_s15  }
  0x51   : > { %p11_p4 = scmp.ge.s32.totalorder %s14_s15, 4  }
  0x53   :  { %13 = sbr.rel (!%p11_p4) target bundleno = 1 (0x1), region = 66 }

// kernel: _lambda_.13
= control target key start
LH: loop header
LB: loop body
LE: loop exit
PB: predicated region body
PF: predicated region fallthrough
CT: control target
= control target key end

     0   :  { %s1128_s15 = smov 0   ;;  %s1506_s0 = inlined_call_operand.vmem [shape: bf16[512,128], index: 0, kind: input, shape index: {}]   ;;  %s1507_s1 = inlined_call_operand.vmem [shape: bf16[128,128], index: 1, kind: input, shape index: {}]   ;;  %s1508_s2 = inlined_call_operand.vmem [shape: f32[1,128], index: 2, kind: input, shape index: {}]   ;;  %s1509_s3 = inlined_call_operand.vmem [shape: f32[512,128], index: 3, kind: output, shape index: {0}]   ;;  %s1510_s4 = inlined_call_operand.vmem [shape: f32[2,128], index: 4, kind: output, shape index: {1}]  }
   0x1 LB: > { %s1134_s16 = sadd.s32 4294967295, %s1099_s15   ;;  %p937_p0 = scmp.ge.s32.totalorder %s1099_s15, 1  ;;  %s1099_s15 = sphi %s1128_s15, %s15_s15  }
   0x2   : > { %p161_p1 = scmp.lt.s32.totalorder %s1099_s15, 3 }
   0x4   : > { %p162_p2 = pnand %p937_p0, %p161_p1 }
   0x5   : > { %s938_s19 = sshll.u32 (!%p162_p2), %s1134_s16, 5  ;;  %s967_s12 = sshll.u32 (!%p162_p2), %s1134_s16, 8 }
   0x6   : > { %165 = sbr.rel (%p162_p2) target bundleno = 336 (0x150), region = 32  ;;  %p188_p3 = scmp.lt.s32.totalorder (!%p162_p2), %s938_s19, 63 }
   0x7   : > { %p968_p4 = scmp.ne.s32.totalorder (!%p162_p2), %s1134_s16, 0 }
   0xb   : > { %v1069_v0 = vld [vmem:[%s1507_s1 + $0x38] sm:$0xff]   ;;  %v1070_v1 = vld [vmem:[%s1507_s1 + $0x30] sm:$0xff]   ;;  %s1512_s19 = smov (!%p188_p3, %s938_s19), 63  ;;  %v1071_v2 = vld [vmem:[%s1507_s1 + $0x28] sm:$0xff]   ;;  %v592_v24 = vlaneseq  ;;  %v1191_v27 = vstv %s967_s12  ;;  %v1101_v52 = vmov 0.0  }
   0xc   : > { %995 = vmatprep.subr.bf16.mxu0 %v1069_v0  ;;  %1043 = vmatprep.subr.bf16.mxu1 %v1069_v0  ;;  %s939_s24 = sshll.u32 %s1512_s19, 2  ;;  %v1072_v3 = vld [vmem:[%s1507_s1 + $0x20] sm:$0xff]   ;;  %v1073_v5 = vld [vmem:[%s1507_s1 + $0x18] sm:$0xff]   ;;  %v1074_v7 = vld [vmem:[%s1507_s1 + $0x10] sm:$0xff]   ;;  %s941_s13 = sshll.u32 %s1512_s19, 3 }
   0xd   : > { %996 = vmatpush3.bf16.msra.mxu0 %v1069_v0  ;;  %1051 = vmatpush3.bf16.msra.mxu1 %v1069_v0  ;;  %s1154_s27 = scalar_lea.vmem %s1506_s0, %s939_s24  ;;  %v1075_v8 = vld [vmem:[%s1507_s1 + $0x8] sm:$0xff]   ;;  %v1076_v9 = vld [vmem:[%s1507_s1] sm:$0xff]   ;;  %v1187_v25 = vshrl.u32 %v592_v24, 7  ;;  %s1217_s21 = scalar_lea.vmem %s1509_s3, %s941_s13 }
   0xe   : > { %997 = vmatprep.subr.bf16.mxu0 %v1070_v1  ;;  %1044 = vmatprep.subr.bf16.mxu1 %v1070_v1  ;;  %v1077_v4 = vld [vmem:[%s1154_s27] sm:$0xff]   ;;  %v1078_v10 = vld [vmem:[%s1154_s27 + $0x8] sm:$0xff]   ;;  %v1079_v12 = vld [vmem:[%s1154_s27 + $0x10] sm:$0xff]  }
   0xf   : > { %1011 = vmatprep.mubr.bf16.mxu0 %v1077_v4  ;;  %v1084_v6 = vld [vmem:[%s1154_s27 + $0x40] sm:$0xff]   ;;  %v1086_v11 = vld [vmem:[%s1154_s27 + $0x48] sm:$0xff]   ;;  %v1087_v13 = vld [vmem:[%s1154_s27 + $0x50] sm:$0xff]   ;;  %v595_v26 = vadd.s32 16, %v1187_v25  ;;  %v596_v28 = vadd.s32 24, %v1187_v25  ;;  %v594_v29 = vadd.s32 8, %v1187_v25  ;;  %v627_v32 = vadd.s32 %v1191_v27, %v1187_v25 }
  0x10   : > { %1027 = vmatprep.mubr.bf16.mxu1 %v1084_v6  ;;  %v1080_v14 = vld [vmem:[%s1154_s27 + $0x18] sm:$0xff]   ;;  %v1081_v16 = vld [vmem:[%s1154_s27 + $0x20] sm:$0xff]   ;;  %v1082_v18 = vld [vmem:[%s1154_s27 + $0x28] sm:$0xff]   ;;  %v599_v30 = vadd.s32 48, %v1187_v25  ;;  %v597_v35 = vadd.s32 32, %v1187_v25  ;;  %v600_v37 = vadd.s32 56, %v1187_v25 }
  0x11   : > { %998 = vmatpush3.bf16.msra.mxu0 %v1070_v1  ;;  %1052 = vmatpush3.bf16.msra.mxu1 %v1070_v1  ;;  %v1088_v15 = vld [vmem:[%s1154_s27 + $0x58] sm:$0xff]   ;;  %v1089_v17 = vld [vmem:[%s1154_s27 + $0x60] sm:$0xff]   ;;  %v1090_v19 = vld [vmem:[%s1154_s27 + $0x68] sm:$0xff]   ;;  %v629_v31 = vadd.s32 %v1191_v27, %v595_v26  ;;  %v630_v33 = vadd.s32 %v1191_v27, %v596_v28  ;;  %v628_v34 = vadd.s32 %v1191_v27, %v594_v29  ;;  %v598_v38 = vadd.s32 40, %v1187_v25 }
  0x12   : > { %999 = vmatprep.subr.bf16.mxu0 %v1071_v2  ;;  %1045 = vmatprep.subr.bf16.mxu1 %v1071_v2  ;;  %v1083_v20 = vld [vmem:[%s1154_s27 + $0x30] sm:$0xff]   ;;  %v1085_v22 = vld [vmem:[%s1154_s27 + $0x38] sm:$0xff]   ;;  %v633_v36 = vadd.s32 %v1191_v27, %v599_v30  ;;  %v603_v39 = vadd.s32 80, %v1187_v25  ;;  %v1210_v40 = vld [vmem:[%s1508_s2] ss:$0 sm:$0xff]  ;;  %vm659_vm1 = vcmp.lt.s32.totalorder %v627_v32, 384  ;;  %v631_v41 = vadd.s32 %v1191_v27, %v597_v35 }
  0x13   : > { %v1091_v21 = vld [vmem:[%s1154_s27 + $0x70] sm:$0xff]   ;;  %v1092_v23 = vld [vmem:[%s1154_s27 + $0x78] sm:$0xff]   ;;  %vm661_vm0 = vcmp.lt.s32.totalorder %v629_v31, 384  ;;  %vm662_vm2 = vcmp.lt.s32.totalorder %v630_v33, 384  ;;  %vm660_vm3 = vcmp.lt.s32.totalorder %v628_v34, 384  ;;  %v601_v42 = vadd.s32 64, %v1187_v25 }
  0x14   : > { %vm665_vm4 = vcmp.lt.s32.totalorder %v633_v36, 384  ;;  %v634_v44 = vadd.s32 %v1191_v27, %v600_v37  ;;  %v632_v45 = vadd.s32 %v1191_v27, %v598_v38  ;;  %v604_v46 = vadd.s32 88, %v1187_v25 }
  0x15   : > { %1000 = vmatpush3.bf16.msra.mxu0 %v1071_v2  ;;  %1053 = vmatpush3.bf16.msra.mxu1 %v1071_v2  ;;  %v637_v49 = vadd.s32 %v1191_v27, %v603_v39  ;;  %v602_v50 = vadd.s32 72, %v1187_v25  ;;  %v693_v53 = vsel %vm661_vm0, 1.0, %v1101_v52  ;;  %v691_v55 = vsel %vm659_vm1, 1.0, %v1101_v52 }
  0x16   : > { %1001 = vmatprep.subr.bf16.mxu0 %v1072_v3  ;;  %1046 = vmatprep.subr.bf16.mxu1 %v1072_v3  ;;  %v694_v56 = vsel %vm662_vm2, 1.0, %v1101_v52  ;;  %v607_v57 = vadd.s32 112, %v1187_v25  ;;  %vm663_vm5 = vcmp.lt.s32.totalorder %v631_v41, 384  ;;  %v635_v60 = vadd.s32 %v1191_v27, %v601_v42 }
  0x17   : > { %v692_v63 = vsel %vm660_vm3, 1.0, %v1101_v52  ;;  %v1250_v0 = vsel %vm665_vm4, 1.0, %v1101_v52  ;;  %vm666_vm6 = vcmp.lt.s32.totalorder %v634_v44, 384  ;;  %v638_v1 = vadd.s32 %v1191_v27, %v604_v46 }
  0x18   : > { %vm664_vm7 = vcmp.lt.s32.totalorder %v632_v45, 384  ;;  %vm669_vm8 = vcmp.lt.s32.totalorder %v637_v49, 384  ;;  %v636_v4 = vadd.s32 %v1191_v27, %v602_v50  ;;  %vm667_vm9 = vcmp.lt.s32.totalorder %v635_v60, 384 }
  0x19   : > { %1002 = vmatpush3.bf16.msra.mxu0 %v1072_v3  ;;  %1054 = vmatpush3.bf16.msra.mxu1 %v1072_v3  ;;  %vm670_vm10 = vcmp.lt.s32.totalorder %v638_v1, 384  ;;  %v1291_v24 = vsel %vm667_vm9, 1.0, %v1101_v52 }
  0x1a   : > { %1003 = vmatprep.subr.bf16.mxu0 %v1073_v5  ;;  %1047 = vmatprep.subr.bf16.mxu1 %v1073_v5  ;;  %vm668_vm11 = vcmp.lt.s32.totalorder %v636_v4, 384  ;;  %v1301_v34 = vsel %vm670_vm10, 1.0, %v1101_v52  ;;  %v609_v4 = vadd.s32 128, %v1187_v25 }
  0x1b   : > { %v1304_v35 = vsel %vm668_vm11, 1.0, %v1101_v52 }
  0x1d   : > { %1004 = vmatpush3.bf16.msra.mxu0 %v1073_v5  ;;  %1055 = vmatpush3.bf16.msra.mxu1 %v1073_v5 }
  0x1e   : > { %1005 = vmatprep.subr.bf16.mxu0 %v1074_v7  ;;  %1048 = vmatprep.subr.bf16.mxu1 %v1074_v7 }
  0x21   : > { %1006 = vmatpush3.bf16.msra.mxu0 %v1074_v7  ;;  %1056 = vmatpush3.bf16.msra.mxu1 %v1074_v7  ;;  %v695_v7 = vsel %vm663_vm5, 1.0, %v1101_v52 }
  0x22   : > { %1007 = vmatprep.subr.bf16.mxu0 %v1075_v8  ;;  %1049 = vmatprep.subr.bf16.mxu1 %v1075_v8 }
  0x25   : > { %1008 = vmatpush3.bf16.msra.mxu0 %v1075_v8  ;;  %1057 = vmatpush3.bf16.msra.mxu1 %v1075_v8  ;;  %v641_v8 = vadd.s32 %v1191_v27, %v607_v57 }
  0x26   : > { %1009 = vmatprep.subr.bf16.mxu0 %v1076_v9  ;;  %1050 = vmatprep.subr.bf16.mxu1 %v1076_v9 }
  0x27   : > { %vm673_vm12 = vcmp.lt.s32.totalorder %v641_v8, 384 }
  0x28   : > { %v1317_v46 = vsel %vm673_vm12, 1.0, %v1101_v52 }
  0x29   : > { %1010 = vmatpush3.bf16.msra.mxu0 %v1076_v9  ;;  %1058 = vmatpush3.bf16.msra.mxu1 %v1076_v9 }
  0x2c   : > { %1012 = vmatmul.mubr.bf16.vlgmr.msra.gmra.mxu0 %v1078_v10  ;;  %1028 = vmatmul.mubr.bf16.vlgmr.msra.gmra.mxu1 %v1086_v11 }
  0x2d   : > { %1015 = vmatprep.mubr.bf16.mxu0 %v1079_v12  ;;  %1031 = vmatprep.mubr.bf16.mxu1 %v1087_v13  ;;  %v1268_v12 = vsel %vm666_vm6, 1.0, %v1101_v52 }
  0x34   : > { %1016 = vmatmul.mubr.bf16.gmra.mxu0 %v1080_v14  ;;  %1032 = vmatmul.mubr.bf16.gmra.mxu1 %v1088_v15  ;;  %v696_v15 = vsel %vm664_vm7, 1.0, %v1101_v52 }
  0x35   : > { %1019 = vmatprep.mubr.bf16.mxu0 %v1081_v16  ;;  %1035 = vmatprep.mubr.bf16.mxu1 %v1089_v17  ;;  %v1277_v16 = vsel %vm669_vm8, 1.0, %v1101_v52  ;;  %v605_v17 = vadd.s32 96, %v1187_v25 }
  0x37   : > { %v639_v36 = vadd.s32 %v1191_v27, %v605_v17 }
  0x39   : > { %vm671_vm13 = vcmp.lt.s32.totalorder %v639_v36, 384 }
  0x3c   : > { %1020 = vmatmul.mubr.bf16.gmra.mxu0 %v1082_v18  ;;  %1036 = vmatmul.mubr.bf16.gmra.mxu1 %v1090_v19 }
  0x3d   : > { %1023 = vmatprep.mubr.bf16.mxu0 %v1083_v20  ;;  %1039 = vmatprep.mubr.bf16.mxu1 %v1091_v21 }
  0x44   : > { %1024 = vmatmul.mubr.bf16.gmra.mxu0 %v1085_v22  ;;  %1040 = vmatmul.mubr.bf16.gmra.mxu1 %v1092_v23 }
  0xec   : > { %v1013_v43 = vpop.f32.mrf.mxu0  ;;  %v1029_v47 = vpop.f32.mrf.mxu1 }
  0xed   : > { %v1223_v48 = vadd.f32 %v1013_v43, %v1210_v40  ;;  %v1228_v51 = vadd.f32 %v1029_v47, %v1210_v40  ;;  %v608_v47 = vadd.s32 120, %v1187_v25 }
  0xee   : > { %v433_v54 = vpop.f32.mrf.mxu0  ;;  %v497_v58 = vpop.f32.mrf.mxu1 }
  0xef   : > { %562 = vst [vmem:[%s1217_s21 + $0x10] sm:$0xff] %v1223_v48  ;;  %v434_v59 = vadd.f32 %v1210_v40, %v433_v54  ;;  %578 = vst [vmem:[%s1217_s21 + $0x90] sm:$0xff] %v1228_v51  ;;  %v1244_v61 = vadd.f32 %v1210_v40, %v497_v58  ;;  %v725_v19 = vmul.f32 %v693_v53, %v1223_v48 }
  0xf0   : > { %v1014_v62 = vpop.f32.mrf.mxu0  ;;  %v1030_v2 = vpop.f32.mrf.mxu1 }
  0xf1   : > { %560 = vst [vmem:[%s1217_s21] sm:$0xff] %v434_v59  ;;  %v445_v3 = vadd.f32 %v1014_v62, %v1210_v40  ;;  %576 = vst [vmem:[%s1217_s21 + $0x80] sm:$0xff] %v1244_v61  ;;  %v723_v5 = vmul.f32 %v691_v55, %v434_v59  ;;  %v1262_v9 = vadd.f32 %v1030_v2, %v1210_v40 }
  0xf2   : > { %v436_v6 = vpop.f32.mrf.mxu0  ;;  %v500_v10 = vpop.f32.mrf.mxu1  ;;  %v794_v39 = vmul.f32 %v725_v19, %v1223_v48 }
  0xf3   : > { %563 = vst [vmem:[%s1217_s21 + $0x18] sm:$0xff] %v445_v3  ;;  %v437_v11 = vadd.f32 %v1210_v40, %v436_v6  ;;  %v1271_v13 = vadd.f32 %v1210_v40, %v500_v10  ;;  %579 = vst [vmem:[%s1217_s21 + $0x98] sm:$0xff] %v1262_v9  ;;  %v792_v22 = vmul.f32 %v723_v5, %v434_v59 }
  0xf4   : > { %v1017_v14 = vpop.f32.mrf.mxu0  ;;  %v1033_v18 = vpop.f32.mrf.mxu1  ;;  %v726_v29 = vmul.f32 %v694_v56, %v445_v3 }
  0xf5   : > { %561 = vst [vmem:[%s1217_s21 + $0x8] sm:$0xff] %v437_v11  ;;  %v724_v20 = vmul.f32 %v692_v63, %v437_v11  ;;  %v1285_v21 = vadd.f32 %v1017_v14, %v1210_v40  ;;  %577 = vst [vmem:[%s1217_s21 + $0x88] sm:$0xff] %v1271_v13  ;;  %v1294_v26 = vadd.f32 %v1033_v18, %v1210_v40  ;;  %v703_v18 = vsel %vm671_vm13, 1.0, %v1101_v52 }
  0xf6   : > { %v449_v23 = vpop.f32.mrf.mxu0  ;;  %v513_v28 = vpop.f32.mrf.mxu1  ;;  %v795_v50 = vmul.f32 %v726_v29, %v445_v3 }
  0xf7   : > { %v755_v30 = vadd.f32 %v724_v20, %v723_v5  ;;  %v793_v31 = vmul.f32 %v724_v20, %v437_v11  ;;  %566 = vst [vmem:[%s1217_s21 + $0x30] sm:$0xff] %v1285_v21  ;;  %v450_v32 = vadd.f32 %v1210_v40, %v449_v23  ;;  %582 = vst [vmem:[%s1217_s21 + $0xb0] sm:$0xff] %v1294_v26  ;;  %v606_v5 = vadd.s32 104, %v1187_v25 }
  0xf8   : > { %v1018_v33 = vpop.f32.mrf.mxu0  ;;  %v1310_v37 = vadd.f32 %v1210_v40, %v513_v28  ;;  %v1034_v38 = vpop.f32.mrf.mxu1  ;;  %v729_v56 = vmul.f32 %v1250_v0, %v1285_v21  ;;  %v611_v0 = vadd.s32 144, %v1187_v25 }
  0xf9   : > { %v756_v41 = vadd.f32 %v755_v30, %v725_v19  ;;  %v824_v42 = vadd.f32 %v793_v31, %v792_v22  ;;  %564 = vst [vmem:[%s1217_s21 + $0x20] sm:$0xff] %v450_v32  ;;  %v727_v43 = vmul.f32 %v695_v7, %v450_v32  ;;  %v461_v44 = vadd.f32 %v1018_v33, %v1210_v40 }
  0xfa   : > { %v452_v45 = vpop.f32.mrf.mxu0  ;;  %580 = vst [vmem:[%s1217_s21 + $0xa0] sm:$0xff] %v1310_v37  ;;  %v1323_v49 = vadd.f32 %v1034_v38, %v1210_v40  ;;  %v516_v48 = vpop.f32.mrf.mxu1  ;;  %v642_v19 = vadd.s32 %v1191_v27, %v608_v47  ;;  %v640_v33 = vadd.s32 %v1191_v27, %v606_v5 }
  0xfb   : > { %v825_v53 = vadd.f32 %v824_v42, %v794_v39  ;;  %v757_v54 = vadd.f32 %v756_v41, %v726_v29  ;;  %v453_v55 = vadd.f32 %v1210_v40, %v452_v45  ;;  %v796_v57 = vmul.f32 %v727_v43, %v450_v32  ;;  %567 = vst [vmem:[%s1217_s21 + $0x38] sm:$0xff] %v461_v44 }
  0xfc   : > { %v1021_v58 = vpop.f32.mrf.mxu0  ;;  %583 = vst [vmem:[%s1217_s21 + $0xb8] sm:$0xff] %v1323_v49  ;;  %v1332_v59 = vadd.f32 %v1210_v40, %v516_v48  ;;  %v1037_v60 = vpop.f32.mrf.mxu1  ;;  %v730_v10 = vmul.f32 %v1268_v12, %v461_v44  ;;  %v798_v12 = vmul.f32 %v729_v56, %v1285_v21  ;;  %v612_v32 = vadd.s32 152, %v1187_v25 }
  0xfd   : > { %v758_v62 = vadd.f32 %v757_v54, %v727_v43  ;;  %v826_v63 = vadd.f32 %v825_v53, %v795_v50  ;;  %565 = vst [vmem:[%s1217_s21 + $0x28] sm:$0xff] %v453_v55  ;;  %v728_v1 = vmul.f32 %v696_v15, %v453_v55  ;;  %v474_v2 = vadd.f32 %v1021_v58, %v1210_v40 }
  0xfe   : > { %v465_v3 = vpop.f32.mrf.mxu0  ;;  %581 = vst [vmem:[%s1217_s21 + $0xa8] sm:$0xff] %v1332_v59  ;;  %v1342_v6 = vadd.f32 %v1037_v60, %v1210_v40  ;;  %v529_v7 = vpop.f32.mrf.mxu1  ;;  %v799_v21 = vmul.f32 %v730_v10, %v461_v44  ;;  %vm674_vm14 = vcmp.lt.s32.totalorder %v642_v19, 384  ;;  %v610_v45 = vadd.s32 136, %v1187_v25 }
  0xff   : > { %v827_v8 = vadd.f32 %v826_v63, %v796_v57  ;;  %v759_v11 = vadd.f32 %v758_v62, %v728_v1  ;;  %v797_v14 = vmul.f32 %v728_v1, %v453_v55  ;;  %570 = vst [vmem:[%s1217_s21 + $0x50] sm:$0xff] %v474_v2  ;;  %v466_v15 = vadd.f32 %v1210_v40, %v465_v3 }
 0x100   : > { %v1022_v17 = vpop.f32.mrf.mxu0  ;;  %586 = vst [vmem:[%s1217_s21 + $0xd0] sm:$0xff] %v1342_v6  ;;  %v1353_v20 = vadd.f32 %v1210_v40, %v529_v7  ;;  %v1038_v22 = vpop.f32.mrf.mxu1  ;;  %vm672_vm15 = vcmp.lt.s32.totalorder %v640_v33, 384  ;;  %v643_v3 = vadd.s32 %v1191_v27, %v609_v4  ;;  %v613_v19 = vadd.s32 160, %v1187_v25 }
 0x101   : > { %v760_v23 = vadd.f32 %v759_v11, %v729_v56  ;;  %v828_v28 = vadd.f32 %v827_v8, %v797_v14  ;;  %v477_v29 = vadd.f32 %v1022_v17, %v1210_v40  ;;  %568 = vst [vmem:[%s1217_s21 + $0x40] sm:$0xff] %v466_v15  ;;  %v731_v30 = vmul.f32 %v1291_v24, %v466_v15 }
 0x102   : > { %v468_v31 = vpop.f32.mrf.mxu0  ;;  %584 = vst [vmem:[%s1217_s21 + $0xc0] sm:$0xff] %v1353_v20  ;;  %v1364_v36 = vadd.f32 %v1038_v22, %v1210_v40  ;;  %v532_v38 = vpop.f32.mrf.mxu1  ;;  %v733_v24 = vmul.f32 %v1277_v16, %v474_v2  ;;  %v704_v4 = vsel %vm672_vm15, 1.0, %v1101_v52  ;;  %v644_v17 = vadd.s32 %v1191_v27, %v610_v45 }
 0x103   : > { %v829_v39 = vadd.f32 %v828_v28, %v798_v12  ;;  %v761_v41 = vadd.f32 %v760_v23, %v730_v10  ;;  %571 = vst [vmem:[%s1217_s21 + $0x58] sm:$0xff] %v477_v29  ;;  %v469_v42 = vadd.f32 %v1210_v40, %v468_v31  ;;  %v1373_v47 = vadd.f32 %v1210_v40, %v532_v38 }
 0x104   : > { %v1025_v43 = vpop.f32.mrf.mxu0  ;;  %587 = vst [vmem:[%s1217_s21 + $0xd8] sm:$0xff] %v1364_v36  ;;  %v1041_v48 = vpop.f32.mrf.mxu1  ;;  %v800_v44 = vmul.f32 %v731_v30, %v466_v15  ;;  %v734_v16 = vmul.f32 %v1301_v34, %v477_v29  ;;  %v645_v34 = vadd.s32 %v1191_v27, %v611_v0  ;;  %v706_v0 = vsel %vm674_vm14, 1.0, %v1101_v52 }
 0x105   : > { %v762_v50 = vadd.f32 %v761_v41, %v731_v30  ;;  %v830_v53 = vadd.f32 %v829_v39, %v799_v21  ;;  %569 = vst [vmem:[%s1217_s21 + $0x48] sm:$0xff] %v469_v42  ;;  %v732_v54 = vmul.f32 %v1304_v35, %v469_v42  ;;  %v490_v55 = vadd.f32 %v1025_v43, %v1210_v40 }
 0x106   : > { %v481_v56 = vpop.f32.mrf.mxu0  ;;  %585 = vst [vmem:[%s1217_s21 + $0xc8] sm:$0xff] %v1373_v47  ;;  %v1382_v57 = vadd.f32 %v1041_v48, %v1210_v40  ;;  %v545_v58 = vpop.f32.mrf.mxu1  ;;  %v802_v35 = vmul.f32 %v733_v24, %v474_v2  ;;  %vm675_vm0 = vcmp.lt.s32.totalorder %v643_v3, 384  ;;  %v646_v30 = vadd.s32 %v1191_v27, %v612_v32 }
 0x107   : > { %v831_v60 = vadd.f32 %v830_v53, %v800_v44  ;;  %v763_v62 = vadd.f32 %v762_v50, %v732_v54  ;;  %v801_v63 = vmul.f32 %v732_v54, %v469_v42  ;;  %v482_v1 = vadd.f32 %v1210_v40, %v481_v56  ;;  %574 = vst [vmem:[%s1217_s21 + $0x70] sm:$0xff] %v490_v55 }
 0x108   : > { %v1026_v5 = vpop.f32.mrf.mxu0  ;;  %590 = vst [vmem:[%s1217_s21 + $0xf0] sm:$0xff] %v1382_v57  ;;  %v1391_v7 = vadd.f32 %v1210_v40, %v545_v58  ;;  %v1042_v8 = vpop.f32.mrf.mxu1  ;;  %v737_v41 = vmul.f32 %v1317_v46, %v490_v55  ;;  %vm676_vm1 = vcmp.lt.s32.totalorder %v644_v17, 384  ;;  %v615_v43 = vadd.s32 176, %v1187_v25 }
 0x109   : > { %v764_v10 = vadd.f32 %v763_v62, %v733_v24  ;;  %v832_v11 = vadd.f32 %v831_v60, %v801_v63  ;;  %572 = vst [vmem:[%s1217_s21 + $0x60] sm:$0xff] %v482_v1  ;;  %v735_v14 = vmul.f32 %v703_v18, %v482_v1  ;;  %v493_v2 = vadd.f32 %v1026_v5, %v1210_v40 }
 0x10a   : > { %v484_v15 = vpop.f32.mrf.mxu0  ;;  %588 = vst [vmem:[%s1217_s21 + $0xe0] sm:$0xff] %v1391_v7  ;;  %v1403_v22 = vadd.f32 %v1042_v8, %v1210_v40  ;;  %v548_v12 = vpop.f32.mrf.mxu1  ;;  %v803_v18 = vmul.f32 %v734_v16, %v477_v29  ;;  %v614_v29 = vadd.s32 168, %v1187_v25  ;;  %v707_v24 = vsel %vm675_vm0, 1.0, %v1101_v52 }
 0x10b   : > { %v833_v23 = vadd.f32 %v832_v11, %v802_v35  ;;  %v765_v28 = vadd.f32 %v764_v10, %v734_v16  ;;  %575 = vst [vmem:[%s1217_s21 + $0x78] sm:$0xff] %v493_v2  ;;  %v485_v31 = vadd.f32 %v1210_v40, %v484_v15  ;;  %v1412_v33 = vadd.f32 %v1210_v40, %v548_v12 }
 0x10c   : > { %591 = vst [vmem:[%s1217_s21 + $0xf8] sm:$0xff] %v1403_v22  ;;  %v804_v21 = vmul.f32 %v735_v14, %v482_v1  ;;  %v647_v40 = vadd.s32 %v1191_v27, %v613_v19  ;;  %vm677_vm2 = vcmp.lt.s32.totalorder %v645_v34, 384  ;;  %v738_v45 = vmul.f32 %v706_v0, %v493_v2 }
 0x10d   : > { %v766_v38 = vadd.f32 %v765_v28, %v735_v14  ;;  %v834_v39 = vadd.f32 %v833_v23, %v803_v18  ;;  %573 = vst [vmem:[%s1217_s21 + $0x68] sm:$0xff] %v485_v31  ;;  %v736_v42 = vmul.f32 %v704_v4, %v485_v31  ;;  %589 = vst [vmem:[%s1217_s21 + $0xe8] sm:$0xff] %v1412_v33  ;;  %vm678_vm3 = vcmp.lt.s32.totalorder %v646_v30, 384 }
 0x10e   : > { %v708_v44 = vsel %vm676_vm1, 1.0, %v1101_v52  ;;  %v616_v46 = vadd.s32 184, %v1187_v25  ;;  %v648_v53 = vadd.s32 %v1191_v27, %v614_v29  ;;  %v806_v54 = vmul.f32 %v737_v41, %v490_v55 }
 0x10f   : > { %v835_v32 = vadd.f32 %v834_v39, %v804_v21  ;;  %v767_v48 = vadd.f32 %v766_v38, %v736_v42  ;;  %v805_v50 = vmul.f32 %v736_v42, %v485_v31  ;;  %v739_v16 = vmul.f32 %v707_v24, %v1244_v61 }
 0x110   : > { %v709_v60 = vsel %vm677_vm2, 1.0, %v1101_v52  ;;  %v649_v62 = vadd.s32 %v1191_v27, %v615_v43  ;;  %vm679_vm4 = vcmp.lt.s32.totalorder %v647_v40, 384  ;;  %v617_v63 = vadd.s32 192, %v1187_v25 }
 0x111   : > { %v768_v56 = vadd.f32 %v767_v48, %v737_v41  ;;  %v836_v58 = vadd.f32 %v835_v32, %v805_v50  ;;  %v807_v1 = vmul.f32 %v738_v45, %v493_v2  ;;  %v740_v34 = vmul.f32 %v708_v44, %v1271_v13 }
 0x112   : > { %v710_v5 = vsel %vm678_vm3, 1.0, %v1101_v52  ;;  %v650_v55 = vadd.s32 %v1191_v27, %v616_v46  ;;  %vm680_vm5 = vcmp.lt.s32.totalorder %v648_v53, 384  ;;  %v618_v8 = vadd.s32 200, %v1187_v25 }
 0x113   : > { %v837_v35 = vadd.f32 %v836_v58, %v806_v54  ;;  %v769_v3 = vadd.f32 %v768_v56, %v738_v45  ;;  %v741_v10 = vmul.f32 %v709_v60, %v1228_v51  ;;  %v808_v11 = vmul.f32 %v739_v16, %v1244_v61 }
 0x114   : > { %vm681_vm6 = vcmp.lt.s32.totalorder %v649_v62, 384  ;;  %v711_v2 = vsel %vm679_vm4, 1.0, %v1101_v52  ;;  %v619_v15 = vadd.s32 208, %v1187_v25  ;;  %v651_v4 = vadd.s32 %v1191_v27, %v617_v63 }
 0x115   : > { %v770_v14 = vadd.f32 %v769_v3, %v739_v16  ;;  %v838_v0 = vadd.f32 %v837_v35, %v807_v1  ;;  %v742_v17 = vmul.f32 %v710_v5, %v1262_v9  ;;  %v809_v18 = vmul.f32 %v740_v34, %v1271_v13 }
 0x116   : > { %vm682_vm7 = vcmp.lt.s32.totalorder %v650_v55, 384  ;;  %v712_v28 = vsel %vm680_vm5, 1.0, %v1101_v52  ;;  %v620_v61 = vadd.s32 216, %v1187_v25  ;;  %v652_v19 = vadd.s32 %v1191_v27, %v618_v8 }
 0x117   : > { %v771_v12 = vadd.f32 %v770_v14, %v740_v34  ;;  %v839_v23 = vadd.f32 %v838_v0, %v808_v11  ;;  %v810_v30 = vmul.f32 %v741_v10, %v1228_v51  ;;  %v743_v21 = vmul.f32 %v711_v2, %v1310_v37 }
 0x118   : > { %v713_v39 = vsel %vm681_vm6, 1.0, %v1101_v52  ;;  %v653_v29 = vadd.s32 %v1191_v27, %v619_v15  ;;  %vm683_vm8 = vcmp.lt.s32.totalorder %v651_v4, 384  ;;  %v621_v13 = vadd.s32 224, %v1187_v25 }
 0x119   : > { %v772_v31 = vadd.f32 %v771_v12, %v741_v10  ;;  %v840_v38 = vadd.f32 %v839_v23, %v809_v18  ;;  %v811_v41 = vmul.f32 %v742_v17, %v1262_v9  ;;  %v744_v24 = vmul.f32 %v712_v28, %v1332_v59 }
 0x11a   : > { %v714_v51 = vsel %vm682_vm7, 1.0, %v1101_v52  ;;  %v654_v43 = vadd.s32 %v1191_v27, %v620_v61  ;;  %vm684_vm9 = vcmp.lt.s32.totalorder %v652_v19, 384  ;;  %v622_v40 = vadd.s32 232, %v1187_v25 }
 0x11b   : > { %v841_v42 = vadd.f32 %v840_v38, %v810_v30  ;;  %v773_v32 = vadd.f32 %v772_v31, %v742_v17  ;;  %v745_v45 = vmul.f32 %v713_v39, %v1294_v26  ;;  %v812_v50 = vmul.f32 %v743_v21, %v1310_v37 }
 0x11c   : > { %vm685_vm10 = vcmp.lt.s32.totalorder %v653_v29, 384  ;;  %v715_v9 = vsel %vm683_vm8, 1.0, %v1101_v52  ;;  %v623_v46 = vadd.s32 240, %v1187_v25  ;;  %v655_v53 = vadd.s32 %v1191_v27, %v621_v13 }
 0x11d   : > { %v774_v48 = vadd.f32 %v773_v32, %v743_v21  ;;  %v842_v44 = vadd.f32 %v841_v42, %v811_v41  ;;  %v746_v16 = vmul.f32 %v714_v51, %v1323_v49  ;;  %v813_v58 = vmul.f32 %v744_v24, %v1332_v59 }
 0x11e   : > { %vm686_vm11 = vcmp.lt.s32.totalorder %v654_v43, 384  ;;  %v716_v60 = vsel %vm684_vm9, 1.0, %v1101_v52  ;;  %v624_v62 = vadd.s32 248, %v1187_v25  ;;  %v656_v37 = vadd.s32 %v1191_v27, %v622_v40 }
 0x11f   : > { %v843_v54 = vadd.f32 %v842_v44, %v812_v50  ;;  %v775_v56 = vadd.f32 %v774_v48, %v744_v24  ;;  %v814_v63 = vmul.f32 %v745_v45, %v1294_v26  ;;  %v747_v34 = vmul.f32 %v715_v9, %v1353_v20 }
 0x120   : > { %v717_v3 = vsel %vm685_vm10, 1.0, %v1101_v52  ;;  %v657_v5 = vadd.s32 %v1191_v27, %v623_v46  ;;  %vm687_vm12 = vcmp.lt.s32.totalorder %v655_v53, 384  ;;  %v815_v59 = vmul.f32 %v746_v16, %v1323_v49 }
 0x121   : > { %v776_v1 = vadd.f32 %v775_v56, %v745_v45  ;;  %v844_v35 = vadd.f32 %v843_v54, %v813_v58  ;;  %v748_v25 = vmul.f32 %v716_v60, %v1373_v47  ;;  %v718_v10 = vsel %vm686_vm11, 1.0, %v1101_v52 }
 0x122   : > { %v658_v26 = vadd.s32 %v1191_v27, %v624_v62  ;;  %vm688_vm13 = vcmp.lt.s32.totalorder %v656_v37, 384  ;;  %v749_v11 = vmul.f32 %v717_v3, %v1342_v6  ;;  %v816_v0 = vmul.f32 %v747_v34, %v1353_v20 }
 0x123   : > { %v845_v55 = vadd.f32 %v844_v35, %v814_v63  ;;  %v777_v8 = vadd.f32 %v776_v1, %v746_v16  ;;  %vm689_vm14 = vcmp.lt.s32.totalorder %v657_v5, 384  ;;  %v719_v15 = vsel %vm687_vm12, 1.0, %v1101_v52 }
 0x124   : > { %v750_v49 = vmul.f32 %v718_v10, %v1364_v36  ;;  %v817_v12 = vmul.f32 %v748_v25, %v1373_v47  ;;  %vm690_vm15 = vcmp.lt.s32.totalorder %v658_v26, 384  ;;  %v720_v18 = vsel %vm688_vm13, 1.0, %v1101_v52 }
 0x125   : > { %v778_v14 = vadd.f32 %v777_v8, %v747_v34  ;;  %v846_v2 = vadd.f32 %v845_v55, %v815_v59  ;;  %v818_v27 = vmul.f32 %v749_v11, %v1342_v6  ;;  %v751_v61 = vmul.f32 %v719_v15, %v1391_v7 }
 0x126   : > { %v721_v20 = vsel %vm689_vm14, 1.0, %v1101_v52  ;;  %v819_v19 = vmul.f32 %v750_v49, %v1364_v36  ;;  %v752_v38 = vmul.f32 %v720_v18, %v1412_v33  ;;  %v722_v21 = vsel %vm690_vm15, 1.0, %v1101_v52 }
 0x127   : > { %v847_v4 = vadd.f32 %v846_v2, %v816_v0  ;;  %v779_v17 = vadd.f32 %v778_v14, %v748_v25  ;;  %v753_v47 = vmul.f32 %v721_v20, %v1382_v57  ;;  %v820_v29 = vmul.f32 %v751_v61, %v1391_v7 }
 0x128   : > { %v754_v41 = vmul.f32 %v722_v21, %v1403_v22  ;;  %v821_v32 = vmul.f32 %v752_v38, %v1412_v33  ;;  %vm861_vm0 = vcmask 1040384  }
 0x129   : > { %v780_v23 = vadd.f32 %v779_v17, %v749_v11  ;;  %v848_v28 = vadd.f32 %v847_v4, %v817_v12  ;;  %v822_v36 = vmul.f32 %v753_v47, %v1382_v57 }
 0x12a   : > { %v823_v43 = vmul.f32 %v754_v41, %v1403_v22 }
 0x12b   : > { %v849_v30 = vadd.f32 %v848_v28, %v818_v27  ;;  %v781_v31 = vadd.f32 %v780_v23, %v750_v49 }
 0x12d   : > { %v782_v39 = vadd.f32 %v781_v31, %v751_v61  ;;  %v850_v6 = vadd.f32 %v849_v30, %v819_v19 }
 0x12f   : > { %v851_v13 = vadd.f32 %v850_v6, %v820_v29  ;;  %v783_v42 = vadd.f32 %v782_v39, %v752_v38 }
 0x131   : > { %v784_v24 = vadd.f32 %v783_v42, %v753_v47  ;;  %v852_v51 = vadd.f32 %v851_v13, %v821_v32 }
 0x133   : > { %v785_v40 = vadd.f32 %v784_v24, %v754_v41  ;;  %v853_v52 = vadd.f32 %v852_v51, %v822_v36 }
 0x135   : > { %v786_v45 = vrot.slane %v785_v40, 4  ;;  %v854_v48 = vadd.f32 %v853_v52, %v823_v43 }
 0x137   : > { %v787_v50 = vadd.f32 %v786_v45, %v785_v40  ;;  %v855_v44 = vrot.slane %v854_v48, 4 }
 0x139   : > { %v788_v7 = vrot.slane %v787_v50, 2  ;;  %v856_v9 = vadd.f32 %v855_v44, %v854_v48 }
 0x13b   : > { %v789_v46 = vadd.f32 %v788_v7, %v787_v50  ;;  %v857_v53 = vrot.slane %v856_v9, 2 }
 0x13d   : > { %v790_v54 = vrot.slane %v789_v46, 1  ;;  %v858_v16 = vadd.f32 %v857_v53, %v856_v9 }
 0x13f   : > { %v859_v56 = vrot.slane %v858_v16, 1  ;;  %v791_v33 = vadd.f32 %v790_v54, %v789_v46  ;;  %866 = sbr.rel (%p968_p4) target bundleno = 326 (0x146), region = 36 }
 0x141   : > { %v860_v57 = vadd.f32 %v859_v56, %v858_v16 }
 0x143   : > { %v862_v58 = vsel %vm861_vm0, %v791_v33, %v860_v57 }
 0x144   : > { %v1102_v22 = vmov 0.0  }
 0x145   : > { %867 = vst [vmem:[%s1510_s4] sm:$0x3] %v1102_v22 }
 0x146 PF:  {}
 0x14c   : > { %v868_v60 = vld [vmem:[%s1510_s4] sm:$0x3] }
 0x14d   : > { %v869_v62 = vadd.f32 %v868_v60, %v862_v58 }
 0x14f   : > { %870 = vst [vmem:[%s1510_s4] sm:$0x3] %v869_v62 }
 0x150 PF: > { %s15_s15 = sadd.s32 1, %s1099_s15  }
 0x151   : > { %p12_p5 = scmp.ge.s32.totalorder %s15_s15, 4  }
 0x153   :  { %14 = sbr.rel (!%p12_p5) target bundleno = 1 (0x1), region = 74 }

// kernel: _lambda_.16
= control target key start
LH: loop header
LB: loop body
LE: loop exit
PB: predicated region body
PF: predicated region fallthrough
CT: control target
= control target key end

     0   :  { %v119_v7 = vmov 1966171168   ;;  %v32_v9 = vlaneseq  ;;  %s202_s1 = inlined_call_operand.vmem [shape: f32[2,128], index: 1, kind: input, shape index: {}]   ;;  %s203_s0 = inlined_call_operand.vmem [shape: f32[64,128], index: 0, kind: input, shape index: {}]   ;;  %s204_s2 = inlined_call_operand.vmem [shape: f32[1,128], index: 2, kind: input, shape index: {}]   ;;  %s205_s3 = inlined_call_operand.vmem [shape: f32[1,128], index: 3, kind: input, shape index: {}]   ;;  %s206_s4 = inlined_call_operand.vmem [shape: f32[64,128], index: 4, kind: output, shape index: {}]  }
   0x1   :  { %v17_v0 = vld [vmem:[%s202_s1] sm:$0x3]  ;;  %v30_v8 = vunpack.c.l.s4 %v119_v7  ;;  %v47_v20 = vld [vmem:[%s203_s0 + $0x8] sm:$0xff]  ;;  %v48_v21 = vld [vmem:[%s203_s0 + $0x10] sm:$0xff] }
   0x2   :  { %v18_v1 = vmul.f32 0.015625, %v17_v0  ;;  %v33_v11 = vshrl.u32 %v32_v9, 7  ;;  %v25_v17 = vld [vmem:[%s204_s2] sm:$0x1]  ;;  %v49_v22 = vld [vmem:[%s203_s0 + $0x18] sm:$0xff]  ;;  %v51_v25 = vld [vmem:[%s203_s0 + $0x28] sm:$0xff] }
   0x3   :  { %v31_v10 = vunpack.c.0.s8 %v30_v8  ;;  %v46_v19 = vld [vmem:[%s203_s0] sm:$0xff]  ;;  %v52_v26 = vld [vmem:[%s203_s0 + $0x30] sm:$0xff]  ;;  %v53_v27 = vld [vmem:[%s203_s0 + $0x38] sm:$0xff] }
   0x4   :  { %v19_v2 = vmul.f32 %v18_v1, %v18_v1  ;;  %v56_v13 = vsub.s32 0, %v33_v11  ;;  %v50_v23 = vld [vmem:[%s203_s0 + $0x20] sm:$0xff] }
   0x5   :  { %v34_v12 = vsub.s32 %v31_v10, %v33_v11  ;;  %v115_v38 = vld [vmem:[%s205_s3] ss:$0 sm:$0xff] }
   0x6   :  { %v21_v3 = vrot.slane %v19_v2, 7  ;;  %v57_v16 = vrot.slane %v18_v1, %v56_v13 }
   0x8   :  { %v23_v4 = vsub.f32 %v18_v1, %v21_v3  ;;  %v58_v28 = vsub.f32 %v46_v19, %v57_v16  ;;  %v59_v30 = vsub.f32 %v47_v20, %v57_v16  ;;  %v60_v31 = vsub.f32 %v48_v21, %v57_v16 }
   0x9   :  { %v61_v32 = vsub.f32 %v49_v22, %v57_v16  ;;  %v62_v33 = vsub.f32 %v50_v23, %v57_v16  ;;  %v63_v34 = vsub.f32 %v51_v25, %v57_v16  ;;  %v64_v35 = vsub.f32 %v52_v26, %v57_v16 }
   0xa   :  { %v24_v5 = vmax.f32 %v23_v4, 0.0  ;;  %v65_v36 = vsub.f32 %v53_v27, %v57_v16 }
   0xc   :  { %v26_v6 = vadd.f32 1e-05, %v24_v5 }
   0xe   :  { %117 = vrsqrt.f32 %v26_v6 }
  0x1b   :  { %v118_v14 = vpop.eup %117 }
  0x1c   :  { %v35_v15 = vrot.slane %v118_v14, %v34_v12 }
  0x1e   :  { %v36_v18 = vcombine.high %v35_v15, %v35_v15 }
  0x20   :  { %v43_v24 = vrot.slane %v36_v18, %v34_v12 }
  0x22   :  { %v45_v29 = vmul.f32 %v43_v24, %v25_v17 }
  0x24   :  { %v70_v37 = vrot.slane %v45_v29, %v56_v13 }
  0x26   :  { %v72_v39 = vmul.f32 %v70_v37, %v58_v28  ;;  %v73_v40 = vmul.f32 %v70_v37, %v59_v30  ;;  %v74_v41 = vmul.f32 %v70_v37, %v60_v31  ;;  %v75_v42 = vmul.f32 %v70_v37, %v61_v32 }
  0x27   :  { %v76_v43 = vmul.f32 %v70_v37, %v62_v33  ;;  %v77_v44 = vmul.f32 %v70_v37, %v63_v34  ;;  %v78_v45 = vmul.f32 %v70_v37, %v64_v35  ;;  %v79_v46 = vmul.f32 %v70_v37, %v65_v36 }
  0x28   :  { %v87_v47 = vadd.f32 %v115_v38, %v72_v39  ;;  %v88_v48 = vadd.f32 %v115_v38, %v73_v40  ;;  %v89_v49 = vadd.f32 %v115_v38, %v74_v41  ;;  %v90_v50 = vadd.f32 %v115_v38, %v75_v42 }
  0x29   :  { %v91_v51 = vadd.f32 %v115_v38, %v76_v43  ;;  %v92_v52 = vadd.f32 %v115_v38, %v77_v44  ;;  %v93_v53 = vadd.f32 %v115_v38, %v78_v45  ;;  %v94_v54 = vadd.f32 %v115_v38, %v79_v46 }
  0x2a   :  { %v95_v55 = vmax.f32 %v87_v47, 0.0  ;;  %v96_v56 = vmax.f32 %v88_v48, 0.0  ;;  %v97_v57 = vmax.f32 %v89_v49, 0.0  ;;  %v98_v58 = vmax.f32 %v90_v50, 0.0 }
  0x2b   :  { %v99_v59 = vmax.f32 %v91_v51, 0.0  ;;  %v100_v60 = vmax.f32 %v92_v52, 0.0  ;;  %v101_v61 = vmax.f32 %v93_v53, 0.0  ;;  %v102_v62 = vmax.f32 %v94_v54, 0.0 }
  0x2c   :  { %103 = vst [vmem:[%s206_s4] sm:$0xff] %v95_v55  ;;  %104 = vst [vmem:[%s206_s4 + $0x8] sm:$0xff] %v96_v56 }
  0x2d   :  { %105 = vst [vmem:[%s206_s4 + $0x10] sm:$0xff] %v97_v57  ;;  %106 = vst [vmem:[%s206_s4 + $0x18] sm:$0xff] %v98_v58 }
  0x2e   :  { %107 = vst [vmem:[%s206_s4 + $0x20] sm:$0xff] %v99_v59  ;;  %108 = vst [vmem:[%s206_s4 + $0x28] sm:$0xff] %v100_v60 }
  0x2f   :  { %109 = vst [vmem:[%s206_s4 + $0x30] sm:$0xff] %v101_v61  ;;  %110 = vst [vmem:[%s206_s4 + $0x38] sm:$0xff] %v102_v62 }

// kernel: _lambda_.15
= control target key start
LH: loop header
LB: loop body
LE: loop exit
PB: predicated region body
PF: predicated region fallthrough
CT: control target
= control target key end

     0   :  { %v1032_v60 = vmov 0.0   ;;  %vm752_vm0 = vcmask 1040384   ;;  %s1274_s1 = inlined_call_operand.vmem [shape: bf16[640,128], index: 1, kind: input, shape index: {}]   ;;  %s1275_s0 = inlined_call_operand.vmem [shape: bf16[64,640], index: 0, kind: input, shape index: {}]   ;;  %s1276_s4 = inlined_call_operand.vmem [shape: f32[2,128], index: 4, kind: output, shape index: {1}]   ;;  %s1277_s2 = inlined_call_operand.vmem [shape: f32[1,128], index: 2, kind: input, shape index: {}]   ;;  %s1278_s3 = inlined_call_operand.vmem [shape: f32[64,128], index: 3, kind: output, shape index: {0}]  }
   0x1   :  { %v964_v0 = vld [vmem:[%s1274_s1 + $0x78] sm:$0xff]   ;;  %v968_v4 = vld [vmem:[%s1274_s1 + $0x70] sm:$0xff]   ;;  %v972_v8 = vld [vmem:[%s1274_s1 + $0x68] sm:$0xff]   ;;  %758 = vst [vmem:[%s1276_s4] sm:$0x3] %v1032_v60 }
   0x2   :  { %v965_v1 = vld [vmem:[%s1274_s1 + $0xf8] sm:$0xff]   ;;  %831 = vmatprep.subr.bf16.mxu0 %v964_v0  ;;  %v969_v5 = vld [vmem:[%s1274_s1 + $0xf0] sm:$0xff]   ;;  %v973_v9 = vld [vmem:[%s1274_s1 + $0xe8] sm:$0xff]  }
   0x3   :  { %v966_v2 = vld [vmem:[%s1274_s1 + $0x38] sm:$0xff]   ;;  %871 = vmatprep.subr.bf16.mxu1 %v965_v1  ;;  %v970_v6 = vld [vmem:[%s1274_s1 + $0x30] sm:$0xff]   ;;  %v974_v10 = vld [vmem:[%s1274_s1 + $0x28] sm:$0xff]  }
   0x4   :  { %v967_v3 = vld [vmem:[%s1274_s1 + $0xb8] sm:$0xff]   ;;  %832 = vmatpush3.bf16.msra.mxu0 %v966_v2  ;;  %v971_v7 = vld [vmem:[%s1274_s1 + $0xb0] sm:$0xff]   ;;  %v975_v11 = vld [vmem:[%s1274_s1 + $0xa8] sm:$0xff]  }
   0x5   :  { %872 = vmatpush3.bf16.msra.mxu1 %v967_v3  ;;  %833 = vmatprep.subr.bf16.mxu0 %v968_v4  ;;  %v976_v12 = vld [vmem:[%s1274_s1 + $0x60] sm:$0xff]   ;;  %v980_v16 = vld [vmem:[%s1274_s1 + $0x58] sm:$0xff]   ;;  %v984_v20 = vld [vmem:[%s1274_s1 + $0x50] sm:$0xff]  }
   0x6   :  { %873 = vmatprep.subr.bf16.mxu1 %v969_v5  ;;  %v977_v13 = vld [vmem:[%s1274_s1 + $0xe0] sm:$0xff]   ;;  %v981_v17 = vld [vmem:[%s1274_s1 + $0xd8] sm:$0xff]   ;;  %v985_v21 = vld [vmem:[%s1274_s1 + $0xd0] sm:$0xff]  }
   0x7   :  { %v978_v14 = vld [vmem:[%s1274_s1 + $0x20] sm:$0xff]   ;;  %v982_v18 = vld [vmem:[%s1274_s1 + $0x18] sm:$0xff]   ;;  %v986_v22 = vld [vmem:[%s1274_s1 + $0x10] sm:$0xff]  }
   0x8   :  { %834 = vmatpush3.bf16.msra.mxu0 %v970_v6  ;;  %v979_v15 = vld [vmem:[%s1274_s1 + $0xa0] sm:$0xff]   ;;  %v983_v19 = vld [vmem:[%s1274_s1 + $0x98] sm:$0xff]   ;;  %v987_v23 = vld [vmem:[%s1274_s1 + $0x90] sm:$0xff]  }
   0x9   :  { %874 = vmatpush3.bf16.msra.mxu1 %v971_v7  ;;  %835 = vmatprep.subr.bf16.mxu0 %v972_v8  ;;  %v988_v24 = vld [vmem:[%s1274_s1 + $0x48] sm:$0xff]   ;;  %v992_v28 = vld [vmem:[%s1274_s1 + $0x40] sm:$0xff]   ;;  %v1002_v36 = vld [vmem:[%s1274_s1 + $0x138] sm:$0xff]  }
   0xa   :  { %875 = vmatprep.subr.bf16.mxu1 %v973_v9  ;;  %v989_v25 = vld [vmem:[%s1274_s1 + $0xc8] sm:$0xff]   ;;  %v993_v29 = vld [vmem:[%s1274_s1 + $0xc0] sm:$0xff]   ;;  %v1003_v37 = vld [vmem:[%s1274_s1 + $0x130] sm:$0xff]  }
   0xb   :  { %v990_v26 = vld [vmem:[%s1274_s1 + $0x8] sm:$0xff]   ;;  %v994_v30 = vld [vmem:[%s1274_s1] sm:$0xff]   ;;  %v1014_v45 = vld [vmem:[%s1275_s0 + $0x5c] ss:$20 sps:$4 sm:$0xff]  }
   0xc   :  { %836 = vmatpush3.bf16.msra.mxu0 %v974_v10  ;;  %v991_v27 = vld [vmem:[%s1274_s1 + $0x88] sm:$0xff]   ;;  %v995_v31 = vld [vmem:[%s1274_s1 + $0x80] sm:$0xff]   ;;  %v1018_v46 = vld [vmem:[%s1274_s1 + $0x118] sm:$0xff]  }
   0xd   :  { %876 = vmatpush3.bf16.msra.mxu1 %v975_v11  ;;  %837 = vmatprep.subr.bf16.mxu0 %v976_v12  ;;  %v996_v32 = vld [vmem:[%s1275_s0] ss:$20 sps:$4 sm:$0xff]   ;;  %v998_v33 = vld [vmem:[%s1275_s0 + $0x4] ss:$20 sps:$4 sm:$0xff]   ;;  %v999_v34 = vld [vmem:[%s1275_s0 + $0x8] ss:$20 sps:$4 sm:$0xff]  }
   0xe   :  { %877 = vmatprep.subr.bf16.mxu1 %v977_v13  ;;  %v1001_v35 = vld [vmem:[%s1275_s0 + $0xc] ss:$20 sps:$4 sm:$0xff]   ;;  %504 = vmatprep.mubr.bf16.mxu0 %v998_v33  ;;  %v1006_v39 = vld [vmem:[%s1275_s0 + $0x34] ss:$20 sps:$4 sm:$0xff]   ;;  %v1009_v42 = vld [vmem:[%s1275_s0 + $0x30] ss:$20 sps:$4 sm:$0xff]  }
   0xf   :  { %569 = vmatprep.mubr.bf16.mxu1 %v1001_v35  ;;  %v1004_v38 = vld [vmem:[%s1275_s0 + $0x2c] ss:$20 sps:$4 sm:$0xff]   ;;  %v1008_v40 = vld [vmem:[%s1275_s0 + $0x28] ss:$20 sps:$4 sm:$0xff]   ;;  %v1016_v47 = vld [vmem:[%s1275_s0 + $0x50] ss:$20 sps:$4 sm:$0xff]  }
  0x10   :  { %838 = vmatpush3.bf16.msra.mxu0 %v978_v14  ;;  %v1010_v41 = vld [vmem:[%s1274_s1 + $0x128] sm:$0xff]   ;;  %v1011_v44 = vld [vmem:[%s1274_s1 + $0x120] sm:$0xff]   ;;  %v1020_v49 = vld [vmem:[%s1275_s0 + $0x7c] ss:$20 sps:$4 sm:$0xff]  }
  0x11   :  { %878 = vmatpush3.bf16.msra.mxu1 %v979_v15  ;;  %839 = vmatprep.subr.bf16.mxu0 %v980_v16  ;;  %v1012_v43 = vld [vmem:[%s1275_s0 + $0x54] ss:$20 sps:$4 sm:$0xff]   ;;  %v1017_v48 = vld [vmem:[%s1275_s0 + $0x58] ss:$20 sps:$4 sm:$0xff]   ;;  %v1028_v55 = vld [vmem:[%s1275_s0 + $0x10] ss:$20 sps:$4 sm:$0xff]  }
  0x12   :  { %879 = vmatprep.subr.bf16.mxu1 %v981_v17  ;;  %v1022_v50 = vld [vmem:[%s1275_s0 + $0x84] ss:$20 sps:$4 sm:$0xff]   ;;  %v1019_v51 = vld [vmem:[%s1274_s1 + $0x110] sm:$0xff]   ;;  %v1026_v52 = vld [vmem:[%s1274_s1 + $0x108] sm:$0xff]  }
  0x13   :  { %v1024_v53 = vld [vmem:[%s1275_s0 + $0x78] ss:$20 sps:$4 sm:$0xff]   ;;  %v1025_v54 = vld [vmem:[%s1275_s0 + $0x80] ss:$20 sps:$4 sm:$0xff]   ;;  %v1031_v59 = vld [vmem:[%s1275_s0 + $0x88] ss:$20 sps:$4 sm:$0xff]  }
  0x14   :  { %840 = vmatpush3.bf16.msra.mxu0 %v982_v18  ;;  %v1029_v56 = vld [vmem:[%s1275_s0 + $0x60] ss:$20 sps:$4 sm:$0xff]   ;;  %v1030_v58 = vld [vmem:[%s1275_s0 + $0x38] ss:$20 sps:$4 sm:$0xff]  }
  0x15   :  { %880 = vmatpush3.bf16.msra.mxu1 %v983_v19  ;;  %841 = vmatprep.subr.bf16.mxu0 %v984_v20  ;;  %v1027_v57 = vld [vmem:[%s1274_s1 + $0x100] sm:$0xff]  }
  0x16   :  { %881 = vmatprep.subr.bf16.mxu1 %v985_v21 }
  0x18   :  { %842 = vmatpush3.bf16.msra.mxu0 %v986_v22 }
  0x19   :  { %882 = vmatpush3.bf16.msra.mxu1 %v987_v23  ;;  %843 = vmatprep.subr.bf16.mxu0 %v988_v24 }
  0x1a   :  { %883 = vmatprep.subr.bf16.mxu1 %v989_v25  ;;  %v770_v25 = vld [vmem:[%s1277_s2] ss:$0 sm:$0xff] }
  0x1c   :  { %844 = vmatpush3.bf16.msra.mxu0 %v990_v26 }
  0x1d   :  { %884 = vmatpush3.bf16.msra.mxu1 %v991_v27  ;;  %845 = vmatprep.subr.bf16.mxu0 %v992_v28 }
  0x1e   :  { %885 = vmatprep.subr.bf16.mxu1 %v993_v29 }
  0x20   :  { %846 = vmatpush3.bf16.msra.mxu0 %v994_v30 }
  0x21   :  { %886 = vmatpush3.bf16.msra.mxu1 %v995_v31  ;;  %923 = vmatprep.subr.bf16.mxu0 %v1002_v36 }
  0x22   :  { %947 = vmatprep.subr.bf16.mxu1 %v1002_v36 }
  0x23   :  { %505 = vmatmul.mubr.bf16.vlgmr.msra.gmra.mxu0 %v996_v32 }
  0x24   :  { %570 = vmatmul.mubr.bf16.vlgmr.msra.gmra.mxu1 %v999_v34  ;;  %924 = vmatpush3.bf16.msra.mxu0 %v1002_v36 }
  0x25   :  { %955 = vmatpush3.bf16.msra.mxu1 %v1002_v36  ;;  %925 = vmatprep.subr.bf16.mxu0 %v1003_v37 }
  0x26   :  { %948 = vmatprep.subr.bf16.mxu1 %v1003_v37  ;;  %512 = vmatprep.mubr.bf16.mxu0 %v1004_v38 }
  0x27   :  { %577 = vmatprep.mubr.bf16.mxu1 %v1006_v39 }
  0x28   :  { %926 = vmatpush3.bf16.msra.mxu0 %v1003_v37 }
  0x29   :  { %956 = vmatpush3.bf16.msra.mxu1 %v1003_v37  ;;  %927 = vmatprep.subr.bf16.mxu0 %v1010_v41 }
  0x2a   :  { %949 = vmatprep.subr.bf16.mxu1 %v1010_v41 }
  0x2b   :  { %513 = vmatmul.mubr.bf16.gmra.mxu0 %v1008_v40 }
  0x2c   :  { %578 = vmatmul.mubr.bf16.gmra.mxu1 %v1009_v42  ;;  %520 = vmatprep.mubr.bf16.mxu0 %v1012_v43 }
  0x2d   :  { %928 = vmatpush3.bf16.msra.mxu0 %v1010_v41  ;;  %585 = vmatprep.mubr.bf16.mxu1 %v1014_v45 }
  0x2e   :  { %957 = vmatpush3.bf16.msra.mxu1 %v1010_v41  ;;  %929 = vmatprep.subr.bf16.mxu0 %v1011_v44 }
  0x2f   :  { %950 = vmatprep.subr.bf16.mxu1 %v1011_v44 }
  0x31   :  { %930 = vmatpush3.bf16.msra.mxu0 %v1011_v44 }
  0x32   :  { %958 = vmatpush3.bf16.msra.mxu1 %v1011_v44  ;;  %931 = vmatprep.subr.bf16.mxu0 %v1018_v46 }
  0x33   :  { %521 = vmatmul.mubr.bf16.gmra.mxu0 %v1016_v47  ;;  %951 = vmatprep.subr.bf16.mxu1 %v1018_v46 }
  0x34   :  { %586 = vmatmul.mubr.bf16.gmra.mxu1 %v1017_v48  ;;  %528 = vmatprep.mubr.bf16.mxu0 %v1020_v49 }
  0x35   :  { %932 = vmatpush3.bf16.msra.mxu0 %v1018_v46  ;;  %593 = vmatprep.mubr.bf16.mxu1 %v1022_v50 }
  0x36   :  { %959 = vmatpush3.bf16.msra.mxu1 %v1018_v46  ;;  %933 = vmatprep.subr.bf16.mxu0 %v1019_v51 }
  0x37   :  { %952 = vmatprep.subr.bf16.mxu1 %v1019_v51 }
  0x39   :  { %934 = vmatpush3.bf16.msra.mxu0 %v1019_v51 }
  0x3a   :  { %960 = vmatpush3.bf16.msra.mxu1 %v1019_v51  ;;  %935 = vmatprep.subr.bf16.mxu0 %v1026_v52 }
  0x3b   :  { %529 = vmatmul.mubr.bf16.gmra.mxu0 %v1024_v53  ;;  %953 = vmatprep.subr.bf16.mxu1 %v1026_v52 }
  0x3c   :  { %594 = vmatmul.mubr.bf16.gmra.mxu1 %v1025_v54  ;;  %939 = vmatprep.mubr.bf16.mxu0 %v1028_v55 }
  0x3d   :  { %936 = vmatpush3.bf16.msra.mxu0 %v1026_v52  ;;  %943 = vmatprep.mubr.bf16.mxu1 %v1029_v56 }
  0x3e   :  { %961 = vmatpush3.bf16.msra.mxu1 %v1026_v52  ;;  %937 = vmatprep.subr.bf16.mxu0 %v1027_v57 }
  0x3f   :  { %954 = vmatprep.subr.bf16.mxu1 %v1027_v57 }
  0x41   :  { %938 = vmatpush3.bf16.msra.mxu0 %v1027_v57 }
  0x42   :  { %962 = vmatpush3.bf16.msra.mxu1 %v1027_v57 }
  0x44   :  { %940 = vmatmul.mubr.bf16.vlgmr.msra.gmra.mxu0 %v1030_v58 }
  0x45   :  { %944 = vmatmul.mubr.bf16.vlgmr.msra.gmra.mxu1 %v1031_v59 }
  0xe3   :  { %v847_v61 = vpop.f32.mrf.mxu0 }
  0xe4   :  { %v887_v62 = vpop.f32.mrf.mxu1 }
  0xe5   :  { %v848_v63 = vpop.f32.mrf.mxu0 }
  0xe6   :  { %v888_v0 = vpop.f32.mrf.mxu1  ;;  %v849_v23 = vadd.f32 %v848_v63, %v847_v61 }
  0xe7   :  { %v850_v1 = vpop.f32.mrf.mxu0  ;;  %v889_v36 = vadd.f32 %v888_v0, %v887_v62 }
  0xe8   :  { %v890_v2 = vpop.f32.mrf.mxu1  ;;  %v507_v35 = vadd.f32 %v849_v23, %v770_v25 }
  0xe9   :  { %v851_v3 = vpop.f32.mrf.mxu0 }
  0xea   :  { %v891_v4 = vpop.f32.mrf.mxu1  ;;  %v852_v39 = vadd.f32 %v851_v3, %v850_v1  ;;  %v572_v53 = vadd.f32 %v889_v36, %v507_v35 }
  0xeb   :  { %v853_v5 = vpop.f32.mrf.mxu0  ;;  %v892_v55 = vadd.f32 %v891_v4, %v890_v2 }
  0xec   :  { %v893_v6 = vpop.f32.mrf.mxu1  ;;  %v510_v54 = vadd.f32 %v852_v39, %v770_v25 }
  0xed   :  { %v854_v7 = vpop.f32.mrf.mxu0 }
  0xee   :  { %v894_v8 = vpop.f32.mrf.mxu1  ;;  %v855_v21 = vadd.f32 %v854_v7, %v853_v5  ;;  %v575_v7 = vadd.f32 %v892_v55, %v510_v54 }
  0xef   :  { %v856_v9 = vpop.f32.mrf.mxu0  ;;  %v895_v31 = vadd.f32 %v894_v8, %v893_v6 }
  0xf0   :  { %v896_v10 = vpop.f32.mrf.mxu1  ;;  %v515_v30 = vadd.f32 %v855_v21, %v770_v25 }
  0xf1   :  { %v857_v11 = vpop.f32.mrf.mxu0 }
  0xf2   :  { %v897_v12 = vpop.f32.mrf.mxu1  ;;  %v858_v32 = vadd.f32 %v857_v11, %v856_v9  ;;  %v580_v50 = vadd.f32 %v895_v31, %v515_v30 }
  0xf3   :  { %v859_v13 = vpop.f32.mrf.mxu0  ;;  %v898_v48 = vadd.f32 %v897_v12, %v896_v10 }
  0xf4   :  { %v899_v14 = vpop.f32.mrf.mxu1  ;;  %v518_v47 = vadd.f32 %v858_v32, %v770_v25 }
  0xf5   :  { %v860_v15 = vpop.f32.mrf.mxu0 }
  0xf6   :  { %v900_v16 = vpop.f32.mrf.mxu1  ;;  %v861_v26 = vadd.f32 %v860_v15, %v859_v13  ;;  %v583_v3 = vadd.f32 %v898_v48, %v518_v47  ;;  %v759_v48 = vld [vmem:[%s1276_s4] sm:$0x3] }
  0xf7   :  { %v862_v17 = vpop.f32.mrf.mxu0  ;;  %v901_v41 = vadd.f32 %v900_v16, %v899_v14 }
  0xf8   :  { %v902_v18 = vpop.f32.mrf.mxu1  ;;  %v523_v40 = vadd.f32 %v861_v26, %v770_v25 }
  0xf9   :  { %v863_v19 = vpop.f32.mrf.mxu0 }
  0xfa   :  { %v903_v20 = vpop.f32.mrf.mxu1  ;;  %v864_v43 = vadd.f32 %v863_v19, %v862_v17  ;;  %v588_v58 = vadd.f32 %v901_v41, %v523_v40 }
  0xfb   :  { %v865_v22 = vpop.f32.mrf.mxu0  ;;  %v904_v60 = vadd.f32 %v903_v20, %v902_v18 }
  0xfc   :  { %v905_v24 = vpop.f32.mrf.mxu1  ;;  %v526_v59 = vadd.f32 %v864_v43, %v770_v25 }
  0xfd   :  { %v866_v27 = vpop.f32.mrf.mxu0 }
  0xfe   :  { %v867_v28 = vadd.f32 %v866_v27, %v865_v22  ;;  %v906_v29 = vpop.f32.mrf.mxu1  ;;  %v591_v10 = vadd.f32 %v904_v60, %v526_v59 }
  0xff   :  { %v907_v33 = vadd.f32 %v906_v29, %v905_v24  ;;  %v868_v34 = vpop.f32.mrf.mxu0 }
 0x100   :  { %v531_v37 = vadd.f32 %v867_v28, %v770_v25  ;;  %v908_v38 = vpop.f32.mrf.mxu1 }
 0x101   :  { %v869_v42 = vpop.f32.mrf.mxu0 }
 0x102   :  { %v870_v44 = vadd.f32 %v869_v42, %v868_v34  ;;  %v909_v45 = vpop.f32.mrf.mxu1  ;;  %v596_v46 = vadd.f32 %v907_v33, %v531_v37 }
 0x103   :  { %v910_v49 = vadd.f32 %v909_v45, %v908_v38 }
 0x104   :  { %v534_v51 = vadd.f32 %v870_v44, %v770_v25  ;;  %v941_v52 = vpop.f32.mrf.mxu0 }
 0x105   :  { %v645_v56 = vadd.f32 %v941_v52, %v580_v50  ;;  %v945_v57 = vpop.f32.mrf.mxu1 }
 0x106   :  { %v661_v61 = vadd.f32 %v945_v57, %v596_v46  ;;  %v636_v62 = vpop.f32.mrf.mxu0  ;;  %v599_v63 = vadd.f32 %v910_v49, %v534_v51 }
 0x107   :  { %669 = vst [vmem:[%s1278_s3 + $0x10] sm:$0xff] %v645_v56  ;;  %v637_v0 = vadd.f32 %v636_v62, %v572_v53  ;;  %v652_v1 = vpop.f32.mrf.mxu1  ;;  %v733_v17 = vmul.f32 %v645_v56, %v645_v56 }
 0x108   :  { %673 = vst [vmem:[%s1278_s3 + $0x30] sm:$0xff] %v661_v61  ;;  %v653_v2 = vadd.f32 %v652_v1, %v588_v58  ;;  %v942_v4 = vpop.f32.mrf.mxu0  ;;  %v737_v29 = vmul.f32 %v661_v61, %v661_v61 }
 0x109   :  { %667 = vst [vmem:[%s1278_s3] sm:$0xff] %v637_v0  ;;  %v648_v5 = vadd.f32 %v942_v4, %v583_v3  ;;  %v946_v6 = vpop.f32.mrf.mxu1  ;;  %v731_v14 = vmul.f32 %v637_v0, %v637_v0 }
 0x10a   :  { %671 = vst [vmem:[%s1278_s3 + $0x20] sm:$0xff] %v653_v2  ;;  %v664_v8 = vadd.f32 %v946_v6, %v599_v63  ;;  %v639_v9 = vpop.f32.mrf.mxu0  ;;  %v735_v23 = vmul.f32 %v653_v2, %v653_v2 }
 0x10b   :  { %670 = vst [vmem:[%s1278_s3 + $0x18] sm:$0xff] %v648_v5  ;;  %v640_v11 = vadd.f32 %v639_v9, %v575_v7  ;;  %v655_v12 = vpop.f32.mrf.mxu1  ;;  %v734_v20 = vmul.f32 %v648_v5, %v648_v5 }
 0x10c   :  { %674 = vst [vmem:[%s1278_s3 + $0x38] sm:$0xff] %v664_v8  ;;  %v656_v13 = vadd.f32 %v655_v12, %v591_v10  ;;  %v738_v32 = vmul.f32 %v664_v8, %v664_v8 }
 0x10d   :  { %668 = vst [vmem:[%s1278_s3 + $0x8] sm:$0xff] %v640_v11  ;;  %v718_v15 = vadd.f32 %v640_v11, %v637_v0  ;;  %v732_v16 = vmul.f32 %v640_v11, %v640_v11 }
 0x10e   :  { %672 = vst [vmem:[%s1278_s3 + $0x28] sm:$0xff] %v656_v13  ;;  %v736_v27 = vmul.f32 %v656_v13, %v656_v13 }
 0x10f   :  { %v719_v18 = vadd.f32 %v718_v15, %v645_v56  ;;  %v739_v19 = vadd.f32 %v732_v16, %v731_v14 }
 0x111   :  { %v740_v21 = vadd.f32 %v739_v19, %v733_v17  ;;  %v720_v22 = vadd.f32 %v719_v18, %v648_v5 }
 0x113   :  { %v721_v24 = vadd.f32 %v720_v22, %v653_v2  ;;  %v741_v25 = vadd.f32 %v740_v21, %v734_v20 }
 0x115   :  { %v722_v26 = vadd.f32 %v721_v24, %v656_v13  ;;  %v742_v28 = vadd.f32 %v741_v25, %v735_v23 }
 0x117   :  { %v723_v30 = vadd.f32 %v722_v26, %v661_v61  ;;  %v743_v31 = vadd.f32 %v742_v28, %v736_v27 }
 0x119   :  { %v724_v33 = vadd.f32 %v723_v30, %v664_v8  ;;  %v744_v34 = vadd.f32 %v743_v31, %v737_v29 }
 0x11b   :  { %v725_v35 = vrot.slane %v724_v33, 4  ;;  %v745_v36 = vadd.f32 %v744_v34, %v738_v32 }
 0x11d   :  { %v726_v37 = vadd.f32 %v725_v35, %v724_v33  ;;  %v746_v38 = vrot.slane %v745_v36, 4 }
 0x11f   :  { %v727_v39 = vrot.slane %v726_v37, 2  ;;  %v747_v40 = vadd.f32 %v746_v38, %v745_v36 }
 0x121   :  { %v728_v41 = vadd.f32 %v727_v39, %v726_v37  ;;  %v748_v42 = vrot.slane %v747_v40, 2 }
 0x123   :  { %v729_v43 = vrot.slane %v728_v41, 1  ;;  %v749_v44 = vadd.f32 %v748_v42, %v747_v40 }
 0x125   :  { %v750_v45 = vrot.slane %v749_v44, 1  ;;  %v730_v46 = vadd.f32 %v729_v43, %v728_v41 }
 0x127   :  { %v751_v47 = vadd.f32 %v750_v45, %v749_v44 }
 0x129   :  { %v753_v49 = vsel %vm752_vm0, %v730_v46, %v751_v47 }
 0x12a   :  { %v760_v50 = vadd.f32 %v759_v48, %v753_v49 }
 0x12c   :  { %761 = vst [vmem:[%s1276_s4] sm:$0x3] %v760_v50 }

// kernel: _lambda_.18
= control target key start
LH: loop header
LB: loop body
LE: loop exit
PB: predicated region body
PF: predicated region fallthrough
CT: control target
= control target key end

     0   :  { %v32_v7 = vlaneseq  ;;  %v112_v8 = vmov 1966171168   ;;  %s171_s1 = inlined_call_operand.vmem [shape: f32[2,256], index: 1, kind: input, shape index: {}]   ;;  %s172_s0 = inlined_call_operand.vmem [shape: f32[16,256], index: 0, kind: input, shape index: {}]   ;;  %s173_s2 = inlined_call_operand.vmem [shape: f32[1,256], index: 2, kind: input, shape index: {}]   ;;  %s174_s3 = inlined_call_operand.vmem [shape: f32[1,256], index: 3, kind: input, shape index: {}]   ;;  %s175_s4 = inlined_call_operand.vmem [shape: f32[16,256], index: 4, kind: output, shape index: {}]  }
   0x1   :  { %v17_v0 = vld [vmem:[%s171_s1] sm:$0xf]  ;;  %v30_v9 = vunpack.c.l.s4 %v112_v8  ;;  %v40_v23 = vld [vmem:[%s172_s0 + $0x8] sm:$0xff]  ;;  %v41_v24 = vld [vmem:[%s172_s0 + $0x10] sm:$0xff] }
   0x2   :  { %v18_v1 = vmul.f32 0.0625, %v17_v0  ;;  %v33_v10 = vshrl.u32 %v32_v7, 7  ;;  %v25_v19 = vld [vmem:[%s173_s2] sm:$0x3]  ;;  %v42_v25 = vld [vmem:[%s172_s0 + $0x18] sm:$0xff] }
   0x3   :  { %v31_v12 = vunpack.c.0.s8 %v30_v9  ;;  %v39_v21 = vld [vmem:[%s172_s0] sm:$0xff] }
   0x4   :  { %v19_v2 = vmul.f32 %v18_v1, %v18_v1  ;;  %v46_v11 = vsub.s32 0, %v33_v10  ;;  %v50_v13 = vsub.s32 2, %v33_v10  ;;  %v73_v27 = vsub.s32 1, %v33_v10  ;;  %v81_v29 = vld [vmem:[%s174_s3] sm:$0x3] }
   0x5   :  { %v34_v15 = vsub.s32 %v31_v12, %v33_v10 }
   0x6   :  { %v21_v3 = vrot.slane %v19_v2, 7  ;;  %v47_v14 = vrot.slane %v18_v1, %v46_v11  ;;  %v51_v16 = vrot.slane %v18_v1, %v50_v13  ;;  %v86_v35 = vrot.slane %v81_v29, %v46_v11 }
   0x7   :  { %v90_v37 = vrot.slane %v81_v29, %v73_v27 }
   0x8   :  { %v23_v4 = vsub.f32 %v18_v1, %v21_v3  ;;  %v57_v18 = vrot.slane %v47_v14, %v46_v11  ;;  %v61_v22 = vrot.slane %v51_v16, %v46_v11 }
   0xa   :  { %v24_v5 = vmax.f32 %v23_v4, 0.0  ;;  %v62_v28 = vsub.f32 %v39_v21, %v57_v18  ;;  %v63_v31 = vsub.f32 %v40_v23, %v61_v22  ;;  %v64_v32 = vsub.f32 %v41_v24, %v57_v18 }
   0xb   :  { %v65_v33 = vsub.f32 %v42_v25, %v61_v22 }
   0xc   :  { %v26_v6 = vadd.f32 1e-05, %v24_v5 }
   0xe   :  { %110 = vrsqrt.f32 %v26_v6 }
  0x1b   :  { %v111_v17 = vpop.eup %110 }
  0x1c   :  { %v35_v20 = vrot.slane %v111_v17, %v34_v15 }
  0x1e   :  { %v36_v26 = vcombine.high %v35_v20, %v35_v20 }
  0x20   :  { %v38_v30 = vmul.f32 %v36_v26, %v25_v19 }
  0x22   :  { %v70_v34 = vrot.slane %v38_v30, %v46_v11  ;;  %v74_v36 = vrot.slane %v38_v30, %v73_v27 }
  0x24   :  { %v77_v38 = vmul.f32 %v70_v34, %v62_v28  ;;  %v78_v39 = vmul.f32 %v74_v36, %v63_v31  ;;  %v79_v40 = vmul.f32 %v70_v34, %v64_v32  ;;  %v80_v41 = vmul.f32 %v74_v36, %v65_v33 }
  0x26   :  { %v93_v42 = vadd.f32 %v86_v35, %v77_v38  ;;  %v94_v43 = vadd.f32 %v90_v37, %v78_v39  ;;  %v95_v44 = vadd.f32 %v86_v35, %v79_v40  ;;  %v96_v45 = vadd.f32 %v90_v37, %v80_v41 }
  0x28   :  { %v97_v46 = vmax.f32 %v93_v42, 0.0  ;;  %v98_v47 = vmax.f32 %v94_v43, 0.0  ;;  %v99_v48 = vmax.f32 %v95_v44, 0.0  ;;  %v100_v49 = vmax.f32 %v96_v45, 0.0 }
  0x2a   :  { %101 = vst [vmem:[%s175_s4] sm:$0xff] %v97_v46  ;;  %102 = vst [vmem:[%s175_s4 + $0x8] sm:$0xff] %v98_v47 }
  0x2b   :  { %103 = vst [vmem:[%s175_s4 + $0x10] sm:$0xff] %v99_v48  ;;  %104 = vst [vmem:[%s175_s4 + $0x18] sm:$0xff] %v100_v49 }

// kernel: _lambda_.17
= control target key start
LH: loop header
LB: loop body
LE: loop exit
PB: predicated region body
PF: predicated region fallthrough
CT: control target
= control target key end

     0   :  { %vm1215_vm0 = vcmask 1040384   ;;  %s2146_s1 = inlined_call_operand.vmem [shape: bf16[1152,256], index: 1, kind: input, shape index: {}]   ;;  %s2147_s0 = inlined_call_operand.vmem [shape: bf16[16,1152], index: 0, kind: input, shape index: {}]   ;;  %s2148_s4 = inlined_call_operand.vmem [shape: f32[2,256], index: 4, kind: output, shape index: {1}]   ;;  %s2149_s2 = inlined_call_operand.vmem [shape: f32[1,256], index: 2, kind: input, shape index: {}]   ;;  %s2150_s3 = inlined_call_operand.vmem [shape: f32[16,256], index: 3, kind: output, shape index: {0}]  }
   0x1   :  { %v1401_v0 = vld [vmem:[%s2146_s1 + $0x74] ss:$8 sps:$4 sm:$0xff]   ;;  %v1403_v1 = vld [vmem:[%s2146_s1 + $0x70] ss:$8 sps:$4 sm:$0xff]   ;;  %v1407_v4 = vld [vmem:[%s2146_s1 + $0x64] ss:$8 sps:$4 sm:$0xff]  }
   0x2   :  { %949 = vmatprep.subr.bf16.mxu0 %v1401_v0  ;;  %v1404_v2 = vld [vmem:[%s2146_s1 + $0x174] ss:$8 sps:$4 sm:$0xff]   ;;  %v1406_v3 = vld [vmem:[%s2146_s1 + $0x170] ss:$8 sps:$4 sm:$0xff]   ;;  %v1409_v5 = vld [vmem:[%s2146_s1 + $0x60] ss:$8 sps:$4 sm:$0xff]  }
   0x3   :  { %950 = vmatpush1.bf16.msra.mxu0 %v1403_v1  ;;  %992 = vmatprep.subr.bf16.mxu1 %v1404_v2  ;;  %v1410_v6 = vld [vmem:[%s2146_s1 + $0x164] ss:$8 sps:$4 sm:$0xff]   ;;  %v1412_v7 = vld [vmem:[%s2146_s1 + $0x160] ss:$8 sps:$4 sm:$0xff]   ;;  %v1413_v8 = vld [vmem:[%s2146_s1 + $0x54] ss:$8 sps:$4 sm:$0xff]  }
   0x4   :  { %993 = vmatpush1.bf16.msra.mxu1 %v1406_v3  ;;  %951 = vmatprep.subr.bf16.mxu0 %v1407_v4  ;;  %v1415_v9 = vld [vmem:[%s2146_s1 + $0x50] ss:$8 sps:$4 sm:$0xff]   ;;  %v1416_v10 = vld [vmem:[%s2146_s1 + $0x154] ss:$8 sps:$4 sm:$0xff]   ;;  %v1419_v11 = vld [vmem:[%s2146_s1 + $0x44] ss:$8 sps:$4 sm:$0xff]  }
   0x5   :  { %994 = vmatprep.subr.bf16.mxu1 %v1410_v6  ;;  %v1418_v12 = vld [vmem:[%s2146_s1 + $0x150] ss:$8 sps:$4 sm:$0xff]   ;;  %v1422_v13 = vld [vmem:[%s2146_s1 + $0x144] ss:$8 sps:$4 sm:$0xff]   ;;  %v1421_v14 = vld [vmem:[%s2146_s1 + $0x40] ss:$8 sps:$4 sm:$0xff]  }
   0x6   :  { %v1425_v15 = vld [vmem:[%s2146_s1 + $0x34] ss:$8 sps:$4 sm:$0xff]   ;;  %v1424_v16 = vld [vmem:[%s2146_s1 + $0x140] ss:$8 sps:$4 sm:$0xff]   ;;  %v1427_v18 = vld [vmem:[%s2146_s1 + $0x30] ss:$8 sps:$4 sm:$0xff]  }
   0x7   :  { %952 = vmatpush1.bf16.msra.mxu0 %v1409_v5  ;;  %v1428_v17 = vld [vmem:[%s2146_s1 + $0x134] ss:$8 sps:$4 sm:$0xff]   ;;  %v1431_v19 = vld [vmem:[%s2146_s1 + $0x24] ss:$8 sps:$4 sm:$0xff]   ;;  %v1430_v20 = vld [vmem:[%s2146_s1 + $0x130] ss:$8 sps:$4 sm:$0xff]  }
   0x8   :  { %953 = vmatprep.subr.bf16.mxu0 %v1413_v8  ;;  %995 = vmatpush1.bf16.msra.mxu1 %v1412_v7  ;;  %v1434_v21 = vld [vmem:[%s2146_s1 + $0x124] ss:$8 sps:$4 sm:$0xff]   ;;  %v1433_v22 = vld [vmem:[%s2146_s1 + $0x20] ss:$8 sps:$4 sm:$0xff]   ;;  %v1437_v23 = vld [vmem:[%s2146_s1 + $0x14] ss:$8 sps:$4 sm:$0xff]  }
   0x9   :  { %996 = vmatprep.subr.bf16.mxu1 %v1416_v10  ;;  %v1436_v24 = vld [vmem:[%s2146_s1 + $0x120] ss:$8 sps:$4 sm:$0xff]   ;;  %v1440_v25 = vld [vmem:[%s2146_s1 + $0x114] ss:$8 sps:$4 sm:$0xff]   ;;  %v1439_v26 = vld [vmem:[%s2146_s1 + $0x10] ss:$8 sps:$4 sm:$0xff]  }
   0xa   :  { %v1443_v27 = vld [vmem:[%s2146_s1 + $0x4] ss:$8 sps:$4 sm:$0xff]   ;;  %v1442_v28 = vld [vmem:[%s2146_s1 + $0x110] ss:$8 sps:$4 sm:$0xff]   ;;  %v1445_v30 = vld [vmem:[%s2146_s1] ss:$8 sps:$4 sm:$0xff]  }
   0xb   :  { %954 = vmatpush1.bf16.msra.mxu0 %v1415_v9  ;;  %v1446_v29 = vld [vmem:[%s2146_s1 + $0x104] ss:$8 sps:$4 sm:$0xff]   ;;  %v1449_v31 = vld [vmem:[%s2146_s1 + $0xf4] ss:$8 sps:$4 sm:$0xff]   ;;  %v1448_v32 = vld [vmem:[%s2146_s1 + $0x100] ss:$8 sps:$4 sm:$0xff]  }
   0xc   :  { %955 = vmatprep.subr.bf16.mxu0 %v1419_v11  ;;  %997 = vmatpush1.bf16.msra.mxu1 %v1418_v12  ;;  %v1452_v33 = vld [vmem:[%s2146_s1 + $0x1f4] ss:$8 sps:$4 sm:$0xff]   ;;  %v1451_v34 = vld [vmem:[%s2146_s1 + $0xf0] ss:$8 sps:$4 sm:$0xff]   ;;  %v1455_v35 = vld [vmem:[%s2146_s1 + $0xe4] ss:$8 sps:$4 sm:$0xff]  }
   0xd   :  { %998 = vmatprep.subr.bf16.mxu1 %v1422_v13  ;;  %v1454_v36 = vld [vmem:[%s2146_s1 + $0x1f0] ss:$8 sps:$4 sm:$0xff]   ;;  %v1458_v37 = vld [vmem:[%s2146_s1 + $0x1e4] ss:$8 sps:$4 sm:$0xff]   ;;  %v1457_v38 = vld [vmem:[%s2146_s1 + $0xe0] ss:$8 sps:$4 sm:$0xff]  }
   0xe   :  { %v1461_v39 = vld [vmem:[%s2146_s1 + $0xd4] ss:$8 sps:$4 sm:$0xff]   ;;  %v1460_v40 = vld [vmem:[%s2146_s1 + $0x1e0] ss:$8 sps:$4 sm:$0xff]   ;;  %v1463_v42 = vld [vmem:[%s2146_s1 + $0xd0] ss:$8 sps:$4 sm:$0xff]  }
   0xf   :  { %956 = vmatpush1.bf16.msra.mxu0 %v1421_v14  ;;  %v1464_v41 = vld [vmem:[%s2146_s1 + $0x1d4] ss:$8 sps:$4 sm:$0xff]   ;;  %v1467_v43 = vld [vmem:[%s2146_s1 + $0xc4] ss:$8 sps:$4 sm:$0xff]   ;;  %v1466_v44 = vld [vmem:[%s2146_s1 + $0x1d0] ss:$8 sps:$4 sm:$0xff]  }
  0x10   :  { %957 = vmatprep.subr.bf16.mxu0 %v1425_v15  ;;  %999 = vmatpush1.bf16.msra.mxu1 %v1424_v16  ;;  %v1470_v45 = vld [vmem:[%s2146_s1 + $0x1c4] ss:$8 sps:$4 sm:$0xff]   ;;  %v1469_v46 = vld [vmem:[%s2146_s1 + $0xc0] ss:$8 sps:$4 sm:$0xff]   ;;  %v1473_v48 = vld [vmem:[%s2146_s1 + $0xb4] ss:$8 sps:$4 sm:$0xff]  }
  0x11   :  { %1000 = vmatprep.subr.bf16.mxu1 %v1428_v17  ;;  %v1498_v47 = vld [vmem:[%s2147_s0 + $0x4] ss:$36 sps:$4 sm:$0xff]   ;;  %v1476_v50 = vld [vmem:[%s2146_s1 + $0x1b4] ss:$8 sps:$4 sm:$0xff]   ;;  %v1505_v51 = vld [vmem:[%s2147_s0 + $0xc] ss:$36 sps:$4 sm:$0xff]  }
  0x12   :  { %v1472_v49 = vld [vmem:[%s2146_s1 + $0x1c0] ss:$8 sps:$4 sm:$0xff]   ;;  %981 = vmatprep.mubr.bf16.mxu0 %v1498_v47  ;;  %v1475_v52 = vld [vmem:[%s2146_s1 + $0xb0] ss:$8 sps:$4 sm:$0xff]   ;;  %v1479_v53 = vld [vmem:[%s2146_s1 + $0xa4] ss:$8 sps:$4 sm:$0xff]   ;;  %1024 = vmatprep.mubr.bf16.mxu1 %v1505_v51 }
  0x13   :  { %958 = vmatpush1.bf16.msra.mxu0 %v1427_v18  ;;  %v1478_v54 = vld [vmem:[%s2146_s1 + $0x1b0] ss:$8 sps:$4 sm:$0xff]   ;;  %v1482_v55 = vld [vmem:[%s2146_s1 + $0x1a4] ss:$8 sps:$4 sm:$0xff]   ;;  %v1481_v56 = vld [vmem:[%s2146_s1 + $0xa0] ss:$8 sps:$4 sm:$0xff]  }
  0x14   :  { %959 = vmatprep.subr.bf16.mxu0 %v1431_v19  ;;  %1001 = vmatpush1.bf16.msra.mxu1 %v1430_v20  ;;  %v1485_v57 = vld [vmem:[%s2146_s1 + $0x94] ss:$8 sps:$4 sm:$0xff]   ;;  %v1484_v58 = vld [vmem:[%s2146_s1 + $0x1a0] ss:$8 sps:$4 sm:$0xff]   ;;  %v1487_v60 = vld [vmem:[%s2146_s1 + $0x90] ss:$8 sps:$4 sm:$0xff]  }
  0x15   :  { %1002 = vmatprep.subr.bf16.mxu1 %v1434_v21  ;;  %v1488_v59 = vld [vmem:[%s2146_s1 + $0x194] ss:$8 sps:$4 sm:$0xff]   ;;  %v1491_v61 = vld [vmem:[%s2146_s1 + $0x84] ss:$8 sps:$4 sm:$0xff]   ;;  %v1490_v62 = vld [vmem:[%s2146_s1 + $0x190] ss:$8 sps:$4 sm:$0xff]  }
  0x16   :  { %v1494_v63 = vld [vmem:[%s2146_s1 + $0x184] ss:$8 sps:$4 sm:$0xff]   ;;  %v1493_v0 = vld [vmem:[%s2146_s1 + $0x80] ss:$8 sps:$4 sm:$0xff]   ;;  %v1502_v1 = vld [vmem:[%s2146_s1 + $0x274] ss:$8 sps:$4 sm:$0xff]  }
  0x17   :  { %960 = vmatpush1.bf16.msra.mxu0 %v1433_v22  ;;  %v1499_v2 = vld [vmem:[%s2146_s1 + $0x180] ss:$8 sps:$4 sm:$0xff]   ;;  %v1508_v4 = vld [vmem:[%s2146_s1 + $0x374] ss:$8 sps:$4 sm:$0xff]   ;;  %v1500_v5 = vld [vmem:[%s2146_s1 + $0x270] ss:$8 sps:$4 sm:$0xff]  }
  0x18   :  { %961 = vmatprep.subr.bf16.mxu0 %v1437_v23  ;;  %1003 = vmatpush1.bf16.msra.mxu1 %v1436_v24  ;;  %v1496_v3 = vld [vmem:[%s2147_s0] ss:$36 sps:$4 sm:$0xff]   ;;  %v1503_v6 = vld [vmem:[%s2147_s0 + $0x8] ss:$36 sps:$4 sm:$0xff]   ;;  %v1506_v8 = vld [vmem:[%s2146_s1 + $0x370] ss:$8 sps:$4 sm:$0xff]  }
  0x19   :  { %1004 = vmatprep.subr.bf16.mxu1 %v1440_v25  ;;  %v1511_v7 = vld [vmem:[%s2146_s1 + $0x264] ss:$8 sps:$4 sm:$0xff]   ;;  %v1509_v10 = vld [vmem:[%s2146_s1 + $0x260] ss:$8 sps:$4 sm:$0xff]   ;;  %v1517_v11 = vld [vmem:[%s2146_s1 + $0x254] ss:$8 sps:$4 sm:$0xff]  }
  0x1a   :  { %v1514_v9 = vld [vmem:[%s2146_s1 + $0x364] ss:$8 sps:$4 sm:$0xff]   ;;  %v1512_v12 = vld [vmem:[%s2146_s1 + $0x360] ss:$8 sps:$4 sm:$0xff]   ;;  %v1520_v13 = vld [vmem:[%s2146_s1 + $0x354] ss:$8 sps:$4 sm:$0xff]  }
  0x1b   :  { %962 = vmatpush1.bf16.msra.mxu0 %v1439_v26  ;;  %v1515_v14 = vld [vmem:[%s2146_s1 + $0x250] ss:$8 sps:$4 sm:$0xff]   ;;  %v1523_v15 = vld [vmem:[%s2146_s1 + $0x244] ss:$8 sps:$4 sm:$0xff]   ;;  %v1521_v18 = vld [vmem:[%s2146_s1 + $0x240] ss:$8 sps:$4 sm:$0xff]  }
  0x1c   :  { %963 = vmatprep.subr.bf16.mxu0 %v1443_v27  ;;  %1005 = vmatpush1.bf16.msra.mxu1 %v1442_v28  ;;  %v1518_v16 = vld [vmem:[%s2146_s1 + $0x350] ss:$8 sps:$4 sm:$0xff]   ;;  %v1526_v17 = vld [vmem:[%s2146_s1 + $0x344] ss:$8 sps:$4 sm:$0xff]   ;;  %v1529_v19 = vld [vmem:[%s2146_s1 + $0x234] ss:$8 sps:$4 sm:$0xff]  }
  0x1d   :  { %1006 = vmatprep.subr.bf16.mxu1 %v1446_v29  ;;  %v1524_v20 = vld [vmem:[%s2146_s1 + $0x340] ss:$8 sps:$4 sm:$0xff]   ;;  %v1532_v21 = vld [vmem:[%s2146_s1 + $0x334] ss:$8 sps:$4 sm:$0xff]   ;;  %v1527_v22 = vld [vmem:[%s2146_s1 + $0x230] ss:$8 sps:$4 sm:$0xff]  }
  0x1e   :  { %v1535_v23 = vld [vmem:[%s2146_s1 + $0x224] ss:$8 sps:$4 sm:$0xff]   ;;  %v1530_v24 = vld [vmem:[%s2146_s1 + $0x330] ss:$8 sps:$4 sm:$0xff]   ;;  %v1533_v26 = vld [vmem:[%s2146_s1 + $0x220] ss:$8 sps:$4 sm:$0xff]  }
  0x1f   :  { %964 = vmatpush1.bf16.msra.mxu0 %v1445_v30  ;;  %v1538_v25 = vld [vmem:[%s2146_s1 + $0x324] ss:$8 sps:$4 sm:$0xff]   ;;  %v1541_v27 = vld [vmem:[%s2146_s1 + $0x214] ss:$8 sps:$4 sm:$0xff]   ;;  %v1536_v28 = vld [vmem:[%s2146_s1 + $0x320] ss:$8 sps:$4 sm:$0xff]  }
  0x20   :  { %965 = vmatprep.subr.bf16.mxu0 %v1449_v31  ;;  %1007 = vmatpush1.bf16.msra.mxu1 %v1448_v32  ;;  %v1544_v29 = vld [vmem:[%s2146_s1 + $0x314] ss:$8 sps:$4 sm:$0xff]   ;;  %v1539_v30 = vld [vmem:[%s2146_s1 + $0x210] ss:$8 sps:$4 sm:$0xff]   ;;  %v1547_v32 = vld [vmem:[%s2146_s1 + $0x204] ss:$8 sps:$4 sm:$0xff]  }
  0x21   :  { %1008 = vmatprep.subr.bf16.mxu1 %v1452_v33  ;;  %v1542_v31 = vld [vmem:[%s2146_s1 + $0x310] ss:$8 sps:$4 sm:$0xff]   ;;  %v1568_v47 = vld [vmem:[%s2146_s1 + $0x3d4] ss:$8 sps:$4 sm:$0xff]   ;;  %v1574_v51 = vld [vmem:[%s2146_s1 + $0x3c4] ss:$8 sps:$4 sm:$0xff]  }
  0x22   :  { %v1601_v33 = vld [vmem:[%s2147_s0 + $0x14] ss:$36 sps:$4 sm:$0xff]  }
  0x23   :  { %966 = vmatpush2.bf16.msra.mxu0 %v1451_v34  ;;  %v1550_v34 = vld [vmem:[%s2146_s1 + $0x304] ss:$8 sps:$4 sm:$0xff]  }
  0x24   :  { %967 = vmatprep.subr.bf16.mxu0 %v1455_v35  ;;  %1009 = vmatpush2.bf16.msra.mxu1 %v1454_v36  ;;  %v1545_v35 = vld [vmem:[%s2146_s1 + $0x200] ss:$8 sps:$4 sm:$0xff]  }
  0x25   :  { %1010 = vmatprep.subr.bf16.mxu1 %v1458_v37  ;;  %v1607_v36 = vld [vmem:[%s2147_s0 + $0x1c] ss:$36 sps:$4 sm:$0xff]  }
  0x26   :  { %v1553_v37 = vld [vmem:[%s2146_s1 + $0x2f4] ss:$8 sps:$4 sm:$0xff]  }
  0x27   :  { %968 = vmatpush2.bf16.msra.mxu0 %v1457_v38  ;;  %v1548_v38 = vld [vmem:[%s2146_s1 + $0x300] ss:$8 sps:$4 sm:$0xff]  }
  0x28   :  { %969 = vmatprep.subr.bf16.mxu0 %v1461_v39  ;;  %1011 = vmatpush2.bf16.msra.mxu1 %v1460_v40  ;;  %v1556_v39 = vld [vmem:[%s2146_s1 + $0x3f4] ss:$8 sps:$4 sm:$0xff]   ;;  %v1551_v40 = vld [vmem:[%s2146_s1 + $0x2f0] ss:$8 sps:$4 sm:$0xff]  }
  0x29   :  { %1012 = vmatprep.subr.bf16.mxu1 %v1464_v41  ;;  %v1559_v41 = vld [vmem:[%s2146_s1 + $0x2e4] ss:$8 sps:$4 sm:$0xff]  }
  0x2b   :  { %970 = vmatpush2.bf16.msra.mxu0 %v1463_v42  ;;  %v1554_v42 = vld [vmem:[%s2146_s1 + $0x3f0] ss:$8 sps:$4 sm:$0xff]  }
  0x2c   :  { %971 = vmatprep.subr.bf16.mxu0 %v1467_v43  ;;  %1013 = vmatpush2.bf16.msra.mxu1 %v1466_v44  ;;  %v1562_v43 = vld [vmem:[%s2146_s1 + $0x3e4] ss:$8 sps:$4 sm:$0xff]   ;;  %v1557_v44 = vld [vmem:[%s2146_s1 + $0x2e0] ss:$8 sps:$4 sm:$0xff]  }
  0x2d   :  { %1014 = vmatprep.subr.bf16.mxu1 %v1470_v45  ;;  %v1565_v45 = vld [vmem:[%s2146_s1 + $0x2d4] ss:$8 sps:$4 sm:$0xff]  }
  0x2f   :  { %972 = vmatpush2.bf16.msra.mxu0 %v1469_v46  ;;  %v1560_v46 = vld [vmem:[%s2146_s1 + $0x3e0] ss:$8 sps:$4 sm:$0xff]  }
  0x30   :  { %973 = vmatprep.subr.bf16.mxu0 %v1473_v48  ;;  %1015 = vmatpush2.bf16.msra.mxu1 %v1472_v49  ;;  %v1563_v48 = vld [vmem:[%s2146_s1 + $0x2d0] ss:$8 sps:$4 sm:$0xff]   ;;  %v1571_v49 = vld [vmem:[%s2146_s1 + $0x2c4] ss:$8 sps:$4 sm:$0xff]  }
  0x31   :  { %1016 = vmatprep.subr.bf16.mxu1 %v1476_v50  ;;  %v1566_v50 = vld [vmem:[%s2146_s1 + $0x3d0] ss:$8 sps:$4 sm:$0xff]  }
  0x33   :  { %974 = vmatpush2.bf16.msra.mxu0 %v1475_v52  ;;  %v1569_v52 = vld [vmem:[%s2146_s1 + $0x2c0] ss:$8 sps:$4 sm:$0xff]  }
  0x34   :  { %975 = vmatprep.subr.bf16.mxu0 %v1479_v53  ;;  %1017 = vmatpush2.bf16.msra.mxu1 %v1478_v54  ;;  %v1577_v53 = vld [vmem:[%s2146_s1 + $0x2b4] ss:$8 sps:$4 sm:$0xff]   ;;  %v1572_v54 = vld [vmem:[%s2146_s1 + $0x3c0] ss:$8 sps:$4 sm:$0xff]  }
  0x35   :  { %1018 = vmatprep.subr.bf16.mxu1 %v1482_v55  ;;  %v1580_v55 = vld [vmem:[%s2146_s1 + $0x3b4] ss:$8 sps:$4 sm:$0xff]  }
  0x37   :  { %976 = vmatpush2.bf16.msra.mxu0 %v1481_v56  ;;  %v1575_v56 = vld [vmem:[%s2146_s1 + $0x2b0] ss:$8 sps:$4 sm:$0xff]  }
  0x38   :  { %977 = vmatprep.subr.bf16.mxu0 %v1485_v57  ;;  %1019 = vmatpush2.bf16.msra.mxu1 %v1484_v58  ;;  %v1583_v57 = vld [vmem:[%s2146_s1 + $0x2a4] ss:$8 sps:$4 sm:$0xff]   ;;  %v1578_v58 = vld [vmem:[%s2146_s1 + $0x3b0] ss:$8 sps:$4 sm:$0xff]  }
  0x39   :  { %1020 = vmatprep.subr.bf16.mxu1 %v1488_v59  ;;  %v1586_v59 = vld [vmem:[%s2146_s1 + $0x3a4] ss:$8 sps:$4 sm:$0xff]  }
  0x3b   :  { %978 = vmatpush2.bf16.msra.mxu0 %v1487_v60  ;;  %v1581_v60 = vld [vmem:[%s2146_s1 + $0x2a0] ss:$8 sps:$4 sm:$0xff]  }
  0x3c   :  { %979 = vmatprep.subr.bf16.mxu0 %v1491_v61  ;;  %1021 = vmatpush2.bf16.msra.mxu1 %v1490_v62  ;;  %v1589_v61 = vld [vmem:[%s2146_s1 + $0x294] ss:$8 sps:$4 sm:$0xff]   ;;  %v1584_v62 = vld [vmem:[%s2146_s1 + $0x3a0] ss:$8 sps:$4 sm:$0xff]  }
  0x3d   :  { %1022 = vmatprep.subr.bf16.mxu1 %v1494_v63  ;;  %v1592_v63 = vld [vmem:[%s2146_s1 + $0x394] ss:$8 sps:$4 sm:$0xff]  }
  0x3f   :  { %980 = vmatpush2.bf16.msra.mxu0 %v1493_v0  ;;  %v1587_v0 = vld [vmem:[%s2146_s1 + $0x290] ss:$8 sps:$4 sm:$0xff]  }
  0x40   :  { %1035 = vmatprep.subr.bf16.mxu0 %v1502_v1  ;;  %1023 = vmatpush2.bf16.msra.mxu1 %v1499_v2  ;;  %v1595_v1 = vld [vmem:[%s2146_s1 + $0x284] ss:$8 sps:$4 sm:$0xff]   ;;  %v1590_v2 = vld [vmem:[%s2146_s1 + $0x390] ss:$8 sps:$4 sm:$0xff]  }
  0x41   :  { %1078 = vmatprep.subr.bf16.mxu1 %v1508_v4  ;;  %v1593_v4 = vld [vmem:[%s2146_s1 + $0x280] ss:$8 sps:$4 sm:$0xff]  }
  0x42   :  { %982 = vmatmul.mubr.bf16.vlgmr.msra.gmra.mxu0 %v1496_v3  ;;  %v1598_v3 = vld [vmem:[%s2146_s1 + $0x384] ss:$8 sps:$4 sm:$0xff]  }
  0x43   :  { %1036 = vmatpush1.bf16.msra.mxu0 %v1500_v5  ;;  %1025 = vmatmul.mubr.bf16.vlgmr.msra.gmra.mxu1 %v1503_v6  ;;  %v1604_v5 = vld [vmem:[%s2146_s1 + $0x474] ss:$8 sps:$4 sm:$0xff]   ;;  %v1596_v6 = vld [vmem:[%s2146_s1 + $0x380] ss:$8 sps:$4 sm:$0xff]  }
  0x44   :  { %1037 = vmatprep.subr.bf16.mxu0 %v1511_v7  ;;  %1079 = vmatpush1.bf16.msra.mxu1 %v1506_v8  ;;  %v1599_v7 = vld [vmem:[%s2147_s0 + $0x10] ss:$36 sps:$4 sm:$0xff]  }
  0x45   :  { %1080 = vmatprep.subr.bf16.mxu1 %v1514_v9  ;;  %1067 = vmatprep.mubr.bf16.mxu0 %v1601_v33  ;;  %v1602_v8 = vld [vmem:[%s2146_s1 + $0x470] ss:$8 sps:$4 sm:$0xff]  }
  0x46   :  { %1110 = vmatprep.mubr.bf16.mxu1 %v1607_v36  ;;  %v1605_v9 = vld [vmem:[%s2147_s0 + $0x18] ss:$36 sps:$4 sm:$0xff]  }
  0x47   :  { %1038 = vmatpush1.bf16.msra.mxu0 %v1509_v10  ;;  %v1610_v10 = vld [vmem:[%s2146_s1 + $0x464] ss:$8 sps:$4 sm:$0xff]  }
  0x48   :  { %1039 = vmatprep.subr.bf16.mxu0 %v1517_v11  ;;  %1081 = vmatpush1.bf16.msra.mxu1 %v1512_v12  ;;  %v1608_v11 = vld [vmem:[%s2146_s1 + $0x460] ss:$8 sps:$4 sm:$0xff]   ;;  %v1630_v12 = vmov 0  }
  0x49   :  { %1082 = vmatprep.subr.bf16.mxu1 %v1520_v13  ;;  %v1613_v13 = vld [vmem:[%s2146_s1 + $0x454] ss:$8 sps:$4 sm:$0xff]  }
  0x4b   :  { %1040 = vmatpush1.bf16.msra.mxu0 %v1515_v14  ;;  %v1611_v14 = vld [vmem:[%s2146_s1 + $0x450] ss:$8 sps:$4 sm:$0xff]  }
  0x4c   :  { %1041 = vmatprep.subr.bf16.mxu0 %v1523_v15  ;;  %1083 = vmatpush1.bf16.msra.mxu1 %v1518_v16  ;;  %v1616_v15 = vld [vmem:[%s2146_s1 + $0x444] ss:$8 sps:$4 sm:$0xff]   ;;  %v1614_v16 = vld [vmem:[%s2146_s1 + $0x440] ss:$8 sps:$4 sm:$0xff]  }
  0x4d   :  { %1084 = vmatprep.subr.bf16.mxu1 %v1526_v17  ;;  %v1619_v17 = vld [vmem:[%s2146_s1 + $0x434] ss:$8 sps:$4 sm:$0xff]  }
  0x4f   :  { %1042 = vmatpush1.bf16.msra.mxu0 %v1521_v18  ;;  %v1617_v18 = vld [vmem:[%s2146_s1 + $0x430] ss:$8 sps:$4 sm:$0xff]  }
  0x50   :  { %1043 = vmatprep.subr.bf16.mxu0 %v1529_v19  ;;  %1085 = vmatpush1.bf16.msra.mxu1 %v1524_v20  ;;  %v1622_v19 = vld [vmem:[%s2146_s1 + $0x424] ss:$8 sps:$4 sm:$0xff]   ;;  %v1620_v20 = vld [vmem:[%s2146_s1 + $0x420] ss:$8 sps:$4 sm:$0xff]  }
  0x51   :  { %1086 = vmatprep.subr.bf16.mxu1 %v1532_v21  ;;  %v1625_v21 = vld [vmem:[%s2146_s1 + $0x414] ss:$8 sps:$4 sm:$0xff]  }
  0x53   :  { %1044 = vmatpush1.bf16.msra.mxu0 %v1527_v22  ;;  %v1623_v22 = vld [vmem:[%s2146_s1 + $0x410] ss:$8 sps:$4 sm:$0xff]  }
  0x54   :  { %1045 = vmatprep.subr.bf16.mxu0 %v1535_v23  ;;  %1087 = vmatpush1.bf16.msra.mxu1 %v1530_v24  ;;  %v1628_v23 = vld [vmem:[%s2146_s1 + $0x404] ss:$8 sps:$4 sm:$0xff]   ;;  %v1626_v24 = vld [vmem:[%s2146_s1 + $0x400] ss:$8 sps:$4 sm:$0xff]  }
  0x55   :  { %1088 = vmatprep.subr.bf16.mxu1 %v1538_v25  ;;  %v1629_v25 = vld [vmem:[%s2147_s0 + $0x20] ss:$36 sps:$4 sm:$0xff]  }
  0x57   :  { %1046 = vmatpush1.bf16.msra.mxu0 %v1533_v26  ;;  %v1631_v26 = vmov 0.0  }
  0x58   :  { %1047 = vmatprep.subr.bf16.mxu0 %v1541_v27  ;;  %1089 = vmatpush1.bf16.msra.mxu1 %v1536_v28  ;;  %1222 = vst [vmem:[%s2148_s4] sm:$0xf] %v1631_v26  ;;  %v173_v28 = vlaneseq }
  0x59   :  { %1090 = vmatprep.subr.bf16.mxu1 %v1544_v29 }
  0x5b   :  { %1048 = vmatpush1.bf16.msra.mxu0 %v1539_v30 }
  0x5c   :  { %1049 = vmatprep.subr.bf16.mxu0 %v1547_v32  ;;  %1091 = vmatpush1.bf16.msra.mxu1 %v1542_v31  ;;  %v2120_v31 = vshrl.u32 %v173_v28, 7 }
  0x5d   :  { %1092 = vmatprep.subr.bf16.mxu1 %v1550_v34 }
  0x5e   :  { %v175_v34 = vsub.s32 0, %v2120_v31  ;;  %v179_v36 = vsub.s32 1, %v2120_v31 }
  0x5f   :  { %1050 = vmatpush1.bf16.msra.mxu0 %v1545_v35  ;;  %v171_v35 = vld [vmem:[%s2149_s2] sm:$0x3] }
  0x60   :  { %1051 = vmatprep.subr.bf16.mxu0 %v1553_v37  ;;  %1093 = vmatpush1.bf16.msra.mxu1 %v1548_v38 }
  0x61   :  { %1094 = vmatprep.subr.bf16.mxu1 %v1556_v39  ;;  %v176_v39 = vrot.slane %v171_v35, %v175_v34 }
  0x63   :  { %1052 = vmatpush2.bf16.msra.mxu0 %v1551_v40 }
  0x64   :  { %1053 = vmatprep.subr.bf16.mxu0 %v1559_v41  ;;  %1095 = vmatpush2.bf16.msra.mxu1 %v1554_v42  ;;  %v180_v41 = vrot.slane %v171_v35, %v179_v36 }
  0x65   :  { %1096 = vmatprep.subr.bf16.mxu1 %v1562_v43 }
  0x67   :  { %1054 = vmatpush2.bf16.msra.mxu0 %v1557_v44 }
  0x68   :  { %1055 = vmatprep.subr.bf16.mxu0 %v1565_v45  ;;  %1097 = vmatpush2.bf16.msra.mxu1 %v1560_v46 }
  0x69   :  { %1098 = vmatprep.subr.bf16.mxu1 %v1568_v47 }
  0x6b   :  { %1056 = vmatpush2.bf16.msra.mxu0 %v1563_v48 }
  0x6c   :  { %1057 = vmatprep.subr.bf16.mxu0 %v1571_v49  ;;  %1099 = vmatpush2.bf16.msra.mxu1 %v1566_v50 }
  0x6d   :  { %1100 = vmatprep.subr.bf16.mxu1 %v1574_v51 }
  0x6f   :  { %1058 = vmatpush2.bf16.msra.mxu0 %v1569_v52 }
  0x70   :  { %1059 = vmatprep.subr.bf16.mxu0 %v1577_v53  ;;  %1101 = vmatpush2.bf16.msra.mxu1 %v1572_v54 }
  0x71   :  { %1102 = vmatprep.subr.bf16.mxu1 %v1580_v55 }
  0x73   :  { %1060 = vmatpush2.bf16.msra.mxu0 %v1575_v56 }
  0x74   :  { %1061 = vmatprep.subr.bf16.mxu0 %v1583_v57  ;;  %1103 = vmatpush2.bf16.msra.mxu1 %v1578_v58 }
  0x75   :  { %1104 = vmatprep.subr.bf16.mxu1 %v1586_v59 }
  0x77   :  { %1062 = vmatpush2.bf16.msra.mxu0 %v1581_v60 }
  0x78   :  { %1063 = vmatprep.subr.bf16.mxu0 %v1589_v61  ;;  %1105 = vmatpush2.bf16.msra.mxu1 %v1584_v62 }
  0x79   :  { %1106 = vmatprep.subr.bf16.mxu1 %v1592_v63 }
  0x7b   :  { %1064 = vmatpush2.bf16.msra.mxu0 %v1587_v0 }
  0x7c   :  { %1065 = vmatprep.subr.bf16.mxu0 %v1595_v1  ;;  %1107 = vmatpush2.bf16.msra.mxu1 %v1590_v2 }
  0x7d   :  { %1108 = vmatprep.subr.bf16.mxu1 %v1598_v3 }
  0x7f   :  { %1066 = vmatpush2.bf16.msra.mxu0 %v1593_v4 }
  0x80   :  { %1121 = vmatprep.subr.bf16.mxu0 %v1604_v5  ;;  %1109 = vmatpush2.bf16.msra.mxu1 %v1596_v6 }
  0x82   :  { %1068 = vmatmul.mubr.bf16.vlgmr.msra.gmra.mxu0 %v1599_v7 }
  0x83   :  { %1122 = vmatpush1.bf16.msra.mxu0 %v1602_v8  ;;  %1153 = vmatprep.mubr.bf16.mxu0 %v1630_v12 }
  0x84   :  { %1111 = vmatmul.mubr.bf16.vlgmr.msra.gmra.mxu1 %v1605_v9  ;;  %1123 = vmatprep.subr.bf16.mxu0 %v1610_v10 }
  0x87   :  { %1124 = vmatpush1.bf16.msra.mxu0 %v1608_v11 }
  0x88   :  { %1125 = vmatprep.subr.bf16.mxu0 %v1613_v13 }
  0x8b   :  { %1126 = vmatpush1.bf16.msra.mxu0 %v1611_v14 }
  0x8c   :  { %1127 = vmatprep.subr.bf16.mxu0 %v1616_v15 }
  0x8f   :  { %1128 = vmatpush1.bf16.msra.mxu0 %v1614_v16 }
  0x90   :  { %1129 = vmatprep.subr.bf16.mxu0 %v1619_v17 }
  0x93   :  { %1130 = vmatpush1.bf16.msra.mxu0 %v1617_v18 }
  0x94   :  { %1131 = vmatprep.subr.bf16.mxu0 %v1622_v19 }
  0x97   :  { %1132 = vmatpush1.bf16.msra.mxu0 %v1620_v20 }
  0x98   :  { %1133 = vmatprep.subr.bf16.mxu0 %v1625_v21 }
  0x9b   :  { %1134 = vmatpush1.bf16.msra.mxu0 %v1623_v22 }
  0x9c   :  { %1135 = vmatprep.subr.bf16.mxu0 %v1628_v23 }
  0x9f   :  { %1136 = vmatpush1.bf16.msra.mxu0 %v1626_v24 }
  0xa2   :  { %1154 = vmatmul.mubr.bf16.vlgmr.msra.gmra.mxu0 %v1629_v25 }
 0x102   :  { %v983_v27 = vpop.f32.mrf.mxu0 }
 0x103   :  { %v1026_v30 = vpop.f32.mrf.mxu1  ;;  %v984_v43 = vadd.f32 %v983_v27, %v176_v39 }
 0x104   :  { %v985_v29 = vpop.f32.mrf.mxu0 }
 0x105   :  { %v1028_v33 = vpop.f32.mrf.mxu1  ;;  %v986_v46 = vadd.f32 %v985_v29, %v180_v41  ;;  %v1027_v47 = vadd.f32 %v1026_v30, %v984_v43  ;;  %v1632_v30 = vmov 1983009808  }
 0x106   :  { %v987_v32 = vpop.f32.mrf.mxu0 }
 0x107   :  { %v1030_v38 = vpop.f32.mrf.mxu1  ;;  %v988_v48 = vadd.f32 %v987_v32, %v176_v39  ;;  %v1029_v51 = vadd.f32 %v1028_v33, %v986_v46  ;;  %v1228_v32 = vunpack.c.l.s4 %v1632_v30 }
 0x108   :  { %v989_v37 = vpop.f32.mrf.mxu0 }
 0x109   :  { %v1032_v42 = vpop.f32.mrf.mxu1  ;;  %v990_v52 = vadd.f32 %v989_v37, %v180_v41  ;;  %v1031_v54 = vadd.f32 %v1030_v38, %v988_v48 }
 0x10b   :  { %v1033_v58 = vadd.f32 %v1032_v42, %v990_v52 }
 0x142   :  { %v1069_v40 = vpop.f32.mrf.mxu0 }
 0x143   :  { %v1070_v53 = vadd.f32 %v1069_v40, %v1027_v47  ;;  %v1229_v40 = vunpack.c.0.s8 %v1228_v32 }
 0x144   :  { %v1071_v44 = vpop.f32.mrf.mxu0  ;;  %v1112_v45 = vpop.f32.mrf.mxu1 }
 0x145   :  { %v1072_v55 = vadd.f32 %v1071_v44, %v1029_v51  ;;  %v1113_v59 = vadd.f32 %v1112_v45, %v1070_v53  ;;  %v1232_v46 = vsub.s32 %v1229_v40, %v2120_v31 }
 0x146   :  { %v1073_v49 = vpop.f32.mrf.mxu0  ;;  %v1114_v50 = vpop.f32.mrf.mxu1 }
 0x147   :  { %v1074_v60 = vadd.f32 %v1073_v49, %v1031_v54  ;;  %v1115_v62 = vadd.f32 %v1114_v50, %v1072_v55  ;;  %v1223_v50 = vld [vmem:[%s2148_s4] sm:$0xf] }
 0x148   :  { %v1075_v56 = vpop.f32.mrf.mxu0  ;;  %v1116_v57 = vpop.f32.mrf.mxu1 }
 0x149   :  { %v1076_v63 = vadd.f32 %v1075_v56, %v1033_v58  ;;  %v1117_v3 = vadd.f32 %v1116_v57, %v1074_v60 }
 0x14a   :  { %v1118_v1 = vpop.f32.mrf.mxu1 }
 0x14b   :  { %v1119_v6 = vadd.f32 %v1118_v1, %v1076_v63 }
 0x162   :  { %v1155_v61 = vpop.f32.mrf.mxu0 }
 0x163   :  { %v1156_v0 = vadd.f32 %v1155_v61, %v1113_v59 }
 0x164   :  { %v1157_v2 = vpop.f32.mrf.mxu0 }
 0x165   :  { %1164 = vst [vmem:[%s2150_s3] sm:$0xff] %v1156_v0  ;;  %v1158_v4 = vadd.f32 %v1157_v2, %v1115_v62  ;;  %v1197_v9 = vmul.f32 %v1156_v0, %v1156_v0 }
 0x166   :  { %v1159_v5 = vpop.f32.mrf.mxu0 }
 0x167   :  { %1165 = vst [vmem:[%s2150_s3 + $0x8] sm:$0xff] %v1158_v4  ;;  %v1160_v7 = vadd.f32 %v1159_v5, %v1117_v3  ;;  %v1198_v13 = vmul.f32 %v1158_v4, %v1158_v4 }
 0x168   :  { %v1161_v8 = vpop.f32.mrf.mxu0 }
 0x169   :  { %1166 = vst [vmem:[%s2150_s3 + $0x10] sm:$0xff] %v1160_v7  ;;  %v1183_v10 = vadd.f32 %v1160_v7, %v1156_v0  ;;  %v1199_v11 = vmul.f32 %v1160_v7, %v1160_v7  ;;  %v1162_v12 = vadd.f32 %v1161_v8, %v1119_v6 }
 0x16b   :  { %v1184_v14 = vrot.slane %v1183_v10, 4  ;;  %v1201_v15 = vadd.f32 %v1199_v11, %v1197_v9  ;;  %1167 = vst [vmem:[%s2150_s3 + $0x18] sm:$0xff] %v1162_v12  ;;  %v1190_v16 = vadd.f32 %v1162_v12, %v1158_v4  ;;  %v1200_v17 = vmul.f32 %v1162_v12, %v1162_v12 }
 0x16d   :  { %v1185_v18 = vadd.f32 %v1184_v14, %v1183_v10  ;;  %v1202_v19 = vrot.slane %v1201_v15, 4  ;;  %v1191_v20 = vrot.slane %v1190_v16, 4  ;;  %v1208_v21 = vadd.f32 %v1200_v17, %v1198_v13 }
 0x16f   :  { %v1186_v22 = vrot.slane %v1185_v18, 2  ;;  %v1203_v23 = vadd.f32 %v1202_v19, %v1201_v15  ;;  %v1192_v24 = vadd.f32 %v1191_v20, %v1190_v16  ;;  %v1209_v25 = vrot.slane %v1208_v21, 4 }
 0x171   :  { %v1187_v26 = vadd.f32 %v1186_v22, %v1185_v18  ;;  %v1204_v27 = vrot.slane %v1203_v23, 2  ;;  %v1193_v28 = vrot.slane %v1192_v24, 2  ;;  %v1210_v29 = vadd.f32 %v1209_v25, %v1208_v21 }
 0x173   :  { %v1205_v33 = vadd.f32 %v1204_v27, %v1203_v23  ;;  %v1194_v34 = vadd.f32 %v1193_v28, %v1192_v24  ;;  %v1211_v35 = vrot.slane %v1210_v29, 2  ;;  %v1188_v36 = vrot.slane %v1187_v26, 1 }
 0x175   :  { %v1206_v37 = vrot.slane %v1205_v33, 1  ;;  %v1195_v38 = vrot.slane %v1194_v34, 1  ;;  %v1212_v39 = vadd.f32 %v1211_v35, %v1210_v29  ;;  %v1189_v43 = vadd.f32 %v1188_v36, %v1187_v26 }
 0x177   :  { %v1207_v41 = vadd.f32 %v1206_v37, %v1205_v33  ;;  %v1213_v42 = vrot.slane %v1212_v39, 1  ;;  %v1196_v44 = vadd.f32 %v1195_v38, %v1194_v34 }
 0x179   :  { %v1214_v45 = vadd.f32 %v1213_v42, %v1212_v39  ;;  %v1216_v47 = vsel %vm1215_vm0, %v1189_v43, %v1207_v41 }
 0x17b   :  { %v1217_v48 = vsel %vm1215_vm0, %v1196_v44, %v1214_v45 }
 0x17c   :  { %v1226_v49 = vcombine.low %v1216_v47, %v1217_v48 }
 0x17e   :  { %v1233_v51 = vrot.slane %v1226_v49, %v1232_v46 }
 0x180   :  { %v1235_v52 = vadd.f32 %v1233_v51, %v1223_v50 }
 0x182   :  { %1236 = vst [vmem:[%s2148_s4] sm:$0xf] %v1235_v52 }

// kernel: _lambda_.19
= control target key start
LH: loop header
LB: loop body
LE: loop exit
PB: predicated region body
PF: predicated region fallthrough
CT: control target
= control target key end

     0   :  { %s940_s1 = inlined_call_operand.vmem [shape: bf16[256,512], index: 1, kind: input, shape index: {}]   ;;  %s941_s0 = inlined_call_operand.vmem [shape: bf16[16,256], index: 0, kind: input, shape index: {}]   ;;  %s942_s2 = inlined_call_operand.vmem [shape: f32[1,512], index: 2, kind: input, shape index: {}]   ;;  %s943_s3 = inlined_call_operand.vmem [shape: f32[16,512], index: 3, kind: output, shape index: {}]  }
   0x1   :  { %v596_v0 = vld [vmem:[%s940_s1 + $0xe4] ss:$16 sps:$4 sm:$0xff]   ;;  %v598_v1 = vld [vmem:[%s940_s1 + $0xec] ss:$16 sps:$4 sm:$0xff]   ;;  %v600_v2 = vld [vmem:[%s940_s1 + $0xe0] ss:$16 sps:$4 sm:$0xff]  }
   0x2   :  { %432 = vmatprep.subr.bf16.mxu0 %v596_v0  ;;  %v601_v3 = vld [vmem:[%s940_s1 + $0xe8] ss:$16 sps:$4 sm:$0xff]   ;;  %475 = vmatprep.subr.bf16.mxu1 %v598_v1  ;;  %v602_v4 = vld [vmem:[%s940_s1 + $0xc4] ss:$16 sps:$4 sm:$0xff]   ;;  %v604_v5 = vld [vmem:[%s940_s1 + $0xcc] ss:$16 sps:$4 sm:$0xff]  }
   0x3   :  { %433 = vmatpush1.bf16.msra.mxu0 %v600_v2  ;;  %476 = vmatpush1.bf16.msra.mxu1 %v601_v3  ;;  %v606_v6 = vld [vmem:[%s940_s1 + $0xc0] ss:$16 sps:$4 sm:$0xff]   ;;  %v607_v7 = vld [vmem:[%s940_s1 + $0xc8] ss:$16 sps:$4 sm:$0xff]   ;;  %v608_v8 = vld [vmem:[%s940_s1 + $0xa4] ss:$16 sps:$4 sm:$0xff]   ;;  %v82_v2 = vlaneseq }
   0x4   :  { %434 = vmatprep.subr.bf16.mxu0 %v602_v4  ;;  %477 = vmatprep.subr.bf16.mxu1 %v604_v5  ;;  %v610_v9 = vld [vmem:[%s940_s1 + $0xac] ss:$16 sps:$4 sm:$0xff]   ;;  %v612_v10 = vld [vmem:[%s940_s1 + $0xa0] ss:$16 sps:$4 sm:$0xff]   ;;  %v613_v11 = vld [vmem:[%s940_s1 + $0xa8] ss:$16 sps:$4 sm:$0xff]  }
   0x5   :  { %v614_v12 = vld [vmem:[%s940_s1 + $0x84] ss:$16 sps:$4 sm:$0xff]   ;;  %v616_v13 = vld [vmem:[%s940_s1 + $0x8c] ss:$16 sps:$4 sm:$0xff]   ;;  %v618_v14 = vld [vmem:[%s940_s1 + $0x80] ss:$16 sps:$4 sm:$0xff]  }
   0x6   :  { %v619_v15 = vld [vmem:[%s940_s1 + $0x88] ss:$16 sps:$4 sm:$0xff]   ;;  %v620_v16 = vld [vmem:[%s940_s1 + $0x64] ss:$16 sps:$4 sm:$0xff]   ;;  %v622_v17 = vld [vmem:[%s940_s1 + $0x6c] ss:$16 sps:$4 sm:$0xff]  }
   0x7   :  { %435 = vmatpush1.bf16.msra.mxu0 %v606_v6  ;;  %478 = vmatpush1.bf16.msra.mxu1 %v607_v7  ;;  %v624_v18 = vld [vmem:[%s940_s1 + $0x60] ss:$16 sps:$4 sm:$0xff]   ;;  %v625_v19 = vld [vmem:[%s940_s1 + $0x68] ss:$16 sps:$4 sm:$0xff]   ;;  %v626_v20 = vld [vmem:[%s940_s1 + $0x44] ss:$16 sps:$4 sm:$0xff]  }
   0x8   :  { %436 = vmatprep.subr.bf16.mxu0 %v608_v8  ;;  %479 = vmatprep.subr.bf16.mxu1 %v610_v9  ;;  %v628_v21 = vld [vmem:[%s940_s1 + $0x4c] ss:$16 sps:$4 sm:$0xff]   ;;  %v630_v22 = vld [vmem:[%s940_s1 + $0x40] ss:$16 sps:$4 sm:$0xff]   ;;  %v631_v23 = vld [vmem:[%s940_s1 + $0x48] ss:$16 sps:$4 sm:$0xff]  }
   0x9   :  { %v632_v24 = vld [vmem:[%s940_s1 + $0x24] ss:$16 sps:$4 sm:$0xff]   ;;  %v634_v25 = vld [vmem:[%s940_s1 + $0x2c] ss:$16 sps:$4 sm:$0xff]   ;;  %v636_v26 = vld [vmem:[%s940_s1 + $0x20] ss:$16 sps:$4 sm:$0xff]  }
   0xa   :  { %v637_v27 = vld [vmem:[%s940_s1 + $0x28] ss:$16 sps:$4 sm:$0xff]   ;;  %v638_v28 = vld [vmem:[%s940_s1 + $0x4] ss:$16 sps:$4 sm:$0xff]   ;;  %v640_v29 = vld [vmem:[%s940_s1 + $0xc] ss:$16 sps:$4 sm:$0xff]  }
   0xb   :  { %437 = vmatpush1.bf16.msra.mxu0 %v612_v10  ;;  %480 = vmatpush1.bf16.msra.mxu1 %v613_v11  ;;  %v642_v30 = vld [vmem:[%s940_s1] ss:$16 sps:$4 sm:$0xff]   ;;  %v643_v31 = vld [vmem:[%s940_s1 + $0x8] ss:$16 sps:$4 sm:$0xff]   ;;  %v644_v32 = vld [vmem:[%s940_s1 + $0x1e4] ss:$16 sps:$4 sm:$0xff]  }
   0xc   :  { %438 = vmatprep.subr.bf16.mxu0 %v614_v12  ;;  %481 = vmatprep.subr.bf16.mxu1 %v616_v13  ;;  %v646_v33 = vld [vmem:[%s940_s1 + $0x1ec] ss:$16 sps:$4 sm:$0xff]   ;;  %v648_v34 = vld [vmem:[%s940_s1 + $0x1e0] ss:$16 sps:$4 sm:$0xff]   ;;  %v649_v35 = vld [vmem:[%s940_s1 + $0x1e8] ss:$16 sps:$4 sm:$0xff]  }
   0xd   :  { %v650_v36 = vld [vmem:[%s940_s1 + $0x1c4] ss:$16 sps:$4 sm:$0xff]   ;;  %v652_v37 = vld [vmem:[%s940_s1 + $0x1cc] ss:$16 sps:$4 sm:$0xff]   ;;  %v654_v38 = vld [vmem:[%s940_s1 + $0x1c0] ss:$16 sps:$4 sm:$0xff]  }
   0xe   :  { %v655_v39 = vld [vmem:[%s940_s1 + $0x1c8] ss:$16 sps:$4 sm:$0xff]   ;;  %v656_v40 = vld [vmem:[%s940_s1 + $0x1a4] ss:$16 sps:$4 sm:$0xff]   ;;  %v658_v41 = vld [vmem:[%s940_s1 + $0x1ac] ss:$16 sps:$4 sm:$0xff]  }
   0xf   :  { %439 = vmatpush1.bf16.msra.mxu0 %v618_v14  ;;  %482 = vmatpush1.bf16.msra.mxu1 %v619_v15  ;;  %v660_v42 = vld [vmem:[%s940_s1 + $0x1a0] ss:$16 sps:$4 sm:$0xff]   ;;  %v661_v43 = vld [vmem:[%s940_s1 + $0x1a8] ss:$16 sps:$4 sm:$0xff]   ;;  %v662_v44 = vld [vmem:[%s940_s1 + $0x184] ss:$16 sps:$4 sm:$0xff]  }
  0x10   :  { %440 = vmatprep.subr.bf16.mxu0 %v620_v16  ;;  %483 = vmatprep.subr.bf16.mxu1 %v622_v17  ;;  %v664_v45 = vld [vmem:[%s940_s1 + $0x18c] ss:$16 sps:$4 sm:$0xff]   ;;  %v666_v47 = vld [vmem:[%s940_s1 + $0x180] ss:$16 sps:$4 sm:$0xff]   ;;  %v667_v48 = vld [vmem:[%s940_s1 + $0x188] ss:$16 sps:$4 sm:$0xff]  }
  0x11   :  { %v694_v46 = vld [vmem:[%s941_s0 + $0x4] ss:$8 sps:$4 sm:$0xff]   ;;  %v672_v51 = vld [vmem:[%s940_s1 + $0x160] ss:$16 sps:$4 sm:$0xff]   ;;  %v673_v52 = vld [vmem:[%s940_s1 + $0x168] ss:$16 sps:$4 sm:$0xff]  }
  0x12   :  { %v668_v49 = vld [vmem:[%s940_s1 + $0x164] ss:$16 sps:$4 sm:$0xff]   ;;  %v670_v50 = vld [vmem:[%s940_s1 + $0x16c] ss:$16 sps:$4 sm:$0xff]   ;;  %464 = vmatprep.mubr.bf16.mxu0 %v694_v46  ;;  %507 = vmatprep.mubr.bf16.mxu1 %v694_v46  ;;  %v678_v55 = vld [vmem:[%s940_s1 + $0x140] ss:$16 sps:$4 sm:$0xff]  }
  0x13   :  { %441 = vmatpush1.bf16.msra.mxu0 %v624_v18  ;;  %484 = vmatpush1.bf16.msra.mxu1 %v625_v19  ;;  %v674_v53 = vld [vmem:[%s940_s1 + $0x144] ss:$16 sps:$4 sm:$0xff]   ;;  %v676_v54 = vld [vmem:[%s940_s1 + $0x14c] ss:$16 sps:$4 sm:$0xff]   ;;  %v679_v56 = vld [vmem:[%s940_s1 + $0x148] ss:$16 sps:$4 sm:$0xff]  }
  0x14   :  { %442 = vmatprep.subr.bf16.mxu0 %v626_v20  ;;  %485 = vmatprep.subr.bf16.mxu1 %v628_v21  ;;  %v680_v57 = vld [vmem:[%s940_s1 + $0x124] ss:$16 sps:$4 sm:$0xff]   ;;  %v682_v58 = vld [vmem:[%s940_s1 + $0x12c] ss:$16 sps:$4 sm:$0xff]   ;;  %v684_v59 = vld [vmem:[%s940_s1 + $0x120] ss:$16 sps:$4 sm:$0xff]  }
  0x15   :  { %v685_v60 = vld [vmem:[%s940_s1 + $0x128] ss:$16 sps:$4 sm:$0xff]   ;;  %v686_v61 = vld [vmem:[%s940_s1 + $0x104] ss:$16 sps:$4 sm:$0xff]   ;;  %v688_v62 = vld [vmem:[%s940_s1 + $0x10c] ss:$16 sps:$4 sm:$0xff]  }
  0x16   :  { %v690_v63 = vld [vmem:[%s940_s1 + $0x100] ss:$16 sps:$4 sm:$0xff]   ;;  %v691_v0 = vld [vmem:[%s940_s1 + $0x108] ss:$16 sps:$4 sm:$0xff]   ;;  %v83_v3 = vshrl.u32 %v82_v2, 7 }
  0x17   :  { %443 = vmatpush1.bf16.msra.mxu0 %v630_v22  ;;  %486 = vmatpush1.bf16.msra.mxu1 %v631_v23  ;;  %v692_v1 = vld [vmem:[%s941_s0] ss:$8 sps:$4 sm:$0xff]  }
  0x18   :  { %444 = vmatprep.subr.bf16.mxu0 %v632_v24  ;;  %487 = vmatprep.subr.bf16.mxu1 %v634_v25  ;;  %v84_v4 = vsub.s32 0, %v83_v3  ;;  %v92_v5 = vsub.s32 2, %v83_v3  ;;  %v80_v6 = vld [vmem:[%s942_s2] sm:$0xf]  ;;  %v88_v7 = vsub.s32 1, %v83_v3  ;;  %v96_v8 = vsub.s32 3, %v83_v3 }
  0x1a   :  { %v85_v9 = vrot.slane %v80_v6, %v84_v4  ;;  %v93_v10 = vrot.slane %v80_v6, %v92_v5  ;;  %v89_v11 = vrot.slane %v80_v6, %v88_v7  ;;  %v97_v12 = vrot.slane %v80_v6, %v96_v8 }
  0x1b   :  { %445 = vmatpush1.bf16.msra.mxu0 %v636_v26  ;;  %488 = vmatpush1.bf16.msra.mxu1 %v637_v27 }
  0x1c   :  { %446 = vmatprep.subr.bf16.mxu0 %v638_v28  ;;  %489 = vmatprep.subr.bf16.mxu1 %v640_v29 }
  0x1f   :  { %447 = vmatpush1.bf16.msra.mxu0 %v642_v30  ;;  %490 = vmatpush1.bf16.msra.mxu1 %v643_v31 }
  0x20   :  { %448 = vmatprep.subr.bf16.mxu0 %v644_v32  ;;  %491 = vmatprep.subr.bf16.mxu1 %v646_v33 }
  0x23   :  { %449 = vmatpush2.bf16.msra.mxu0 %v648_v34  ;;  %492 = vmatpush2.bf16.msra.mxu1 %v649_v35 }
  0x24   :  { %450 = vmatprep.subr.bf16.mxu0 %v650_v36  ;;  %493 = vmatprep.subr.bf16.mxu1 %v652_v37 }
  0x27   :  { %451 = vmatpush2.bf16.msra.mxu0 %v654_v38  ;;  %494 = vmatpush2.bf16.msra.mxu1 %v655_v39 }
  0x28   :  { %452 = vmatprep.subr.bf16.mxu0 %v656_v40  ;;  %495 = vmatprep.subr.bf16.mxu1 %v658_v41 }
  0x2b   :  { %453 = vmatpush2.bf16.msra.mxu0 %v660_v42  ;;  %496 = vmatpush2.bf16.msra.mxu1 %v661_v43 }
  0x2c   :  { %454 = vmatprep.subr.bf16.mxu0 %v662_v44  ;;  %497 = vmatprep.subr.bf16.mxu1 %v664_v45 }
  0x2f   :  { %455 = vmatpush2.bf16.msra.mxu0 %v666_v47  ;;  %498 = vmatpush2.bf16.msra.mxu1 %v667_v48 }
  0x30   :  { %456 = vmatprep.subr.bf16.mxu0 %v668_v49  ;;  %499 = vmatprep.subr.bf16.mxu1 %v670_v50 }
  0x33   :  { %457 = vmatpush2.bf16.msra.mxu0 %v672_v51  ;;  %500 = vmatpush2.bf16.msra.mxu1 %v673_v52 }
  0x34   :  { %458 = vmatprep.subr.bf16.mxu0 %v674_v53  ;;  %501 = vmatprep.subr.bf16.mxu1 %v676_v54 }
  0x37   :  { %459 = vmatpush2.bf16.msra.mxu0 %v678_v55  ;;  %502 = vmatpush2.bf16.msra.mxu1 %v679_v56 }
  0x38   :  { %460 = vmatprep.subr.bf16.mxu0 %v680_v57  ;;  %503 = vmatprep.subr.bf16.mxu1 %v682_v58 }
  0x3b   :  { %461 = vmatpush2.bf16.msra.mxu0 %v684_v59  ;;  %504 = vmatpush2.bf16.msra.mxu1 %v685_v60 }
  0x3c   :  { %462 = vmatprep.subr.bf16.mxu0 %v686_v61  ;;  %505 = vmatprep.subr.bf16.mxu1 %v688_v62 }
  0x3f   :  { %463 = vmatpush2.bf16.msra.mxu0 %v690_v63  ;;  %506 = vmatpush2.bf16.msra.mxu1 %v691_v0 }
  0x42   :  { %465 = vmatmul.mubr.bf16.vlgmr.msra.gmra.mxu0 %v692_v1  ;;  %508 = vmatmul.mubr.bf16.vlgmr.msra.gmra.mxu1 %v692_v1 }
 0x102   :  { %v466_v13 = vpop.f32.mrf.mxu0  ;;  %v509_v14 = vpop.f32.mrf.mxu1 }
 0x103   :  { %v467_v15 = vadd.f32 %v466_v13, %v85_v9  ;;  %v510_v16 = vadd.f32 %v509_v14, %v93_v10 }
 0x104   :  { %v468_v17 = vpop.f32.mrf.mxu0  ;;  %v511_v18 = vpop.f32.mrf.mxu1 }
 0x105   :  { %518 = vst [vmem:[%s943_s3] sm:$0xff] %v467_v15  ;;  %520 = vst [vmem:[%s943_s3 + $0x10] sm:$0xff] %v510_v16  ;;  %v469_v19 = vadd.f32 %v468_v17, %v89_v11  ;;  %v512_v20 = vadd.f32 %v511_v18, %v97_v12 }
 0x106   :  { %v470_v21 = vpop.f32.mrf.mxu0  ;;  %v513_v22 = vpop.f32.mrf.mxu1 }
 0x107   :  { %519 = vst [vmem:[%s943_s3 + $0x8] sm:$0xff] %v469_v19  ;;  %521 = vst [vmem:[%s943_s3 + $0x18] sm:$0xff] %v512_v20  ;;  %v471_v23 = vadd.f32 %v470_v21, %v85_v9  ;;  %v514_v24 = vadd.f32 %v513_v22, %v93_v10 }
 0x108   :  { %v472_v25 = vpop.f32.mrf.mxu0  ;;  %v515_v26 = vpop.f32.mrf.mxu1 }
 0x109   :  { %522 = vst [vmem:[%s943_s3 + $0x20] sm:$0xff] %v471_v23  ;;  %524 = vst [vmem:[%s943_s3 + $0x30] sm:$0xff] %v514_v24  ;;  %v473_v27 = vadd.f32 %v472_v25, %v89_v11  ;;  %v516_v28 = vadd.f32 %v515_v26, %v97_v12 }
 0x10b   :  { %523 = vst [vmem:[%s943_s3 + $0x28] sm:$0xff] %v473_v27  ;;  %525 = vst [vmem:[%s943_s3 + $0x38] sm:$0xff] %v516_v28 }

// kernel: _lambda_.22
= control target key start
LH: loop header
LB: loop body
LE: loop exit
PB: predicated region body
PF: predicated region fallthrough
CT: control target
= control target key end

     0   :  { %v313_v1 = vmov 0   ;;  %v41_v21 = vlaneseq  ;;  %s445_s1 = inlined_call_operand.vmem [shape: bf16[128,256], index: 1, kind: input, shape index: {}]   ;;  %s446_s0 = inlined_call_operand.vmem [shape: bf16[64,128], index: 0, kind: input, shape index: {}]   ;;  %s447_s2 = inlined_call_operand.vmem [shape: f32[1,256], index: 2, kind: input, shape index: {}]   ;;  %s448_s3 = inlined_call_operand.vmem [shape: f32[64,256], index: 3, kind: output, shape index: {}]  }
   0x1   :  { %v285_v0 = vld [vmem:[%s445_s1 + $0x74] ss:$8 sps:$4 sm:$0xff]   ;;  %187 = vmatprep.mubr.bf16.mxu0 %v313_v1  ;;  %207 = vmatprep.mubr.bf16.mxu1 %v313_v1  ;;  %v287_v2 = vld [vmem:[%s445_s1 + $0x70] ss:$8 sps:$4 sm:$0xff]   ;;  %v288_v3 = vld [vmem:[%s445_s1 + $0x64] ss:$8 sps:$4 sm:$0xff]  }
   0x2   :  { %155 = vmatprep.subr.bf16.mxu0 %v285_v0  ;;  %268 = vmatprep.subr.bf16.mxu1 %v285_v0  ;;  %v290_v4 = vld [vmem:[%s445_s1 + $0x60] ss:$8 sps:$4 sm:$0xff]   ;;  %v291_v5 = vld [vmem:[%s445_s1 + $0x54] ss:$8 sps:$4 sm:$0xff]   ;;  %v293_v6 = vld [vmem:[%s445_s1 + $0x50] ss:$8 sps:$4 sm:$0xff]  }
   0x3   :  { %156 = vmatpush1.bf16.msra.mxu0 %v287_v2  ;;  %276 = vmatpush1.bf16.msra.mxu1 %v287_v2  ;;  %v294_v7 = vld [vmem:[%s445_s1 + $0x44] ss:$8 sps:$4 sm:$0xff]   ;;  %v296_v8 = vld [vmem:[%s445_s1 + $0x40] ss:$8 sps:$4 sm:$0xff]   ;;  %v297_v9 = vld [vmem:[%s445_s1 + $0x34] ss:$8 sps:$4 sm:$0xff]  }
   0x4   :  { %157 = vmatprep.subr.bf16.mxu0 %v288_v3  ;;  %269 = vmatprep.subr.bf16.mxu1 %v288_v3  ;;  %v299_v10 = vld [vmem:[%s445_s1 + $0x30] ss:$8 sps:$4 sm:$0xff]   ;;  %v300_v11 = vld [vmem:[%s445_s1 + $0x24] ss:$8 sps:$4 sm:$0xff]   ;;  %v302_v12 = vld [vmem:[%s445_s1 + $0x20] ss:$8 sps:$4 sm:$0xff]  }
   0x5   :  { %v303_v13 = vld [vmem:[%s445_s1 + $0x14] ss:$8 sps:$4 sm:$0xff]   ;;  %v305_v14 = vld [vmem:[%s445_s1 + $0x10] ss:$8 sps:$4 sm:$0xff]   ;;  %v306_v15 = vld [vmem:[%s445_s1 + $0x4] ss:$8 sps:$4 sm:$0xff]  }
   0x6   :  { %v308_v16 = vld [vmem:[%s445_s1] ss:$8 sps:$4 sm:$0xff]   ;;  %v310_v18 = vld [vmem:[%s446_s0 + $0x10] sm:$0xff]   ;;  %v312_v20 = vld [vmem:[%s446_s0 + $0x18] sm:$0xff]   ;;  %v42_v22 = vshrl.u32 %v41_v21, 7 }
   0x7   :  { %158 = vmatpush1.bf16.msra.mxu0 %v290_v4  ;;  %277 = vmatpush1.bf16.msra.mxu1 %v290_v4  ;;  %v309_v17 = vld [vmem:[%s446_s0] sm:$0xff]   ;;  %v311_v19 = vld [vmem:[%s446_s0 + $0x8] sm:$0xff]  }
   0x8   :  { %159 = vmatprep.subr.bf16.mxu0 %v291_v5  ;;  %270 = vmatprep.subr.bf16.mxu1 %v291_v5  ;;  %v43_v23 = vsub.s32 0, %v42_v22  ;;  %v39_v24 = vld [vmem:[%s447_s2] sm:$0x3]  ;;  %v47_v25 = vsub.s32 1, %v42_v22 }
   0xa   :  { %v44_v26 = vrot.slane %v39_v24, %v43_v23  ;;  %v48_v27 = vrot.slane %v39_v24, %v47_v25 }
   0xb   :  { %160 = vmatpush1.bf16.msra.mxu0 %v293_v6  ;;  %278 = vmatpush1.bf16.msra.mxu1 %v293_v6 }
   0xc   :  { %161 = vmatprep.subr.bf16.mxu0 %v294_v7  ;;  %271 = vmatprep.subr.bf16.mxu1 %v294_v7 }
   0xf   :  { %162 = vmatpush1.bf16.msra.mxu0 %v296_v8  ;;  %279 = vmatpush1.bf16.msra.mxu1 %v296_v8 }
  0x10   :  { %163 = vmatprep.subr.bf16.mxu0 %v297_v9  ;;  %272 = vmatprep.subr.bf16.mxu1 %v297_v9 }
  0x13   :  { %164 = vmatpush1.bf16.msra.mxu0 %v299_v10  ;;  %280 = vmatpush1.bf16.msra.mxu1 %v299_v10 }
  0x14   :  { %165 = vmatprep.subr.bf16.mxu0 %v300_v11  ;;  %273 = vmatprep.subr.bf16.mxu1 %v300_v11 }
  0x17   :  { %166 = vmatpush1.bf16.msra.mxu0 %v302_v12  ;;  %281 = vmatpush1.bf16.msra.mxu1 %v302_v12 }
  0x18   :  { %167 = vmatprep.subr.bf16.mxu0 %v303_v13  ;;  %274 = vmatprep.subr.bf16.mxu1 %v303_v13 }
  0x1b   :  { %168 = vmatpush1.bf16.msra.mxu0 %v305_v14  ;;  %282 = vmatpush1.bf16.msra.mxu1 %v305_v14 }
  0x1c   :  { %169 = vmatprep.subr.bf16.mxu0 %v306_v15  ;;  %275 = vmatprep.subr.bf16.mxu1 %v306_v15 }
  0x1f   :  { %170 = vmatpush1.bf16.msra.mxu0 %v308_v16  ;;  %283 = vmatpush1.bf16.msra.mxu1 %v308_v16 }
  0x22   :  { %188 = vmatmul.mubr.bf16.vlgmr.msra.gmra.mxu0 %v309_v17  ;;  %208 = vmatmul.mubr.bf16.vlgmr.msra.gmra.mxu1 %v310_v18 }
  0x23   :  { %197 = vmatprep.mubr.bf16.mxu0 %v313_v1  ;;  %217 = vmatprep.mubr.bf16.mxu1 %v313_v1 }
  0x2a   :  { %198 = vmatmul.mubr.bf16.gmra.mxu0 %v311_v19  ;;  %218 = vmatmul.mubr.bf16.gmra.mxu1 %v312_v20 }
  0xe2   :  { %v189_v28 = vpop.f32.mrf.mxu0  ;;  %v209_v29 = vpop.f32.mrf.mxu1 }
  0xe3   :  { %v190_v30 = vadd.f32 %v189_v28, %v44_v26  ;;  %v210_v31 = vadd.f32 %v209_v29, %v44_v26 }
  0xe4   :  { %v191_v32 = vpop.f32.mrf.mxu0  ;;  %v211_v33 = vpop.f32.mrf.mxu1 }
  0xe5   :  { %228 = vst [vmem:[%s448_s3] sm:$0xff] %v190_v30  ;;  %236 = vst [vmem:[%s448_s3 + $0x40] sm:$0xff] %v210_v31  ;;  %v192_v34 = vadd.f32 %v191_v32, %v48_v27  ;;  %v212_v35 = vadd.f32 %v211_v33, %v48_v27 }
  0xe6   :  { %v193_v36 = vpop.f32.mrf.mxu0  ;;  %v213_v37 = vpop.f32.mrf.mxu1 }
  0xe7   :  { %229 = vst [vmem:[%s448_s3 + $0x8] sm:$0xff] %v192_v34  ;;  %237 = vst [vmem:[%s448_s3 + $0x48] sm:$0xff] %v212_v35  ;;  %v194_v38 = vadd.f32 %v193_v36, %v44_v26  ;;  %v214_v39 = vadd.f32 %v213_v37, %v44_v26 }
  0xe8   :  { %v195_v40 = vpop.f32.mrf.mxu0  ;;  %v215_v41 = vpop.f32.mrf.mxu1 }
  0xe9   :  { %230 = vst [vmem:[%s448_s3 + $0x10] sm:$0xff] %v194_v38  ;;  %238 = vst [vmem:[%s448_s3 + $0x50] sm:$0xff] %v214_v39  ;;  %v196_v42 = vadd.f32 %v195_v40, %v48_v27  ;;  %v216_v43 = vadd.f32 %v215_v41, %v48_v27 }
  0xea   :  { %v199_v44 = vpop.f32.mrf.mxu0  ;;  %v219_v45 = vpop.f32.mrf.mxu1 }
  0xeb   :  { %231 = vst [vmem:[%s448_s3 + $0x18] sm:$0xff] %v196_v42  ;;  %239 = vst [vmem:[%s448_s3 + $0x58] sm:$0xff] %v216_v43  ;;  %v200_v46 = vadd.f32 %v199_v44, %v44_v26  ;;  %v220_v47 = vadd.f32 %v219_v45, %v44_v26 }
  0xec   :  { %v201_v48 = vpop.f32.mrf.mxu0  ;;  %v221_v49 = vpop.f32.mrf.mxu1 }
  0xed   :  { %232 = vst [vmem:[%s448_s3 + $0x20] sm:$0xff] %v200_v46  ;;  %240 = vst [vmem:[%s448_s3 + $0x60] sm:$0xff] %v220_v47  ;;  %v202_v50 = vadd.f32 %v201_v48, %v48_v27  ;;  %v222_v51 = vadd.f32 %v221_v49, %v48_v27 }
  0xee   :  { %v203_v52 = vpop.f32.mrf.mxu0  ;;  %v223_v53 = vpop.f32.mrf.mxu1 }
  0xef   :  { %233 = vst [vmem:[%s448_s3 + $0x28] sm:$0xff] %v202_v50  ;;  %241 = vst [vmem:[%s448_s3 + $0x68] sm:$0xff] %v222_v51  ;;  %v204_v54 = vadd.f32 %v203_v52, %v44_v26  ;;  %v224_v55 = vadd.f32 %v223_v53, %v44_v26 }
  0xf0   :  { %v205_v56 = vpop.f32.mrf.mxu0  ;;  %v225_v57 = vpop.f32.mrf.mxu1 }
  0xf1   :  { %234 = vst [vmem:[%s448_s3 + $0x30] sm:$0xff] %v204_v54  ;;  %242 = vst [vmem:[%s448_s3 + $0x70] sm:$0xff] %v224_v55  ;;  %v206_v58 = vadd.f32 %v205_v56, %v48_v27  ;;  %v226_v59 = vadd.f32 %v225_v57, %v48_v27 }
  0xf3   :  { %235 = vst [vmem:[%s448_s3 + $0x38] sm:$0xff] %v206_v58  ;;  %243 = vst [vmem:[%s448_s3 + $0x78] sm:$0xff] %v226_v59 }

// kernel: _lambda_.20
= control target key start
LH: loop header
LB: loop body
LE: loop exit
PB: predicated region body
PF: predicated region fallthrough
CT: control target
= control target key end

     0   :  { %vm2278_vm0 = vcmask 1040384   ;;  %s3972_s1 = inlined_call_operand.vmem [shape: bf16[2304,128], index: 1, kind: input, shape index: {}]   ;;  %s3973_s0 = inlined_call_operand.vmem [shape: bf16[64,2304], index: 0, kind: input, shape index: {}]   ;;  %s3974_s2 = inlined_call_operand.vmem [shape: f32[1,128], index: 2, kind: input, shape index: {}]   ;;  %s3975_s4 = inlined_call_operand.vmem [shape: f32[2,128], index: 4, kind: output, shape index: {1}]   ;;  %s3976_s3 = inlined_call_operand.vmem [shape: f32[64,128], index: 3, kind: output, shape index: {0}]  }
   0x1   :  { %v2890_v0 = vld [vmem:[%s3972_s1 + $0x78] sm:$0xff]   ;;  %v2894_v4 = vld [vmem:[%s3972_s1 + $0x70] sm:$0xff]   ;;  %v2898_v8 = vld [vmem:[%s3972_s1 + $0x68] sm:$0xff]  }
   0x2   :  { %v2891_v1 = vld [vmem:[%s3972_s1 + $0xf8] sm:$0xff]   ;;  %2513 = vmatprep.subr.bf16.mxu0 %v2890_v0  ;;  %v2895_v5 = vld [vmem:[%s3972_s1 + $0xf0] sm:$0xff]   ;;  %v2899_v9 = vld [vmem:[%s3972_s1 + $0xe8] sm:$0xff]  }
   0x3   :  { %v2892_v2 = vld [vmem:[%s3972_s1 + $0x38] sm:$0xff]   ;;  %2553 = vmatprep.subr.bf16.mxu1 %v2891_v1  ;;  %v2896_v6 = vld [vmem:[%s3972_s1 + $0x30] sm:$0xff]   ;;  %v2900_v10 = vld [vmem:[%s3972_s1 + $0x28] sm:$0xff]  }
   0x4   :  { %v2893_v3 = vld [vmem:[%s3972_s1 + $0xb8] sm:$0xff]   ;;  %2514 = vmatpush3.bf16.msra.mxu0 %v2892_v2  ;;  %v2897_v7 = vld [vmem:[%s3972_s1 + $0xb0] sm:$0xff]   ;;  %v2901_v11 = vld [vmem:[%s3972_s1 + $0xa8] sm:$0xff]  }
   0x5   :  { %2554 = vmatpush3.bf16.msra.mxu1 %v2893_v3  ;;  %2515 = vmatprep.subr.bf16.mxu0 %v2894_v4  ;;  %v2902_v12 = vld [vmem:[%s3972_s1 + $0x60] sm:$0xff]   ;;  %v2906_v16 = vld [vmem:[%s3972_s1 + $0x58] sm:$0xff]   ;;  %v2910_v20 = vld [vmem:[%s3972_s1 + $0x50] sm:$0xff]  }
   0x6   :  { %2555 = vmatprep.subr.bf16.mxu1 %v2895_v5  ;;  %v2903_v13 = vld [vmem:[%s3972_s1 + $0xe0] sm:$0xff]   ;;  %v2907_v17 = vld [vmem:[%s3972_s1 + $0xd8] sm:$0xff]   ;;  %v2911_v21 = vld [vmem:[%s3972_s1 + $0xd0] sm:$0xff]  }
   0x7   :  { %v2904_v14 = vld [vmem:[%s3972_s1 + $0x20] sm:$0xff]   ;;  %v2908_v18 = vld [vmem:[%s3972_s1 + $0x18] sm:$0xff]   ;;  %v2912_v22 = vld [vmem:[%s3972_s1 + $0x10] sm:$0xff]  }
   0x8   :  { %2516 = vmatpush3.bf16.msra.mxu0 %v2896_v6  ;;  %v2905_v15 = vld [vmem:[%s3972_s1 + $0xa0] sm:$0xff]   ;;  %v2909_v19 = vld [vmem:[%s3972_s1 + $0x98] sm:$0xff]   ;;  %v2913_v23 = vld [vmem:[%s3972_s1 + $0x90] sm:$0xff]  }
   0x9   :  { %2556 = vmatpush3.bf16.msra.mxu1 %v2897_v7  ;;  %2517 = vmatprep.subr.bf16.mxu0 %v2898_v8  ;;  %v2914_v24 = vld [vmem:[%s3972_s1 + $0x48] sm:$0xff]   ;;  %v2918_v28 = vld [vmem:[%s3972_s1 + $0x40] sm:$0xff]   ;;  %v2928_v36 = vld [vmem:[%s3972_s1 + $0x178] sm:$0xff]  }
   0xa   :  { %2557 = vmatprep.subr.bf16.mxu1 %v2899_v9  ;;  %v2915_v25 = vld [vmem:[%s3972_s1 + $0xc8] sm:$0xff]   ;;  %v2919_v29 = vld [vmem:[%s3972_s1 + $0xc0] sm:$0xff]   ;;  %v2929_v37 = vld [vmem:[%s3972_s1 + $0x1f8] sm:$0xff]  }
   0xb   :  { %v2916_v26 = vld [vmem:[%s3972_s1 + $0x8] sm:$0xff]   ;;  %v2920_v30 = vld [vmem:[%s3972_s1] sm:$0xff]   ;;  %v2930_v38 = vld [vmem:[%s3972_s1 + $0x138] sm:$0xff]  }
   0xc   :  { %2518 = vmatpush3.bf16.msra.mxu0 %v2900_v10  ;;  %v2917_v27 = vld [vmem:[%s3972_s1 + $0x88] sm:$0xff]   ;;  %v2921_v31 = vld [vmem:[%s3972_s1 + $0x80] sm:$0xff]   ;;  %v2931_v39 = vld [vmem:[%s3972_s1 + $0x1b8] sm:$0xff]  }
   0xd   :  { %2558 = vmatpush3.bf16.msra.mxu1 %v2901_v11  ;;  %2519 = vmatprep.subr.bf16.mxu0 %v2902_v12  ;;  %v2922_v32 = vld [vmem:[%s3973_s0] ss:$72 sps:$4 sm:$0xff]   ;;  %v2924_v33 = vld [vmem:[%s3973_s0 + $0x4] ss:$72 sps:$4 sm:$0xff]   ;;  %v2932_v40 = vld [vmem:[%s3972_s1 + $0x170] sm:$0xff]  }
   0xe   :  { %2559 = vmatprep.subr.bf16.mxu1 %v2903_v13  ;;  %v2925_v34 = vld [vmem:[%s3973_s0 + $0x8] ss:$72 sps:$4 sm:$0xff]   ;;  %v2927_v35 = vld [vmem:[%s3973_s0 + $0xc] ss:$72 sps:$4 sm:$0xff]   ;;  %1640 = vmatprep.mubr.bf16.mxu0 %v2924_v33  ;;  %v2938_v45 = vld [vmem:[%s3973_s0 + $0x9c] ss:$72 sps:$4 sm:$0xff]  }
   0xf   :  { %1705 = vmatprep.mubr.bf16.mxu1 %v2927_v35  ;;  %v2933_v41 = vld [vmem:[%s3972_s1 + $0x1f0] sm:$0xff]   ;;  %v2941_v47 = vld [vmem:[%s3973_s0 + $0x98] ss:$72 sps:$4 sm:$0xff]   ;;  %v2942_v48 = vld [vmem:[%s3972_s1 + $0x168] sm:$0xff]  }
  0x10   :  { %2520 = vmatpush3.bf16.msra.mxu0 %v2904_v14  ;;  %v2934_v42 = vld [vmem:[%s3972_s1 + $0x130] sm:$0xff]   ;;  %v2943_v49 = vld [vmem:[%s3972_s1 + $0x1e8] sm:$0xff]   ;;  %v2946_v52 = vld [vmem:[%s3972_s1 + $0x160] sm:$0xff]  }
  0x11   :  { %2560 = vmatpush3.bf16.msra.mxu1 %v2905_v15  ;;  %2521 = vmatprep.subr.bf16.mxu0 %v2906_v16  ;;  %v2935_v43 = vld [vmem:[%s3972_s1 + $0x1b0] sm:$0xff]   ;;  %v2944_v50 = vld [vmem:[%s3972_s1 + $0x128] sm:$0xff]   ;;  %v2947_v53 = vld [vmem:[%s3972_s1 + $0x1e0] sm:$0xff]  }
  0x12   :  { %2561 = vmatprep.subr.bf16.mxu1 %v2907_v17  ;;  %v2936_v44 = vld [vmem:[%s3973_s0 + $0x94] ss:$72 sps:$4 sm:$0xff]   ;;  %v2940_v46 = vld [vmem:[%s3973_s0 + $0x90] ss:$72 sps:$4 sm:$0xff]   ;;  %v2945_v51 = vld [vmem:[%s3972_s1 + $0x1a8] sm:$0xff]  }
  0x13   :  { %v2948_v54 = vld [vmem:[%s3972_s1 + $0x120] sm:$0xff]   ;;  %v2952_v57 = vld [vmem:[%s3973_s0 + $0x12c] ss:$72 sps:$4 sm:$0xff]   ;;  %v2955_v59 = vld [vmem:[%s3973_s0 + $0x128] ss:$72 sps:$4 sm:$0xff]  }
  0x14   :  { %2522 = vmatpush3.bf16.msra.mxu0 %v2908_v18  ;;  %v2949_v55 = vld [vmem:[%s3972_s1 + $0x1a0] sm:$0xff]   ;;  %v2956_v60 = vld [vmem:[%s3972_s1 + $0x158] sm:$0xff]   ;;  %v2960_v0 = vld [vmem:[%s3972_s1 + $0x150] sm:$0xff]  }
  0x15   :  { %2562 = vmatpush3.bf16.msra.mxu1 %v2909_v19  ;;  %2523 = vmatprep.subr.bf16.mxu0 %v2910_v20  ;;  %v2950_v56 = vld [vmem:[%s3973_s0 + $0x124] ss:$72 sps:$4 sm:$0xff]   ;;  %v2954_v58 = vld [vmem:[%s3973_s0 + $0x120] ss:$72 sps:$4 sm:$0xff]   ;;  %v2957_v61 = vld [vmem:[%s3972_s1 + $0x1d8] sm:$0xff]  }
  0x16   :  { %2563 = vmatprep.subr.bf16.mxu1 %v2911_v21  ;;  %v2958_v62 = vld [vmem:[%s3972_s1 + $0x118] sm:$0xff]   ;;  %v2961_v1 = vld [vmem:[%s3972_s1 + $0x1d0] sm:$0xff]   ;;  %v2970_v8 = vld [vmem:[%s3972_s1 + $0x148] sm:$0xff]  }
  0x17   :  { %v2959_v63 = vld [vmem:[%s3972_s1 + $0x198] sm:$0xff]   ;;  %v2962_v2 = vld [vmem:[%s3972_s1 + $0x110] sm:$0xff]   ;;  %v2971_v9 = vld [vmem:[%s3972_s1 + $0x1c8] sm:$0xff]  }
  0x18   :  { %2524 = vmatpush3.bf16.msra.mxu0 %v2912_v22  ;;  %v2963_v3 = vld [vmem:[%s3972_s1 + $0x190] sm:$0xff]   ;;  %v2966_v5 = vld [vmem:[%s3973_s0 + $0x1bc] ss:$72 sps:$4 sm:$0xff]   ;;  %v2969_v7 = vld [vmem:[%s3973_s0 + $0x1b8] ss:$72 sps:$4 sm:$0xff]  }
  0x19   :  { %2564 = vmatpush3.bf16.msra.mxu1 %v2913_v23  ;;  %2525 = vmatprep.subr.bf16.mxu0 %v2914_v24  ;;  %v2964_v4 = vld [vmem:[%s3973_s0 + $0x1b4] ss:$72 sps:$4 sm:$0xff]   ;;  %v2968_v6 = vld [vmem:[%s3973_s0 + $0x1b0] ss:$72 sps:$4 sm:$0xff]   ;;  %v2972_v10 = vld [vmem:[%s3972_s1 + $0x108] sm:$0xff]  }
  0x1a   :  { %2565 = vmatprep.subr.bf16.mxu1 %v2915_v25  ;;  %v2973_v11 = vld [vmem:[%s3972_s1 + $0x188] sm:$0xff]   ;;  %v2974_v12 = vld [vmem:[%s3972_s1 + $0x140] sm:$0xff]   ;;  %v2978_v16 = vld [vmem:[%s3973_s0 + $0x10] ss:$72 sps:$4 sm:$0xff]  }
  0x1b   :  { %v2975_v13 = vld [vmem:[%s3972_s1 + $0x1c0] sm:$0xff]   ;;  %v2980_v17 = vld [vmem:[%s3973_s0 + $0x14] ss:$72 sps:$4 sm:$0xff]   ;;  %v2999_v33 = vld [vmem:[%s3972_s1 + $0x2e8] sm:$0xff]  }
  0x1c   :  { %2526 = vmatpush3.bf16.msra.mxu0 %v2916_v26  ;;  %v2976_v14 = vld [vmem:[%s3972_s1 + $0x100] sm:$0xff]   ;;  %v2984_v20 = vld [vmem:[%s3972_s1 + $0x278] sm:$0xff]   ;;  %v2988_v24 = vld [vmem:[%s3972_s1 + $0x270] sm:$0xff]  }
  0x1d   :  { %2566 = vmatpush3.bf16.msra.mxu1 %v2917_v27  ;;  %2527 = vmatprep.subr.bf16.mxu0 %v2918_v28  ;;  %v2977_v15 = vld [vmem:[%s3972_s1 + $0x180] sm:$0xff]   ;;  %v2985_v21 = vld [vmem:[%s3972_s1 + $0x2f8] sm:$0xff]   ;;  %v2989_v25 = vld [vmem:[%s3972_s1 + $0x2f0] sm:$0xff]  }
  0x1e   :  { %2567 = vmatprep.subr.bf16.mxu1 %v2919_v29  ;;  %v2981_v18 = vld [vmem:[%s3973_s0 + $0x18] ss:$72 sps:$4 sm:$0xff]   ;;  %v2983_v19 = vld [vmem:[%s3973_s0 + $0x1c] ss:$72 sps:$4 sm:$0xff]   ;;  %v2990_v26 = vld [vmem:[%s3972_s1 + $0x230] sm:$0xff]  }
  0x1f   :  { %v2986_v22 = vld [vmem:[%s3972_s1 + $0x238] sm:$0xff]   ;;  %v2991_v27 = vld [vmem:[%s3972_s1 + $0x2b0] sm:$0xff]   ;;  %v2992_v28 = vld [vmem:[%s3973_s0 + $0xa4] ss:$72 sps:$4 sm:$0xff]  }
  0x20   :  { %2528 = vmatpush3.bf16.msra.mxu0 %v2920_v30  ;;  %v2987_v23 = vld [vmem:[%s3972_s1 + $0x2b8] sm:$0xff]   ;;  %v2994_v29 = vld [vmem:[%s3973_s0 + $0xac] ss:$72 sps:$4 sm:$0xff]   ;;  %v2996_v30 = vld [vmem:[%s3973_s0 + $0xa0] ss:$72 sps:$4 sm:$0xff]  }
  0x21   :  { %2568 = vmatpush3.bf16.msra.mxu1 %v2921_v31  ;;  %2593 = vmatprep.subr.bf16.mxu0 %v2928_v36  ;;  %v2997_v31 = vld [vmem:[%s3973_s0 + $0xa8] ss:$72 sps:$4 sm:$0xff]   ;;  %v3002_v36 = vld [vmem:[%s3972_s1 + $0x260] sm:$0xff]  }
  0x22   :  { %2633 = vmatprep.subr.bf16.mxu1 %v2929_v37  ;;  %v3001_v35 = vld [vmem:[%s3972_s1 + $0x2a8] sm:$0xff]   ;;  %v3003_v37 = vld [vmem:[%s3972_s1 + $0x2e0] sm:$0xff]  }
  0x23   :  { %1641 = vmatmul.mubr.bf16.vlgmr.msra.gmra.mxu0 %v2922_v32  ;;  %v2998_v32 = vld [vmem:[%s3972_s1 + $0x268] sm:$0xff]  }
  0x24   :  { %1706 = vmatmul.mubr.bf16.vlgmr.msra.gmra.mxu1 %v2925_v34  ;;  %2594 = vmatpush3.bf16.msra.mxu0 %v2930_v38  ;;  %v3000_v34 = vld [vmem:[%s3972_s1 + $0x228] sm:$0xff]   ;;  %v3004_v38 = vld [vmem:[%s3972_s1 + $0x220] sm:$0xff]  }
  0x25   :  { %2634 = vmatpush3.bf16.msra.mxu1 %v2931_v39  ;;  %2595 = vmatprep.subr.bf16.mxu0 %v2932_v40  ;;  %v3005_v39 = vld [vmem:[%s3972_s1 + $0x2a0] sm:$0xff]   ;;  %v3006_v40 = vld [vmem:[%s3973_s0 + $0x134] ss:$72 sps:$4 sm:$0xff]  }
  0x26   :  { %2635 = vmatprep.subr.bf16.mxu1 %v2933_v41  ;;  %1648 = vmatprep.mubr.bf16.mxu0 %v2936_v44  ;;  %v3008_v41 = vld [vmem:[%s3973_s0 + $0x13c] ss:$72 sps:$4 sm:$0xff]  }
  0x27   :  { %1713 = vmatprep.mubr.bf16.mxu1 %v2938_v45  ;;  %v3012_v44 = vld [vmem:[%s3972_s1 + $0x258] sm:$0xff]  }
  0x28   :  { %2596 = vmatpush3.bf16.msra.mxu0 %v2934_v42  ;;  %v3010_v42 = vld [vmem:[%s3973_s0 + $0x130] ss:$72 sps:$4 sm:$0xff]  }
  0x29   :  { %2636 = vmatpush3.bf16.msra.mxu1 %v2935_v43  ;;  %2597 = vmatprep.subr.bf16.mxu0 %v2942_v48  ;;  %v3011_v43 = vld [vmem:[%s3973_s0 + $0x138] ss:$72 sps:$4 sm:$0xff]   ;;  %v3016_v48 = vld [vmem:[%s3972_s1 + $0x250] sm:$0xff]  }
  0x2a   :  { %2637 = vmatprep.subr.bf16.mxu1 %v2943_v49  ;;  %v3013_v45 = vld [vmem:[%s3972_s1 + $0x2d8] sm:$0xff]   ;;  %v3017_v49 = vld [vmem:[%s3972_s1 + $0x2d0] sm:$0xff]  }
  0x2b   :  { %1649 = vmatmul.mubr.bf16.gmra.mxu0 %v2940_v46  ;;  %v3014_v46 = vld [vmem:[%s3972_s1 + $0x218] sm:$0xff]  }
  0x2c   :  { %1714 = vmatmul.mubr.bf16.gmra.mxu1 %v2941_v47  ;;  %2598 = vmatpush3.bf16.msra.mxu0 %v2944_v50  ;;  %v3015_v47 = vld [vmem:[%s3972_s1 + $0x298] sm:$0xff]   ;;  %v3018_v50 = vld [vmem:[%s3972_s1 + $0x210] sm:$0xff]  }
  0x2d   :  { %2638 = vmatpush3.bf16.msra.mxu1 %v2945_v51  ;;  %2599 = vmatprep.subr.bf16.mxu0 %v2946_v52  ;;  %v3019_v51 = vld [vmem:[%s3972_s1 + $0x290] sm:$0xff]   ;;  %v3020_v52 = vld [vmem:[%s3973_s0 + $0x1c4] ss:$72 sps:$4 sm:$0xff]  }
  0x2e   :  { %2639 = vmatprep.subr.bf16.mxu1 %v2947_v53  ;;  %1656 = vmatprep.mubr.bf16.mxu0 %v2950_v56  ;;  %v3022_v53 = vld [vmem:[%s3973_s0 + $0x1cc] ss:$72 sps:$4 sm:$0xff]  }
  0x2f   :  { %1721 = vmatprep.mubr.bf16.mxu1 %v2952_v57  ;;  %v3026_v56 = vld [vmem:[%s3972_s1 + $0x248] sm:$0xff]  }
  0x30   :  { %2600 = vmatpush3.bf16.msra.mxu0 %v2948_v54  ;;  %v3024_v54 = vld [vmem:[%s3973_s0 + $0x1c0] ss:$72 sps:$4 sm:$0xff]  }
  0x31   :  { %2640 = vmatpush3.bf16.msra.mxu1 %v2949_v55  ;;  %2601 = vmatprep.subr.bf16.mxu0 %v2956_v60  ;;  %v3025_v55 = vld [vmem:[%s3973_s0 + $0x1c8] ss:$72 sps:$4 sm:$0xff]   ;;  %v3030_v60 = vld [vmem:[%s3972_s1 + $0x240] sm:$0xff]  }
  0x32   :  { %2641 = vmatprep.subr.bf16.mxu1 %v2957_v61  ;;  %v3027_v57 = vld [vmem:[%s3972_s1 + $0x2c8] sm:$0xff]   ;;  %v3031_v61 = vld [vmem:[%s3972_s1 + $0x2c0] sm:$0xff]  }
  0x33   :  { %1657 = vmatmul.mubr.bf16.gmra.mxu0 %v2954_v58  ;;  %v3028_v58 = vld [vmem:[%s3972_s1 + $0x208] sm:$0xff]  }
  0x34   :  { %1722 = vmatmul.mubr.bf16.gmra.mxu1 %v2955_v59  ;;  %2602 = vmatpush3.bf16.msra.mxu0 %v2958_v62  ;;  %v3029_v59 = vld [vmem:[%s3972_s1 + $0x288] sm:$0xff]   ;;  %v3032_v62 = vld [vmem:[%s3972_s1 + $0x200] sm:$0xff]  }
  0x35   :  { %2642 = vmatpush3.bf16.msra.mxu1 %v2959_v63  ;;  %2603 = vmatprep.subr.bf16.mxu0 %v2960_v0  ;;  %v3033_v63 = vld [vmem:[%s3972_s1 + $0x280] sm:$0xff]  }
  0x36   :  { %2643 = vmatprep.subr.bf16.mxu1 %v2961_v1  ;;  %1664 = vmatprep.mubr.bf16.mxu0 %v2964_v4  ;;  %v3034_v0 = vld [vmem:[%s3973_s0 + $0x20] ss:$72 sps:$4 sm:$0xff]   ;;  %v3036_v1 = vld [vmem:[%s3973_s0 + $0x24] ss:$72 sps:$4 sm:$0xff]   ;;  %v3040_v4 = vld [vmem:[%s3972_s1 + $0x378] sm:$0xff]  }
  0x37   :  { %1729 = vmatprep.mubr.bf16.mxu1 %v2966_v5  ;;  %v3041_v5 = vld [vmem:[%s3972_s1 + $0x3f8] sm:$0xff]  }
  0x38   :  { %2604 = vmatpush3.bf16.msra.mxu0 %v2962_v2  ;;  %v3037_v2 = vld [vmem:[%s3973_s0 + $0x28] ss:$72 sps:$4 sm:$0xff]  }
  0x39   :  { %2644 = vmatpush3.bf16.msra.mxu1 %v2963_v3  ;;  %2605 = vmatprep.subr.bf16.mxu0 %v2970_v8  ;;  %v3039_v3 = vld [vmem:[%s3973_s0 + $0x2c] ss:$72 sps:$4 sm:$0xff]  }
  0x3a   :  { %2645 = vmatprep.subr.bf16.mxu1 %v2971_v9  ;;  %v3044_v8 = vld [vmem:[%s3972_s1 + $0x370] sm:$0xff]  }
  0x3b   :  { %1665 = vmatmul.mubr.bf16.gmra.mxu0 %v2968_v6  ;;  %v3042_v6 = vld [vmem:[%s3972_s1 + $0x338] sm:$0xff]   ;;  %v3045_v9 = vld [vmem:[%s3972_s1 + $0x3f0] sm:$0xff]  }
  0x3c   :  { %1730 = vmatmul.mubr.bf16.gmra.mxu1 %v2969_v7  ;;  %2606 = vmatpush3.bf16.msra.mxu0 %v2972_v10  ;;  %v3043_v7 = vld [vmem:[%s3972_s1 + $0x3b8] sm:$0xff]   ;;  %v3046_v10 = vld [vmem:[%s3972_s1 + $0x330] sm:$0xff]  }
  0x3d   :  { %2646 = vmatpush3.bf16.msra.mxu1 %v2973_v11  ;;  %2607 = vmatprep.subr.bf16.mxu0 %v2974_v12  ;;  %v3047_v11 = vld [vmem:[%s3972_s1 + $0x3b0] sm:$0xff]  }
  0x3e   :  { %2647 = vmatprep.subr.bf16.mxu1 %v2975_v13  ;;  %1770 = vmatprep.mubr.bf16.mxu0 %v2980_v17  ;;  %v3048_v12 = vld [vmem:[%s3973_s0 + $0xb4] ss:$72 sps:$4 sm:$0xff]   ;;  %v3055_v17 = vld [vmem:[%s3972_s1 + $0x3e8] sm:$0xff]  }
  0x3f   :  { %1835 = vmatprep.mubr.bf16.mxu1 %v2983_v19  ;;  %v3050_v13 = vld [vmem:[%s3973_s0 + $0xbc] ss:$72 sps:$4 sm:$0xff]   ;;  %v3057_v19 = vld [vmem:[%s3972_s1 + $0x3a8] sm:$0xff]  }
  0x40   :  { %2608 = vmatpush3.bf16.msra.mxu0 %v2976_v14  ;;  %v3052_v14 = vld [vmem:[%s3973_s0 + $0xb0] ss:$72 sps:$4 sm:$0xff]  }
  0x41   :  { %2648 = vmatpush3.bf16.msra.mxu1 %v2977_v15  ;;  %2673 = vmatprep.subr.bf16.mxu0 %v2984_v20  ;;  %v3053_v15 = vld [vmem:[%s3973_s0 + $0xb8] ss:$72 sps:$4 sm:$0xff]  }
  0x42   :  { %2713 = vmatprep.subr.bf16.mxu1 %v2985_v21  ;;  %v3058_v20 = vld [vmem:[%s3972_s1 + $0x360] sm:$0xff]  }
  0x43   :  { %1771 = vmatmul.mubr.bf16.vlgmr.msra.gmra.mxu0 %v2978_v16  ;;  %v3054_v16 = vld [vmem:[%s3972_s1 + $0x368] sm:$0xff]   ;;  %v3059_v21 = vld [vmem:[%s3972_s1 + $0x3e0] sm:$0xff]  }
  0x44   :  { %1836 = vmatmul.mubr.bf16.vlgmr.msra.gmra.mxu1 %v2981_v18  ;;  %2674 = vmatpush3.bf16.msra.mxu0 %v2986_v22  ;;  %v3056_v18 = vld [vmem:[%s3972_s1 + $0x328] sm:$0xff]   ;;  %v3060_v22 = vld [vmem:[%s3972_s1 + $0x320] sm:$0xff]  }
  0x45   :  { %2714 = vmatpush3.bf16.msra.mxu1 %v2987_v23  ;;  %2675 = vmatprep.subr.bf16.mxu0 %v2988_v24  ;;  %v3061_v23 = vld [vmem:[%s3972_s1 + $0x3a0] sm:$0xff]  }
  0x46   :  { %2715 = vmatprep.subr.bf16.mxu1 %v2989_v25  ;;  %1778 = vmatprep.mubr.bf16.mxu0 %v2992_v28  ;;  %v3062_v24 = vld [vmem:[%s3973_s0 + $0x144] ss:$72 sps:$4 sm:$0xff]   ;;  %v3068_v28 = vld [vmem:[%s3972_s1 + $0x358] sm:$0xff]  }
  0x47   :  { %1843 = vmatprep.mubr.bf16.mxu1 %v2994_v29  ;;  %v3064_v25 = vld [vmem:[%s3973_s0 + $0x14c] ss:$72 sps:$4 sm:$0xff]   ;;  %v3069_v29 = vld [vmem:[%s3972_s1 + $0x3d8] sm:$0xff]  }
  0x48   :  { %2676 = vmatpush3.bf16.msra.mxu0 %v2990_v26  ;;  %v3066_v26 = vld [vmem:[%s3973_s0 + $0x140] ss:$72 sps:$4 sm:$0xff]  }
  0x49   :  { %2716 = vmatpush3.bf16.msra.mxu1 %v2991_v27  ;;  %2677 = vmatprep.subr.bf16.mxu0 %v2998_v32  ;;  %v3067_v27 = vld [vmem:[%s3973_s0 + $0x148] ss:$72 sps:$4 sm:$0xff]  }
  0x4a   :  { %2717 = vmatprep.subr.bf16.mxu1 %v2999_v33  ;;  %v3072_v32 = vld [vmem:[%s3972_s1 + $0x350] sm:$0xff]  }
  0x4b   :  { %1779 = vmatmul.mubr.bf16.gmra.mxu0 %v2996_v30  ;;  %v3070_v30 = vld [vmem:[%s3972_s1 + $0x318] sm:$0xff]   ;;  %v3073_v33 = vld [vmem:[%s3972_s1 + $0x3d0] sm:$0xff]  }
  0x4c   :  { %1844 = vmatmul.mubr.bf16.gmra.mxu1 %v2997_v31  ;;  %2678 = vmatpush3.bf16.msra.mxu0 %v3000_v34  ;;  %v3071_v31 = vld [vmem:[%s3972_s1 + $0x398] sm:$0xff]   ;;  %v3074_v34 = vld [vmem:[%s3972_s1 + $0x310] sm:$0xff]  }
  0x4d   :  { %2718 = vmatpush3.bf16.msra.mxu1 %v3001_v35  ;;  %2679 = vmatprep.subr.bf16.mxu0 %v3002_v36  ;;  %v3075_v35 = vld [vmem:[%s3972_s1 + $0x390] sm:$0xff]  }
  0x4e   :  { %2719 = vmatprep.subr.bf16.mxu1 %v3003_v37  ;;  %1786 = vmatprep.mubr.bf16.mxu0 %v3006_v40  ;;  %v3076_v36 = vld [vmem:[%s3973_s0 + $0x1d4] ss:$72 sps:$4 sm:$0xff]   ;;  %v3082_v40 = vld [vmem:[%s3972_s1 + $0x348] sm:$0xff]  }
  0x4f   :  { %1851 = vmatprep.mubr.bf16.mxu1 %v3008_v41  ;;  %v3078_v37 = vld [vmem:[%s3973_s0 + $0x1dc] ss:$72 sps:$4 sm:$0xff]   ;;  %v3083_v41 = vld [vmem:[%s3972_s1 + $0x3c8] sm:$0xff]  }
  0x50   :  { %2680 = vmatpush3.bf16.msra.mxu0 %v3004_v38  ;;  %v3080_v38 = vld [vmem:[%s3973_s0 + $0x1d0] ss:$72 sps:$4 sm:$0xff]  }
  0x51   :  { %2720 = vmatpush3.bf16.msra.mxu1 %v3005_v39  ;;  %2681 = vmatprep.subr.bf16.mxu0 %v3012_v44  ;;  %v3081_v39 = vld [vmem:[%s3973_s0 + $0x1d8] ss:$72 sps:$4 sm:$0xff]  }
  0x52   :  { %2721 = vmatprep.subr.bf16.mxu1 %v3013_v45  ;;  %v3086_v44 = vld [vmem:[%s3972_s1 + $0x340] sm:$0xff]  }
  0x53   :  { %1787 = vmatmul.mubr.bf16.gmra.mxu0 %v3010_v42  ;;  %v3084_v42 = vld [vmem:[%s3972_s1 + $0x308] sm:$0xff]   ;;  %v3087_v45 = vld [vmem:[%s3972_s1 + $0x3c0] sm:$0xff]  }
  0x54   :  { %1852 = vmatmul.mubr.bf16.gmra.mxu1 %v3011_v43  ;;  %2682 = vmatpush3.bf16.msra.mxu0 %v3014_v46  ;;  %v3085_v43 = vld [vmem:[%s3972_s1 + $0x388] sm:$0xff]   ;;  %v3088_v46 = vld [vmem:[%s3972_s1 + $0x300] sm:$0xff]  }
  0x55   :  { %2722 = vmatpush3.bf16.msra.mxu1 %v3015_v47  ;;  %2683 = vmatprep.subr.bf16.mxu0 %v3016_v48  ;;  %v3089_v47 = vld [vmem:[%s3972_s1 + $0x380] sm:$0xff]   ;;  %v3090_v48 = vld [vmem:[%s3973_s0 + $0x30] ss:$72 sps:$4 sm:$0xff]  }
  0x56   :  { %2723 = vmatprep.subr.bf16.mxu1 %v3017_v49  ;;  %1794 = vmatprep.mubr.bf16.mxu0 %v3020_v52  ;;  %v3092_v49 = vld [vmem:[%s3973_s0 + $0x34] ss:$72 sps:$4 sm:$0xff]  }
  0x57   :  { %1859 = vmatprep.mubr.bf16.mxu1 %v3022_v53  ;;  %v3096_v52 = vld [vmem:[%s3972_s1 + $0x478] sm:$0xff]  }
  0x58   :  { %2684 = vmatpush3.bf16.msra.mxu0 %v3018_v50  ;;  %v3093_v50 = vld [vmem:[%s3973_s0 + $0x38] ss:$72 sps:$4 sm:$0xff]  }
  0x59   :  { %2724 = vmatpush3.bf16.msra.mxu1 %v3019_v51  ;;  %2685 = vmatprep.subr.bf16.mxu0 %v3026_v56  ;;  %v3095_v51 = vld [vmem:[%s3973_s0 + $0x3c] ss:$72 sps:$4 sm:$0xff]  }
  0x5a   :  { %2725 = vmatprep.subr.bf16.mxu1 %v3027_v57  ;;  %v3097_v53 = vld [vmem:[%s3972_s1 + $0x438] sm:$0xff]   ;;  %v3100_v56 = vld [vmem:[%s3973_s0 + $0xc4] ss:$72 sps:$4 sm:$0xff]  }
  0x5b   :  { %1795 = vmatmul.mubr.bf16.gmra.mxu0 %v3024_v54  ;;  %v3098_v54 = vld [vmem:[%s3972_s1 + $0x470] sm:$0xff]  }
  0x5c   :  { %1860 = vmatmul.mubr.bf16.gmra.mxu1 %v3025_v55  ;;  %2686 = vmatpush3.bf16.msra.mxu0 %v3028_v58  ;;  %v3099_v55 = vld [vmem:[%s3972_s1 + $0x430] sm:$0xff]   ;;  %v3104_v58 = vld [vmem:[%s3973_s0 + $0xc0] ss:$72 sps:$4 sm:$0xff]  }
  0x5d   :  { %2726 = vmatpush3.bf16.msra.mxu1 %v3029_v59  ;;  %2687 = vmatprep.subr.bf16.mxu0 %v3030_v60  ;;  %v3102_v57 = vld [vmem:[%s3973_s0 + $0xcc] ss:$72 sps:$4 sm:$0xff]   ;;  %v3105_v59 = vld [vmem:[%s3973_s0 + $0xc8] ss:$72 sps:$4 sm:$0xff]  }
  0x5e   :  { %2727 = vmatprep.subr.bf16.mxu1 %v3031_v61  ;;  %1900 = vmatprep.mubr.bf16.mxu0 %v3036_v1  ;;  %v3106_v60 = vld [vmem:[%s3972_s1 + $0x468] sm:$0xff]   ;;  %v3112_v1 = vld [vmem:[%s3973_s0 + $0x15c] ss:$72 sps:$4 sm:$0xff]  }
  0x5f   :  { %1965 = vmatprep.mubr.bf16.mxu1 %v3039_v3  ;;  %v3107_v61 = vld [vmem:[%s3972_s1 + $0x428] sm:$0xff]   ;;  %v3116_v3 = vld [vmem:[%s3972_s1 + $0x458] sm:$0xff]  }
  0x60   :  { %2688 = vmatpush3.bf16.msra.mxu0 %v3032_v62  ;;  %v3108_v62 = vld [vmem:[%s3972_s1 + $0x460] sm:$0xff]  }
  0x61   :  { %2728 = vmatpush3.bf16.msra.mxu1 %v3033_v63  ;;  %2753 = vmatprep.subr.bf16.mxu0 %v3040_v4  ;;  %v3109_v63 = vld [vmem:[%s3972_s1 + $0x420] sm:$0xff]  }
  0x62   :  { %2793 = vmatprep.subr.bf16.mxu1 %v3041_v5  ;;  %v3115_v4 = vld [vmem:[%s3973_s0 + $0x158] ss:$72 sps:$4 sm:$0xff]  }
  0x63   :  { %1901 = vmatmul.mubr.bf16.vlgmr.msra.gmra.mxu0 %v3034_v0  ;;  %v3110_v0 = vld [vmem:[%s3973_s0 + $0x154] ss:$72 sps:$4 sm:$0xff]  }
  0x64   :  { %1966 = vmatmul.mubr.bf16.vlgmr.msra.gmra.mxu1 %v3037_v2  ;;  %2754 = vmatpush3.bf16.msra.mxu0 %v3042_v6  ;;  %v3114_v2 = vld [vmem:[%s3973_s0 + $0x150] ss:$72 sps:$4 sm:$0xff]  }
  0x65   :  { %2794 = vmatpush3.bf16.msra.mxu1 %v3043_v7  ;;  %2755 = vmatprep.subr.bf16.mxu0 %v3044_v8  ;;  %v3117_v5 = vld [vmem:[%s3972_s1 + $0x418] sm:$0xff]   ;;  %v3118_v6 = vld [vmem:[%s3972_s1 + $0x450] sm:$0xff]   ;;  %v3120_v7 = vld [vmem:[%s3973_s0 + $0x1e4] ss:$72 sps:$4 sm:$0xff]  }
  0x66   :  { %2795 = vmatprep.subr.bf16.mxu1 %v3045_v9  ;;  %1908 = vmatprep.mubr.bf16.mxu0 %v3048_v12  ;;  %v3122_v8 = vld [vmem:[%s3973_s0 + $0x1ec] ss:$72 sps:$4 sm:$0xff]   ;;  %v3125_v12 = vld [vmem:[%s3973_s0 + $0x1e8] ss:$72 sps:$4 sm:$0xff]  }
  0x67   :  { %1973 = vmatprep.mubr.bf16.mxu1 %v3050_v13  ;;  %v3119_v9 = vld [vmem:[%s3972_s1 + $0x410] sm:$0xff]   ;;  %v3127_v13 = vld [vmem:[%s3972_s1 + $0x408] sm:$0xff]  }
  0x68   :  { %2756 = vmatpush3.bf16.msra.mxu0 %v3046_v10  ;;  %v3126_v10 = vld [vmem:[%s3972_s1 + $0x448] sm:$0xff]  }
  0x69   :  { %2796 = vmatpush3.bf16.msra.mxu1 %v3047_v11  ;;  %2757 = vmatprep.subr.bf16.mxu0 %v3054_v16  ;;  %v3124_v11 = vld [vmem:[%s3973_s0 + $0x1e0] ss:$72 sps:$4 sm:$0xff]   ;;  %v3135_v16 = vld [vmem:[%s3973_s0 + $0x164] ss:$72 sps:$4 sm:$0xff]  }
  0x6a   :  { %2797 = vmatprep.subr.bf16.mxu1 %v3055_v17  ;;  %v3129_v17 = vld [vmem:[%s3972_s1 + $0x400] sm:$0xff]  }
  0x6b   :  { %1909 = vmatmul.mubr.bf16.gmra.mxu0 %v3052_v14  ;;  %v3128_v14 = vld [vmem:[%s3972_s1 + $0x440] sm:$0xff]  }
  0x6c   :  { %1974 = vmatmul.mubr.bf16.gmra.mxu1 %v3053_v15  ;;  %2758 = vmatpush3.bf16.msra.mxu0 %v3056_v18  ;;  %v3132_v15 = vld [vmem:[%s3973_s0 + $0x44] ss:$72 sps:$4 sm:$0xff]   ;;  %v3130_v18 = vld [vmem:[%s3973_s0 + $0x40] ss:$72 sps:$4 sm:$0xff]  }
  0x6d   :  { %2798 = vmatpush3.bf16.msra.mxu1 %v3057_v19  ;;  %2759 = vmatprep.subr.bf16.mxu0 %v3058_v20  ;;  %v3133_v19 = vld [vmem:[%s3973_s0 + $0x160] ss:$72 sps:$4 sm:$0xff]   ;;  %v3136_v20 = vld [vmem:[%s3973_s0 + $0xd4] ss:$72 sps:$4 sm:$0xff]  }
  0x6e   :  { %2799 = vmatprep.subr.bf16.mxu1 %v3059_v21  ;;  %1916 = vmatprep.mubr.bf16.mxu0 %v3062_v24  ;;  %v3138_v21 = vld [vmem:[%s3973_s0 + $0x1f4] ss:$72 sps:$4 sm:$0xff]  }
  0x6f   :  { %1981 = vmatprep.mubr.bf16.mxu1 %v3064_v25 }
  0x70   :  { %2760 = vmatpush3.bf16.msra.mxu0 %v3060_v22  ;;  %v3140_v22 = vld [vmem:[%s3973_s0 + $0xd0] ss:$72 sps:$4 sm:$0xff]  }
  0x71   :  { %2800 = vmatpush3.bf16.msra.mxu1 %v3061_v23  ;;  %2761 = vmatprep.subr.bf16.mxu0 %v3068_v28  ;;  %v3141_v23 = vld [vmem:[%s3973_s0 + $0x1f0] ss:$72 sps:$4 sm:$0xff]  }
  0x72   :  { %2801 = vmatprep.subr.bf16.mxu1 %v3069_v29 }
  0x73   :  { %1917 = vmatmul.mubr.bf16.gmra.mxu0 %v3066_v26  ;;  %v2296_v26 = vld [vmem:[%s3974_s2] ss:$0 sm:$0xff] }
  0x74   :  { %1982 = vmatmul.mubr.bf16.gmra.mxu1 %v3067_v27  ;;  %2762 = vmatpush3.bf16.msra.mxu0 %v3070_v30 }
  0x75   :  { %2802 = vmatpush3.bf16.msra.mxu1 %v3071_v31  ;;  %2763 = vmatprep.subr.bf16.mxu0 %v3072_v32 }
  0x76   :  { %2803 = vmatprep.subr.bf16.mxu1 %v3073_v33  ;;  %1924 = vmatprep.mubr.bf16.mxu0 %v3076_v36 }
  0x77   :  { %1989 = vmatprep.mubr.bf16.mxu1 %v3078_v37 }
  0x78   :  { %2764 = vmatpush3.bf16.msra.mxu0 %v3074_v34 }
  0x79   :  { %2804 = vmatpush3.bf16.msra.mxu1 %v3075_v35  ;;  %2765 = vmatprep.subr.bf16.mxu0 %v3082_v40 }
  0x7a   :  { %2805 = vmatprep.subr.bf16.mxu1 %v3083_v41 }
  0x7b   :  { %1925 = vmatmul.mubr.bf16.gmra.mxu0 %v3080_v38 }
  0x7c   :  { %1990 = vmatmul.mubr.bf16.gmra.mxu1 %v3081_v39  ;;  %2766 = vmatpush3.bf16.msra.mxu0 %v3084_v42 }
  0x7d   :  { %2806 = vmatpush3.bf16.msra.mxu1 %v3085_v43  ;;  %2767 = vmatprep.subr.bf16.mxu0 %v3086_v44 }
  0x7e   :  { %2807 = vmatprep.subr.bf16.mxu1 %v3087_v45  ;;  %2030 = vmatprep.mubr.bf16.mxu0 %v3092_v49 }
  0x7f   :  { %2095 = vmatprep.mubr.bf16.mxu1 %v3095_v51 }
  0x80   :  { %2768 = vmatpush3.bf16.msra.mxu0 %v3088_v46 }
  0x81   :  { %2808 = vmatpush3.bf16.msra.mxu1 %v3089_v47  ;;  %2833 = vmatprep.subr.bf16.mxu0 %v3096_v52 }
  0x82   :  { %2873 = vmatprep.subr.bf16.mxu1 %v3096_v52 }
  0x83   :  { %2031 = vmatmul.mubr.bf16.vlgmr.msra.gmra.mxu0 %v3090_v48 }
  0x84   :  { %2096 = vmatmul.mubr.bf16.vlgmr.msra.gmra.mxu1 %v3093_v50  ;;  %2834 = vmatpush3.bf16.msra.mxu0 %v3097_v53 }
  0x85   :  { %2881 = vmatpush3.bf16.msra.mxu1 %v3097_v53  ;;  %2835 = vmatprep.subr.bf16.mxu0 %v3098_v54 }
  0x86   :  { %2874 = vmatprep.subr.bf16.mxu1 %v3098_v54  ;;  %2038 = vmatprep.mubr.bf16.mxu0 %v3100_v56 }
  0x87   :  { %2103 = vmatprep.mubr.bf16.mxu1 %v3102_v57 }
  0x88   :  { %2836 = vmatpush3.bf16.msra.mxu0 %v3099_v55 }
  0x89   :  { %2882 = vmatpush3.bf16.msra.mxu1 %v3099_v55  ;;  %2837 = vmatprep.subr.bf16.mxu0 %v3106_v60 }
  0x8a   :  { %2875 = vmatprep.subr.bf16.mxu1 %v3106_v60 }
  0x8b   :  { %2039 = vmatmul.mubr.bf16.gmra.mxu0 %v3104_v58 }
  0x8c   :  { %2104 = vmatmul.mubr.bf16.gmra.mxu1 %v3105_v59  ;;  %2838 = vmatpush3.bf16.msra.mxu0 %v3107_v61 }
  0x8d   :  { %2883 = vmatpush3.bf16.msra.mxu1 %v3107_v61  ;;  %2839 = vmatprep.subr.bf16.mxu0 %v3108_v62 }
  0x8e   :  { %2876 = vmatprep.subr.bf16.mxu1 %v3108_v62  ;;  %2046 = vmatprep.mubr.bf16.mxu0 %v3110_v0 }
  0x8f   :  { %2111 = vmatprep.mubr.bf16.mxu1 %v3112_v1 }
  0x90   :  { %2840 = vmatpush3.bf16.msra.mxu0 %v3109_v63 }
  0x91   :  { %2884 = vmatpush3.bf16.msra.mxu1 %v3109_v63  ;;  %2841 = vmatprep.subr.bf16.mxu0 %v3116_v3 }
  0x92   :  { %2877 = vmatprep.subr.bf16.mxu1 %v3116_v3 }
  0x93   :  { %2047 = vmatmul.mubr.bf16.gmra.mxu0 %v3114_v2 }
  0x94   :  { %2112 = vmatmul.mubr.bf16.gmra.mxu1 %v3115_v4  ;;  %2842 = vmatpush3.bf16.msra.mxu0 %v3117_v5 }
  0x95   :  { %2054 = vmatprep.mubr.bf16.mxu0 %v3120_v7  ;;  %2885 = vmatpush3.bf16.msra.mxu1 %v3117_v5 }
  0x96   :  { %2843 = vmatprep.subr.bf16.mxu0 %v3118_v6  ;;  %2878 = vmatprep.subr.bf16.mxu1 %v3118_v6 }
  0x97   :  { %2119 = vmatprep.mubr.bf16.mxu1 %v3122_v8 }
  0x98   :  { %2844 = vmatpush3.bf16.msra.mxu0 %v3119_v9 }
  0x99   :  { %2886 = vmatpush3.bf16.msra.mxu1 %v3119_v9  ;;  %2845 = vmatprep.subr.bf16.mxu0 %v3126_v10 }
  0x9a   :  { %2879 = vmatprep.subr.bf16.mxu1 %v3126_v10 }
  0x9b   :  { %2055 = vmatmul.mubr.bf16.gmra.mxu0 %v3124_v11 }
  0x9c   :  { %2120 = vmatmul.mubr.bf16.gmra.mxu1 %v3125_v12  ;;  %2160 = vmatprep.mubr.bf16.mxu0 %v3132_v15 }
  0x9d   :  { %2846 = vmatpush3.bf16.msra.mxu0 %v3127_v13  ;;  %2887 = vmatpush3.bf16.msra.mxu1 %v3127_v13 }
  0x9e   :  { %2847 = vmatprep.subr.bf16.mxu0 %v3128_v14  ;;  %2880 = vmatprep.subr.bf16.mxu1 %v3128_v14 }
  0x9f   :  { %2176 = vmatprep.mubr.bf16.mxu1 %v3135_v16 }
  0xa1   :  { %2848 = vmatpush3.bf16.msra.mxu0 %v3129_v17  ;;  %2888 = vmatpush3.bf16.msra.mxu1 %v3129_v17 }
  0xa4   :  { %2161 = vmatmul.mubr.bf16.vlgmr.msra.gmra.mxu0 %v3130_v18  ;;  %2177 = vmatmul.mubr.bf16.vlgmr.msra.gmra.mxu1 %v3133_v19 }
  0xa5   :  { %2168 = vmatprep.mubr.bf16.mxu0 %v3136_v20  ;;  %2184 = vmatprep.mubr.bf16.mxu1 %v3138_v21 }
  0xac   :  { %2169 = vmatmul.mubr.bf16.gmra.mxu0 %v3140_v22  ;;  %2185 = vmatmul.mubr.bf16.gmra.mxu1 %v3141_v23 }
  0xe3   :  { %v2529_v24 = vpop.f32.mrf.mxu0 }
  0xe4   :  { %v2569_v25 = vpop.f32.mrf.mxu1 }
  0xe5   :  { %v2530_v27 = vpop.f32.mrf.mxu0 }
  0xe6   :  { %v2531_v28 = vadd.f32 %v2530_v27, %v2529_v24  ;;  %v2570_v29 = vpop.f32.mrf.mxu1 }
  0xe7   :  { %v2571_v30 = vadd.f32 %v2570_v29, %v2569_v25  ;;  %v2532_v31 = vpop.f32.mrf.mxu0 }
  0xe8   :  { %v1643_v32 = vadd.f32 %v2531_v28, %v2296_v26  ;;  %v2572_v33 = vpop.f32.mrf.mxu1 }
  0xe9   :  { %v2533_v34 = vpop.f32.mrf.mxu0 }
  0xea   :  { %v1708_v35 = vadd.f32 %v2571_v30, %v1643_v32  ;;  %v2534_v36 = vadd.f32 %v2533_v34, %v2532_v31  ;;  %v2573_v37 = vpop.f32.mrf.mxu1 }
  0xeb   :  { %v2574_v38 = vadd.f32 %v2573_v37, %v2572_v33  ;;  %v2535_v40 = vpop.f32.mrf.mxu0 }
  0xec   :  { %v1646_v39 = vadd.f32 %v2534_v36, %v2296_v26  ;;  %v2575_v42 = vpop.f32.mrf.mxu1 }
  0xed   :  { %v2536_v43 = vpop.f32.mrf.mxu0 }
  0xee   :  { %v1711_v41 = vadd.f32 %v2574_v38, %v1646_v39  ;;  %v2537_v44 = vadd.f32 %v2536_v43, %v2535_v40  ;;  %v2576_v45 = vpop.f32.mrf.mxu1 }
  0xef   :  { %v2577_v46 = vadd.f32 %v2576_v45, %v2575_v42  ;;  %v2538_v47 = vpop.f32.mrf.mxu0 }
  0xf0   :  { %v1651_v48 = vadd.f32 %v2537_v44, %v2296_v26  ;;  %v2578_v49 = vpop.f32.mrf.mxu1 }
  0xf1   :  { %v2539_v50 = vpop.f32.mrf.mxu0 }
  0xf2   :  { %v1716_v51 = vadd.f32 %v2577_v46, %v1651_v48  ;;  %v2540_v52 = vadd.f32 %v2539_v50, %v2538_v47  ;;  %v2579_v53 = vpop.f32.mrf.mxu1 }
  0xf3   :  { %v2580_v54 = vadd.f32 %v2579_v53, %v2578_v49  ;;  %v2541_v57 = vpop.f32.mrf.mxu0 }
  0xf4   :  { %v1654_v55 = vadd.f32 %v2540_v52, %v2296_v26  ;;  %v2581_v58 = vpop.f32.mrf.mxu1 }
  0xf5   :  { %v2542_v59 = vpop.f32.mrf.mxu0 }
  0xf6   :  { %v3819_v56 = vadd.f32 %v2580_v54, %v1654_v55  ;;  %v2543_v60 = vadd.f32 %v2542_v59, %v2541_v57  ;;  %v2582_v61 = vpop.f32.mrf.mxu1 }
  0xf7   :  { %v2583_v62 = vadd.f32 %v2582_v61, %v2581_v58  ;;  %v2544_v63 = vpop.f32.mrf.mxu0 }
  0xf8   :  { %v1659_v0 = vadd.f32 %v2543_v60, %v2296_v26  ;;  %v2584_v1 = vpop.f32.mrf.mxu1 }
  0xf9   :  { %v2545_v2 = vpop.f32.mrf.mxu0 }
  0xfa   :  { %v3821_v3 = vadd.f32 %v2583_v62, %v1659_v0  ;;  %v2546_v4 = vadd.f32 %v2545_v2, %v2544_v63  ;;  %v2585_v5 = vpop.f32.mrf.mxu1 }
  0xfb   :  { %v2586_v6 = vadd.f32 %v2585_v5, %v2584_v1  ;;  %v2547_v9 = vpop.f32.mrf.mxu0 }
  0xfc   :  { %v1662_v7 = vadd.f32 %v2546_v4, %v2296_v26  ;;  %v2587_v10 = vpop.f32.mrf.mxu1 }
  0xfd   :  { %v2548_v11 = vpop.f32.mrf.mxu0 }
  0xfe   :  { %v3823_v8 = vadd.f32 %v2586_v6, %v1662_v7  ;;  %v2588_v12 = vpop.f32.mrf.mxu1  ;;  %v2549_v13 = vadd.f32 %v2548_v11, %v2547_v9  ;;  %v3142_v6 = vmov 0.0  }
  0xff   :  { %v2589_v14 = vadd.f32 %v2588_v12, %v2587_v10  ;;  %v2550_v15 = vpop.f32.mrf.mxu0  ;;  %2284 = vst [vmem:[%s3975_s4] sm:$0x3] %v3142_v6 }
 0x100   :  { %v2590_v16 = vpop.f32.mrf.mxu1  ;;  %v1667_v17 = vadd.f32 %v2549_v13, %v2296_v26 }
 0x101   :  { %v2551_v18 = vpop.f32.mrf.mxu0 }
 0x102   :  { %v2591_v19 = vpop.f32.mrf.mxu1  ;;  %v3825_v20 = vadd.f32 %v2589_v14, %v1667_v17  ;;  %v2552_v21 = vadd.f32 %v2551_v18, %v2550_v15 }
 0x103   :  { %v2592_v22 = vadd.f32 %v2591_v19, %v2590_v16  ;;  %v2609_v24 = vpop.f32.mrf.mxu0 }
 0x104   :  { %v1670_v23 = vadd.f32 %v2552_v21, %v2296_v26  ;;  %v2649_v27 = vpop.f32.mrf.mxu1 }
 0x105   :  { %v2610_v28 = vpop.f32.mrf.mxu0 }
 0x106   :  { %v3827_v25 = vadd.f32 %v2592_v22, %v1670_v23  ;;  %v2611_v29 = vadd.f32 %v2610_v28, %v2609_v24  ;;  %v2650_v30 = vpop.f32.mrf.mxu1 }
 0x107   :  { %v2612_v31 = vpop.f32.mrf.mxu0  ;;  %v2651_v33 = vadd.f32 %v2650_v30, %v2649_v27 }
 0x108   :  { %v1773_v32 = vadd.f32 %v2611_v29, %v1708_v35  ;;  %v2652_v34 = vpop.f32.mrf.mxu1 }
 0x109   :  { %v2613_v36 = vpop.f32.mrf.mxu0 }
 0x10a   :  { %v3829_v37 = vadd.f32 %v2651_v33, %v1773_v32  ;;  %v2614_v38 = vadd.f32 %v2613_v36, %v2612_v31  ;;  %v2653_v39 = vpop.f32.mrf.mxu1 }
 0x10b   :  { %v2654_v42 = vadd.f32 %v2653_v39, %v2652_v34  ;;  %v2615_v26 = vpop.f32.mrf.mxu0 }
 0x10c   :  { %v1776_v40 = vadd.f32 %v2614_v38, %v1711_v41  ;;  %v2655_v44 = vpop.f32.mrf.mxu1 }
 0x10d   :  { %v2616_v45 = vpop.f32.mrf.mxu0 }
 0x10e   :  { %v3831_v43 = vadd.f32 %v2654_v42, %v1776_v40  ;;  %v2617_v46 = vadd.f32 %v2616_v45, %v2615_v26  ;;  %v2656_v47 = vpop.f32.mrf.mxu1 }
 0x10f   :  { %v2657_v48 = vadd.f32 %v2656_v47, %v2655_v44  ;;  %v2618_v49 = vpop.f32.mrf.mxu0 }
 0x110   :  { %v1781_v50 = vadd.f32 %v2617_v46, %v1716_v51  ;;  %v2658_v35 = vpop.f32.mrf.mxu1 }
 0x111   :  { %v2619_v52 = vpop.f32.mrf.mxu0 }
 0x112   :  { %v3833_v53 = vadd.f32 %v2657_v48, %v1781_v50  ;;  %v2620_v54 = vadd.f32 %v2619_v52, %v2618_v49  ;;  %v2659_v55 = vpop.f32.mrf.mxu1 }
 0x113   :  { %v2660_v57 = vadd.f32 %v2659_v55, %v2658_v35  ;;  %v2621_v59 = vpop.f32.mrf.mxu0 }
 0x114   :  { %v1784_v41 = vadd.f32 %v2620_v54, %v3819_v56  ;;  %v2661_v60 = vpop.f32.mrf.mxu1 }
 0x115   :  { %v2622_v61 = vpop.f32.mrf.mxu0 }
 0x116   :  { %v3836_v58 = vadd.f32 %v2660_v57, %v1784_v41  ;;  %v2662_v62 = vpop.f32.mrf.mxu1  ;;  %v2623_v63 = vadd.f32 %v2622_v61, %v2621_v59 }
 0x117   :  { %v2663_v0 = vadd.f32 %v2662_v62, %v2661_v60  ;;  %v2624_v1 = vpop.f32.mrf.mxu0 }
 0x118   :  { %3977 = vst [vmem:[#allocation2_spill] sm:$0xff] %v3836_v58  ;;  %v2664_v2 = vpop.f32.mrf.mxu1  ;;  %v1789_v51 = vadd.f32 %v2623_v63, %v3821_v3 }
 0x119   :  { %v2625_v4 = vpop.f32.mrf.mxu0 }
 0x11a   :  { %v2665_v5 = vpop.f32.mrf.mxu1  ;;  %v3842_v56 = vadd.f32 %v2663_v0, %v1789_v51  ;;  %v2626_v7 = vadd.f32 %v2625_v4, %v2624_v1 }
 0x11b   :  { %v2666_v9 = vadd.f32 %v2665_v5, %v2664_v2  ;;  %v2627_v11 = vpop.f32.mrf.mxu0 }
 0x11c   :  { %v1792_v10 = vadd.f32 %v2626_v7, %v3823_v8  ;;  %v2667_v13 = vpop.f32.mrf.mxu1 }
 0x11d   :  { %v2628_v14 = vpop.f32.mrf.mxu0 }
 0x11e   :  { %v3845_v12 = vadd.f32 %v2666_v9, %v1792_v10  ;;  %v2629_v15 = vadd.f32 %v2628_v14, %v2627_v11  ;;  %v2668_v3 = vpop.f32.mrf.mxu1 }
 0x11f   :  { %v2669_v16 = vadd.f32 %v2668_v3, %v2667_v13  ;;  %v2630_v17 = vpop.f32.mrf.mxu0 }
 0x120   :  { %v1797_v18 = vadd.f32 %v2629_v15, %v3825_v20  ;;  %v2670_v19 = vpop.f32.mrf.mxu1 }
 0x121   :  { %v2631_v21 = vpop.f32.mrf.mxu0 }
 0x122   :  { %v3848_v22 = vadd.f32 %v2669_v16, %v1797_v18  ;;  %v2632_v23 = vadd.f32 %v2631_v21, %v2630_v17  ;;  %v2671_v24 = vpop.f32.mrf.mxu1 }
 0x123   :  { %v2672_v27 = vadd.f32 %v2671_v24, %v2670_v19  ;;  %v2689_v29 = vpop.f32.mrf.mxu0 }
 0x124   :  { %v1800_v8 = vadd.f32 %v2632_v23, %v3827_v25  ;;  %v2729_v30 = vpop.f32.mrf.mxu1 }
 0x125   :  { %v2690_v31 = vpop.f32.mrf.mxu0 }
 0x126   :  { %v3851_v28 = vadd.f32 %v2672_v27, %v1800_v8  ;;  %v2730_v32 = vpop.f32.mrf.mxu1  ;;  %v2691_v24 = vadd.f32 %v2690_v31, %v2689_v29 }
 0x127   :  { %v2692_v33 = vpop.f32.mrf.mxu0 }
 0x128   :  { %3978 = vst [vmem:[#allocation3_spill] sm:$0xff] %v3851_v28  ;;  %v3853_v34 = vpop.f32.mrf.mxu1  ;;  %v2731_v28 = vadd.f32 %v2730_v32, %v2729_v30 }
 0x129   :  { %v2693_v36 = vpop.f32.mrf.mxu0 }
 0x12a   :  { %v3855_v20 = vpop.f32.mrf.mxu1 }
 0x12b   :  { %v3857_v38 = vpop.f32.mrf.mxu0  ;;  %v2734_v31 = vadd.f32 %v3855_v20, %v3853_v34 }
 0x12c   :  { %v3859_v39 = vpop.f32.mrf.mxu1 }
 0x12d   :  { %v3861_v40 = vpop.f32.mrf.mxu0 }
 0x12e   :  { %v3863_v42 = vpop.f32.mrf.mxu1 }
 0x12f   :  { %v3865_v25 = vpop.f32.mrf.mxu0  ;;  %v2737_v20 = vadd.f32 %v3863_v42, %v3859_v39  ;;  %v3992_v42 = vld [vmem:[#allocation2_spill] sm:$0xff] }
 0x130   :  { %v3867_v26 = vpop.f32.mrf.mxu1 }
 0x131   :  { %v3869_v44 = vpop.f32.mrf.mxu0 }
 0x132   :  { %v3871_v45 = vpop.f32.mrf.mxu1 }
 0x133   :  { %v2701_v46 = vpop.f32.mrf.mxu0 }
 0x134   :  { %v2741_v47 = vpop.f32.mrf.mxu1 }
 0x135   :  { %v2702_v48 = vpop.f32.mrf.mxu0 }
 0x136   :  { %v2742_v49 = vpop.f32.mrf.mxu1 }
 0x137   :  { %v2704_v50 = vpop.f32.mrf.mxu0  ;;  %v2743_v58 = vadd.f32 %v2742_v49, %v2741_v47  ;;  %v2700_v49 = vadd.f32 %v3869_v44, %v3865_v25 }
 0x138   :  { %v2744_v35 = vpop.f32.mrf.mxu1 }
 0x139   :  { %v2705_v52 = vpop.f32.mrf.mxu0 }
 0x13a   :  { %v2745_v54 = vpop.f32.mrf.mxu1 }
 0x13b   :  { %v2707_v55 = vpop.f32.mrf.mxu0 }
 0x13c   :  { %v3873_v57 = vpop.f32.mrf.mxu1 }
 0x13d   :  { %v2708_v41 = vpop.f32.mrf.mxu0 }
 0x13e   :  { %v3875_v59 = vpop.f32.mrf.mxu1  ;;  %v2709_v47 = vadd.f32 %v2708_v41, %v2707_v55 }
 0x13f   :  { %v3877_v60 = vpop.f32.mrf.mxu0  ;;  %v2749_v44 = vadd.f32 %v3875_v59, %v3873_v57 }
 0x140   :  { %3979 = vst [vmem:[#allocation4_spill] sm:$0xff] %v3877_v60  ;;  %v3879_v61 = vpop.f32.mrf.mxu1 }
 0x141   :  { %3980 = vst [vmem:[#allocation5_spill] sm:$0xff] %v3879_v61  ;;  %v3881_v62 = vpop.f32.mrf.mxu0  ;;  %v2694_v61 = vadd.f32 %v2693_v36, %v2692_v33 }
 0x142   :  { %3981 = vst [vmem:[#allocation6_spill] sm:$0xff] %v3881_v62  ;;  %v3883_v63 = vpop.f32.mrf.mxu1 }
 0x143   :  { %3982 = vst [vmem:[#allocation7_spill] sm:$0xff] %v3883_v63  ;;  %v2769_v0 = vpop.f32.mrf.mxu0  ;;  %v1906_v29 = vadd.f32 %v2694_v61, %v3831_v43 }
 0x144   :  { %v2809_v1 = vpop.f32.mrf.mxu1 }
 0x145   :  { %v2770_v2 = vpop.f32.mrf.mxu0 }
 0x146   :  { %v2810_v51 = vpop.f32.mrf.mxu1  ;;  %v2771_v62 = vadd.f32 %v2770_v2, %v2769_v0 }
 0x147   :  { %v2772_v4 = vpop.f32.mrf.mxu0  ;;  %v3990_v41 = vld [vmem:[#allocation4_spill] sm:$0xff] }
 0x148   :  { %v3885_v5 = vpop.f32.mrf.mxu1 }
 0x149   :  { %3983 = vst [vmem:[#allocation8_spill] sm:$0xff] %v3885_v5  ;;  %v2773_v6 = vpop.f32.mrf.mxu0 }
 0x14a   :  { %v2813_v7 = vpop.f32.mrf.mxu1 }
 0x14b   :  { %v2775_v9 = vpop.f32.mrf.mxu0 }
 0x14c   :  { %v3887_v10 = vpop.f32.mrf.mxu1 }
 0x14d   :  { %3984 = vst [vmem:[#allocation9_spill] sm:$0xff] %v3887_v10  ;;  %v2776_v11 = vpop.f32.mrf.mxu0  ;;  %v2703_v10 = vadd.f32 %v2702_v48, %v2701_v46 }
 0x14e   :  { %v3889_v13 = vpop.f32.mrf.mxu1 }
 0x14f   :  { %3985 = vst [vmem:[#allocation10_spill] sm:$0xff] %v3889_v13  ;;  %v3891_v14 = vpop.f32.mrf.mxu0 }
 0x150   :  { %3986 = vst [vmem:[#allocation11_spill] sm:$0xff] %v3891_v14  ;;  %v3893_v15 = vpop.f32.mrf.mxu1  ;;  %v1903_v14 = vadd.f32 %v2691_v24, %v3829_v37  ;;  %v2697_v37 = vadd.f32 %v3861_v40, %v3857_v38  ;;  %v2774_v38 = vadd.f32 %v2773_v6, %v2772_v4  ;;  %v2777_v4 = vadd.f32 %v2776_v11, %v2775_v9  ;;  %v3996_v24 = vld [vmem:[#allocation7_spill] sm:$0xff] }
 0x151   :  { %3987 = vst [vmem:[#allocation12_spill] sm:$0xff] %v3893_v15  ;;  %v3895_v3 = vpop.f32.mrf.mxu0 }
 0x152   :  { %3988 = vst [vmem:[#allocation13_spill] sm:$0xff] %v3895_v3  ;;  %v3897_v16 = vpop.f32.mrf.mxu1  ;;  %v2706_v3 = vadd.f32 %v2705_v52, %v2704_v50  ;;  %v1968_v36 = vadd.f32 %v2731_v28, %v1903_v14  ;;  %v2811_v52 = vadd.f32 %v2810_v51, %v2809_v1  ;;  %v1971_v28 = vadd.f32 %v2734_v31, %v1906_v29 }
 0x153   :  { %3989 = vst [vmem:[#allocation14_spill] sm:$0xff] %v3897_v16  ;;  %v2781_v17 = vpop.f32.mrf.mxu0  ;;  %v1919_v16 = vadd.f32 %v2703_v10, %v3842_v56  ;;  %v2746_v56 = vadd.f32 %v2745_v54, %v2744_v35  ;;  %v1911_v61 = vadd.f32 %v2697_v37, %v3833_v53  ;;  %v1914_v1 = vadd.f32 %v2700_v49, %v3992_v42  ;;  %v3993_v53 = vld [vmem:[#allocation8_spill] sm:$0xff] }
 0x154   :  { %v2821_v18 = vpop.f32.mrf.mxu1  ;;  %v1922_v46 = vadd.f32 %v2706_v3, %v3845_v12  ;;  %v2033_v50 = vadd.f32 %v2771_v62, %v1968_v36  ;;  %v2740_v12 = vadd.f32 %v3871_v45, %v3867_v26  ;;  %v3991_v62 = vld [vmem:[#allocation6_spill] sm:$0xff]  ;;  %v2814_v51 = vadd.f32 %v2813_v7, %v3993_v53  ;;  %v3997_v11 = vld [vmem:[#allocation9_spill] sm:$0xff] }
 0x155   :  { %v2782_v19 = vpop.f32.mrf.mxu0  ;;  %v1984_v43 = vadd.f32 %v2743_v58, %v1919_v16  ;;  %v1927_v58 = vadd.f32 %v2709_v47, %v3848_v22  ;;  %v2712_v0 = vadd.f32 %v3991_v62, %v3990_v41  ;;  %v2036_v45 = vadd.f32 %v2774_v38, %v1971_v28 }
 0x156   :  { %v2822_v21 = vpop.f32.mrf.mxu1  ;;  %v2783_v30 = vadd.f32 %v2782_v19, %v2781_v17  ;;  %v1987_v25 = vadd.f32 %v2746_v56, %v1922_v46  ;;  %v2098_v2 = vadd.f32 %v2811_v52, %v2033_v50  ;;  %v1976_v22 = vadd.f32 %v2737_v20, %v1911_v61  ;;  %v3994_v19 = vld [vmem:[#allocation3_spill] sm:$0xff]  ;;  %v3998_v31 = vld [vmem:[#allocation10_spill] sm:$0xff] }
 0x157   :  { %v2784_v23 = vpop.f32.mrf.mxu0  ;;  %v2823_v54 = vadd.f32 %v2822_v21, %v2821_v18  ;;  %v1992_v18 = vadd.f32 %v2749_v44, %v1927_v58  ;;  %v1930_v21 = vadd.f32 %v2712_v0, %v3994_v19  ;;  %v2817_v36 = vadd.f32 %v3998_v31, %v3997_v11 }
 0x158   :  { %v2824_v27 = vpop.f32.mrf.mxu1  ;;  %v2049_v35 = vadd.f32 %v2783_v30, %v1984_v43  ;;  %v2041_v9 = vadd.f32 %v2777_v4, %v1976_v22 }
 0x159   :  { %v2785_v8 = vpop.f32.mrf.mxu0 }
 0x15a   :  { %v2825_v63 = vpop.f32.mrf.mxu1  ;;  %v2786_v40 = vadd.f32 %v2785_v8, %v2784_v23  ;;  %v2114_v16 = vadd.f32 %v2823_v54, %v2049_v35  ;;  %v3995_v23 = vld [vmem:[#allocation5_spill] sm:$0xff]  ;;  %v4001_v54 = vld [vmem:[#allocation12_spill] sm:$0xff] }
 0x15b   :  { %v2787_v13 = vpop.f32.mrf.mxu0  ;;  %v2826_v10 = vadd.f32 %v2825_v63, %v2824_v27  ;;  %v2752_v8 = vadd.f32 %v3996_v24, %v3995_v23  ;;  %v3999_v63 = vld [vmem:[#allocation11_spill] sm:$0xff]  ;;  %v4000_v27 = vld [vmem:[#allocation13_spill] sm:$0xff] }
 0x15c   :  { %v3900_v15 = vpop.f32.mrf.mxu1  ;;  %v2052_v6 = vadd.f32 %v2786_v40, %v1987_v25  ;;  %v2780_v37 = vadd.f32 %v4000_v27, %v3999_v63 }
 0x15d   :  { %v2788_v5 = vpop.f32.mrf.mxu0  ;;  %v1995_v38 = vadd.f32 %v2752_v8, %v1930_v21 }
 0x15e   :  { %v3903_v60 = vpop.f32.mrf.mxu1  ;;  %v2789_v17 = vadd.f32 %v2788_v5, %v2787_v13  ;;  %v1979_v5 = vadd.f32 %v2740_v12, %v1914_v1  ;;  %v2101_v13 = vadd.f32 %v2814_v51, %v2036_v45  ;;  %v2117_v56 = vadd.f32 %v2826_v10, %v2052_v6 }
 0x15f   :  { %v2790_v33 = vpop.f32.mrf.mxu0  ;;  %v2829_v50 = vadd.f32 %v3903_v60, %v3900_v15  ;;  %v2106_v12 = vadd.f32 %v2817_v36, %v2041_v9 }
 0x160   :  { %v3910_v32 = vpop.f32.mrf.mxu1  ;;  %v2057_v43 = vadd.f32 %v2789_v17, %v1992_v18  ;;  %v2044_v35 = vadd.f32 %v2780_v37, %v1979_v5 }
 0x161   :  { %v2791_v48 = vpop.f32.mrf.mxu0 }
 0x162   :  { %v3915_v34 = vpop.f32.mrf.mxu1  ;;  %v2792_v52 = vadd.f32 %v2791_v48, %v2790_v33  ;;  %v2122_v62 = vadd.f32 %v2829_v50, %v2057_v43 }
 0x164   :  { %v2849_v55 = vpop.f32.mrf.mxu0  ;;  %v2861_v39 = vpop.f32.mrf.mxu1  ;;  %v2060_v0 = vadd.f32 %v2792_v52, %v1995_v38 }
 0x166   :  { %v2850_v26 = vpop.f32.mrf.mxu0  ;;  %v2862_v3 = vpop.f32.mrf.mxu1 }
 0x167   :  { %v2851_v14 = vadd.f32 %v2850_v26, %v2849_v55  ;;  %v2863_v57 = vadd.f32 %v2862_v3, %v2861_v39  ;;  %v4002_v55 = vld [vmem:[#allocation14_spill] sm:$0xff]  ;;  %v2832_v39 = vadd.f32 %v3915_v34, %v3910_v32 }
 0x168   :  { %v2852_v59 = vpop.f32.mrf.mxu0  ;;  %v2864_v7 = vpop.f32.mrf.mxu1  ;;  %v2820_v25 = vadd.f32 %v4002_v55, %v4001_v54 }
 0x169   :  { %v2163_v29 = vadd.f32 %v2851_v14, %v2098_v2  ;;  %v2179_v30 = vadd.f32 %v2863_v57, %v2114_v16  ;;  %v2125_v34 = vadd.f32 %v2832_v39, %v2060_v0 }
 0x16a   :  { %v2853_v46 = vpop.f32.mrf.mxu0  ;;  %v2865_v49 = vpop.f32.mrf.mxu1  ;;  %v2109_v45 = vadd.f32 %v2820_v25, %v2044_v35 }
 0x16b   :  { %2193 = vst [vmem:[%s3976_s3] sm:$0xff] %v2163_v29  ;;  %v2854_v47 = vadd.f32 %v2853_v46, %v2852_v59  ;;  %2197 = vst [vmem:[%s3976_s3 + $0x20] sm:$0xff] %v2179_v30  ;;  %v2866_v28 = vadd.f32 %v2865_v49, %v2864_v7  ;;  %v2257_v41 = vmul.f32 %v2163_v29, %v2163_v29 }
 0x16c   :  { %v2855_v20 = vpop.f32.mrf.mxu0  ;;  %v2867_v61 = vpop.f32.mrf.mxu1  ;;  %v2261_v18 = vmul.f32 %v2179_v30, %v2179_v30 }
 0x16d   :  { %v2166_v40 = vadd.f32 %v2854_v47, %v2101_v13  ;;  %v2182_v58 = vadd.f32 %v2866_v28, %v2117_v56  ;;  %v2285_v28 = vld [vmem:[%s3975_s4] sm:$0x3] }
 0x16e   :  { %v2856_v44 = vpop.f32.mrf.mxu0  ;;  %v2868_v48 = vpop.f32.mrf.mxu1 }
 0x16f   :  { %2194 = vst [vmem:[%s3976_s3 + $0x8] sm:$0xff] %v2166_v40  ;;  %v2244_v60 = vadd.f32 %v2166_v40, %v2163_v29  ;;  %v2258_v15 = vmul.f32 %v2166_v40, %v2166_v40  ;;  %v2857_v33 = vadd.f32 %v2856_v44, %v2855_v20  ;;  %2198 = vst [vmem:[%s3976_s3 + $0x28] sm:$0xff] %v2182_v58 }
 0x170   :  { %v2869_v42 = vadd.f32 %v2868_v48, %v2867_v61  ;;  %v2858_v1 = vpop.f32.mrf.mxu0  ;;  %v2870_v51 = vpop.f32.mrf.mxu1  ;;  %v2262_v23 = vmul.f32 %v2182_v58, %v2182_v58 }
 0x171   :  { %v2265_v2 = vadd.f32 %v2258_v15, %v2257_v41  ;;  %v2171_v53 = vadd.f32 %v2857_v33, %v2106_v12 }
 0x172   :  { %v2187_v4 = vadd.f32 %v2869_v42, %v2122_v62  ;;  %v2859_v26 = vpop.f32.mrf.mxu0  ;;  %v2871_v32 = vpop.f32.mrf.mxu1 }
 0x173   :  { %2195 = vst [vmem:[%s3976_s3 + $0x10] sm:$0xff] %v2171_v53  ;;  %v2245_v6 = vadd.f32 %v2244_v60, %v2171_v53  ;;  %v2259_v10 = vmul.f32 %v2171_v53, %v2171_v53  ;;  %v2860_v14 = vadd.f32 %v2859_v26, %v2858_v1  ;;  %v2872_v3 = vadd.f32 %v2871_v32, %v2870_v51 }
 0x174   :  { %2199 = vst [vmem:[%s3976_s3 + $0x30] sm:$0xff] %v2187_v4  ;;  %v2263_v29 = vmul.f32 %v2187_v4, %v2187_v4 }
 0x175   :  { %v2266_v22 = vadd.f32 %v2265_v2, %v2259_v10  ;;  %v2174_v16 = vadd.f32 %v2860_v14, %v2109_v45  ;;  %v2190_v17 = vadd.f32 %v2872_v3, %v2125_v34 }
 0x177   :  { %2196 = vst [vmem:[%s3976_s3 + $0x18] sm:$0xff] %v2174_v16  ;;  %v2246_v57 = vadd.f32 %v2245_v6, %v2174_v16  ;;  %v2260_v59 = vmul.f32 %v2174_v16, %v2174_v16  ;;  %2200 = vst [vmem:[%s3976_s3 + $0x38] sm:$0xff] %v2190_v17  ;;  %v2264_v31 = vmul.f32 %v2190_v17, %v2190_v17 }
 0x179   :  { %v2247_v19 = vadd.f32 %v2246_v57, %v2179_v30  ;;  %v2267_v21 = vadd.f32 %v2266_v22, %v2260_v59 }
 0x17b   :  { %v2268_v24 = vadd.f32 %v2267_v21, %v2261_v18  ;;  %v2248_v8 = vadd.f32 %v2247_v19, %v2182_v58 }
 0x17d   :  { %v2249_v7 = vadd.f32 %v2248_v8, %v2187_v4  ;;  %v2269_v9 = vadd.f32 %v2268_v24, %v2262_v23 }
 0x17f   :  { %v2250_v11 = vadd.f32 %v2249_v7, %v2190_v17  ;;  %v2270_v36 = vadd.f32 %v2269_v9, %v2263_v29 }
 0x181   :  { %v2251_v63 = vrot.slane %v2250_v11, 4  ;;  %v2271_v27 = vadd.f32 %v2270_v36, %v2264_v31 }
 0x183   :  { %v2252_v37 = vadd.f32 %v2251_v63, %v2250_v11  ;;  %v2272_v46 = vrot.slane %v2271_v27, 4 }
 0x185   :  { %v2253_v5 = vrot.slane %v2252_v37, 2  ;;  %v2273_v13 = vadd.f32 %v2272_v46, %v2271_v27 }
 0x187   :  { %v2254_v56 = vadd.f32 %v2253_v5, %v2252_v37  ;;  %v2274_v47 = vrot.slane %v2273_v13, 2 }
 0x189   :  { %v2255_v49 = vrot.slane %v2254_v56, 1  ;;  %v2275_v30 = vadd.f32 %v2274_v47, %v2273_v13 }
 0x18b   :  { %v2276_v43 = vrot.slane %v2275_v30, 1  ;;  %v2256_v50 = vadd.f32 %v2255_v49, %v2254_v56 }
 0x18d   :  { %v2277_v52 = vadd.f32 %v2276_v43, %v2275_v30 }
 0x18f   :  { %v2279_v20 = vsel %vm2278_vm0, %v2256_v50, %v2277_v52 }
 0x190   :  { %v2286_v38 = vadd.f32 %v2285_v28, %v2279_v20 }
 0x192   :  { %2287 = vst [vmem:[%s3975_s4] sm:$0x3] %v2286_v38 }

// kernel: _lambda_.25
= control target key start
LH: loop header
LB: loop body
LE: loop exit
PB: predicated region body
PF: predicated region fallthrough
CT: control target
= control target key end

     0   :  { %s807_s12 = smov 0   ;;  %s941_s0 = inlined_call_operand.vmem [shape: bf16[512,128], index: 0, kind: input, shape index: {}]   ;;  %s942_s1 = inlined_call_operand.vmem [shape: bf16[128,128], index: 1, kind: input, shape index: {}]   ;;  %s943_s2 = inlined_call_operand.vmem [shape: f32[1,128], index: 2, kind: input, shape index: {}]   ;;  %s944_s3 = inlined_call_operand.vmem [shape: f32[512,128], index: 3, kind: output, shape index: {}]  }
   0x1 LB: > { %s623_s13 = sadd.s32 4294967295, %s785_s12   ;;  %p627_p0 = scmp.ge.s32.totalorder %s785_s12, 1  ;;  %s785_s12 = sphi %s807_s12, %s13_s12  }
   0x2   : > { %p138_p1 = scmp.lt.s32.totalorder %s785_s12, 3 }
   0x4   : > { %p139_p2 = pnand %p627_p0, %p138_p1 }
   0x5   : > { %s628_s16 = sshll.u32 (!%p139_p2), %s623_s13, 5 }
   0x6   : > { %142 = sbr.rel (%p139_p2) target bundleno = 270 (0x10e), region = 32  ;;  %p163_p3 = scmp.lt.s32.totalorder (!%p139_p2), %s628_s16, 63 }
   0xb   : > { %v755_v0 = vld [vmem:[%s942_s1 + $0x38] sm:$0xff]   ;;  %v756_v1 = vld [vmem:[%s942_s1 + $0x30] sm:$0xff]   ;;  %s946_s16 = smov (!%p163_p3, %s628_s16), 63  ;;  %v757_v2 = vld [vmem:[%s942_s1 + $0x28] sm:$0xff]  }
   0xc   : > { %683 = vmatprep.subr.bf16.mxu0 %v755_v0  ;;  %731 = vmatprep.subr.bf16.mxu1 %v755_v0  ;;  %s629_s21 = sshll.u32 %s946_s16, 2  ;;  %v758_v3 = vld [vmem:[%s942_s1 + $0x20] sm:$0xff]   ;;  %v759_v6 = vld [vmem:[%s942_s1 + $0x18] sm:$0xff]   ;;  %v760_v7 = vld [vmem:[%s942_s1 + $0x10] sm:$0xff]   ;;  %s631_s8 = sshll.u32 %s946_s16, 3 }
   0xd   : > { %684 = vmatpush3.bf16.msra.mxu0 %v755_v0  ;;  %739 = vmatpush3.bf16.msra.mxu1 %v755_v0  ;;  %s830_s24 = scalar_lea.vmem %s941_s0, %s629_s21  ;;  %v761_v8 = vld [vmem:[%s942_s1 + $0x8] sm:$0xff]   ;;  %v762_v9 = vld [vmem:[%s942_s1] sm:$0xff]   ;;  %s872_s14 = scalar_lea.vmem %s944_s3, %s631_s8 }
   0xe   : > { %685 = vmatprep.subr.bf16.mxu0 %v756_v1  ;;  %732 = vmatprep.subr.bf16.mxu1 %v756_v1  ;;  %v763_v4 = vld [vmem:[%s830_s24] sm:$0xff]   ;;  %v765_v10 = vld [vmem:[%s830_s24 + $0x8] sm:$0xff]   ;;  %v767_v12 = vld [vmem:[%s830_s24 + $0x10] sm:$0xff]  }
   0xf   : > { %v764_v5 = vld [vmem:[%s830_s24 + $0x40] sm:$0xff]   ;;  %699 = vmatprep.mubr.bf16.mxu0 %v763_v4  ;;  %v766_v11 = vld [vmem:[%s830_s24 + $0x48] sm:$0xff]   ;;  %v768_v13 = vld [vmem:[%s830_s24 + $0x50] sm:$0xff]  }
  0x10   : > { %715 = vmatprep.mubr.bf16.mxu1 %v764_v5  ;;  %v769_v14 = vld [vmem:[%s830_s24 + $0x18] sm:$0xff]   ;;  %v771_v16 = vld [vmem:[%s830_s24 + $0x20] sm:$0xff]   ;;  %v773_v18 = vld [vmem:[%s830_s24 + $0x28] sm:$0xff]  }
  0x11   : > { %686 = vmatpush3.bf16.msra.mxu0 %v756_v1  ;;  %740 = vmatpush3.bf16.msra.mxu1 %v756_v1  ;;  %v770_v15 = vld [vmem:[%s830_s24 + $0x58] sm:$0xff]   ;;  %v772_v17 = vld [vmem:[%s830_s24 + $0x60] sm:$0xff]   ;;  %v774_v19 = vld [vmem:[%s830_s24 + $0x68] sm:$0xff]  }
  0x12   : > { %687 = vmatprep.subr.bf16.mxu0 %v757_v2  ;;  %733 = vmatprep.subr.bf16.mxu1 %v757_v2  ;;  %v775_v20 = vld [vmem:[%s830_s24 + $0x30] sm:$0xff]   ;;  %v777_v22 = vld [vmem:[%s830_s24 + $0x38] sm:$0xff]   ;;  %v867_v24 = vld [vmem:[%s943_s2] ss:$0 sm:$0xff] }
  0x13   : > { %v776_v21 = vld [vmem:[%s830_s24 + $0x70] sm:$0xff]   ;;  %v778_v23 = vld [vmem:[%s830_s24 + $0x78] sm:$0xff]  }
  0x15   : > { %688 = vmatpush3.bf16.msra.mxu0 %v757_v2  ;;  %741 = vmatpush3.bf16.msra.mxu1 %v757_v2 }
  0x16   : > { %689 = vmatprep.subr.bf16.mxu0 %v758_v3  ;;  %734 = vmatprep.subr.bf16.mxu1 %v758_v3 }
  0x19   : > { %690 = vmatpush3.bf16.msra.mxu0 %v758_v3  ;;  %742 = vmatpush3.bf16.msra.mxu1 %v758_v3 }
  0x1a   : > { %691 = vmatprep.subr.bf16.mxu0 %v759_v6  ;;  %735 = vmatprep.subr.bf16.mxu1 %v759_v6 }
  0x1d   : > { %692 = vmatpush3.bf16.msra.mxu0 %v759_v6  ;;  %743 = vmatpush3.bf16.msra.mxu1 %v759_v6 }
  0x1e   : > { %693 = vmatprep.subr.bf16.mxu0 %v760_v7  ;;  %736 = vmatprep.subr.bf16.mxu1 %v760_v7 }
  0x21   : > { %694 = vmatpush3.bf16.msra.mxu0 %v760_v7  ;;  %744 = vmatpush3.bf16.msra.mxu1 %v760_v7 }
  0x22   : > { %695 = vmatprep.subr.bf16.mxu0 %v761_v8  ;;  %737 = vmatprep.subr.bf16.mxu1 %v761_v8 }
  0x25   : > { %696 = vmatpush3.bf16.msra.mxu0 %v761_v8  ;;  %745 = vmatpush3.bf16.msra.mxu1 %v761_v8 }
  0x26   : > { %697 = vmatprep.subr.bf16.mxu0 %v762_v9  ;;  %738 = vmatprep.subr.bf16.mxu1 %v762_v9 }
  0x29   : > { %698 = vmatpush3.bf16.msra.mxu0 %v762_v9  ;;  %746 = vmatpush3.bf16.msra.mxu1 %v762_v9 }
  0x2c   : > { %700 = vmatmul.mubr.bf16.vlgmr.msra.gmra.mxu0 %v765_v10  ;;  %716 = vmatmul.mubr.bf16.vlgmr.msra.gmra.mxu1 %v766_v11 }
  0x2d   : > { %703 = vmatprep.mubr.bf16.mxu0 %v767_v12  ;;  %719 = vmatprep.mubr.bf16.mxu1 %v768_v13 }
  0x34   : > { %704 = vmatmul.mubr.bf16.gmra.mxu0 %v769_v14  ;;  %720 = vmatmul.mubr.bf16.gmra.mxu1 %v770_v15 }
  0x35   : > { %707 = vmatprep.mubr.bf16.mxu0 %v771_v16  ;;  %723 = vmatprep.mubr.bf16.mxu1 %v772_v17 }
  0x3c   : > { %708 = vmatmul.mubr.bf16.gmra.mxu0 %v773_v18  ;;  %724 = vmatmul.mubr.bf16.gmra.mxu1 %v774_v19 }
  0x3d   : > { %711 = vmatprep.mubr.bf16.mxu0 %v775_v20  ;;  %727 = vmatprep.mubr.bf16.mxu1 %v776_v21 }
  0x44   : > { %712 = vmatmul.mubr.bf16.gmra.mxu0 %v777_v22  ;;  %728 = vmatmul.mubr.bf16.gmra.mxu1 %v778_v23 }
  0xec   : > { %v701_v25 = vpop.f32.mrf.mxu0  ;;  %v717_v26 = vpop.f32.mrf.mxu1 }
  0xed   : > { %v417_v27 = vadd.f32 %v701_v25, %v867_v24  ;;  %v481_v28 = vadd.f32 %v717_v26, %v867_v24 }
  0xee   : > { %v408_v29 = vpop.f32.mrf.mxu0  ;;  %v472_v30 = vpop.f32.mrf.mxu1 }
  0xef   : > { %537 = vst [vmem:[%s872_s14 + $0x10] sm:$0xff] %v417_v27  ;;  %553 = vst [vmem:[%s872_s14 + $0x90] sm:$0xff] %v481_v28  ;;  %v409_v31 = vadd.f32 %v867_v24, %v408_v29  ;;  %v473_v32 = vadd.f32 %v867_v24, %v472_v30 }
  0xf0   : > { %v702_v33 = vpop.f32.mrf.mxu0  ;;  %v718_v34 = vpop.f32.mrf.mxu1 }
  0xf1   : > { %535 = vst [vmem:[%s872_s14] sm:$0xff] %v409_v31  ;;  %551 = vst [vmem:[%s872_s14 + $0x80] sm:$0xff] %v473_v32  ;;  %v420_v35 = vadd.f32 %v702_v33, %v867_v24  ;;  %v484_v36 = vadd.f32 %v718_v34, %v867_v24 }
  0xf2   : > { %v411_v37 = vpop.f32.mrf.mxu0  ;;  %v475_v38 = vpop.f32.mrf.mxu1 }
  0xf3   : > { %538 = vst [vmem:[%s872_s14 + $0x18] sm:$0xff] %v420_v35  ;;  %554 = vst [vmem:[%s872_s14 + $0x98] sm:$0xff] %v484_v36  ;;  %v412_v39 = vadd.f32 %v867_v24, %v411_v37  ;;  %v476_v40 = vadd.f32 %v867_v24, %v475_v38 }
  0xf4   : > { %v705_v41 = vpop.f32.mrf.mxu0  ;;  %v721_v42 = vpop.f32.mrf.mxu1 }
  0xf5   : > { %536 = vst [vmem:[%s872_s14 + $0x8] sm:$0xff] %v412_v39  ;;  %552 = vst [vmem:[%s872_s14 + $0x88] sm:$0xff] %v476_v40  ;;  %v433_v43 = vadd.f32 %v705_v41, %v867_v24  ;;  %v497_v44 = vadd.f32 %v721_v42, %v867_v24 }
  0xf6   : > { %v424_v45 = vpop.f32.mrf.mxu0  ;;  %v488_v46 = vpop.f32.mrf.mxu1 }
  0xf7   : > { %541 = vst [vmem:[%s872_s14 + $0x30] sm:$0xff] %v433_v43  ;;  %557 = vst [vmem:[%s872_s14 + $0xb0] sm:$0xff] %v497_v44  ;;  %v425_v47 = vadd.f32 %v867_v24, %v424_v45  ;;  %v489_v48 = vadd.f32 %v867_v24, %v488_v46 }
  0xf8   : > { %v706_v49 = vpop.f32.mrf.mxu0  ;;  %v722_v50 = vpop.f32.mrf.mxu1 }
  0xf9   : > { %539 = vst [vmem:[%s872_s14 + $0x20] sm:$0xff] %v425_v47  ;;  %555 = vst [vmem:[%s872_s14 + $0xa0] sm:$0xff] %v489_v48  ;;  %v436_v51 = vadd.f32 %v706_v49, %v867_v24  ;;  %v500_v52 = vadd.f32 %v722_v50, %v867_v24 }
  0xfa   : > { %v427_v53 = vpop.f32.mrf.mxu0  ;;  %v491_v54 = vpop.f32.mrf.mxu1 }
  0xfb   : > { %542 = vst [vmem:[%s872_s14 + $0x38] sm:$0xff] %v436_v51  ;;  %558 = vst [vmem:[%s872_s14 + $0xb8] sm:$0xff] %v500_v52  ;;  %v428_v55 = vadd.f32 %v867_v24, %v427_v53  ;;  %v492_v56 = vadd.f32 %v867_v24, %v491_v54 }
  0xfc   : > { %v709_v57 = vpop.f32.mrf.mxu0  ;;  %v725_v58 = vpop.f32.mrf.mxu1 }
  0xfd   : > { %540 = vst [vmem:[%s872_s14 + $0x28] sm:$0xff] %v428_v55  ;;  %556 = vst [vmem:[%s872_s14 + $0xa8] sm:$0xff] %v492_v56  ;;  %v449_v59 = vadd.f32 %v709_v57, %v867_v24  ;;  %v513_v60 = vadd.f32 %v725_v58, %v867_v24 }
  0xfe   : > { %v440_v61 = vpop.f32.mrf.mxu0  ;;  %v504_v62 = vpop.f32.mrf.mxu1 }
  0xff   : > { %545 = vst [vmem:[%s872_s14 + $0x50] sm:$0xff] %v449_v59  ;;  %561 = vst [vmem:[%s872_s14 + $0xd0] sm:$0xff] %v513_v60  ;;  %v441_v63 = vadd.f32 %v867_v24, %v440_v61  ;;  %v505_v0 = vadd.f32 %v867_v24, %v504_v62 }
 0x100   : > { %v710_v1 = vpop.f32.mrf.mxu0  ;;  %v726_v2 = vpop.f32.mrf.mxu1 }
 0x101   : > { %543 = vst [vmem:[%s872_s14 + $0x40] sm:$0xff] %v441_v63  ;;  %559 = vst [vmem:[%s872_s14 + $0xc0] sm:$0xff] %v505_v0  ;;  %v452_v3 = vadd.f32 %v710_v1, %v867_v24  ;;  %v516_v4 = vadd.f32 %v726_v2, %v867_v24 }
 0x102   : > { %v443_v5 = vpop.f32.mrf.mxu0  ;;  %v507_v6 = vpop.f32.mrf.mxu1 }
 0x103   : > { %546 = vst [vmem:[%s872_s14 + $0x58] sm:$0xff] %v452_v3  ;;  %562 = vst [vmem:[%s872_s14 + $0xd8] sm:$0xff] %v516_v4  ;;  %v444_v7 = vadd.f32 %v867_v24, %v443_v5  ;;  %v508_v8 = vadd.f32 %v867_v24, %v507_v6 }
 0x104   : > { %v713_v9 = vpop.f32.mrf.mxu0  ;;  %v729_v10 = vpop.f32.mrf.mxu1 }
 0x105   : > { %544 = vst [vmem:[%s872_s14 + $0x48] sm:$0xff] %v444_v7  ;;  %560 = vst [vmem:[%s872_s14 + $0xc8] sm:$0xff] %v508_v8  ;;  %v465_v11 = vadd.f32 %v713_v9, %v867_v24  ;;  %v529_v12 = vadd.f32 %v729_v10, %v867_v24 }
 0x106   : > { %v456_v13 = vpop.f32.mrf.mxu0  ;;  %v520_v14 = vpop.f32.mrf.mxu1 }
 0x107   : > { %549 = vst [vmem:[%s872_s14 + $0x70] sm:$0xff] %v465_v11  ;;  %565 = vst [vmem:[%s872_s14 + $0xf0] sm:$0xff] %v529_v12  ;;  %v457_v15 = vadd.f32 %v867_v24, %v456_v13  ;;  %v521_v16 = vadd.f32 %v867_v24, %v520_v14 }
 0x108   : > { %v714_v17 = vpop.f32.mrf.mxu0  ;;  %v730_v18 = vpop.f32.mrf.mxu1 }
 0x109   : > { %547 = vst [vmem:[%s872_s14 + $0x60] sm:$0xff] %v457_v15  ;;  %563 = vst [vmem:[%s872_s14 + $0xe0] sm:$0xff] %v521_v16  ;;  %v468_v19 = vadd.f32 %v714_v17, %v867_v24  ;;  %v532_v20 = vadd.f32 %v730_v18, %v867_v24 }
 0x10a   : > { %v459_v21 = vpop.f32.mrf.mxu0  ;;  %v523_v22 = vpop.f32.mrf.mxu1 }
 0x10b   : > { %550 = vst [vmem:[%s872_s14 + $0x78] sm:$0xff] %v468_v19  ;;  %566 = vst [vmem:[%s872_s14 + $0xf8] sm:$0xff] %v532_v20  ;;  %v460_v23 = vadd.f32 %v867_v24, %v459_v21  ;;  %v524_v25 = vadd.f32 %v867_v24, %v523_v22 }
 0x10d   : > { %548 = vst [vmem:[%s872_s14 + $0x68] sm:$0xff] %v460_v23  ;;  %564 = vst [vmem:[%s872_s14 + $0xe8] sm:$0xff] %v524_v25 }
 0x10e PF: > { %s13_s12 = sadd.s32 1, %s785_s12  }
 0x10f   : > { %p10_p4 = scmp.ge.s32.totalorder %s13_s12, 4  }
 0x111   :  { %12 = sbr.rel (!%p10_p4) target bundleno = 1 (0x1), region = 62 }

// kernel: _lambda_.23
= control target key start
LH: loop header
LB: loop body
LE: loop exit
PB: predicated region body
PF: predicated region fallthrough
CT: control target
= control target key end

     0   :  { %s3952_s15 = smov 0   ;;  %s5114_s0 = inlined_call_operand.vmem [shape: bf16[512,1152], index: 0, kind: input, shape index: {}]   ;;  %s5115_s1 = inlined_call_operand.vmem [shape: bf16[1152,128], index: 1, kind: input, shape index: {}]   ;;  %s5116_s2 = inlined_call_operand.vmem [shape: f32[1,128], index: 2, kind: input, shape index: {}]   ;;  %s5117_s3 = inlined_call_operand.vmem [shape: f32[512,128], index: 3, kind: output, shape index: {0}]   ;;  %s5118_s4 = inlined_call_operand.vmem [shape: f32[2,128], index: 4, kind: output, shape index: {1}]  }
   0x1 LB: > { %s3958_s16 = sadd.s32 4294967295, %s3923_s15   ;;  %p2864_p0 = scmp.ge.s32.totalorder %s3923_s15, 1  ;;  %s3923_s15 = sphi %s3952_s15, %s15_s15  }
   0x2   : > { %p162_p1 = scmp.lt.s32.totalorder %s3923_s15, 3 }
   0x4   : > { %p163_p2 = pnand %p2864_p0, %p162_p1 }
   0x6   : > { %166 = sbr.rel (%p163_p2) target bundleno = 561 (0x231), region = 32 }
   0xb   : > { %v3637_v0 = vld [vmem:[%s5115_s1 + $0x78] sm:$0xff]   ;;  %s2865_s19 = sshll.u32 %s3958_s16, 5  ;;  %v3639_v2 = vld [vmem:[%s5115_s1 + $0x70] sm:$0xff]   ;;  %v3641_v4 = vld [vmem:[%s5115_s1 + $0x68] sm:$0xff]   ;;  %p3087_p4 = scmp.ne.s32.totalorder %s3958_s16, 0 }
   0xc   : > { %v3638_v1 = vld [vmem:[%s5115_s1 + $0x38] sm:$0xff]   ;;  %3090 = vmatprep.subr.bf16.mxu0 %v3637_v0  ;;  %3610 = vmatprep.subr.bf16.mxu1 %v3637_v0  ;;  %p190_p3 = scmp.lt.s32.totalorder %s2865_s19, 63  ;;  %v3640_v3 = vld [vmem:[%s5115_s1 + $0x30] sm:$0xff]   ;;  %v3642_v5 = vld [vmem:[%s5115_s1 + $0x28] sm:$0xff]  }
   0xd   : > { %3091 = vmatpush3.bf16.msra.mxu0 %v3638_v1  ;;  %3618 = vmatpush3.bf16.msra.mxu1 %v3638_v1  ;;  %v3643_v6 = vld [vmem:[%s5115_s1 + $0x60] sm:$0xff]   ;;  %v3645_v8 = vld [vmem:[%s5115_s1 + $0x58] sm:$0xff]   ;;  %v3647_v10 = vld [vmem:[%s5115_s1 + $0x50] sm:$0xff]  }
   0xe   : > { %3092 = vmatprep.subr.bf16.mxu0 %v3639_v2  ;;  %3611 = vmatprep.subr.bf16.mxu1 %v3639_v2  ;;  %s5191_s19 = smov (!%p190_p3, %s2865_s19), 63  ;;  %v3644_v7 = vld [vmem:[%s5115_s1 + $0x20] sm:$0xff]   ;;  %v3646_v9 = vld [vmem:[%s5115_s1 + $0x18] sm:$0xff]   ;;  %v3648_v13 = vld [vmem:[%s5115_s1 + $0x10] sm:$0xff]  }
   0xf   : > { %s3626_s6 = smul.u32 36, %s5191_s19  ;;  %v3649_v14 = vld [vmem:[%s5115_s1 + $0x48] sm:$0xff]   ;;  %v3651_v16 = vld [vmem:[%s5115_s1 + $0x40] sm:$0xff]   ;;  %v3659_v18 = vld [vmem:[%s5115_s1 + $0xf8] sm:$0xff]   ;;  %s2868_s9 = sshll.u32 %s5191_s19, 3 }
  0x10   : > { %v3650_v15 = vld [vmem:[%s5115_s1 + $0x8] sm:$0xff]   ;;  %v3652_v17 = vld [vmem:[%s5115_s1] sm:$0xff]   ;;  %v3660_v21 = vld [vmem:[%s5115_s1 + $0x178] sm:$0xff]   ;;  %s4793_s11 = scalar_lea.vmem %s5117_s3, %s2868_s9 }
  0x11   : > { %3093 = vmatpush3.bf16.msra.mxu0 %v3640_v3  ;;  %3619 = vmatpush3.bf16.msra.mxu1 %v3640_v3  ;;  %s3996_s13 = scalar_lea.vmem %s5114_s0, %s3626_s6  ;;  %v3661_v22 = vld [vmem:[%s5115_s1 + $0xb8] sm:$0xff]   ;;  %v3663_v24 = vld [vmem:[%s5115_s1 + $0xf0] sm:$0xff]   ;;  %v3671_v32 = vld [vmem:[%s5115_s1 + $0xe8] sm:$0xff]  }
  0x12   : > { %3094 = vmatprep.subr.bf16.mxu0 %v3641_v4  ;;  %3612 = vmatprep.subr.bf16.mxu1 %v3641_v4  ;;  %v3655_v11 = vld [vmem:[%s3996_s13 + $0x4] ss:$36 sps:$4 sm:$0xff]   ;;  %v3662_v23 = vld [vmem:[%s5115_s1 + $0x138] sm:$0xff]   ;;  %v3665_v25 = vld [vmem:[%s3996_s13 + $0x4c] ss:$36 sps:$4 sm:$0xff]  }
  0x13   : > { %v3658_v12 = vld [vmem:[%s3996_s13 + $0x364] ss:$36 sps:$4 sm:$0xff]   ;;  %1714 = vmatprep.mubr.bf16.mxu0 %v3655_v11  ;;  %v3667_v26 = vld [vmem:[%s3996_s13 + $0x3ac] ss:$36 sps:$4 sm:$0xff]   ;;  %v3677_v35 = vld [vmem:[%s3996_s13 + $0x94] ss:$36 sps:$4 sm:$0xff]  }
  0x14   : > { %1810 = vmatprep.mubr.bf16.mxu1 %v3658_v12  ;;  %v3653_v19 = vld [vmem:[%s3996_s13] ss:$36 sps:$4 sm:$0xff]   ;;  %v3674_v27 = vld [vmem:[%s5115_s1 + $0x170] sm:$0xff]   ;;  %v3669_v30 = vld [vmem:[%s3996_s13 + $0x48] ss:$36 sps:$4 sm:$0xff]  }
  0x15   : > { %3095 = vmatpush3.bf16.msra.mxu0 %v3642_v5  ;;  %3620 = vmatpush3.bf16.msra.mxu1 %v3642_v5  ;;  %v3656_v20 = vld [vmem:[%s3996_s13 + $0x360] ss:$36 sps:$4 sm:$0xff]   ;;  %v3664_v28 = vld [vmem:[%s5115_s1 + $0xb0] sm:$0xff]   ;;  %v3670_v31 = vld [vmem:[%s3996_s13 + $0x3a8] ss:$36 sps:$4 sm:$0xff]  }
  0x16   : > { %3096 = vmatprep.subr.bf16.mxu0 %v3643_v6  ;;  %3613 = vmatprep.subr.bf16.mxu1 %v3643_v6  ;;  %v3676_v29 = vld [vmem:[%s5115_s1 + $0x130] sm:$0xff]   ;;  %v3672_v33 = vld [vmem:[%s5115_s1 + $0xa8] sm:$0xff]   ;;  %v3673_v34 = vld [vmem:[%s5115_s1 + $0xe0] sm:$0xff]  }
  0x17   : > { %v3679_v36 = vld [vmem:[%s3996_s13 + $0x3f4] ss:$36 sps:$4 sm:$0xff]   ;;  %v3675_v37 = vld [vmem:[%s5115_s1 + $0xa0] sm:$0xff]   ;;  %v3694_v41 = vld [vmem:[%s5115_s1 + $0x168] sm:$0xff]  }
  0x18   : > { %v3683_v38 = vld [vmem:[%s5115_s1 + $0xd8] sm:$0xff]   ;;  %v3681_v39 = vld [vmem:[%s3996_s13 + $0x90] ss:$36 sps:$4 sm:$0xff]   ;;  %v3696_v44 = vld [vmem:[%s5115_s1 + $0x128] sm:$0xff]  }
  0x19   : > { %3097 = vmatpush3.bf16.msra.mxu0 %v3644_v7  ;;  %3621 = vmatpush3.bf16.msra.mxu1 %v3644_v7  ;;  %v3682_v40 = vld [vmem:[%s3996_s13 + $0x3f0] ss:$36 sps:$4 sm:$0xff]   ;;  %v3684_v42 = vld [vmem:[%s5115_s1 + $0x98] sm:$0xff]   ;;  %v3693_v50 = vld [vmem:[%s5115_s1 + $0xc8] sm:$0xff]  }
  0x1a   : > { %3098 = vmatprep.subr.bf16.mxu0 %v3645_v8  ;;  %3614 = vmatprep.subr.bf16.mxu1 %v3645_v8  ;;  %v3685_v43 = vld [vmem:[%s5115_s1 + $0xd0] sm:$0xff]   ;;  %v3687_v45 = vld [vmem:[%s3996_s13 + $0xdc] ss:$36 sps:$4 sm:$0xff]   ;;  %v3695_v51 = vld [vmem:[%s5115_s1 + $0x88] sm:$0xff]  }
  0x1b   : > { %v3689_v46 = vld [vmem:[%s3996_s13 + $0x43c] ss:$36 sps:$4 sm:$0xff]   ;;  %v3686_v47 = vld [vmem:[%s5115_s1 + $0x90] sm:$0xff]   ;;  %v3699_v52 = vld [vmem:[%s3996_s13 + $0x124] ss:$36 sps:$4 sm:$0xff]  }
  0x1c   : > { %v3691_v48 = vld [vmem:[%s3996_s13 + $0xd8] ss:$36 sps:$4 sm:$0xff]   ;;  %v3697_v53 = vld [vmem:[%s5115_s1 + $0xc0] sm:$0xff]   ;;  %v3703_v56 = vld [vmem:[%s3996_s13 + $0xc] ss:$36 sps:$4 sm:$0xff]  }
  0x1d   : > { %3099 = vmatpush3.bf16.msra.mxu0 %v3646_v9  ;;  %3622 = vmatpush3.bf16.msra.mxu1 %v3646_v9  ;;  %v3692_v49 = vld [vmem:[%s3996_s13 + $0x438] ss:$36 sps:$4 sm:$0xff]   ;;  %v3707_v54 = vld [vmem:[%s5115_s1 + $0x160] sm:$0xff]   ;;  %v3701_v58 = vld [vmem:[%s3996_s13 + $0x8] ss:$36 sps:$4 sm:$0xff]  }
  0x1e   : > { %3100 = vmatprep.subr.bf16.mxu0 %v3647_v10  ;;  %3615 = vmatprep.subr.bf16.mxu1 %v3647_v10  ;;  %v3708_v55 = vld [vmem:[%s5115_s1 + $0x120] sm:$0xff]   ;;  %v3705_v60 = vld [vmem:[%s5115_s1 + $0x1f8] sm:$0xff]   ;;  %v3709_v62 = vld [vmem:[%s3996_s13 + $0x16c] ss:$36 sps:$4 sm:$0xff]  }
  0x1f   : > { %v3698_v57 = vld [vmem:[%s5115_s1 + $0x80] sm:$0xff]   ;;  %v3706_v61 = vld [vmem:[%s5115_s1 + $0x1b8] sm:$0xff]   ;;  %v3722_v2 = vld [vmem:[%s5115_s1 + $0x1f0] sm:$0xff]  }
  0x20   : > { %v3704_v59 = vld [vmem:[%s3996_s13 + $0x120] ss:$36 sps:$4 sm:$0xff]   ;;  %v3721_v63 = vld [vmem:[%s5115_s1 + $0x158] sm:$0xff]   ;;  %v3724_v3 = vld [vmem:[%s5115_s1 + $0x1b0] sm:$0xff]  }
  0x21   : > { %3101 = vmatpush3.bf16.msra.mxu0 %v3648_v13  ;;  %3623 = vmatpush3.bf16.msra.mxu1 %v3648_v13  ;;  %v3711_v0 = vld [vmem:[%s3996_s13 + $0x54] ss:$36 sps:$4 sm:$0xff]   ;;  %v3713_v4 = vld [vmem:[%s3996_s13 + $0x168] ss:$36 sps:$4 sm:$0xff]   ;;  %v3717_v9 = vld [vmem:[%s3996_s13 + $0x9c] ss:$36 sps:$4 sm:$0xff]  }
  0x22   : > { %3102 = vmatprep.subr.bf16.mxu0 %v3649_v14  ;;  %3616 = vmatprep.subr.bf16.mxu1 %v3649_v14  ;;  %v3723_v1 = vld [vmem:[%s5115_s1 + $0x118] sm:$0xff]   ;;  %v3731_v5 = vld [vmem:[%s5115_s1 + $0x150] sm:$0xff]   ;;  %v3739_v10 = vld [vmem:[%s5115_s1 + $0x1e8] sm:$0xff]  }
  0x23   : > { %v3732_v6 = vld [vmem:[%s5115_s1 + $0x110] sm:$0xff]   ;;  %v3740_v11 = vld [vmem:[%s5115_s1 + $0x1a8] sm:$0xff]   ;;  %v3720_v13 = vld [vmem:[%s3996_s13 + $0x98] ss:$36 sps:$4 sm:$0xff]  }
  0x24   : > { %v3714_v7 = vld [vmem:[%s3996_s13 + $0x50] ss:$36 sps:$4 sm:$0xff]   ;;  %v3725_v14 = vld [vmem:[%s3996_s13 + $0x1fc] ss:$36 sps:$4 sm:$0xff]  }
  0x25   : > { %3103 = vmatpush3.bf16.msra.mxu0 %v3650_v15  ;;  %3624 = vmatpush3.bf16.msra.mxu1 %v3650_v15  ;;  %v3715_v8 = vld [vmem:[%s3996_s13 + $0x1b4] ss:$36 sps:$4 sm:$0xff]   ;;  %v3747_v15 = vld [vmem:[%s5115_s1 + $0x148] sm:$0xff]  }
  0x26   : > { %3104 = vmatprep.subr.bf16.mxu0 %v3651_v16  ;;  %3617 = vmatprep.subr.bf16.mxu1 %v3651_v16  ;;  %v3719_v12 = vld [vmem:[%s3996_s13 + $0x1b0] ss:$36 sps:$4 sm:$0xff]   ;;  %v3748_v16 = vld [vmem:[%s5115_s1 + $0x108] sm:$0xff]  }
  0x29   : > { %3105 = vmatpush3.bf16.msra.mxu0 %v3652_v17  ;;  %3625 = vmatpush3.bf16.msra.mxu1 %v3652_v17  ;;  %v3727_v17 = vld [vmem:[%s3996_s13 + $0xe4] ss:$36 sps:$4 sm:$0xff]  }
  0x2a   : > { %3202 = vmatprep.subr.bf16.mxu1 %v3659_v18  ;;  %3314 = vmatprep.subr.bf16.mxu0 %v3660_v21  ;;  %v3755_v18 = vld [vmem:[%s5115_s1 + $0x1e0] sm:$0xff]  }
  0x2b   : > { %v3757_v21 = vld [vmem:[%s5115_s1 + $0x140] sm:$0xff]  }
  0x2c   : > { %1715 = vmatmul.mubr.bf16.vlgmr.msra.gmra.mxu0 %v3653_v19  ;;  %1811 = vmatmul.mubr.bf16.vlgmr.msra.gmra.mxu1 %v3656_v20  ;;  %v3756_v19 = vld [vmem:[%s5115_s1 + $0x1a0] sm:$0xff]   ;;  %v3729_v20 = vld [vmem:[%s3996_s13 + $0x1f8] ss:$36 sps:$4 sm:$0xff]  }
  0x2d   : > { %3203 = vmatpush3.bf16.msra.mxu1 %v3661_v22  ;;  %3315 = vmatpush3.bf16.msra.mxu0 %v3662_v23  ;;  %v3758_v22 = vld [vmem:[%s5115_s1 + $0x100] sm:$0xff]  }
  0x2e   : > { %3204 = vmatprep.subr.bf16.mxu1 %v3663_v24  ;;  %1722 = vmatprep.mubr.bf16.mxu0 %v3665_v25  ;;  %v3730_v23 = vld [vmem:[%s3996_s13 + $0xe0] ss:$36 sps:$4 sm:$0xff]   ;;  %v3735_v25 = vld [vmem:[%s3996_s13 + $0x12c] ss:$36 sps:$4 sm:$0xff]  }
  0x2f   : > { %1818 = vmatprep.mubr.bf16.mxu1 %v3667_v26  ;;  %3316 = vmatprep.subr.bf16.mxu0 %v3674_v27  ;;  %v3733_v24 = vld [vmem:[%s3996_s13 + $0x244] ss:$36 sps:$4 sm:$0xff]   ;;  %v3771_v26 = vld [vmem:[%s5115_s1 + $0x1d8] sm:$0xff]  }
  0x30   : > { %v3737_v27 = vld [vmem:[%s3996_s13 + $0x240] ss:$36 sps:$4 sm:$0xff]  }
  0x31   : > { %3205 = vmatpush3.bf16.msra.mxu1 %v3664_v28  ;;  %3317 = vmatpush3.bf16.msra.mxu0 %v3676_v29  ;;  %v3772_v28 = vld [vmem:[%s5115_s1 + $0x238] sm:$0xff]  }
  0x32   : > { %3206 = vmatprep.subr.bf16.mxu1 %v3671_v32  ;;  %3318 = vmatprep.subr.bf16.mxu0 %v3694_v41  ;;  %v3773_v29 = vld [vmem:[%s5115_s1 + $0x198] sm:$0xff]   ;;  %v3801_v41 = vld [vmem:[%s5115_s1 + $0x1c8] sm:$0xff]  }
  0x33   : > { %v3743_v32 = vld [vmem:[%s3996_s13 + $0x174] ss:$36 sps:$4 sm:$0xff]  }
  0x34   : > { %1723 = vmatmul.mubr.bf16.gmra.mxu0 %v3669_v30  ;;  %1819 = vmatmul.mubr.bf16.gmra.mxu1 %v3670_v31  ;;  %v3738_v30 = vld [vmem:[%s3996_s13 + $0x128] ss:$36 sps:$4 sm:$0xff]  }
  0x35   : > { %3207 = vmatpush3.bf16.msra.mxu1 %v3672_v33  ;;  %1730 = vmatprep.mubr.bf16.mxu0 %v3677_v35  ;;  %v3741_v31 = vld [vmem:[%s3996_s13 + $0x28c] ss:$36 sps:$4 sm:$0xff]  }
  0x36   : > { %3208 = vmatprep.subr.bf16.mxu1 %v3673_v34  ;;  %1826 = vmatprep.mubr.bf16.mxu1 %v3679_v36  ;;  %v3786_v33 = vld [vmem:[%s5115_s1 + $0x1d0] sm:$0xff]   ;;  %v3745_v34 = vld [vmem:[%s3996_s13 + $0x288] ss:$36 sps:$4 sm:$0xff]  }
  0x37   : > { %3319 = vmatpush3.bf16.msra.mxu0 %v3696_v44  ;;  %v3746_v35 = vld [vmem:[%s3996_s13 + $0x170] ss:$36 sps:$4 sm:$0xff]   ;;  %v3761_v44 = vld [vmem:[%s3996_s13 + $0x204] ss:$36 sps:$4 sm:$0xff]  }
  0x38   : > { %3320 = vmatprep.subr.bf16.mxu0 %v3707_v54  ;;  %v3788_v36 = vld [vmem:[%s5115_s1 + $0x190] sm:$0xff]   ;;  %v3776_v54 = vld [vmem:[%s3996_s13 + $0x5c] ss:$36 sps:$4 sm:$0xff]  }
  0x39   : > { %3209 = vmatpush3.bf16.msra.mxu1 %v3675_v37  ;;  %v3749_v37 = vld [vmem:[%s3996_s13 + $0x2d4] ss:$36 sps:$4 sm:$0xff]  }
  0x3a   : > { %3210 = vmatprep.subr.bf16.mxu1 %v3683_v38  ;;  %v3751_v38 = vld [vmem:[%s3996_s13 + $0x1bc] ss:$36 sps:$4 sm:$0xff]  }
  0x3b   : > { %3321 = vmatpush3.bf16.msra.mxu0 %v3708_v55  ;;  %v3787_v55 = vld [vmem:[%s5115_s1 + $0x230] sm:$0xff]  }
  0x3c   : > { %1731 = vmatmul.mubr.bf16.gmra.mxu0 %v3681_v39  ;;  %1827 = vmatmul.mubr.bf16.gmra.mxu1 %v3682_v40  ;;  %v3753_v39 = vld [vmem:[%s3996_s13 + $0x2d0] ss:$36 sps:$4 sm:$0xff]   ;;  %v3754_v40 = vld [vmem:[%s3996_s13 + $0x1b8] ss:$36 sps:$4 sm:$0xff]  }
  0x3d   : > { %3211 = vmatpush3.bf16.msra.mxu1 %v3684_v42  ;;  %1738 = vmatprep.mubr.bf16.mxu0 %v3687_v45  ;;  %v3759_v42 = vld [vmem:[%s3996_s13 + $0x31c] ss:$36 sps:$4 sm:$0xff]  }
  0x3e   : > { %3212 = vmatprep.subr.bf16.mxu1 %v3685_v43  ;;  %1834 = vmatprep.mubr.bf16.mxu1 %v3689_v46  ;;  %v3803_v43 = vld [vmem:[%s5115_s1 + $0x188] sm:$0xff]   ;;  %v3763_v45 = vld [vmem:[%s3996_s13 + $0x318] ss:$36 sps:$4 sm:$0xff]   ;;  %v3764_v46 = vld [vmem:[%s3996_s13 + $0x200] ss:$36 sps:$4 sm:$0xff]  }
  0x3f   : > { %3322 = vmatprep.subr.bf16.mxu0 %v3721_v63  ;;  %v3831_v63 = vld [vmem:[%s5115_s1 + $0x218] sm:$0xff]  }
  0x40   : > { %3323 = vmatpush3.bf16.msra.mxu0 %v3723_v1  ;;  %v3789_v1 = vld [vmem:[%s3996_s13 + $0x324] ss:$36 sps:$4 sm:$0xff]  }
  0x41   : > { %3213 = vmatpush3.bf16.msra.mxu1 %v3686_v47  ;;  %3324 = vmatprep.subr.bf16.mxu0 %v3731_v5  ;;  %v3816_v47 = vld [vmem:[%s5115_s1 + $0x1c0] sm:$0xff]   ;;  %v3857_v5 = vld [vmem:[%s5115_s1 + $0x208] sm:$0xff]  }
  0x42   : > { %3214 = vmatprep.subr.bf16.mxu1 %v3693_v50  ;;  %v3769_v50 = vld [vmem:[%s3996_s13 + $0x14] ss:$36 sps:$4 sm:$0xff]  }
  0x44   : > { %1739 = vmatmul.mubr.bf16.gmra.mxu0 %v3691_v48  ;;  %1835 = vmatmul.mubr.bf16.gmra.mxu1 %v3692_v49  ;;  %v3765_v48 = vld [vmem:[%s3996_s13 + $0x24c] ss:$36 sps:$4 sm:$0xff]   ;;  %v3818_v49 = vld [vmem:[%s5115_s1 + $0x180] sm:$0xff]  }
  0x45   : > { %3215 = vmatpush3.bf16.msra.mxu1 %v3695_v51  ;;  %1746 = vmatprep.mubr.bf16.mxu0 %v3699_v52  ;;  %v3767_v51 = vld [vmem:[%s3996_s13 + $0x10] ss:$36 sps:$4 sm:$0xff]   ;;  %v3770_v52 = vld [vmem:[%s3996_s13 + $0x248] ss:$36 sps:$4 sm:$0xff]  }
  0x46   : > { %3216 = vmatprep.subr.bf16.mxu1 %v3697_v53  ;;  %1875 = vmatprep.mubr.bf16.mxu1 %v3703_v56  ;;  %v3774_v53 = vld [vmem:[%s3996_s13 + $0x294] ss:$36 sps:$4 sm:$0xff]   ;;  %v3802_v56 = vld [vmem:[%s5115_s1 + $0x228] sm:$0xff]  }
  0x47   : > { %3325 = vmatpush3.bf16.msra.mxu0 %v3732_v6  ;;  %v3794_v6 = vld [vmem:[%s3996_s13 + $0xe8] ss:$36 sps:$4 sm:$0xff]  }
  0x48   : > { %3326 = vmatprep.subr.bf16.mxu0 %v3747_v15  ;;  %v3809_v15 = vld [vmem:[%s3996_s13 + $0x178] ss:$36 sps:$4 sm:$0xff]  }
  0x49   : > { %3217 = vmatpush3.bf16.msra.mxu1 %v3698_v57  ;;  %v3778_v57 = vld [vmem:[%s3996_s13 + $0x290] ss:$36 sps:$4 sm:$0xff]  }
  0x4a   : > { %3426 = vmatprep.subr.bf16.mxu1 %v3705_v60  ;;  %v3782_v60 = vld [vmem:[%s3996_s13 + $0xa4] ss:$36 sps:$4 sm:$0xff]  }
  0x4b   : > { %3327 = vmatpush3.bf16.msra.mxu0 %v3748_v16  ;;  %v3810_v16 = vld [vmem:[%s3996_s13 + $0x3fc] ss:$36 sps:$4 sm:$0xff]  }
  0x4c   : > { %1747 = vmatmul.mubr.bf16.gmra.mxu0 %v3704_v59  ;;  %1876 = vmatmul.mubr.bf16.vlgmr.msra.gmra.mxu1 %v3701_v58  ;;  %v3779_v58 = vld [vmem:[%s3996_s13 + $0x58] ss:$36 sps:$4 sm:$0xff]  }
  0x4d   : > { %3427 = vmatpush3.bf16.msra.mxu1 %v3706_v61  ;;  %1754 = vmatprep.mubr.bf16.mxu0 %v3709_v62  ;;  %v3780_v59 = vld [vmem:[%s3996_s13 + $0x2dc] ss:$36 sps:$4 sm:$0xff]  }
  0x4e   : > { %1883 = vmatprep.mubr.bf16.mxu1 %v3711_v0  ;;  %3428 = vmatprep.subr.bf16.mxu1 %v3722_v2  ;;  %v3817_v61 = vld [vmem:[%s5115_s1 + $0x220] sm:$0xff]   ;;  %v3784_v62 = vld [vmem:[%s3996_s13 + $0x2d8] ss:$36 sps:$4 sm:$0xff]   ;;  %v3791_v2 = vld [vmem:[%s3996_s13 + $0xec] ss:$36 sps:$4 sm:$0xff]  }
  0x4f   : > { %3328 = vmatprep.subr.bf16.mxu0 %v3757_v21  ;;  %v3785_v0 = vld [vmem:[%s3996_s13 + $0xa0] ss:$36 sps:$4 sm:$0xff]   ;;  %v3821_v21 = vld [vmem:[%s3996_s13 + $0x20c] ss:$36 sps:$4 sm:$0xff]  }
  0x50   : > { %3329 = vmatpush3.bf16.msra.mxu0 %v3758_v22  ;;  %v3823_v22 = vld [vmem:[%s3996_s13 + $0x440] ss:$36 sps:$4 sm:$0xff]  }
  0x51   : > { %3429 = vmatpush3.bf16.msra.mxu1 %v3724_v3  ;;  %3562 = vmatprep.subr.bf16.mxu0 %v3772_v28  ;;  %v3844_v3 = vld [vmem:[%s5115_s1 + $0x210] sm:$0xff]  }
  0x52   : > { %3430 = vmatprep.subr.bf16.mxu1 %v3739_v10  ;;  %v3799_v10 = vld [vmem:[%s3996_s13 + $0x368] ss:$36 sps:$4 sm:$0xff]  }
  0x54   : > { %1755 = vmatmul.mubr.bf16.gmra.mxu0 %v3713_v4  ;;  %1884 = vmatmul.mubr.bf16.gmra.mxu1 %v3714_v7  ;;  %v3793_v4 = vld [vmem:[%s3996_s13 + $0x320] ss:$36 sps:$4 sm:$0xff]   ;;  %v3795_v7 = vld [vmem:[%s3996_s13 + $0x36c] ss:$36 sps:$4 sm:$0xff]  }
  0x55   : > { %1762 = vmatprep.mubr.bf16.mxu0 %v3715_v8  ;;  %1891 = vmatprep.mubr.bf16.mxu1 %v3717_v9  ;;  %v3797_v8 = vld [vmem:[%s3996_s13 + $0x134] ss:$36 sps:$4 sm:$0xff]   ;;  %v3870_v9 = vld [vmem:[%s5115_s1 + $0x200] sm:$0xff]  }
  0x56   : > { %3431 = vmatpush3.bf16.msra.mxu1 %v3740_v11  ;;  %v3800_v11 = vld [vmem:[%s3996_s13 + $0x130] ss:$36 sps:$4 sm:$0xff]  }
  0x57   : > { %3432 = vmatprep.subr.bf16.mxu1 %v3755_v18  ;;  %v3814_v18 = vld [vmem:[%s3996_s13 + $0x3f8] ss:$36 sps:$4 sm:$0xff]  }
  0x5a   : > { %3433 = vmatpush3.bf16.msra.mxu1 %v3756_v19  ;;  %v3815_v19 = vld [vmem:[%s3996_s13 + $0x1c0] ss:$36 sps:$4 sm:$0xff]  }
  0x5b   : > { %3434 = vmatprep.subr.bf16.mxu1 %v3771_v26  ;;  %v3827_v26 = vld [vmem:[%s3996_s13 + $0x18] ss:$36 sps:$4 sm:$0xff]  }
  0x5c   : > { %1763 = vmatmul.mubr.bf16.gmra.mxu0 %v3719_v12  ;;  %1892 = vmatmul.mubr.bf16.gmra.mxu1 %v3720_v13  ;;  %v3804_v12 = vld [vmem:[%s3996_s13 + $0x3b4] ss:$36 sps:$4 sm:$0xff]   ;;  %v3806_v13 = vld [vmem:[%s3996_s13 + $0x17c] ss:$36 sps:$4 sm:$0xff]  }
  0x5d   : > { %1770 = vmatprep.mubr.bf16.mxu0 %v3725_v14  ;;  %1899 = vmatprep.mubr.bf16.mxu1 %v3727_v17  ;;  %v3808_v14 = vld [vmem:[%s3996_s13 + $0x3b0] ss:$36 sps:$4 sm:$0xff]   ;;  %v3812_v17 = vld [vmem:[%s3996_s13 + $0x1c4] ss:$36 sps:$4 sm:$0xff]  }
  0x5e   : > { %3435 = vmatpush3.bf16.msra.mxu1 %v3773_v29  ;;  %v3834_v29 = vld [vmem:[%s3996_s13 + $0x64] ss:$36 sps:$4 sm:$0xff]  }
  0x5f   : > { %3436 = vmatprep.subr.bf16.mxu1 %v3786_v33  ;;  %v3840_v33 = vld [vmem:[%s3996_s13 + $0xac] ss:$36 sps:$4 sm:$0xff]  }
  0x62   : > { %3437 = vmatpush3.bf16.msra.mxu1 %v3788_v36  ;;  %v3845_v36 = vld [vmem:[%s3996_s13 + $0x32c] ss:$36 sps:$4 sm:$0xff]  }
  0x63   : > { %3438 = vmatprep.subr.bf16.mxu1 %v3801_v41  ;;  %v3853_v41 = vld [vmem:[%s3996_s13 + $0x13c] ss:$36 sps:$4 sm:$0xff]  }
  0x64   : > { %1771 = vmatmul.mubr.bf16.gmra.mxu0 %v3729_v20  ;;  %1900 = vmatmul.mubr.bf16.gmra.mxu1 %v3730_v23  ;;  %v3819_v20 = vld [vmem:[%s3996_s13 + $0x444] ss:$36 sps:$4 sm:$0xff]  }
  0x65   : > { %1778 = vmatprep.mubr.bf16.mxu0 %v3733_v24  ;;  %1907 = vmatprep.mubr.bf16.mxu1 %v3735_v25  ;;  %v3824_v23 = vld [vmem:[%s3996_s13 + $0x208] ss:$36 sps:$4 sm:$0xff]   ;;  %v3825_v24 = vld [vmem:[%s3996_s13 + $0x254] ss:$36 sps:$4 sm:$0xff]   ;;  %v3829_v25 = vld [vmem:[%s3996_s13 + $0x1c] ss:$36 sps:$4 sm:$0xff]  }
  0x66   : > { %3439 = vmatpush3.bf16.msra.mxu1 %v3803_v43  ;;  %v3856_v43 = vld [vmem:[%s3996_s13 + $0x138] ss:$36 sps:$4 sm:$0xff]  }
  0x67   : > { %3440 = vmatprep.subr.bf16.mxu1 %v3816_v47 }
  0x6a   : > { %3441 = vmatpush3.bf16.msra.mxu1 %v3818_v49 }
  0x6c   : > { %1779 = vmatmul.mubr.bf16.gmra.mxu0 %v3737_v27  ;;  %1908 = vmatmul.mubr.bf16.gmra.mxu1 %v3738_v30  ;;  %v3830_v27 = vld [vmem:[%s3996_s13 + $0x250] ss:$36 sps:$4 sm:$0xff]   ;;  %v3836_v30 = vld [vmem:[%s3996_s13 + $0x298] ss:$36 sps:$4 sm:$0xff]  }
  0x6d   : > { %1786 = vmatprep.mubr.bf16.mxu0 %v3741_v31  ;;  %1915 = vmatprep.mubr.bf16.mxu1 %v3743_v32  ;;  %v3837_v31 = vld [vmem:[%s3996_s13 + $0x60] ss:$36 sps:$4 sm:$0xff]  }
  0x6e   : > { %v3838_v32 = vld [vmem:[%s3996_s13 + $0x2e4] ss:$36 sps:$4 sm:$0xff]  }
  0x74   : > { %1787 = vmatmul.mubr.bf16.gmra.mxu0 %v3745_v34  ;;  %1916 = vmatmul.mubr.bf16.gmra.mxu1 %v3746_v35  ;;  %v3842_v34 = vld [vmem:[%s3996_s13 + $0x2e0] ss:$36 sps:$4 sm:$0xff]   ;;  %v3843_v35 = vld [vmem:[%s3996_s13 + $0xa8] ss:$36 sps:$4 sm:$0xff]  }
  0x75   : > { %1794 = vmatprep.mubr.bf16.mxu0 %v3749_v37  ;;  %1923 = vmatprep.mubr.bf16.mxu1 %v3751_v38  ;;  %v3847_v37 = vld [vmem:[%s3996_s13 + $0xf4] ss:$36 sps:$4 sm:$0xff]   ;;  %v3849_v38 = vld [vmem:[%s3996_s13 + $0x328] ss:$36 sps:$4 sm:$0xff]  }
  0x7c   : > { %1795 = vmatmul.mubr.bf16.gmra.mxu0 %v3753_v39  ;;  %1924 = vmatmul.mubr.bf16.gmra.mxu1 %v3754_v40  ;;  %v3850_v39 = vld [vmem:[%s3996_s13 + $0xf0] ss:$36 sps:$4 sm:$0xff]  }
  0x7d   : > { %1802 = vmatprep.mubr.bf16.mxu0 %v3759_v42  ;;  %1931 = vmatprep.mubr.bf16.mxu1 %v3761_v44  ;;  %v3851_v40 = vld [vmem:[%s3996_s13 + $0x374] ss:$36 sps:$4 sm:$0xff]   ;;  %v3858_v44 = vld [vmem:[%s3996_s13 + $0x3bc] ss:$36 sps:$4 sm:$0xff]  }
  0x7e   : > { %v3855_v42 = vld [vmem:[%s3996_s13 + $0x370] ss:$36 sps:$4 sm:$0xff]  }
  0x84   : > { %1803 = vmatmul.mubr.bf16.gmra.mxu0 %v3763_v45  ;;  %1932 = vmatmul.mubr.bf16.gmra.mxu1 %v3764_v46  ;;  %v3860_v45 = vld [vmem:[%s3996_s13 + $0x184] ss:$36 sps:$4 sm:$0xff]  }
  0x85   : > { %1939 = vmatprep.mubr.bf16.mxu1 %v3765_v48  ;;  %2036 = vmatprep.mubr.bf16.mxu0 %v3769_v50 }
  0x8c   : > { %1940 = vmatmul.mubr.bf16.gmra.mxu1 %v3770_v52  ;;  %2037 = vmatmul.mubr.bf16.vlgmr.msra.gmra.mxu0 %v3767_v51 }
  0x8d   : > { %3563 = vmatpush3.bf16.msra.mxu0 %v3772_v28  ;;  %1947 = vmatprep.mubr.bf16.mxu1 %v3774_v53  ;;  %v3832_v28 = vld [vmem:[%s3996_s13 + $0x29c] ss:$36 sps:$4 sm:$0xff]  }
  0x8e   : > { %2044 = vmatprep.mubr.bf16.mxu0 %v3776_v54  ;;  %3564 = vmatprep.subr.bf16.mxu0 %v3787_v55  ;;  %v3862_v54 = vld [vmem:[%s3996_s13 + $0x3b8] ss:$36 sps:$4 sm:$0xff]  }
  0x91   : > { %3565 = vmatpush3.bf16.msra.mxu0 %v3787_v55  ;;  %v3863_v55 = vld [vmem:[%s3996_s13 + $0x180] ss:$36 sps:$4 sm:$0xff]  }
  0x92   : > { %3566 = vmatprep.subr.bf16.mxu0 %v3802_v56 }
  0x94   : > { %1948 = vmatmul.mubr.bf16.gmra.mxu1 %v3778_v57  ;;  %2045 = vmatmul.mubr.bf16.gmra.mxu0 %v3779_v58  ;;  %v3866_v57 = vld [vmem:[%s3996_s13 + $0x1cc] ss:$36 sps:$4 sm:$0xff]  }
  0x95   : > { %1955 = vmatprep.mubr.bf16.mxu1 %v3780_v59  ;;  %2052 = vmatprep.mubr.bf16.mxu0 %v3782_v60 }
  0x96   : > { %3567 = vmatpush3.bf16.msra.mxu0 %v3802_v56  ;;  %v3864_v56 = vld [vmem:[%s3996_s13 + $0x404] ss:$36 sps:$4 sm:$0xff]  }
  0x97   : > { %3568 = vmatprep.subr.bf16.mxu0 %v3817_v61 }
  0x9a   : > { %3569 = vmatpush3.bf16.msra.mxu0 %v3817_v61 }
  0x9b   : > { %3570 = vmatprep.subr.bf16.mxu0 %v3831_v63 }
  0x9c   : > { %1956 = vmatmul.mubr.bf16.gmra.mxu1 %v3784_v62  ;;  %2053 = vmatmul.mubr.bf16.gmra.mxu0 %v3785_v0 }
  0x9d   : > { %1963 = vmatprep.mubr.bf16.mxu1 %v3789_v1  ;;  %2060 = vmatprep.mubr.bf16.mxu0 %v3791_v2 }
  0x9e   : > { %3571 = vmatpush3.bf16.msra.mxu0 %v3831_v63 }
  0x9f   : > { %3572 = vmatprep.subr.bf16.mxu0 %v3844_v3 }
  0xa2   : > { %3573 = vmatpush3.bf16.msra.mxu0 %v3844_v3 }
  0xa3   : > { %3574 = vmatprep.subr.bf16.mxu0 %v3857_v5 }
  0xa4   : > { %1964 = vmatmul.mubr.bf16.gmra.mxu1 %v3793_v4  ;;  %2061 = vmatmul.mubr.bf16.gmra.mxu0 %v3794_v6  ;;  %v3868_v6 = vld [vmem:[%s3996_s13 + $0x400] ss:$36 sps:$4 sm:$0xff]  }
  0xa5   : > { %1971 = vmatprep.mubr.bf16.mxu1 %v3795_v7  ;;  %2068 = vmatprep.mubr.bf16.mxu0 %v3797_v8  ;;  %v3869_v7 = vld [vmem:[%s3996_s13 + $0x1c8] ss:$36 sps:$4 sm:$0xff]  }
  0xa6   : > { %3575 = vmatpush3.bf16.msra.mxu0 %v3857_v5  ;;  %v3871_v8 = vld [vmem:[%s3996_s13 + $0x44c] ss:$36 sps:$4 sm:$0xff]  }
  0xa7   : > { %3576 = vmatprep.subr.bf16.mxu0 %v3870_v9 }
  0xaa   : > { %3577 = vmatpush3.bf16.msra.mxu0 %v3870_v9  ;;  %v3873_v9 = vld [vmem:[%s3996_s13 + $0x214] ss:$36 sps:$4 sm:$0xff]  }
  0xac   : > { %1972 = vmatmul.mubr.bf16.gmra.mxu1 %v3799_v10  ;;  %2069 = vmatmul.mubr.bf16.gmra.mxu0 %v3800_v11 }
  0xad   : > { %1979 = vmatprep.mubr.bf16.mxu1 %v3804_v12  ;;  %2076 = vmatprep.mubr.bf16.mxu0 %v3806_v13 }
  0xb4   : > { %1980 = vmatmul.mubr.bf16.gmra.mxu1 %v3808_v14  ;;  %2077 = vmatmul.mubr.bf16.gmra.mxu0 %v3809_v15 }
  0xb5   : > { %1987 = vmatprep.mubr.bf16.mxu1 %v3810_v16  ;;  %2084 = vmatprep.mubr.bf16.mxu0 %v3812_v17 }
  0xbc   : > { %1988 = vmatmul.mubr.bf16.gmra.mxu1 %v3814_v18  ;;  %2085 = vmatmul.mubr.bf16.gmra.mxu0 %v3815_v19 }
  0xbd   : > { %1995 = vmatprep.mubr.bf16.mxu1 %v3819_v20  ;;  %2092 = vmatprep.mubr.bf16.mxu0 %v3821_v21 }
  0xc4   : > { %1996 = vmatmul.mubr.bf16.gmra.mxu1 %v3823_v22  ;;  %2093 = vmatmul.mubr.bf16.gmra.mxu0 %v3824_v23  ;;  %v3875_v22 = vld [vmem:[%s3996_s13 + $0x448] ss:$36 sps:$4 sm:$0xff]   ;;  %v3876_v23 = vld [vmem:[%s3996_s13 + $0x210] ss:$36 sps:$4 sm:$0xff]  }
  0xc5   : > { %2100 = vmatprep.mubr.bf16.mxu0 %v3825_v24  ;;  %2197 = vmatprep.mubr.bf16.mxu1 %v3829_v25  ;;  %v3879_v24 = vld [vmem:[%s3996_s13 + $0x25c] ss:$36 sps:$4 sm:$0xff]  }
  0xc6   : > { %v3880_v25 = vld [vmem:[%s3996_s13 + $0x20] ss:$36 sps:$4 sm:$0xff]  }
  0xcc   : > { %2101 = vmatmul.mubr.bf16.gmra.mxu0 %v3830_v27  ;;  %2198 = vmatmul.mubr.bf16.vlgmr.msra.gmra.mxu1 %v3827_v26 }
  0xcd   : > { %2108 = vmatprep.mubr.bf16.mxu0 %v3832_v28  ;;  %2205 = vmatprep.mubr.bf16.mxu1 %v3834_v29 }
  0xd4   : > { %2109 = vmatmul.mubr.bf16.gmra.mxu0 %v3836_v30  ;;  %2206 = vmatmul.mubr.bf16.gmra.mxu1 %v3837_v31 }
  0xd5   : > { %2116 = vmatprep.mubr.bf16.mxu0 %v3838_v32  ;;  %2213 = vmatprep.mubr.bf16.mxu1 %v3840_v33 }
  0xdc   : > { %2117 = vmatmul.mubr.bf16.gmra.mxu0 %v3842_v34  ;;  %2214 = vmatmul.mubr.bf16.gmra.mxu1 %v3843_v35 }
  0xdd   : > { %2124 = vmatprep.mubr.bf16.mxu0 %v3845_v36  ;;  %2221 = vmatprep.mubr.bf16.mxu1 %v3847_v37 }
  0xe4   : > { %2125 = vmatmul.mubr.bf16.gmra.mxu0 %v3849_v38  ;;  %2222 = vmatmul.mubr.bf16.gmra.mxu1 %v3850_v39  ;;  %v3877_v38 = vld [vmem:[%s3996_s13 + $0x258] ss:$36 sps:$4 sm:$0xff]   ;;  %v3881_v39 = vld [vmem:[%s3996_s13 + $0x68] ss:$36 sps:$4 sm:$0xff]  }
  0xe5   : > { %2132 = vmatprep.mubr.bf16.mxu0 %v3851_v40  ;;  %2229 = vmatprep.mubr.bf16.mxu1 %v3853_v41  ;;  %v3884_v40 = vld [vmem:[%s3996_s13 + $0x2a4] ss:$36 sps:$4 sm:$0xff]   ;;  %v3885_v41 = vld [vmem:[%s3996_s13 + $0xb0] ss:$36 sps:$4 sm:$0xff]  }
  0xec   : > { %v3106_v46 = vpop.f32.mrf.mxu0  ;;  %v3178_v47 = vpop.f32.mrf.mxu1  ;;  %2133 = vmatmul.mubr.bf16.gmra.mxu0 %v3855_v42  ;;  %2230 = vmatmul.mubr.bf16.gmra.mxu1 %v3856_v43 }
  0xed   : > { %2140 = vmatprep.mubr.bf16.mxu0 %v3858_v44  ;;  %2237 = vmatprep.mubr.bf16.mxu1 %v3860_v45 }
  0xee   : > { %v3107_v48 = vpop.f32.mrf.mxu0  ;;  %v3179_v49 = vpop.f32.mrf.mxu1 }
  0xef   : > { %v4289_v50 = vadd.f32 %v3107_v48, %v3106_v46  ;;  %v4291_v51 = vadd.f32 %v3179_v49, %v3178_v47  ;;  %v4340_v46 = vld [vmem:[%s5116_s2] ss:$0 sm:$0xff] }
  0xf0   : > { %v3109_v52 = vpop.f32.mrf.mxu0  ;;  %v3181_v53 = vpop.f32.mrf.mxu1 }
  0xf2   : > { %v3110_v58 = vpop.f32.mrf.mxu0  ;;  %v3182_v59 = vpop.f32.mrf.mxu1 }
  0xf3   : > { %v4297_v60 = vadd.f32 %v3110_v58, %v3109_v52  ;;  %v4299_v61 = vadd.f32 %v3182_v59, %v3181_v53  ;;  %v1717_v53 = vadd.f32 %v4289_v50, %v4340_v46  ;;  %v3882_v58 = vld [vmem:[%s3996_s13 + $0x2a0] ss:$36 sps:$4 sm:$0xff]   ;;  %v3886_v59 = vld [vmem:[%s3996_s13 + $0xf8] ss:$36 sps:$4 sm:$0xff]  }
  0xf4   : > { %v3112_v62 = vpop.f32.mrf.mxu0  ;;  %v3184_v63 = vpop.f32.mrf.mxu1  ;;  %2141 = vmatmul.mubr.bf16.gmra.mxu0 %v3862_v54  ;;  %2238 = vmatmul.mubr.bf16.gmra.mxu1 %v3863_v55 }
  0xf5   : > { %2148 = vmatprep.mubr.bf16.mxu0 %v3864_v56  ;;  %2245 = vmatprep.mubr.bf16.mxu1 %v3866_v57 }
  0xf6   : > { %v3113_v0 = vpop.f32.mrf.mxu0  ;;  %v3185_v1 = vpop.f32.mrf.mxu1 }
  0xf7   : > { %v4301_v2 = vadd.f32 %v3113_v0, %v3112_v62  ;;  %v4303_v3 = vadd.f32 %v3185_v1, %v3184_v63  ;;  %v3889_v63 = vld [vmem:[%s3996_s13 + $0x2ec] ss:$36 sps:$4 sm:$0xff]   ;;  %v3890_v0 = vld [vmem:[%s3996_s13 + $0x140] ss:$36 sps:$4 sm:$0xff]  }
  0xf8   : > { %v3115_v4 = vpop.f32.mrf.mxu0  ;;  %v3187_v5 = vpop.f32.mrf.mxu1 }
  0xfa   : > { %v3116_v10 = vpop.f32.mrf.mxu0  ;;  %v3188_v11 = vpop.f32.mrf.mxu1 }
  0xfb   : > { %v4309_v12 = vadd.f32 %v3116_v10, %v3115_v4  ;;  %v4311_v13 = vadd.f32 %v3188_v11, %v3187_v5  ;;  %v1720_v5 = vadd.f32 %v4297_v60, %v4340_v46  ;;  %v1725_v60 = vadd.f32 %v4301_v2, %v4340_v46 }
  0xfc   : > { %v3118_v14 = vpop.f32.mrf.mxu0  ;;  %v3190_v15 = vpop.f32.mrf.mxu1  ;;  %2149 = vmatmul.mubr.bf16.gmra.mxu0 %v3868_v6  ;;  %2246 = vmatmul.mubr.bf16.gmra.mxu1 %v3869_v7 }
  0xfd   : > { %2156 = vmatprep.mubr.bf16.mxu0 %v3871_v8  ;;  %2253 = vmatprep.mubr.bf16.mxu1 %v3873_v9 }
  0xfe   : > { %v3119_v16 = vpop.f32.mrf.mxu0  ;;  %v3191_v17 = vpop.f32.mrf.mxu1 }
  0xff   : > { %v4313_v18 = vadd.f32 %v3119_v16, %v3118_v14  ;;  %v4315_v19 = vadd.f32 %v3191_v17, %v3190_v15 }
 0x100   : > { %v3121_v20 = vpop.f32.mrf.mxu0  ;;  %v3193_v21 = vpop.f32.mrf.mxu1 }
 0x102   : > { %v3122_v26 = vpop.f32.mrf.mxu0  ;;  %v3194_v27 = vpop.f32.mrf.mxu1 }
 0x103   : > { %v4321_v28 = vadd.f32 %v3122_v26, %v3121_v20  ;;  %v4323_v29 = vadd.f32 %v3194_v27, %v3193_v21  ;;  %v3887_v20 = vld [vmem:[%s3996_s13 + $0x2e8] ss:$36 sps:$4 sm:$0xff]   ;;  %v1728_v27 = vadd.f32 %v4309_v12, %v4340_v46  ;;  %v1733_v12 = vadd.f32 %v4313_v18, %v4340_v46 }
 0x104   : > { %v3124_v30 = vpop.f32.mrf.mxu0  ;;  %v3196_v31 = vpop.f32.mrf.mxu1  ;;  %2157 = vmatmul.mubr.bf16.gmra.mxu0 %v3875_v22  ;;  %2254 = vmatmul.mubr.bf16.gmra.mxu1 %v3876_v23  ;;  %v3891_v21 = vld [vmem:[%s3996_s13 + $0x188] ss:$36 sps:$4 sm:$0xff]   ;;  %v3894_v23 = vld [vmem:[%s3996_s13 + $0x334] ss:$36 sps:$4 sm:$0xff]  }
 0x105   : > { %2261 = vmatprep.mubr.bf16.mxu1 %v3879_v24  ;;  %3578 = vmatprep.mubr.bf16.mxu0 %v3880_v25  ;;  %v3895_v24 = vld [vmem:[%s3996_s13 + $0x1d0] ss:$36 sps:$4 sm:$0xff]  }
 0x106   : > { %v3125_v32 = vpop.f32.mrf.mxu0  ;;  %v3197_v33 = vpop.f32.mrf.mxu1 }
 0x107   : > { %v4325_v34 = vadd.f32 %v3125_v32, %v3124_v30  ;;  %v4327_v35 = vadd.f32 %v3197_v33, %v3196_v31 }
 0x108   : > { %v3127_v36 = vpop.f32.mrf.mxu0  ;;  %v3199_v37 = vpop.f32.mrf.mxu1 }
 0x10a   : > { %v3128_v42 = vpop.f32.mrf.mxu0  ;;  %v3200_v43 = vpop.f32.mrf.mxu1 }
 0x10b   : > { %v4333_v44 = vadd.f32 %v3128_v42, %v3127_v36  ;;  %v4335_v45 = vadd.f32 %v3200_v43, %v3199_v37  ;;  %v3892_v42 = vld [vmem:[%s3996_s13 + $0x330] ss:$36 sps:$4 sm:$0xff]   ;;  %v3896_v43 = vld [vmem:[%s3996_s13 + $0x218] ss:$36 sps:$4 sm:$0xff]  }
 0x10c   : > { %v3130_v47 = vpop.f32.mrf.mxu0  ;;  %v3218_v48 = vpop.f32.mrf.mxu1  ;;  %2262 = vmatmul.mubr.bf16.gmra.mxu1 %v3877_v38  ;;  %3579 = vmatmul.mubr.bf16.vlgmr.msra.gmra.mxu0 %v3881_v39 }
 0x10d   : > { %2269 = vmatprep.mubr.bf16.mxu1 %v3884_v40  ;;  %3582 = vmatprep.mubr.bf16.mxu0 %v3885_v41 }
 0x10e   : > { %v3131_v49 = vpop.f32.mrf.mxu0  ;;  %v3219_v52 = vpop.f32.mrf.mxu1 }
 0x10f   : > { %v4344_v54 = vadd.f32 %v3131_v49, %v3130_v47  ;;  %v3220_v55 = vadd.f32 %v3219_v52, %v3218_v48  ;;  %v3899_v48 = vld [vmem:[%s3996_s13 + $0x37c] ss:$36 sps:$4 sm:$0xff]  }
 0x110   : > { %v3133_v56 = vpop.f32.mrf.mxu0  ;;  %v3221_v57 = vpop.f32.mrf.mxu1  ;;  %v3900_v49 = vld [vmem:[%s3996_s13 + $0x260] ss:$36 sps:$4 sm:$0xff]  }
 0x111   : > { %v4348_v62 = vadd.f32 %v3220_v55, %v1717_v53  ;;  %v1736_v55 = vadd.f32 %v4321_v28, %v4340_v46  ;;  %v1741_v28 = vadd.f32 %v4325_v34, %v4340_v46 }
 0x112   : > { %v3134_v1 = vpop.f32.mrf.mxu0  ;;  %v3222_v4 = vpop.f32.mrf.mxu1 }
 0x113   : > { %v4354_v6 = vadd.f32 %v3134_v1, %v3133_v56  ;;  %v3223_v50 = vadd.f32 %v3222_v4, %v3221_v57 }
 0x114   : > { %v3136_v7 = vpop.f32.mrf.mxu0  ;;  %v3224_v8 = vpop.f32.mrf.mxu1  ;;  %2270 = vmatmul.mubr.bf16.gmra.mxu1 %v3882_v58  ;;  %3583 = vmatmul.mubr.bf16.gmra.mxu0 %v3886_v59 }
 0x115   : > { %v4356_v9 = vadd.f32 %v3223_v50, %v1720_v5  ;;  %2277 = vmatprep.mubr.bf16.mxu1 %v3889_v63  ;;  %3586 = vmatprep.mubr.bf16.mxu0 %v3890_v0 }
 0x116   : > { %v3137_v10 = vpop.f32.mrf.mxu0  ;;  %v3225_v11 = vpop.f32.mrf.mxu1 }
 0x117   : > { %v4360_v14 = vadd.f32 %v3137_v10, %v3136_v7  ;;  %v3226_v15 = vadd.f32 %v3225_v11, %v3224_v8  ;;  %v3897_v7 = vld [vmem:[%s3996_s13 + $0x378] ss:$36 sps:$4 sm:$0xff]   ;;  %v3901_v8 = vld [vmem:[%s3996_s13 + $0x2a8] ss:$36 sps:$4 sm:$0xff]  }
 0x118   : > { %v3139_v16 = vpop.f32.mrf.mxu0  ;;  %v3227_v17 = vpop.f32.mrf.mxu1  ;;  %v3904_v11 = vld [vmem:[%s3996_s13 + $0x3c4] ss:$36 sps:$4 sm:$0xff]  }
 0x119   : > { %v4364_v22 = vadd.f32 %v3226_v15, %v1725_v60  ;;  %v3905_v60 = vld [vmem:[%s3996_s13 + $0x2f0] ss:$36 sps:$4 sm:$0xff]  }
 0x11a   : > { %v3140_v25 = vpop.f32.mrf.mxu0  ;;  %v3228_v26 = vpop.f32.mrf.mxu1 }
 0x11b   : > { %v4370_v30 = vadd.f32 %v3140_v25, %v3139_v16  ;;  %v3229_v2 = vadd.f32 %v3228_v26, %v3227_v17  ;;  %v1744_v17 = vadd.f32 %v4333_v44, %v4340_v46  ;;  %v1749_v44 = vadd.f32 %v4344_v54, %v4340_v46 }
 0x11c   : > { %v3142_v31 = vpop.f32.mrf.mxu0  ;;  %v3230_v32 = vpop.f32.mrf.mxu1  ;;  %2278 = vmatmul.mubr.bf16.gmra.mxu1 %v3887_v20  ;;  %3587 = vmatmul.mubr.bf16.gmra.mxu0 %v3891_v21 }
 0x11d   : > { %v4372_v33 = vadd.f32 %v3229_v2, %v1728_v27  ;;  %2285 = vmatprep.mubr.bf16.mxu1 %v3894_v23  ;;  %3590 = vmatprep.mubr.bf16.mxu0 %v3895_v24 }
 0x11e   : > { %v3143_v36 = vpop.f32.mrf.mxu0  ;;  %v3231_v37 = vpop.f32.mrf.mxu1 }
 0x11f   : > { %v4376_v38 = vadd.f32 %v3143_v36, %v3142_v31  ;;  %v3232_v39 = vadd.f32 %v3231_v37, %v3230_v32  ;;  %v3902_v36 = vld [vmem:[%s3996_s13 + $0x3c0] ss:$36 sps:$4 sm:$0xff]   ;;  %v3906_v37 = vld [vmem:[%s3996_s13 + $0x338] ss:$36 sps:$4 sm:$0xff]  }
 0x120   : > { %v3145_v40 = vpop.f32.mrf.mxu0  ;;  %v3233_v41 = vpop.f32.mrf.mxu1 }
 0x121   : > { %v4380_v47 = vadd.f32 %v3232_v39, %v1733_v12  ;;  %v3909_v39 = vld [vmem:[%s3996_s13 + $0x40c] ss:$36 sps:$4 sm:$0xff]  }
 0x122   : > { %v3146_v52 = vpop.f32.mrf.mxu0  ;;  %v3234_v53 = vpop.f32.mrf.mxu1 }
 0x123   : > { %v4386_v56 = vadd.f32 %v3146_v52, %v3145_v40  ;;  %v3235_v18 = vadd.f32 %v3234_v53, %v3233_v41  ;;  %v3910_v40 = vld [vmem:[%s3996_s13 + $0x380] ss:$36 sps:$4 sm:$0xff]  }
 0x124   : > { %v3148_v57 = vpop.f32.mrf.mxu0  ;;  %v3236_v58 = vpop.f32.mrf.mxu1  ;;  %2286 = vmatmul.mubr.bf16.gmra.mxu1 %v3892_v42  ;;  %3591 = vmatmul.mubr.bf16.gmra.mxu0 %v3896_v43  ;;  %v1752_v43 = vadd.f32 %v4354_v6, %v4340_v46  ;;  %v1757_v6 = vadd.f32 %v4360_v14, %v4340_v46 }
 0x125   : > { %v4388_v59 = vadd.f32 %v3235_v18, %v1736_v55  ;;  %2293 = vmatprep.mubr.bf16.mxu1 %v3899_v48  ;;  %3594 = vmatprep.mubr.bf16.mxu0 %v3900_v49 }
 0x126   : > { %v3149_v63 = vpop.f32.mrf.mxu0  ;;  %v3237_v0 = vpop.f32.mrf.mxu1 }
 0x127   : > { %v4392_v1 = vadd.f32 %v3149_v63, %v3148_v57  ;;  %v3238_v4 = vadd.f32 %v3237_v0, %v3236_v58 }
 0x128   : > { %v3151_v5 = vpop.f32.mrf.mxu0  ;;  %v3239_v50 = vpop.f32.mrf.mxu1 }
 0x129   : > { %v4396_v10 = vadd.f32 %v3238_v4, %v1741_v28  ;;  %v3907_v28 = vld [vmem:[%s3996_s13 + $0x408] ss:$36 sps:$4 sm:$0xff]  }
 0x12a   : > { %v3152_v15 = vpop.f32.mrf.mxu0  ;;  %v3240_v16 = vpop.f32.mrf.mxu1  ;;  %v3911_v4 = vld [vmem:[%s3996_s13 + $0x3c8] ss:$36 sps:$4 sm:$0xff]  }
 0x12b   : > { %v4402_v20 = vadd.f32 %v3152_v15, %v3151_v5  ;;  %v3241_v34 = vadd.f32 %v3240_v16, %v3239_v50  ;;  %v3914_v50 = vld [vmem:[%s3996_s13 + $0x454] ss:$36 sps:$4 sm:$0xff]  }
 0x12c   : > { %v3154_v21 = vpop.f32.mrf.mxu0  ;;  %v3242_v23 = vpop.f32.mrf.mxu1  ;;  %2294 = vmatmul.mubr.bf16.gmra.mxu1 %v3897_v7  ;;  %3595 = vmatmul.mubr.bf16.gmra.mxu0 %v3901_v8  ;;  %v3915_v7 = vld [vmem:[%s3996_s13 + $0x410] ss:$36 sps:$4 sm:$0xff]  }
 0x12d   : > { %v4404_v24 = vadd.f32 %v3241_v34, %v1744_v17  ;;  %2301 = vmatprep.mubr.bf16.mxu1 %v3904_v11  ;;  %3598 = vmatprep.mubr.bf16.mxu0 %v3905_v60  ;;  %v1760_v60 = vadd.f32 %v4370_v30, %v4340_v46 }
 0x12e   : > { %v3155_v25 = vpop.f32.mrf.mxu0  ;;  %v3243_v26 = vpop.f32.mrf.mxu1 }
 0x12f   : > { %v4408_v27 = vadd.f32 %v3155_v25, %v3154_v21  ;;  %v3244_v2 = vadd.f32 %v3243_v26, %v3242_v23  ;;  %v1765_v25 = vadd.f32 %v4376_v38, %v4340_v46 }
 0x130   : > { %v3157_v31 = vpop.f32.mrf.mxu0  ;;  %v3245_v32 = vpop.f32.mrf.mxu1 }
 0x131   : > { %v4412_v12 = vadd.f32 %v3244_v2, %v1749_v44 }
 0x132   : > { %v3158_v41 = vpop.f32.mrf.mxu0  ;;  %v3246_v42 = vpop.f32.mrf.mxu1 }
 0x133   : > { %v4418_v48 = vadd.f32 %v3158_v41, %v3157_v31  ;;  %v3247_v54 = vadd.f32 %v3246_v42, %v3245_v32  ;;  %v3912_v31 = vld [vmem:[%s3996_s13 + $0x450] ss:$36 sps:$4 sm:$0xff]   ;;  %v3916_v32 = vld [vmem:[%s3996_s13 + $0x458] ss:$36 sps:$4 sm:$0xff]   ;;  %s3086_s13 = sshll.u32 %s3958_s16, 8 }
 0x134   : > { %v3160_v49 = vpop.f32.mrf.mxu0  ;;  %v3248_v52 = vpop.f32.mrf.mxu1  ;;  %2302 = vmatmul.mubr.bf16.gmra.mxu1 %v3902_v36  ;;  %3599 = vmatmul.mubr.bf16.gmra.mxu0 %v3906_v37 }
 0x135   : > { %v4420_v53 = vadd.f32 %v3247_v54, %v1752_v43  ;;  %2309 = vmatprep.mubr.bf16.mxu1 %v3909_v39  ;;  %3602 = vmatprep.mubr.bf16.mxu0 %v3910_v40  ;;  %v1768_v40 = vadd.f32 %v4386_v56, %v4340_v46 }
 0x136   : > { %v3161_v55 = vpop.f32.mrf.mxu0  ;;  %v3249_v18 = vpop.f32.mrf.mxu1 }
 0x137   : > { %v4424_v57 = vadd.f32 %v3161_v55, %v3160_v49  ;;  %v3250_v58 = vadd.f32 %v3249_v18, %v3248_v52  ;;  %v1773_v55 = vadd.f32 %v4392_v1, %v4340_v46 }
 0x138   : > { %v3163_v63 = vpop.f32.mrf.mxu0  ;;  %v3251_v0 = vpop.f32.mrf.mxu1 }
 0x139   : > { %v4428_v5 = vadd.f32 %v3250_v58, %v1757_v6 }
 0x13a   : > { %v3164_v8 = vpop.f32.mrf.mxu0  ;;  %v3252_v11 = vpop.f32.mrf.mxu1 }
 0x13b   : > { %v4434_v15 = vadd.f32 %v3164_v8, %v3163_v63  ;;  %v3253_v14 = vadd.f32 %v3252_v11, %v3251_v0 }
 0x13c   : > { %v3166_v16 = vpop.f32.mrf.mxu0  ;;  %v3254_v17 = vpop.f32.mrf.mxu1  ;;  %2310 = vmatmul.mubr.bf16.gmra.mxu1 %v3907_v28  ;;  %3603 = vmatmul.mubr.bf16.gmra.mxu0 %v3911_v4  ;;  %v1776_v4 = vadd.f32 %v4402_v20, %v4340_v46 }
 0x13d   : > { %v4436_v34 = vadd.f32 %v3253_v14, %v1760_v60  ;;  %2317 = vmatprep.mubr.bf16.mxu1 %v3914_v50  ;;  %3606 = vmatprep.mubr.bf16.mxu0 %v3915_v7 }
 0x13e   : > { %v3167_v21 = vpop.f32.mrf.mxu0  ;;  %v3255_v23 = vpop.f32.mrf.mxu1 }
 0x13f   : > { %v4440_v26 = vadd.f32 %v3167_v21, %v3166_v16  ;;  %v3256_v30 = vadd.f32 %v3255_v23, %v3254_v17  ;;  %v1781_v16 = vadd.f32 %v4408_v27, %v4340_v46 }
 0x140   : > { %v3169_v44 = vpop.f32.mrf.mxu0  ;;  %v3257_v2 = vpop.f32.mrf.mxu1 }
 0x141   : > { %v4444_v36 = vadd.f32 %v3256_v30, %v1765_v25 }
 0x142   : > { %v3170_v37 = vpop.f32.mrf.mxu0  ;;  %v3258_v39 = vpop.f32.mrf.mxu1 }
 0x143   : > { %v4448_v41 = vadd.f32 %v3170_v37, %v3169_v44  ;;  %v3259_v42 = vadd.f32 %v3258_v39, %v3257_v2 }
 0x144   : > { %v3172_v43 = vpop.f32.mrf.mxu0  ;;  %v3260_v54 = vpop.f32.mrf.mxu1  ;;  %2318 = vmatmul.mubr.bf16.gmra.mxu1 %v3912_v31  ;;  %3607 = vmatmul.mubr.bf16.gmra.mxu0 %v3916_v32  ;;  %v1784_v31 = vadd.f32 %v4418_v48, %v4340_v46 }
 0x145   : > { %v4450_v38 = vadd.f32 %v3259_v42, %v1768_v40 }
 0x146   : > { %v3173_v49 = vpop.f32.mrf.mxu0  ;;  %v3261_v52 = vpop.f32.mrf.mxu1 }
 0x147   : > { %v4454_v18 = vadd.f32 %v3173_v49, %v3172_v43  ;;  %v3262_v6 = vadd.f32 %v3261_v52, %v3260_v54 }
 0x148   : > { %v3175_v58 = vpop.f32.mrf.mxu0  ;;  %v3263_v63 = vpop.f32.mrf.mxu1 }
 0x149   : > { %v4456_v56 = vadd.f32 %v3262_v6, %v1773_v55 }
 0x14a   : > { %v3176_v0 = vpop.f32.mrf.mxu0  ;;  %v3264_v28 = vpop.f32.mrf.mxu1 }
 0x14b   : > { %v4460_v50 = vadd.f32 %v3176_v0, %v3175_v58  ;;  %v3265_v7 = vadd.f32 %v3264_v28, %v3263_v63 }
 0x14c   : > { %v3266_v8 = vpop.f32.mrf.mxu1  ;;  %v3330_v11 = vpop.f32.mrf.mxu0 }
 0x14d   : > { %v4462_v60 = vadd.f32 %v3265_v7, %v1776_v4 }
 0x14e   : > { %v3267_v1 = vpop.f32.mrf.mxu1  ;;  %v3331_v14 = vpop.f32.mrf.mxu0 }
 0x14f   : > { %v3268_v17 = vadd.f32 %v3267_v1, %v3266_v8  ;;  %v3332_v21 = vadd.f32 %v3331_v14, %v3330_v11 }
 0x150   : > { %v3269_v23 = vpop.f32.mrf.mxu1  ;;  %v3333_v25 = vpop.f32.mrf.mxu0 }
 0x151   : > { %v4466_v30 = vadd.f32 %v3268_v17, %v1781_v16  ;;  %v4469_v20 = vadd.f32 %v3332_v21, %v4348_v62  ;;  %v1789_v62 = vadd.f32 %v4424_v57, %v4340_v46 }
 0x152   : > { %v3270_v44 = vpop.f32.mrf.mxu1  ;;  %v3334_v2 = vpop.f32.mrf.mxu0 }
 0x153   : > { %v3271_v32 = vadd.f32 %v3270_v44, %v3269_v23  ;;  %v3335_v37 = vadd.f32 %v3334_v2, %v3333_v25 }
 0x154   : > { %v3272_v39 = vpop.f32.mrf.mxu1  ;;  %v3336_v40 = vpop.f32.mrf.mxu0 }
 0x155   : > { %v4473_v42 = vadd.f32 %v3271_v32, %v1784_v31  ;;  %v4476_v27 = vadd.f32 %v3335_v37, %v4356_v9  ;;  %v1792_v9 = vadd.f32 %v4434_v15, %v4340_v46 }
 0x156   : > { %v3273_v43 = vpop.f32.mrf.mxu1  ;;  %v3337_v54 = vpop.f32.mrf.mxu0 }
 0x157   : > { %v3274_v49 = vadd.f32 %v3273_v43, %v3272_v39  ;;  %v3338_v52 = vadd.f32 %v3337_v54, %v3336_v40 }
 0x158   : > { %v3275_v55 = vpop.f32.mrf.mxu1  ;;  %v3339_v6 = vpop.f32.mrf.mxu0 }
 0x159   : > { %v4480_v58 = vadd.f32 %v3274_v49, %v1789_v62  ;;  %v4483_v48 = vadd.f32 %v3338_v52, %v4364_v22  ;;  %v1797_v22 = vadd.f32 %v4440_v26, %v4340_v46 }
 0x15a   : > { %v3276_v63 = vpop.f32.mrf.mxu1  ;;  %v3340_v0 = vpop.f32.mrf.mxu0 }
 0x15b   : > { %v3277_v28 = vadd.f32 %v3276_v63, %v3275_v55  ;;  %v3341_v4 = vadd.f32 %v3340_v0, %v3339_v6 }
 0x15c   : > { %v3278_v7 = vpop.f32.mrf.mxu1  ;;  %v3342_v8 = vpop.f32.mrf.mxu0 }
 0x15d   : > { %v4487_v11 = vadd.f32 %v3277_v28, %v1792_v9  ;;  %v4490_v57 = vadd.f32 %v3341_v4, %v4372_v33  ;;  %v1800_v33 = vadd.f32 %v4448_v41, %v4340_v46 }
 0x15e   : > { %v3279_v1 = vpop.f32.mrf.mxu1  ;;  %v3343_v14 = vpop.f32.mrf.mxu0 }
 0x15f   : > { %v3280_v16 = vadd.f32 %v3279_v1, %v3278_v7  ;;  %v3344_v17 = vadd.f32 %v3343_v14, %v3342_v8 }
 0x160   : > { %v3281_v21 = vpop.f32.mrf.mxu1  ;;  %v3345_v23 = vpop.f32.mrf.mxu0 }
 0x161   : > { %v4494_v25 = vadd.f32 %v3280_v16, %v1797_v22  ;;  %v4497_v15 = vadd.f32 %v3344_v17, %v4380_v47  ;;  %v1805_v47 = vadd.f32 %v4454_v18, %v4340_v46 }
 0x162   : > { %v3282_v44 = vpop.f32.mrf.mxu1  ;;  %v3346_v2 = vpop.f32.mrf.mxu0 }
 0x163   : > { %v3283_v31 = vadd.f32 %v3282_v44, %v3281_v21  ;;  %v3347_v32 = vadd.f32 %v3346_v2, %v3345_v23 }
 0x164   : > { %v3284_v37 = vpop.f32.mrf.mxu1  ;;  %v3348_v39 = vpop.f32.mrf.mxu0 }
 0x165   : > { %v4501_v40 = vadd.f32 %v3283_v31, %v1800_v33  ;;  %v4504_v26 = vadd.f32 %v3347_v32, %v4388_v59  ;;  %v1808_v59 = vadd.f32 %v4460_v50, %v4340_v46 }
 0x166   : > { %v3285_v43 = vpop.f32.mrf.mxu1  ;;  %v3349_v54 = vpop.f32.mrf.mxu0 }
 0x167   : > { %v3286_v62 = vadd.f32 %v3285_v43, %v3284_v37  ;;  %v3350_v49 = vadd.f32 %v3349_v54, %v3348_v39 }
 0x168   : > { %v3287_v52 = vpop.f32.mrf.mxu1  ;;  %v3351_v55 = vpop.f32.mrf.mxu0 }
 0x169   : > { %v4508_v6 = vadd.f32 %v3286_v62, %v1805_v47  ;;  %v4511_v41 = vadd.f32 %v3350_v49, %v4396_v10  ;;  %v1813_v10 = vadd.f32 %v4291_v51, %v4340_v46 }
 0x16a   : > { %v3288_v63 = vpop.f32.mrf.mxu1  ;;  %v3352_v0 = vpop.f32.mrf.mxu0 }
 0x16b   : > { %v3289_v9 = vadd.f32 %v3288_v63, %v3287_v52  ;;  %v3353_v28 = vadd.f32 %v3352_v0, %v3351_v55 }
 0x16c   : > { %v3290_v4 = vpop.f32.mrf.mxu1  ;;  %v3354_v7 = vpop.f32.mrf.mxu0 }
 0x16d   : > { %v4515_v8 = vadd.f32 %v3289_v9, %v1808_v59  ;;  %v4518_v18 = vadd.f32 %v3353_v28, %v4404_v24  ;;  %v1816_v24 = vadd.f32 %v4299_v61, %v4340_v46 }
 0x16e   : > { %v3291_v1 = vpop.f32.mrf.mxu1  ;;  %v3355_v14 = vpop.f32.mrf.mxu0 }
 0x16f   : > { %v3292_v22 = vadd.f32 %v3291_v1, %v3290_v4  ;;  %v3356_v16 = vadd.f32 %v3355_v14, %v3354_v7 }
 0x170   : > { %v3293_v17 = vpop.f32.mrf.mxu1  ;;  %v3357_v21 = vpop.f32.mrf.mxu0 }
 0x171   : > { %v4522_v23 = vadd.f32 %v3292_v22, %v1813_v10  ;;  %v4525_v50 = vadd.f32 %v3356_v16, %v4412_v12  ;;  %v1821_v12 = vadd.f32 %v4303_v3, %v4340_v46 }
 0x172   : > { %v3294_v44 = vpop.f32.mrf.mxu1  ;;  %v3358_v2 = vpop.f32.mrf.mxu0 }
 0x173   : > { %5121 = vst [vmem:[#allocation2_spill] sm:$0xff] %v4525_v50  ;;  %v3295_v33 = vadd.f32 %v3294_v44, %v3293_v17  ;;  %v3359_v31 = vadd.f32 %v3358_v2, %v3357_v21 }
 0x174   : > { %v3296_v32 = vpop.f32.mrf.mxu1  ;;  %v3360_v37 = vpop.f32.mrf.mxu0 }
 0x175   : > { %v4529_v39 = vadd.f32 %v3295_v33, %v1816_v24  ;;  %v4532_v51 = vadd.f32 %v3359_v31, %v4420_v53  ;;  %v1824_v53 = vadd.f32 %v4311_v13, %v4340_v46 }
 0x176   : > { %v3297_v43 = vpop.f32.mrf.mxu1  ;;  %v3361_v54 = vpop.f32.mrf.mxu0 }
 0x177   : > { %5122 = vst [vmem:[#allocation3_spill] sm:$0xff] %v4532_v51  ;;  %v3298_v47 = vadd.f32 %v3297_v43, %v3296_v32  ;;  %v3362_v62 = vadd.f32 %v3361_v54, %v3360_v37 }
 0x178   : > { %v3299_v49 = vpop.f32.mrf.mxu1  ;;  %v3363_v52 = vpop.f32.mrf.mxu0 }
 0x179   : > { %v4536_v55 = vadd.f32 %v3298_v47, %v1821_v12  ;;  %v4539_v61 = vadd.f32 %v3362_v62, %v4428_v5  ;;  %v1829_v5 = vadd.f32 %v4315_v19, %v4340_v46 }
 0x17a   : > { %v3300_v63 = vpop.f32.mrf.mxu1  ;;  %v3364_v0 = vpop.f32.mrf.mxu0 }
 0x17b   : > { %v3301_v59 = vadd.f32 %v3300_v63, %v3299_v49  ;;  %v3365_v9 = vadd.f32 %v3364_v0, %v3363_v52 }
 0x17c   : > { %v3302_v28 = vpop.f32.mrf.mxu1  ;;  %v3366_v4 = vpop.f32.mrf.mxu0 }
 0x17d   : > { %v4543_v7 = vadd.f32 %v3301_v59, %v1824_v53  ;;  %v4546_v3 = vadd.f32 %v3365_v9, %v4436_v34  ;;  %v1832_v34 = vadd.f32 %v4323_v29, %v4340_v46 }
 0x17e   : > { %v3303_v1 = vpop.f32.mrf.mxu1  ;;  %v3367_v14 = vpop.f32.mrf.mxu0 }
 0x17f   : > { %5123 = vst [vmem:[#allocation4_spill] sm:$0xff] %v4546_v3  ;;  %v3304_v10 = vadd.f32 %v3303_v1, %v3302_v28  ;;  %v3368_v22 = vadd.f32 %v3367_v14, %v3366_v4 }
 0x180   : > { %v3305_v16 = vpop.f32.mrf.mxu1  ;;  %v3369_v17 = vpop.f32.mrf.mxu0 }
 0x181   : > { %v4550_v21 = vadd.f32 %v3304_v10, %v1829_v5  ;;  %v4553_v13 = vadd.f32 %v3368_v22, %v4444_v36  ;;  %v1837_v36 = vadd.f32 %v4327_v35, %v4340_v46 }
 0x182   : > { %v3306_v44 = vpop.f32.mrf.mxu1  ;;  %v3370_v2 = vpop.f32.mrf.mxu0 }
 0x183   : > { %5124 = vst [vmem:[#allocation5_spill] sm:$0xff] %v4553_v13  ;;  %v3307_v24 = vadd.f32 %v3306_v44, %v3305_v16  ;;  %v3371_v33 = vadd.f32 %v3370_v2, %v3369_v17 }
 0x184   : > { %v3308_v31 = vpop.f32.mrf.mxu1  ;;  %v3372_v32 = vpop.f32.mrf.mxu0 }
 0x185   : > { %v4557_v37 = vadd.f32 %v3307_v24, %v1832_v34  ;;  %v4560_v19 = vadd.f32 %v3371_v33, %v4450_v38  ;;  %v1840_v38 = vadd.f32 %v4335_v45, %v4340_v46 }
 0x186   : > { %v3309_v43 = vpop.f32.mrf.mxu1  ;;  %v3373_v54 = vpop.f32.mrf.mxu0 }
 0x187   : > { %5125 = vst [vmem:[#allocation6_spill] sm:$0xff] %v4560_v19  ;;  %v3310_v12 = vadd.f32 %v3309_v43, %v3308_v31  ;;  %v3374_v47 = vadd.f32 %v3373_v54, %v3372_v32 }
 0x188   : > { %v3311_v62 = vpop.f32.mrf.mxu1  ;;  %v3375_v49 = vpop.f32.mrf.mxu0 }
 0x189   : > { %v4564_v52 = vadd.f32 %v3310_v12, %v1837_v36  ;;  %v4567_v29 = vadd.f32 %v3374_v47, %v4456_v56 }
 0x18a   : > { %v3312_v63 = vpop.f32.mrf.mxu1  ;;  %v3376_v0 = vpop.f32.mrf.mxu0 }
 0x18b   : > { %5126 = vst [vmem:[#allocation7_spill] sm:$0xff] %v4567_v29  ;;  %v3313_v53 = vadd.f32 %v3312_v63, %v3311_v62  ;;  %v3377_v59 = vadd.f32 %v3376_v0, %v3375_v49 }
 0x18c   : > { %v3378_v9 = vpop.f32.mrf.mxu0  ;;  %v4571_v28 = vpop.f32.mrf.mxu1 }
 0x18d   : > { %v4573_v35 = vadd.f32 %v3313_v53, %v1840_v38  ;;  %v4576_v4 = vadd.f32 %v3377_v59, %v4462_v60 }
 0x18e   : > { %v3379_v1 = vpop.f32.mrf.mxu0  ;;  %v4578_v14 = vpop.f32.mrf.mxu1 }
 0x18f   : > { %5127 = vst [vmem:[#allocation8_spill] sm:$0xff] %v4576_v4  ;;  %v3380_v56 = vadd.f32 %v3379_v1, %v3378_v9 }
 0x190   : > { %v3381_v5 = vpop.f32.mrf.mxu0  ;;  %v4580_v10 = vpop.f32.mrf.mxu1 }
 0x191   : > { %v4583_v22 = vadd.f32 %v3380_v56, %v4466_v30 }
 0x192   : > { %v3382_v45 = vpop.f32.mrf.mxu0  ;;  %v4585_v46 = vpop.f32.mrf.mxu1 }
 0x193   : > { %5128 = vst [vmem:[#allocation9_spill] sm:$0xff] %v4583_v22  ;;  %v3383_v16 = vadd.f32 %v3382_v45, %v3381_v5 }
 0x194   : > { %v3384_v17 = vpop.f32.mrf.mxu0  ;;  %v4587_v44 = vpop.f32.mrf.mxu1 }
 0x195   : > { %v4590_v60 = vadd.f32 %v3383_v16, %v4473_v42 }
 0x196   : > { %v3385_v2 = vpop.f32.mrf.mxu0  ;;  %v4592_v34 = vpop.f32.mrf.mxu1 }
 0x197   : > { %5129 = vst [vmem:[#allocation10_spill] sm:$0xff] %v4590_v60  ;;  %v3386_v24 = vadd.f32 %v3385_v2, %v3384_v17 }
 0x198   : > { %v3387_v33 = vpop.f32.mrf.mxu0  ;;  %v4594_v31 = vpop.f32.mrf.mxu1 }
 0x199   : > { %v4597_v30 = vadd.f32 %v3386_v24, %v4480_v58 }
 0x19a   : > { %v3388_v32 = vpop.f32.mrf.mxu0  ;;  %v4599_v43 = vpop.f32.mrf.mxu1 }
 0x19b   : > { %5130 = vst [vmem:[#allocation11_spill] sm:$0xff] %v4597_v30  ;;  %v3389_v54 = vadd.f32 %v3388_v32, %v3387_v33  ;;  %v2519_v33 = vlaneseq }
 0x19c   : > { %v3390_v36 = vpop.f32.mrf.mxu0  ;;  %v4601_v12 = vpop.f32.mrf.mxu1 }
 0x19d   : > { %v4604_v42 = vadd.f32 %v3389_v54, %v4487_v11 }
 0x19e   : > { %v3391_v47 = vpop.f32.mrf.mxu0  ;;  %v4606_v62 = vpop.f32.mrf.mxu1 }
 0x19f   : > { %5131 = vst [vmem:[#allocation12_spill] sm:$0xff] %v4604_v42  ;;  %v3392_v49 = vadd.f32 %v3391_v47, %v3390_v36 }
 0x1a0   : > { %v3393_v63 = vpop.f32.mrf.mxu0  ;;  %v4608_v0 = vpop.f32.mrf.mxu1 }
 0x1a1   : > { %v4611_v58 = vadd.f32 %v3392_v49, %v4494_v25 }
 0x1a2   : > { %v3394_v38 = vpop.f32.mrf.mxu0  ;;  %v4613_v53 = vpop.f32.mrf.mxu1 }
 0x1a3   : > { %5132 = vst [vmem:[#allocation13_spill] sm:$0xff] %v4611_v58  ;;  %v3395_v59 = vadd.f32 %v3394_v38, %v3393_v63  ;;  %v4636_v63 = vshrl.u32 %v2519_v33, 7 }
 0x1a4   : > { %v3396_v9 = vpop.f32.mrf.mxu0  ;;  %v4615_v1 = vpop.f32.mrf.mxu1 }
 0x1a5   : > { %v4618_v11 = vadd.f32 %v3395_v59, %v4501_v40  ;;  %v2526_v58 = vadd.s32 48, %v4636_v63  ;;  %v2528_v42 = vadd.s32 64, %v4636_v63  ;;  %v2531_v29 = vadd.s32 88, %v4636_v63 }
 0x1a6   : > { %v3397_v56 = vpop.f32.mrf.mxu0  ;;  %v4620_v5 = vpop.f32.mrf.mxu1 }
 0x1a7   : > { %5133 = vst [vmem:[#allocation14_spill] sm:$0xff] %v4618_v11  ;;  %v3398_v45 = vadd.f32 %v3397_v56, %v3396_v9 }
 0x1a8   : > { %v3399_v16 = vpop.f32.mrf.mxu0  ;;  %v4622_v17 = vpop.f32.mrf.mxu1 }
 0x1a9   : > { %v4625_v25 = vadd.f32 %v3398_v45, %v4508_v6 }
 0x1aa   : > { %v3400_v2 = vpop.f32.mrf.mxu0  ;;  %v4627_v24 = vpop.f32.mrf.mxu1 }
 0x1ab   : > { %5134 = vst [vmem:[#allocation15_spill] sm:$0xff] %v4625_v25  ;;  %v3401_v32 = vadd.f32 %v3400_v2, %v3399_v16  ;;  %v2522_v16 = vadd.s32 16, %v4636_v63  ;;  %v4647_v2 = vstv %s3086_s13 }
 0x1ac   : > { %v3402_v54 = vpop.f32.mrf.mxu0  ;;  %v4629_v36 = vpop.f32.mrf.mxu1  ;;  %v2560_v19 = vadd.s32 %v4647_v2, %v2526_v58  ;;  %v2534_v58 = vadd.s32 112, %v4636_v63 }
 0x1ad   : > { %v4632_v40 = vadd.f32 %v3401_v32, %v4515_v8  ;;  %v2523_v32 = vadd.s32 24, %v4636_v63 }
 0x1ae   : > { %v3403_v47 = vpop.f32.mrf.mxu0  ;;  %v4634_v49 = vpop.f32.mrf.mxu1  ;;  %vm2592_vm4 = vcmp.lt.s32.totalorder %v2560_v19, 384 }
 0x1af   : > { %5135 = vst [vmem:[#allocation16_spill] sm:$0xff] %v4632_v40  ;;  %v3404_v38 = vadd.f32 %v3403_v47, %v3402_v54 }
 0x1b0   : > { %v3405_v59 = vpop.f32.mrf.mxu0  ;;  %v4638_v6 = vpop.f32.mrf.mxu1 }
 0x1b1   : > { %v4642_v9 = vadd.f32 %v3404_v38, %v4522_v23  ;;  %v2556_v23 = vadd.s32 %v4647_v2, %v2522_v16  ;;  %v2554_v38 = vadd.s32 %v4647_v2, %v4636_v63 }
 0x1b2   : > { %v3406_v56 = vpop.f32.mrf.mxu0  ;;  %v4644_v45 = vpop.f32.mrf.mxu1 }
 0x1b3   : > { %5136 = vst [vmem:[#allocation17_spill] sm:$0xff] %v4642_v9  ;;  %v3407_v8 = vadd.f32 %v3406_v56, %v3405_v59  ;;  %v2557_v59 = vadd.s32 %v4647_v2, %v2523_v32  ;;  %v2521_v56 = vadd.s32 8, %v4636_v63  ;;  %vm2588_vm0 = vcmp.lt.s32.totalorder %v2556_v23, 384 }
 0x1b4   : > { %v3408_v33 = vpop.f32.mrf.mxu0  ;;  %v4650_v11 = vpop.f32.mrf.mxu1  ;;  %vm2586_vm1 = vcmp.lt.s32.totalorder %v2554_v38, 384  ;;  %v2565_v23 = vadd.s32 %v4647_v2, %v2531_v29  ;;  %v5145_v29 = vmov 0.0  }
 0x1b5   : > { %v4653_v54 = vadd.f32 %v3407_v8, %v4529_v39  ;;  %v2524_v39 = vadd.s32 32, %v4636_v63  ;;  %v2527_v8 = vadd.s32 56, %v4636_v63  ;;  %vm2589_vm2 = vcmp.lt.s32.totalorder %v2557_v59, 384 }
 0x1b6   : > { %v3409_v47 = vpop.f32.mrf.mxu0  ;;  %v4655_v40 = vpop.f32.mrf.mxu1  ;;  %v2555_v30 = vadd.s32 %v4647_v2, %v2521_v56  ;;  %v2529_v56 = vadd.s32 72, %v4636_v63  ;;  %vm2597_vm10 = vcmp.lt.s32.totalorder %v2565_v23, 384  ;;  %v2538_v23 = vadd.s32 144, %v4636_v63 }
 0x1b7   : > { %5137 = vst [vmem:[#allocation18_spill] sm:$0xff] %v4653_v54  ;;  %v3410_v9 = vadd.f32 %v3409_v47, %v3408_v33  ;;  %v2525_v54 = vadd.s32 40, %v4636_v63  ;;  %v2530_v33 = vadd.s32 80, %v4636_v63 }
 0x1b8   : > { %v3411_v25 = vpop.f32.mrf.mxu0  ;;  %v4663_v60 = vpop.f32.mrf.mxu1  ;;  %vm2587_vm3 = vcmp.lt.s32.totalorder %v2555_v30, 384 }
 0x1b9   : > { %v4669_v16 = vadd.f32 %v3410_v9, %v4536_v55  ;;  %v2558_v55 = vadd.s32 %v4647_v2, %v2524_v39  ;;  %v2561_v9 = vadd.s32 %v4647_v2, %v2527_v8 }
 0x1ba   : > { %v3412_v47 = vpop.f32.mrf.mxu0  ;;  %v4672_v32 = vpop.f32.mrf.mxu1 }
 0x1bb   : > { %5138 = vst [vmem:[#allocation19_spill] sm:$0xff] %v4669_v16  ;;  %v3413_v22 = vadd.f32 %v3412_v47, %v3411_v25  ;;  %v2559_v16 = vadd.s32 %v4647_v2, %v2525_v54  ;;  %v2564_v25 = vadd.s32 %v4647_v2, %v2530_v33  ;;  %vm2590_vm5 = vcmp.lt.s32.totalorder %v2558_v55, 384 }
 0x1bc   : > { %v3414_v4 = vpop.f32.mrf.mxu0  ;;  %v4677_v13 = vpop.f32.mrf.mxu1  ;;  %vm2593_vm6 = vcmp.lt.s32.totalorder %v2561_v9, 384 }
 0x1bd   : > { %5139 = vst [vmem:[#allocation20_spill] sm:$0xff] %v4677_v13  ;;  %v4684_v51 = vadd.f32 %v3413_v22, %v4543_v7  ;;  %v5119_v13 = vmov 0.0   ;;  %v2562_v7 = vadd.s32 %v4647_v2, %v2528_v42  ;;  %vm2591_vm7 = vcmp.lt.s32.totalorder %v2559_v16, 384 }
 0x1be   : > { %v3415_v47 = vpop.f32.mrf.mxu0  ;;  %v4689_v3 = vpop.f32.mrf.mxu1  ;;  %v4693_v39 = vsel %vm2588_vm0, 1.0, %v5119_v13  ;;  %v4697_v54 = vsel %vm2586_vm1, 1.0, %v5119_v13  ;;  %v4702_v8 = vsel %vm2589_vm2, 1.0, %v5119_v13  ;;  %vm2596_vm8 = vcmp.lt.s32.totalorder %v2564_v25, 384 }
 0x1bf   : > { %5140 = vst [vmem:[#allocation21_spill] sm:$0xff] %v4684_v51  ;;  %5141 = vst [vmem:[#allocation22_spill] sm:$0xff] %v4689_v3  ;;  %v3416_v22 = vadd.f32 %v3415_v47, %v3414_v4  ;;  %v2563_v4 = vadd.s32 %v4647_v2, %v2529_v56  ;;  %v2568_v42 = vadd.s32 %v4647_v2, %v2534_v58  ;;  %vm2594_vm9 = vcmp.lt.s32.totalorder %v2562_v7, 384 }
 0x1c0   : > { %v3417_v33 = vpop.f32.mrf.mxu0  ;;  %v4704_v51 = vpop.f32.mrf.mxu1  ;;  %v2532_v13 = vadd.s32 96, %v4636_v63  ;;  %v2533_v3 = vadd.s32 104, %v4636_v63  ;;  %v4723_v56 = vsel %vm2592_vm4, 1.0, %v5145_v29  ;;  %v4727_v58 = vsel %vm2590_vm5, 1.0, %v5145_v29 }
 0x1c1   : > { %5142 = vst [vmem:[#allocation23_spill] sm:$0xff] %v4704_v51  ;;  %v4708_v38 = vadd.f32 %v3416_v22, %v4550_v21  ;;  %v2535_v51 = vadd.s32 120, %v4636_v63  ;;  %v4719_v21 = vsel %vm2587_vm3, 1.0, %v5145_v29  ;;  %v4737_v30 = vsel %vm2591_vm7, 1.0, %v5145_v29 }
 0x1c2   : > { %v3418_v59 = vpop.f32.mrf.mxu0  ;;  %v4712_v47 = vpop.f32.mrf.mxu1  ;;  %v4741_v19 = vsel %vm2596_vm8, 1.0, %v5145_v29  ;;  %vm2595_vm11 = vcmp.lt.s32.totalorder %v2563_v4, 384  ;;  %vm2600_vm12 = vcmp.lt.s32.totalorder %v2568_v42, 384  ;;  %v2566_v16 = vadd.s32 %v4647_v2, %v2532_v13 }
 0x1c3   : > { %5143 = vst [vmem:[#allocation24_spill] sm:$0xff] %v4708_v38  ;;  %5144 = vst [vmem:[#allocation25_spill] sm:$0xff] %v4712_v47  ;;  %v3419_v50 = vadd.f32 %v3418_v59, %v3417_v33  ;;  %v4733_v38 = vsel %vm2593_vm6, 1.0, %v5145_v29  ;;  %v4747_v33 = vsel %vm2594_vm9, 1.0, %v5145_v29  ;;  %v2569_v47 = vadd.s32 %v4647_v2, %v2535_v51 }
 0x1c4   : > { %v3420_v7 = vpop.f32.mrf.mxu0  ;;  %v4729_v22 = vpop.f32.mrf.mxu1  ;;  %5146 = vst [vmem:[#allocation26_spill] sm:$0xff] %v4733_v38  ;;  %5147 = vst [vmem:[#allocation27_spill] sm:$0xff] %v4741_v19  ;;  %v2567_v25 = vadd.s32 %v4647_v2, %v2533_v3  ;;  %v2536_v19 = vadd.s32 128, %v4636_v63  ;;  %v2539_v13 = vadd.s32 152, %v4636_v63  ;;  %v2537_v51 = vadd.s32 136, %v4636_v63 }
 0x1c5   : > { %v4744_v55 = vadd.f32 %v3419_v50, %v4557_v37  ;;  %5149 = vst [vmem:[#allocation29_spill] sm:$0xff] %v4747_v33  ;;  %v3450_v50 = vadd.f32 %v4592_v34, %v4587_v44  ;;  %v2542_v3 = vadd.s32 176, %v4636_v63  ;;  %v3444_v44 = vadd.f32 %v4578_v14, %v4571_v28 }
 0x1c6   : > { %v3421_v9 = vpop.f32.mrf.mxu0  ;;  %v4749_v59 = vpop.f32.mrf.mxu1  ;;  %vm2598_vm13 = vcmp.lt.s32.totalorder %v2566_v16, 384  ;;  %vm2601_vm14 = vcmp.lt.s32.totalorder %v2569_v47, 384  ;;  %vm2599_vm15 = vcmp.lt.s32.totalorder %v2567_v25, 384  ;;  %v2572_v28 = vadd.s32 %v4647_v2, %v2538_v23 }
 0x1c7   : > { %5148 = vst [vmem:[#allocation28_spill] sm:$0xff] %v4744_v55  ;;  %5150 = vst [vmem:[#allocation30_spill] sm:$0xff] %v4749_v59  ;;  %v3422_v37 = vadd.f32 %v3421_v9, %v3420_v7  ;;  %v4758_v55 = vsel %vm2597_vm10, 1.0, %v5145_v29  ;;  %v2540_v59 = vadd.s32 160, %v4636_v63  ;;  %v4775_v7 = vsel %vm2595_vm11, 1.0, %v5145_v29 }
 0x1c8   : > { %5151 = vst [vmem:[#allocation31_spill] sm:$0xff] %v4758_v55  ;;  %v3423_v33 = vpop.f32.mrf.mxu0  ;;  %v4761_v38 = vpop.f32.mrf.mxu1  ;;  %v4779_v9 = vsel %vm2600_vm12, 1.0, %v5145_v29  ;;  %v2208_v4 = vadd.f32 %v3450_v50, %v4483_v48  ;;  %v2571_v23 = vadd.s32 %v4647_v2, %v2537_v51  ;;  %v3447_v48 = vadd.f32 %v4585_v46, %v4580_v10 }
 0x1c9   : > { %5152 = vst [vmem:[#allocation32_spill] sm:$0xff] %v4761_v38  ;;  %v4770_v34 = vadd.f32 %v3422_v37, %v4564_v52  ;;  %5154 = vst [vmem:[#allocation34_spill] sm:$0xff] %v4779_v9  ;;  %v3453_v52 = vadd.f32 %v4599_v43, %v4594_v31  ;;  %v2570_v37 = vadd.s32 %v4647_v2, %v2536_v19  ;;  %vm2604_vm0 = vcmp.lt.s32.totalorder %v2572_v28, 384 }
 0x1ca   : > { %v3424_v55 = vpop.f32.mrf.mxu0  ;;  %v4781_v38 = vpop.f32.mrf.mxu1  ;;  %v2573_v9 = vadd.s32 %v4647_v2, %v2539_v13  ;;  %v2576_v31 = vadd.s32 %v4647_v2, %v2542_v3  ;;  %v2574_v43 = vadd.s32 %v4647_v2, %v2540_v59  ;;  %v4811_v13 = vsel %vm2598_vm13, 1.0, %v5145_v29 }
 0x1cb   : > { %5153 = vst [vmem:[#allocation33_spill] sm:$0xff] %v4770_v34  ;;  %v3425_v14 = vadd.f32 %v3424_v55, %v3423_v33  ;;  %v2200_v33 = vadd.f32 %v3444_v44, %v4469_v20  ;;  %v4815_v59 = vsel %vm2601_vm14, 1.0, %v5145_v29  ;;  %v3462_v20 = vadd.f32 %v4620_v5, %v4615_v1 }
 0x1cc   : > { %v4788_v34 = vpop.f32.mrf.mxu1  ;;  %v3580_v42 = vpop.f32.mrf.mxu0  ;;  %v2211_v46 = vadd.f32 %v3453_v52, %v4490_v57  ;;  %vm2602_vm1 = vcmp.lt.s32.totalorder %v2570_v37, 384  ;;  %vm2605_vm2 = vcmp.lt.s32.totalorder %v2573_v9, 384  ;;  %vm2603_vm3 = vcmp.lt.s32.totalorder %v2571_v23, 384 }
 0x1cd   : > { %5155 = vst [vmem:[#allocation35_spill] sm:$0xff] %v4788_v34  ;;  %v4802_v19 = vadd.f32 %v3425_v14, %v4573_v35  ;;  %v4804_v55 = vadd.f32 %v3580_v42, %v2208_v4  ;;  %v4819_v35 = vsel %vm2599_vm15, 1.0, %v5145_v29  ;;  %vm2608_vm4 = vcmp.lt.s32.totalorder %v2576_v31, 384 }
 0x1ce   : > { %v4807_v50 = vpop.f32.mrf.mxu1  ;;  %v2360_v34 = vpop.f32.mrf.mxu0  ;;  %v2543_v47 = vadd.s32 184, %v4636_v63  ;;  %v2203_v3 = vadd.f32 %v3447_v48, %v4476_v27  ;;  %vm2606_vm5 = vcmp.lt.s32.totalorder %v2574_v43, 384  ;;  %v2541_v1 = vadd.s32 168, %v4636_v63 }
 0x1cf   : > { %2489 = vst [vmem:[%s4793_s11 + $0x10] sm:$0xff] %v4804_v55  ;;  %v2361_v10 = vadd.f32 %v2360_v34, %v2200_v33  ;;  %v3456_v57 = vadd.f32 %v4606_v62, %v4601_v12  ;;  %v3465_v5 = vadd.f32 %v4627_v24, %v4622_v17  ;;  %v4840_v52 = vsel %vm2604_vm0, 1.0, %v5145_v29 }
 0x1d0   : > { %v4826_v16 = vpop.f32.mrf.mxu1  ;;  %v3581_v51 = vpop.f32.mrf.mxu0  ;;  %v4844_v27 = vsel %vm2602_vm1, 1.0, %v5145_v29  ;;  %v2224_v12 = vadd.f32 %v3462_v20, %v4511_v41  ;;  %v4851_v62 = vsel %vm2605_vm2, 1.0, %v5145_v29  ;;  %v4857_v28 = vsel %vm2603_vm3, 1.0, %v5145_v29 }
 0x1d1   : > { %2487 = vst [vmem:[%s4793_s11] sm:$0xff] %v2361_v10  ;;  %v2372_v25 = vadd.f32 %v3581_v51, %v2211_v46  ;;  %v2650_v14 = vmul.f32 %v4697_v54, %v2361_v10  ;;  %v4861_v37 = vsel %vm2608_vm4, 1.0, %v5145_v29  ;;  %v4865_v54 = vsel %vm2606_vm5, 1.0, %v5145_v29 }
 0x1d2   : > { %v4836_v44 = vpop.f32.mrf.mxu1  ;;  %v2363_v34 = vpop.f32.mrf.mxu0  ;;  %v2577_v41 = vadd.s32 %v4647_v2, %v2543_v47  ;;  %v2652_v9 = vmul.f32 %v4693_v39, %v4804_v55  ;;  %v2575_v48 = vadd.s32 %v4647_v2, %v2541_v1  ;;  %v3459_v31 = vadd.f32 %v4613_v53, %v4608_v0 }
 0x1d3   : > { %2490 = vst [vmem:[%s4793_s11 + $0x18] sm:$0xff] %v2372_v25  ;;  %v2364_v4 = vadd.f32 %v2363_v34, %v2203_v3  ;;  %v3474_v43 = vadd.f32 %v4655_v40, %v4650_v11  ;;  %v2216_v20 = vadd.f32 %v3456_v57, %v4497_v15  ;;  %v2227_v39 = vadd.f32 %v3465_v5, %v4518_v18 }
 0x1d4   : > { %v4853_v17 = vpop.f32.mrf.mxu1  ;;  %v3584_v24 = vpop.f32.mrf.mxu0  ;;  %v2719_v51 = vmul.f32 %v2650_v14, %v2361_v10  ;;  %v3468_v0 = vadd.f32 %v4634_v49, %v4629_v36  ;;  %vm2609_vm6 = vcmp.lt.s32.totalorder %v2577_v41, 384  ;;  %v2546_v15 = vadd.s32 208, %v4636_v63 }
 0x1d5   : > { %2488 = vst [vmem:[%s4793_s11 + $0x8] sm:$0xff] %v2364_v4  ;;  %v2651_v42 = vmul.f32 %v4719_v21, %v2364_v4  ;;  %v4872_v23 = vadd.f32 %v3584_v24, %v2224_v12  ;;  %v2653_v21 = vmul.f32 %v4702_v8, %v2372_v25  ;;  %v2721_v18 = vmul.f32 %v2652_v9, %v4804_v55 }
 0x1d6   : > { %v4879_v33 = vpop.f32.mrf.mxu1  ;;  %v2376_v46 = vpop.f32.mrf.mxu0  ;;  %v2219_v36 = vadd.f32 %v3459_v31, %v4504_v26  ;;  %v2240_v34 = vadd.f32 %v3474_v43, %v4539_v61  ;;  %vm2607_vm7 = vcmp.lt.s32.totalorder %v2575_v48, 384  ;;  %v3471_v24 = vadd.f32 %v4644_v45, %v4638_v6  ;;  %v5156_v26 = vld [vmem:[#allocation2_spill] sm:$0xff] }
 0x1d7   : > { %v2682_v47 = vadd.f32 %v2651_v42, %v2650_v14  ;;  %v2720_v3 = vmul.f32 %v2651_v42, %v2364_v4  ;;  %2493 = vst [vmem:[%s4793_s11 + $0x30] sm:$0xff] %v4872_v23  ;;  %v2377_v53 = vadd.f32 %v2376_v46, %v2216_v20  ;;  %v3477_v14 = vadd.f32 %v4672_v32, %v4663_v60 }
 0x1d8   : > { %v4888_v11 = vpop.f32.mrf.mxu1  ;;  %v3585_v40 = vpop.f32.mrf.mxu0  ;;  %v2722_v4 = vmul.f32 %v2653_v21, %v2372_v25  ;;  %v2232_v31 = vadd.f32 %v3468_v0, %v5156_v26  ;;  %v4907_v61 = vadd.s32 %v4647_v2, %v2546_v15  ;;  %v2656_v20 = vmul.f32 %v4723_v56, %v4872_v23  ;;  %v5158_v0 = vld [vmem:[#allocation4_spill] sm:$0xff] }
 0x1d9   : > { %v2683_v10 = vadd.f32 %v2682_v47, %v2652_v9  ;;  %v2751_v1 = vadd.f32 %v2720_v3, %v2719_v51  ;;  %v2388_v8 = vadd.f32 %v3585_v40, %v2227_v39  ;;  %2491 = vst [vmem:[%s4793_s11 + $0x20] sm:$0xff] %v2377_v53  ;;  %v2654_v57 = vmul.f32 %v4727_v58, %v2377_v53 }
 0x1da   : > { %v4894_v5 = vpop.f32.mrf.mxu1  ;;  %v2379_v49 = vpop.f32.mrf.mxu0  ;;  %v4919_v39 = vsel %vm2609_vm6, 1.0, %v5145_v29  ;;  %v2544_v51 = vadd.s32 192, %v4636_v63  ;;  %vm2612_vm8 = vcmp.lt.s32.totalorder %v4907_v61, 384  ;;  %vm2788_vm0 = vcmask 1040384  }
 0x1db   : > { %v2752_v55 = vadd.f32 %v2751_v1, %v2721_v18  ;;  %v2684_v12 = vadd.f32 %v2683_v10, %v2653_v21  ;;  %2494 = vst [vmem:[%s4793_s11 + $0x38] sm:$0xff] %v2388_v8  ;;  %v2380_v58 = vadd.f32 %v2379_v49, %v2219_v36  ;;  %v2723_v60 = vmul.f32 %v2654_v57, %v2377_v53  ;;  %v5157_v21 = vld [vmem:[#allocation30_spill] sm:$0xff] }
 0x1dc   : > { %v4903_v9 = vpop.f32.mrf.mxu1  ;;  %v3588_v42 = vpop.f32.mrf.mxu0  ;;  %v3486_v47 = vadd.f32 %v5157_v21, %v4729_v22  ;;  %v2243_v53 = vadd.f32 %v3477_v14, %v5158_v0  ;;  %v4932_v1 = vsel %vm2607_vm7, 1.0, %v5145_v29  ;;  %v5161_v22 = vld [vmem:[#allocation22_spill] sm:$0xff]  ;;  %v2725_v14 = vmul.f32 %v2656_v20, %v4872_v23 }
 0x1dd   : > { %v2685_v43 = vadd.f32 %v2684_v12, %v2654_v57  ;;  %v2753_v32 = vadd.f32 %v2752_v55, %v2722_v4  ;;  %v4909_v25 = vadd.f32 %v3588_v42, %v2240_v34  ;;  %2492 = vst [vmem:[%s4793_s11 + $0x28] sm:$0xff] %v2380_v58  ;;  %v2655_v6 = vmul.f32 %v4737_v30, %v2380_v58  ;;  %v5159_v30 = vld [vmem:[#allocation26_spill] sm:$0xff]  ;;  %v5160_v57 = vld [vmem:[#allocation20_spill] sm:$0xff]  ;;  %v5162_v34 = vld [vmem:[#allocation3_spill] sm:$0xff] }
 0x1de   : > { %v4915_v45 = vpop.f32.mrf.mxu1  ;;  %v2392_v46 = vpop.f32.mrf.mxu0  ;;  %v2657_v40 = vmul.f32 %v5159_v30, %v2388_v8  ;;  %v3480_v36 = vadd.f32 %v5161_v22, %v5160_v57  ;;  %v2235_v4 = vadd.f32 %v3471_v24, %v5162_v34  ;;  %v4948_v24 = vadd.s32 %v4647_v2, %v2544_v51  ;;  %v5167_v30 = vld [vmem:[#allocation25_spill] sm:$0xff] }
 0x1df   : > { %v2754_v3 = vadd.f32 %v2753_v32, %v2723_v60  ;;  %2497 = vst [vmem:[%s4793_s11 + $0x50] sm:$0xff] %v4909_v25  ;;  %v2393_v56 = vadd.f32 %v2392_v46, %v2232_v31  ;;  %v2686_v15 = vadd.f32 %v2685_v43, %v2655_v6  ;;  %v2724_v18 = vmul.f32 %v2655_v6, %v2380_v58  ;;  %v5163_v58 = vld [vmem:[#allocation29_spill] sm:$0xff]  ;;  %v5164_v31 = vld [vmem:[#allocation32_spill] sm:$0xff]  ;;  %v5165_v32 = vld [vmem:[#allocation7_spill] sm:$0xff] }
 0x1e0   : > { %v4928_v10 = vpop.f32.mrf.mxu1  ;;  %v3589_v41 = vpop.f32.mrf.mxu0  ;;  %v3489_v43 = vadd.f32 %v4781_v38, %v5164_v31  ;;  %v2256_v6 = vadd.f32 %v3486_v47, %v5165_v32  ;;  %v2726_v46 = vmul.f32 %v2657_v40, %v2388_v8  ;;  %v4951_v0 = vadd.s32 216, %v4636_v63  ;;  %v5168_v47 = vld [vmem:[#allocation5_spill] sm:$0xff]  ;;  %v5169_v8 = vld [vmem:[#allocation27_spill] sm:$0xff] }
 0x1e1   : > { %2495 = vst [vmem:[%s4793_s11 + $0x40] sm:$0xff] %v2393_v56  ;;  %v2404_v49 = vadd.f32 %v3589_v41, %v2243_v53  ;;  %v2687_v55 = vadd.f32 %v2686_v15, %v2656_v20  ;;  %v2755_v12 = vadd.f32 %v2754_v3, %v2724_v18  ;;  %v2658_v42 = vmul.f32 %v5163_v58, %v2393_v56  ;;  %v5166_v53 = vld [vmem:[#allocation23_spill] sm:$0xff] }
 0x1e2   : > { %v4941_v26 = vpop.f32.mrf.mxu1  ;;  %v2395_v48 = vpop.f32.mrf.mxu0  ;;  %v3483_v15 = vadd.f32 %v5167_v30, %v5166_v53  ;;  %v2248_v51 = vadd.f32 %v3480_v36, %v5168_v47  ;;  %v2660_v41 = vmul.f32 %v5169_v8, %v4909_v25  ;;  %v5171_v36 = vld [vmem:[#allocation31_spill] sm:$0xff]  ;;  %vm2610_vm9 = vcmp.lt.s32.totalorder %v4948_v24, 384 }
 0x1e3   : > { %2498 = vst [vmem:[%s4793_s11 + $0x58] sm:$0xff] %v2404_v49  ;;  %v2396_v60 = vadd.f32 %v2395_v48, %v2235_v4  ;;  %v2756_v23 = vadd.f32 %v2755_v12, %v2725_v14  ;;  %v2688_v20 = vadd.f32 %v2687_v55, %v2657_v40  ;;  %v2727_v57 = vmul.f32 %v2658_v42, %v2393_v56  ;;  %v5170_v12 = vld [vmem:[#allocation8_spill] sm:$0xff] }
 0x1e4   : > { %v3508_v21 = vpop.f32.mrf.mxu1  ;;  %v3592_v3 = vpop.f32.mrf.mxu0  ;;  %v3498_v14 = vadd.f32 %v4879_v33, %v4853_v17  ;;  %v2259_v58 = vadd.f32 %v3489_v43, %v5170_v12  ;;  %v2661_v31 = vmul.f32 %v5171_v36, %v2404_v49  ;;  %v5173_v33 = vld [vmem:[#allocation6_spill] sm:$0xff]  ;;  %v4976_v43 = vsel %vm2612_vm8, 1.0, %v5145_v29 }
 0x1e5   : > { %2496 = vst [vmem:[%s4793_s11 + $0x48] sm:$0xff] %v2396_v60  ;;  %v2659_v38 = vmul.f32 %v4775_v7, %v2396_v60  ;;  %v4957_v18 = vadd.f32 %v3592_v3, %v2256_v6  ;;  %v2689_v40 = vadd.f32 %v2688_v20, %v2658_v42  ;;  %v2757_v22 = vadd.f32 %v2756_v23, %v2726_v46  ;;  %v5172_v46 = vld [vmem:[#allocation35_spill] sm:$0xff] }
 0x1e6   : > { %v3509_v34 = vpop.f32.mrf.mxu1  ;;  %v2408_v4 = vpop.f32.mrf.mxu0  ;;  %v2545_v42 = vadd.s32 200, %v4636_v63  ;;  %v3492_v23 = vadd.f32 %v4807_v50, %v5172_v46  ;;  %v2729_v20 = vmul.f32 %v2660_v41, %v4909_v25  ;;  %v3501_v50 = vadd.f32 %v4894_v5, %v4888_v11 }
 0x1e7   : > { %v2728_v55 = vmul.f32 %v2659_v38, %v2396_v60  ;;  %2501 = vst [vmem:[%s4793_s11 + $0x70] sm:$0xff] %v4957_v18  ;;  %v2409_v7 = vadd.f32 %v2408_v4, %v2248_v51  ;;  %v2758_v48 = vadd.f32 %v2757_v22, %v2727_v57  ;;  %v2690_v32 = vadd.f32 %v2689_v40, %v2659_v38  ;;  %v5175_v4 = vld [vmem:[#allocation9_spill] sm:$0xff] }
 0x1e8   : > { %v3511_v6 = vpop.f32.mrf.mxu1  ;;  %v3593_v56 = vpop.f32.mrf.mxu0  ;;  %v2251_v60 = vadd.f32 %v3483_v15, %v5173_v33  ;;  %v5174_v15 = vld [vmem:[#allocation11_spill] sm:$0xff]  ;;  %v2730_v61 = vmul.f32 %v2661_v31, %v2404_v49  ;;  %v3495_v22 = vadd.f32 %v4836_v44, %v4826_v16  ;;  %v5176_v49 = vld [vmem:[#allocation34_spill] sm:$0xff]  ;;  %v5177_v44 = vld [vmem:[#allocation12_spill] sm:$0xff] }
 0x1e9   : > { %2499 = vst [vmem:[%s4793_s11 + $0x60] sm:$0xff] %v2409_v7  ;;  %v2420_v17 = vadd.f32 %v3593_v56, %v2259_v58  ;;  %v2691_v3 = vadd.f32 %v2690_v32, %v2660_v41  ;;  %v2759_v53 = vadd.f32 %v2758_v48, %v2728_v55  ;;  %v2662_v30 = vmul.f32 %v4811_v13, %v2409_v7 }
 0x1ea   : > { %v3512_v38 = vpop.f32.mrf.mxu1  ;;  %v2411_v47 = vpop.f32.mrf.mxu0  ;;  %v2272_v8 = vadd.f32 %v3498_v14, %v5174_v15  ;;  %v4988_v13 = vadd.s32 %v4647_v2, %v2545_v42  ;;  %v2264_v14 = vadd.f32 %v3492_v23, %v5175_v4  ;;  %v2664_v55 = vmul.f32 %v5176_v49, %v4957_v18 }
 0x1eb   : > { %2502 = vst [vmem:[%s4793_s11 + $0x78] sm:$0xff] %v2420_v17  ;;  %v2412_v51 = vadd.f32 %v2411_v47, %v2251_v60  ;;  %v2760_v40 = vadd.f32 %v2759_v53, %v2729_v20  ;;  %v2692_v57 = vadd.f32 %v2691_v3, %v2661_v31  ;;  %v2731_v58 = vmul.f32 %v2662_v30, %v2409_v7  ;;  %v5178_v20 = vld [vmem:[#allocation10_spill] sm:$0xff] }
 0x1ec   : > { %v4985_v25 = vpop.f32.mrf.mxu1  ;;  %v3596_v41 = vpop.f32.mrf.mxu0  ;;  %v3510_v32 = vadd.f32 %v3509_v34, %v3508_v21  ;;  %v2665_v46 = vmul.f32 %v4815_v59, %v2420_v17  ;;  %v5007_v7 = vadd.s32 %v4647_v2, %v4951_v0  ;;  %v3504_v21 = vadd.f32 %v4915_v45, %v4903_v9  ;;  %v5179_v45 = vld [vmem:[#allocation15_spill] sm:$0xff] }
 0x1ed   : > { %2500 = vst [vmem:[%s4793_s11 + $0x68] sm:$0xff] %v2412_v51  ;;  %v2663_v11 = vmul.f32 %v4819_v35, %v2412_v51  ;;  %v4994_v5 = vadd.f32 %v3596_v41, %v2272_v8  ;;  %v2693_v12 = vadd.f32 %v2692_v57, %v2662_v30  ;;  %v2761_v48 = vadd.f32 %v2760_v40, %v2730_v61 }
 0x1ee   : > { %v3515_v36 = vpop.f32.mrf.mxu1  ;;  %v2424_v31 = vpop.f32.mrf.mxu0  ;;  %v2275_v35 = vadd.f32 %v3501_v50, %v5177_v44  ;;  %v2267_v3 = vadd.f32 %v3495_v22, %v5178_v20  ;;  %v5016_v59 = vsel %vm2610_vm9, 1.0, %v5145_v29  ;;  %v2733_v53 = vmul.f32 %v2664_v55, %v4957_v18  ;;  %v5180_v22 = vld [vmem:[#allocation13_spill] sm:$0xff] }
 0x1ef   : > { %v2732_v56 = vmul.f32 %v2663_v11, %v2412_v51  ;;  %2505 = vst [vmem:[%s4793_s11 + $0x90] sm:$0xff] %v4994_v5  ;;  %v2425_v16 = vadd.f32 %v2424_v31, %v2264_v14  ;;  %v2762_v42 = vadd.f32 %v2761_v48, %v2731_v58  ;;  %v2694_v23 = vadd.f32 %v2693_v12, %v2663_v11  ;;  %v5181_v48 = vld [vmem:[#allocation16_spill] sm:$0xff] }
 0x1f0   : > { %v5003_v33 = vpop.f32.mrf.mxu1  ;;  %v3597_v60 = vpop.f32.mrf.mxu0  ;;  %v3513_v15 = vadd.f32 %v3512_v38, %v3511_v6  ;;  %v2288_v8 = vadd.f32 %v3510_v32, %v5179_v45  ;;  %vm2611_vm10 = vcmp.lt.s32.totalorder %v4988_v13, 384  ;;  %v2734_v61 = vmul.f32 %v2665_v46, %v2420_v17 }
 0x1f1   : > { %2503 = vst [vmem:[%s4793_s11 + $0x80] sm:$0xff] %v2425_v16  ;;  %v2436_v34 = vadd.f32 %v3597_v60, %v2275_v35  ;;  %v2695_v30 = vadd.f32 %v2694_v23, %v2664_v55  ;;  %v2763_v47 = vadd.f32 %v2762_v42, %v2732_v56  ;;  %v2666_v0 = vmul.f32 %v4844_v27, %v2425_v16  ;;  %v5182_v42 = vld [vmem:[#allocation14_spill] sm:$0xff] }
 0x1f2   : > { %v3518_v50 = vpop.f32.mrf.mxu1  ;;  %v2427_v51 = vpop.f32.mrf.mxu0  ;;  %v2548_v41 = vadd.s32 224, %v4636_v63  ;;  %v3507_v27 = vadd.f32 %v4941_v26, %v4928_v10  ;;  %v2280_v11 = vadd.f32 %v3504_v21, %v5180_v22  ;;  %v2668_v17 = vmul.f32 %v4840_v52, %v4994_v5 }
 0x1f3   : > { %2506 = vst [vmem:[%s4793_s11 + $0x98] sm:$0xff] %v2436_v34  ;;  %v2428_v9 = vadd.f32 %v2427_v51, %v2267_v3  ;;  %v2764_v24 = vadd.f32 %v2763_v47, %v2733_v53  ;;  %v2696_v40 = vadd.f32 %v2695_v30, %v2665_v46  ;;  %v2735_v14 = vmul.f32 %v2666_v0, %v2425_v16  ;;  %v5183_v30 = vld [vmem:[#allocation19_spill] sm:$0xff] }
 0x1f4   : > { %v3520_v57 = vpop.f32.mrf.mxu1  ;;  %v3600_v18 = vpop.f32.mrf.mxu0  ;;  %v2669_v32 = vmul.f32 %v4851_v62, %v2436_v34  ;;  %vm2613_vm11 = vcmp.lt.s32.totalorder %v5007_v7, 384  ;;  %v3516_v16 = vadd.f32 %v3515_v36, %v4985_v25  ;;  %v2283_v46 = vadd.f32 %v3507_v27, %v5182_v42 }
 0x1f5   : > { %2504 = vst [vmem:[%s4793_s11 + $0x88] sm:$0xff] %v2428_v9  ;;  %v2667_v6 = vmul.f32 %v4857_v28, %v2428_v9  ;;  %v5028_v38 = vadd.f32 %v3600_v18, %v2288_v8  ;;  %v2697_v4 = vadd.f32 %v2696_v40, %v2666_v0  ;;  %v2765_v49 = vadd.f32 %v2764_v24, %v2734_v61  ;;  %v5184_v24 = vld [vmem:[#allocation17_spill] sm:$0xff] }
 0x1f6   : > { %v3521_v55 = vpop.f32.mrf.mxu1  ;;  %v2440_v12 = vpop.f32.mrf.mxu0  ;;  %v2291_v28 = vadd.f32 %v3513_v15, %v5181_v48  ;;  %v5044_v23 = vsel %vm2611_vm10, 1.0, %v5145_v29  ;;  %v2737_v60 = vmul.f32 %v2668_v17, %v4994_v5  ;;  %v5051_v0 = vadd.s32 %v4647_v2, %v2548_v41 }
 0x1f7   : > { %v2736_v58 = vmul.f32 %v2667_v6, %v2428_v9  ;;  %2509 = vst [vmem:[%s4793_s11 + $0xb0] sm:$0xff] %v5028_v38  ;;  %v3522_v10 = vadd.f32 %v3521_v55, %v3520_v57  ;;  %v2441_v26 = vadd.f32 %v2440_v12, %v2280_v11  ;;  %v2766_v31 = vadd.f32 %v2765_v49, %v2735_v14 }
 0x1f8   : > { %v2698_v56 = vadd.f32 %v2697_v4, %v2667_v6  ;;  %v3523_v44 = vpop.f32.mrf.mxu1  ;;  %v3601_v52 = vpop.f32.mrf.mxu0  ;;  %v2738_v13 = vmul.f32 %v2669_v32, %v2436_v34  ;;  %v2549_v45 = vadd.s32 232, %v4636_v63  ;;  %v2296_v40 = vadd.f32 %v3516_v16, %v5184_v24  ;;  %v5189_v24 = vld [vmem:[#allocation28_spill] sm:$0xff] }
 0x1f9   : > { %2507 = vst [vmem:[%s4793_s11 + $0xa0] sm:$0xff] %v2441_v26  ;;  %v2452_v35 = vadd.f32 %v3601_v52, %v2291_v28  ;;  %v2767_v21 = vadd.f32 %v2766_v31, %v2736_v58  ;;  %v2670_v20 = vmul.f32 %v4865_v54, %v2441_v26  ;;  %v2304_v47 = vadd.f32 %v3522_v10, %v5183_v30  ;;  %v5186_v10 = vld [vmem:[#allocation18_spill] sm:$0xff] }
 0x1fa   : > { %v2699_v62 = vadd.f32 %v2698_v56, %v2668_v17  ;;  %v3524_v3 = vpop.f32.mrf.mxu1  ;;  %v2443_v53 = vpop.f32.mrf.mxu0  ;;  %v3519_v54 = vadd.f32 %v3518_v50, %v5003_v33  ;;  %v2672_v57 = vmul.f32 %v4861_v37, %v5028_v38  ;;  %v5185_v50 = vld [vmem:[#allocation21_spill] sm:$0xff]  ;;  %v2583_v55 = vadd.s32 %v4647_v2, %v2549_v45 }
 0x1fb   : > { %2510 = vst [vmem:[%s4793_s11 + $0xb8] sm:$0xff] %v2452_v35  ;;  %v3525_v25 = vadd.f32 %v3524_v3, %v3523_v44  ;;  %v2444_v36 = vadd.f32 %v2443_v53, %v2283_v46  ;;  %v2768_v51 = vadd.f32 %v2767_v21, %v2737_v60  ;;  %v2739_v18 = vmul.f32 %v2670_v20, %v2441_v26 }
 0x1fc   : > { %v2700_v15 = vadd.f32 %v2699_v62, %v2669_v32  ;;  %v3526_v5 = vpop.f32.mrf.mxu1  ;;  %v3604_v9 = vpop.f32.mrf.mxu0  ;;  %v2673_v4 = vmul.f32 %v4919_v39, %v2452_v35  ;;  %v2299_v26 = vadd.f32 %v3519_v54, %v5186_v10  ;;  %v2551_v48 = vadd.s32 248, %v4636_v63 }
 0x1fd   : > { %2508 = vst [vmem:[%s4793_s11 + $0xa8] sm:$0xff] %v2444_v36  ;;  %v2671_v8 = vmul.f32 %v4932_v1, %v2444_v36  ;;  %v5057_v61 = vadd.f32 %v3604_v9, %v2304_v47  ;;  %v2769_v41 = vadd.f32 %v2768_v51, %v2738_v13  ;;  %v2307_v11 = vadd.f32 %v3525_v25, %v5185_v50 }
 0x1fe   : > { %v2701_v34 = vadd.f32 %v2700_v15, %v2670_v20  ;;  %v3527_v27 = vpop.f32.mrf.mxu1  ;;  %v2456_v6 = vpop.f32.mrf.mxu0  ;;  %v2550_v1 = vadd.s32 240, %v4636_v63  ;;  %v2741_v28 = vmul.f32 %v2672_v57, %v5028_v38  ;;  %v2645_v52 = vsel %vm2613_vm11, 1.0, %v5145_v29  ;;  %v5187_v20 = vld [vmem:[#allocation24_spill] sm:$0xff] }
 0x1ff   : > { %v2740_v22 = vmul.f32 %v2671_v8, %v2444_v36  ;;  %2513 = vst [vmem:[%s4793_s11 + $0xd0] sm:$0xff] %v5057_v61  ;;  %v2457_v33 = vadd.f32 %v2456_v6, %v2296_v40  ;;  %v2770_v17 = vadd.f32 %v2769_v41, %v2739_v18  ;;  %v3528_v12 = vadd.f32 %v3527_v27, %v3526_v5 }
 0x200   : > { %v2702_v14 = vadd.f32 %v2701_v34, %v2671_v8  ;;  %v3529_v37 = vpop.f32.mrf.mxu1  ;;  %v3605_v49 = vpop.f32.mrf.mxu0  ;;  %v2584_v42 = vadd.s32 %v4647_v2, %v2550_v1  ;;  %vm2614_vm12 = vcmp.lt.s32.totalorder %v5051_v0, 384  ;;  %v2742_v63 = vmul.f32 %v2673_v4, %v2452_v35 }
 0x201   : > { %2511 = vst [vmem:[%s4793_s11 + $0xc0] sm:$0xff] %v2457_v33  ;;  %v2468_v58 = vadd.f32 %v3605_v49, %v2307_v11  ;;  %v2771_v32 = vadd.f32 %v2770_v17, %v2740_v22  ;;  %v2674_v39 = vmul.f32 %v5016_v59, %v2457_v33  ;;  %vm2615_vm13 = vcmp.lt.s32.totalorder %v2583_v55, 384 }
 0x202   : > { %v2703_v31 = vadd.f32 %v2702_v14, %v2672_v57  ;;  %v3530_v56 = vpop.f32.mrf.mxu1  ;;  %v2459_v44 = vpop.f32.mrf.mxu0  ;;  %v2312_v3 = vadd.f32 %v3528_v12, %v5187_v20  ;;  %v2585_v7 = vadd.s32 %v4647_v2, %v2551_v48  ;;  %v2676_v53 = vmul.f32 %v4976_v43, %v5057_v61  ;;  %v5188_v43 = vld [vmem:[#allocation33_spill] sm:$0xff] }
 0x203   : > { %2514 = vst [vmem:[%s4793_s11 + $0xd8] sm:$0xff] %v2468_v58  ;;  %v2460_v16 = vadd.f32 %v2459_v44, %v2299_v26  ;;  %v2772_v46 = vadd.f32 %v2771_v32, %v2741_v28  ;;  %v3531_v21 = vadd.f32 %v3530_v56, %v3529_v37  ;;  %v2743_v36 = vmul.f32 %v2674_v39, %v2457_v33 }
 0x204   : > { %v2704_v38 = vadd.f32 %v2703_v31, %v2673_v4  ;;  %v3532_v60 = vpop.f32.mrf.mxu1  ;;  %v3608_v62 = vpop.f32.mrf.mxu0  ;;  %v2677_v9 = vmul.f32 %v2645_v52, %v2468_v58  ;;  %vm2616_vm14 = vcmp.lt.s32.totalorder %v2584_v42, 384  ;;  %vm2617_vm15 = vcmp.lt.s32.totalorder %v2585_v7, 384 }
 0x205   : > { %2512 = vst [vmem:[%s4793_s11 + $0xc8] sm:$0xff] %v2460_v16  ;;  %v2675_v59 = vmul.f32 %v5044_v23, %v2460_v16  ;;  %v2773_v35 = vadd.f32 %v2772_v46, %v2742_v63  ;;  %v2646_v23 = vsel %vm2614_vm12, 1.0, %v5145_v29  ;;  %v2315_v40 = vadd.f32 %v3531_v21, %v5189_v24 }
 0x206   : > { %v2705_v25 = vadd.f32 %v2704_v38, %v2674_v39  ;;  %v3533_v30 = vpop.f32.mrf.mxu1  ;;  %v2472_v47 = vpop.f32.mrf.mxu0  ;;  %v2647_v57 = vsel %vm2615_vm13, 1.0, %v5145_v29  ;;  %v2745_v34 = vmul.f32 %v2676_v53, %v5057_v61  ;;  %v2648_v33 = vsel %vm2616_vm14, 1.0, %v5145_v29 }
 0x207   : > { %v2744_v13 = vmul.f32 %v2675_v59, %v2460_v16  ;;  %v3534_v51 = vadd.f32 %v3533_v30, %v3532_v60  ;;  %v2473_v15 = vadd.f32 %v2472_v47, %v2312_v3  ;;  %v2774_v5 = vadd.f32 %v2773_v35, %v2743_v36 }
 0x208   : > { %v2706_v45 = vadd.f32 %v2705_v25, %v2675_v59  ;;  %v3535_v2 = vpop.f32.mrf.mxu1  ;;  %v3609_v54 = vpop.f32.mrf.mxu0  ;;  %v2746_v1 = vmul.f32 %v2677_v9, %v2468_v58  ;;  %v2649_v61 = vsel %vm2617_vm15, 1.0, %v5145_v29 }
 0x209   : > { %v2320_v8 = vadd.f32 %v3534_v51, %v5188_v43  ;;  %2515 = vst [vmem:[%s4793_s11 + $0xe0] sm:$0xff] %v2473_v15  ;;  %v2775_v18 = vadd.f32 %v2774_v5, %v2744_v13  ;;  %v2678_v41 = vmul.f32 %v2646_v23, %v2473_v15 }
 0x20a   : > { %v2707_v0 = vadd.f32 %v2706_v45, %v2676_v53  ;;  %v3536_v27 = vpop.f32.mrf.mxu1  ;;  %v2475_v6 = vpop.f32.mrf.mxu0 }
 0x20b   : > { %v2481_v22 = vadd.f32 %v3608_v62, %v2320_v8  ;;  %v3537_v50 = vadd.f32 %v3536_v27, %v3535_v2  ;;  %v2476_v11 = vadd.f32 %v2475_v6, %v2315_v40  ;;  %v2776_v17 = vadd.f32 %v2775_v18, %v2745_v34 }
 0x20c   : > { %v2708_v4 = vadd.f32 %v2707_v0, %v2677_v9  ;;  %v2747_v12 = vmul.f32 %v2678_v41, %v2473_v15 }
 0x20d   : > { %2517 = vst [vmem:[%s4793_s11 + $0xf0] sm:$0xff] %v2481_v22  ;;  %v2323_v14 = vadd.f32 %v3537_v50, %v4802_v19  ;;  %2516 = vst [vmem:[%s4793_s11 + $0xe8] sm:$0xff] %v2476_v11  ;;  %v2679_v37 = vmul.f32 %v2647_v57, %v2476_v11  ;;  %v2680_v49 = vmul.f32 %v2648_v33, %v2481_v22 }
 0x20e   : > { %v2709_v55 = vadd.f32 %v2708_v4, %v2678_v41  ;;  %v2777_v10 = vadd.f32 %v2776_v17, %v2746_v1 }
 0x20f   : > { %v2484_v26 = vadd.f32 %v3609_v54, %v2323_v14  ;;  %v2748_v48 = vmul.f32 %v2679_v37, %v2476_v11  ;;  %v2749_v32 = vmul.f32 %v2680_v49, %v2481_v22 }
 0x210   : > { %v2778_v28 = vadd.f32 %v2777_v10, %v2747_v12  ;;  %v2710_v31 = vadd.f32 %v2709_v55, %v2679_v37 }
 0x211   : > { %2518 = vst [vmem:[%s4793_s11 + $0xf8] sm:$0xff] %v2484_v26  ;;  %v2681_v58 = vmul.f32 %v2649_v61, %v2484_v26 }
 0x212   : > { %v2711_v39 = vadd.f32 %v2710_v31, %v2680_v49  ;;  %v2779_v56 = vadd.f32 %v2778_v28, %v2748_v48 }
 0x213   : > { %v2750_v44 = vmul.f32 %v2681_v58, %v2484_v26 }
 0x214   : > { %v2712_v19 = vadd.f32 %v2711_v39, %v2681_v58  ;;  %v2780_v52 = vadd.f32 %v2779_v56, %v2749_v32 }
 0x216   : > { %v2713_v16 = vrot.slane %v2712_v19, 4  ;;  %v2781_v29 = vadd.f32 %v2780_v52, %v2750_v44 }
 0x218   : > { %v2714_v42 = vadd.f32 %v2713_v16, %v2712_v19  ;;  %v2782_v63 = vrot.slane %v2781_v29, 4 }
 0x21a   : > { %v2715_v46 = vrot.slane %v2714_v42, 2  ;;  %v2783_v38 = vadd.f32 %v2782_v63, %v2781_v29 }
 0x21c   : > { %v2716_v60 = vadd.f32 %v2715_v46, %v2714_v42  ;;  %v2784_v62 = vrot.slane %v2783_v38, 2 }
 0x21e   : > { %v2717_v21 = vrot.slane %v2716_v60, 1  ;;  %v2785_v59 = vadd.f32 %v2784_v62, %v2783_v38 }
 0x220   : > { %v2786_v20 = vrot.slane %v2785_v59, 1  ;;  %v2718_v3 = vadd.f32 %v2717_v21, %v2716_v60  ;;  %2793 = sbr.rel (%p3087_p4) target bundleno = 551 (0x227), region = 36 }
 0x222   : > { %v2787_v7 = vadd.f32 %v2786_v20, %v2785_v59 }
 0x224   : > { %v2789_v53 = vsel %vm2788_vm0, %v2718_v3, %v2787_v7 }
 0x225   : > { %v3926_v25 = vmov 0.0  }
 0x226   : > { %2794 = vst [vmem:[%s5118_s4] sm:$0x3] %v3926_v25 }
 0x227 PF:  {}
 0x22d   : > { %v2795_v36 = vld [vmem:[%s5118_s4] sm:$0x3] }
 0x22e   : > { %v2796_v35 = vadd.f32 %v2795_v36, %v2789_v53 }
 0x230   : > { %2797 = vst [vmem:[%s5118_s4] sm:$0x3] %v2796_v35 }
 0x231 PF: > { %s15_s15 = sadd.s32 1, %s3923_s15  }
 0x232   : > { %p12_p5 = scmp.ge.s32.totalorder %s15_s15, 4  }
 0x234   :  { %14 = sbr.rel (!%p12_p5) target bundleno = 1 (0x1), region = 74 }

</bundles_post_ra>
